<compile_context>
chip_gen: v6e
topology: v6e:2x2x1
jax: 0.10.0
libtpu: 0.0.40
codegen_flags: <defaults>
</compile_context>

<pallas_src>
import functools

import jax
import jax.numpy as jnp
from jax.experimental import pallas as pl
from jax.experimental.pallas import tpu as pltpu

EPS = 1e-5
_LANES = 128


def _round_up(x, m):
    return (x + m - 1) // m * m


def _pick_h_tile(h, w, max_rows=512):
    # Largest divisor of h such that h_tile * w lands near the MXU-M sweet spot.
    # Falls back to 1 for awkward (prime) H — still correct, just small tiles.
    best = 1
    for t in range(1, h + 1):
        if h % t == 0 and t * w <= max_rows:
            best = t
    return best


def _pick_row_tile(rows, max_tile=2048):
    if rows <= max_tile:
        return rows
    cand = max_tile - max_tile % 8
    while cand >= 8:
        if rows % cand == 0:
            return cand
        cand -= 8
    return rows                      # fallback: one big tile (correct, rare)


def _mosaic_params(semantics, inout_bytes, scratch_bytes=0):
    # Computed scoped-VMEM cap: 2x in/out blocks (double buffering) + scratch
    # + headroom; clamped so it is safe on v5e/v6e (128 MiB) and v7x (64 MiB).
    limit = 2 * inout_bytes + scratch_bytes + (8 << 20)
    limit = int(min(max(limit, 16 << 20), 64 << 20))
    return pltpu.CompilerParams(dimension_semantics=semantics,
                                vmem_limit_bytes=limit)


# ---------------------------------------------------------------------------
# Kernel 1: 3x3 conv (stride 1, pad 1) via K-packed im2col + BN partial stats.
# Optionally fuses a per-channel affine + ReLU (previous BN stage) into the
# input read.
# ---------------------------------------------------------------------------
def _conv3x3_stats_kernel(x_ref, scale_ref, bias_ref, w_ref,
                          y_ref, psum_ref, psq_ref,
                          xa_ref, col_ref, *, fuse_bn_relu):
    # x_ref   : (1, H, W, Cin_p)        bf16  whole (unpadded) image, batch b
    # scale/bias_ref : (1, Cin_p)       f32   input-side BN affine (stage 2)
    # w_ref   : (9*Cin_p, Cout_p)       bf16  taps packed along K (kh, kw, cin)
    # y_ref   : (1, rows_t, Cout_p)     bf16  pre-BN conv rows for this tile
    # psum/psq_ref : (1, 1, Cout_p)     f32   per-tile partial sum / sum-of-sq
    # xa_ref  : (h_tile+2, W+2, Cin_p)  bf16  halo'd (activated) input slab
    # col_ref : (rows_t, 9*Cin_p)       bf16  im2col staging buffer
    wdim = x_ref.shape[2]
    cin = x_ref.shape[3]
    h_tile = xa_ref.shape[0] - 2
    rows_t = col_ref.shape[0]
    cout = y_ref.shape[2]

    t = pl.program_id(1)
    row0 = pl.multiple_of(t * h_tile, h_tile)

    def act(v):
        if fuse_bn_relu:
            v = v.astype(jnp.float32) * scale_ref[...] + bias_ref[...]
            v = jnp.maximum(v, 0.0)
        return v.astype(xa_ref.dtype)

    # --- build halo'd, activated input slab (VMEM only, boundary-masked) ----
    xa_ref[...] = jnp.zeros_like(xa_ref)
    xa_ref[pl.ds(1, h_tile), pl.ds(1, wdim), :] = act(
        x_ref[0, pl.ds(row0, h_tile), :, :])

    @pl.when(t > 0)
    def _():
        xa_ref[pl.ds(0, 1), pl.ds(1, wdim), :] = act(
            x_ref[0, pl.ds(row0 - 1, 1), :, :])

    @pl.when(t < pl.num_programs(1) - 1)
    def _():
        xa_ref[pl.ds(h_tile + 1, 1), pl.ds(1, wdim), :] = act(
            x_ref[0, pl.ds(row0 + h_tile, 1), :, :])

    # --- im2col into the staging scratch: taps packed along K ---------------
    for kh in range(3):
        for kw in range(3):
            tap = kh * 3 + kw
            col_ref[:, pl.ds(tap * cin, cin)] = (
                xa_ref[pl.ds(kh, h_tile), pl.ds(kw, wdim), :]
                .reshape(rows_t, cin))

    # --- one big-K MXU matmul, f32 accumulation ------------------------------
    acc = jnp.dot(col_ref[...], w_ref[...], preferred_element_type=jnp.float32)

    y_ref[...] = acc.reshape(1, rows_t, cout).astype(y_ref.dtype)
    psum_ref[...] = jnp.sum(acc, axis=0, keepdims=True).reshape(1, 1, cout)
    psq_ref[...] = jnp.sum(acc * acc, axis=0, keepdims=True).reshape(1, 1, cout)


def _conv3x3_with_stats(x_img, scale, bias, w9, h_tile, fuse_bn_relu):
    """x_img: (N, H, W, Cin_p) bf16; w9: (9*Cin_p, Cout_p) bf16.

    Returns (y, psum, psq):
      y    : (N*n_t, h_tile*W, Cout_p) bf16  (flat row order == (b, h, w))
      psum : (N*n_t, 1, Cout_p) f32   partial per-channel sums
      psq  : (N*n_t, 1, Cout_p) f32   partial per-channel sums of squares
    """
    n, h, w, cin_p = x_img.shape
    kdim, cout_p = w9.shape
    n_t = h // h_tile
    rows_t = h_tile * w

    kernel = functools.partial(_conv3x3_stats_kernel, fuse_bn_relu=fuse_bn_relu)

    inout_bytes = (h * w * cin_p * 2 + 2 * cin_p * 4 + kdim * cout_p * 2
                   + rows_t * cout_p * 2 + 2 * cout_p * 4)
    scratch_bytes = ((h_tile + 2) * (w + 2) * cin_p * 2
                     + rows_t * kdim * 2
                     + rows_t * cout_p * 4)        # f32 matmul result temp
    flops = 2 * n * h * w * kdim * cout_p
    bytes_accessed = (x_img.size * 2 + w9.size * 2
                      + n * n_t * rows_t * cout_p * 2
                      + 2 * n * n_t * cout_p * 4)

    return pl.pallas_call(
        kernel,
        grid=(n, n_t),
        in_specs=[
            pl.BlockSpec((1, h, w, cin_p), lambda b, t: (b, 0, 0, 0)),
            pl.BlockSpec((1, cin_p), lambda b, t: (0, 0)),
            pl.BlockSpec((1, cin_p), lambda b, t: (0, 0)),
            pl.BlockSpec((kdim, cout_p), lambda b, t: (0, 0)),
        ],
        out_specs=[
            pl.BlockSpec((1, rows_t, cout_p), lambda b, t: (b * n_t + t, 0, 0)),
            pl.BlockSpec((1, 1, cout_p), lambda b, t: (b * n_t + t, 0, 0)),
            pl.BlockSpec((1, 1, cout_p), lambda b, t: (b * n_t + t, 0, 0)),
        ],
        out_shape=[
            jax.ShapeDtypeStruct((n * n_t, rows_t, cout_p), jnp.bfloat16),
            jax.ShapeDtypeStruct((n * n_t, 1, cout_p), jnp.float32),
            jax.ShapeDtypeStruct((n * n_t, 1, cout_p), jnp.float32),
        ],
        scratch_shapes=[
            pltpu.VMEM((h_tile + 2, w + 2, cin_p), jnp.bfloat16),
            pltpu.VMEM((rows_t, kdim), jnp.bfloat16),
        ],
        compiler_params=_mosaic_params(("parallel", "parallel"),
                                       inout_bytes, scratch_bytes),
        cost_estimate=pl.CostEstimate(flops=flops, transcendentals=0,
                                      bytes_accessed=bytes_accessed),
    )(x_img, scale, bias, w9)


# ---------------------------------------------------------------------------
# Kernel 2: BN2-apply + bf16 residual + ReLU, big row tiles, lane-dense.
# ---------------------------------------------------------------------------
def _bn_add_relu_kernel(y_ref, scale_ref, bias_ref, res_ref, o_ref):
    o = (y_ref[...].astype(jnp.float32) * scale_ref[...] + bias_ref[...]
         + res_ref[...].astype(jnp.float32))
    o_ref[...] = jnp.maximum(o, 0.0).astype(o_ref.dtype)


def _bn_add_relu(y2d, scale, bias, res2d, out_dtype):
    rows, cpad = y2d.shape
    row_tile = _pick_row_tile(rows)
    inout_bytes = (row_tile * cpad * (2 + 2 + jnp.dtype(out_dtype).itemsize)
                   + 2 * cpad * 4)
    return pl.pallas_call(
        _bn_add_relu_kernel,
        grid=(rows // row_tile,),
        in_specs=[
            pl.BlockSpec((row_tile, cpad), lambda i: (i, 0)),
            pl.BlockSpec((1, cpad), lambda i: (0, 0)),
            pl.BlockSpec((1, cpad), lambda i: (0, 0)),
            pl.BlockSpec((row_tile, cpad), lambda i: (i, 0)),
        ],
        out_specs=pl.BlockSpec((row_tile, cpad), lambda i: (i, 0)),
        out_shape=jax.ShapeDtypeStruct((rows, cpad), out_dtype),
        compiler_params=_mosaic_params(("parallel",), inout_bytes),
    )(y2d, scale, bias, res2d)


# ---------------------------------------------------------------------------
# Glue (layout prep, tiny O(C) stats finish).
# ---------------------------------------------------------------------------
def _prep_weight(w_oihw, cin_p, cout_p):
    # PyTorch (Cout, Cin, 3, 3) -> (kh, kw, Cin, Cout) -> pad -> (9*Cin_p, Cout_p)
    w = jnp.transpose(w_oihw, (2, 3, 1, 0)).astype(jnp.float32)
    cin, cout = w.shape[2], w.shape[3]
    w = jnp.pad(w, ((0, 0), (0, 0), (0, cin_p - cin), (0, cout_p - cout)))
    return w.reshape(9 * cin_p, cout_p).astype(jnp.bfloat16)


def _pad_vec(v, cpad):
    v = v.astype(jnp.float32)
    return jnp.pad(v, (0, cpad - v.shape[0]))


def _bn_scale_bias(psum, psq, gamma_p, beta_p, count):
    total = jnp.sum(psum[:, 0, :], axis=0)            # (Cpad,)
    total_sq = jnp.sum(psq[:, 0, :], axis=0)
    mean = total / count
    # TODO(synk): E[x^2]-E[x]^2 in f32 is cancellation-prone for large-mean
    #             activations; a shifted/Welford accumulation would be safer.
    var = jnp.maximum(total_sq / count - mean * mean, 0.0)   # biased (training BN)
    rstd = jax.lax.rsqrt(var + EPS)
    scale = gamma_p * rstd
    bias = beta_p - mean * scale
    return scale.reshape(1, -1), bias.reshape(1, -1)


def basic_block_forward(x_nchw, params):
    """BasicBlock forward. x_nchw: (N, C, H, W).  stride=1, downsample=None."""
    x = jnp.transpose(x_nchw, (0, 2, 3, 1)).astype(jnp.float32)   # NHWC
    n, h, w, cin = x.shape
    planes = params["conv1_w"].shape[0]
    assert params["conv1_w"].shape[1] == cin
    assert cin == planes, "identity shortcut requires inplanes == planes"

    cin_p = _round_up(cin, _LANES)
    cout_p = _round_up(planes, _LANES)
    rows = n * h * w
    h_tile = _pick_h_tile(h, w)

    # Lane-dense channel pad + bf16 cast in one pass (only wrapper-side copy).
    x_bf = jnp.pad(x, ((0, 0), (0, 0), (0, 0), (0, cin_p - cin))).astype(jnp.bfloat16)

    w1 = _prep_weight(params["conv1_w"], cin_p, cout_p)
    w2 = _prep_weight(params["conv2_w"], cout_p, cout_p)
    g1 = _pad_vec(params["bn1_gamma"], cout_p)
    b1 = _pad_vec(params["bn1_beta"], cout_p)
    g2 = _pad_vec(params["bn2_gamma"], cout_p)
    b2 = _pad_vec(params["bn2_beta"], cout_p)
    one = jnp.ones((1, cin_p), jnp.float32)
    zero = jnp.zeros((1, cin_p), jnp.float32)

    # ---- conv1 (+ BN1 batch statistics) ------------------------------------
    y1, ps1, pq1 = _conv3x3_with_stats(x_bf, one, zero, w1, h_tile,
                                       fuse_bn_relu=False)
    s1, o1 = _bn_scale_bias(ps1, pq1, g1, b1, rows)

    # ---- conv2 with BN1-apply + ReLU fused into its input read -------------
    y1_img = y1.reshape(n, h, w, cout_p)         # contiguous row order -> free
    y2, ps2, pq2 = _conv3x3_with_stats(y1_img, s1, o1, w2, h_tile,
                                       fuse_bn_relu=True)
    s2, o2 = _bn_scale_bias(ps2, pq2, g2, b2, rows)

    # ---- BN2-apply + identity residual (bf16) + ReLU ------------------------
    residual = x_bf.reshape(rows, cin_p)
    out2 = _bn_add_relu(y2.reshape(rows, cout_p), s2, o2, residual, jnp.float32)

    out = out2.reshape(n, h, w, cout_p)[..., :planes]
    return jnp.transpose(out, (0, 3, 1, 2))       # back to NCHW


# ---------------------------------------------------------------------------
# Pure-JAX reference (f32) for a sanity check.
# ---------------------------------------------------------------------------
def _reference_forward(x_nchw, params):
    x = jnp.transpose(x_nchw, (0, 2, 3, 1)).astype(jnp.float32)

    def conv(inp, w_oihw):
        return jax.lax.conv_general_dilated(
            inp, jnp.transpose(w_oihw, (2, 3, 1, 0)), (1, 1), "SAME",
            dimension_numbers=("NHWC", "HWIO", "NHWC"),
            precision=jax.lax.Precision.HIGHEST)

    def bn(y, gamma, beta):
        mean = jnp.mean(y, axis=(0, 1, 2))
        var = jnp.mean((y - mean) ** 2, axis=(0, 1, 2))
        return (y - mean) * jax.lax.rsqrt(var + EPS) * gamma + beta

    out = jnp.maximum(
        bn(conv(x, params["conv1_w"]), params["bn1_gamma"], params["bn1_beta"]), 0.0)
    out = bn(conv(out, params["conv2_w"]), params["bn2_gamma"], params["bn2_beta"]) + x
    out = jnp.maximum(out, 0.0)
    return jnp.transpose(out, (0, 3, 1, 2))


def init_params(key, inplanes, planes):
    k1, k2 = jax.random.split(key)
    return {
        "conv1_w": 0.1 * jax.random.normal(k1, (planes, inplanes, 3, 3), jnp.float32),
        "conv2_w": 0.1 * jax.random.normal(k2, (planes, planes, 3, 3), jnp.float32),
        # BatchNorm2d default init: weight=1, bias=0
        "bn1_gamma": jnp.ones((planes,), jnp.float32),
        "bn1_beta": jnp.zeros((planes,), jnp.float32),
        "bn2_gamma": jnp.ones((planes,), jnp.float32),
        "bn2_beta": jnp.zeros((planes,), jnp.float32),
    }


if __name__ == "__main__":
    key = jax.random.PRNGKey(0)
    kx, kp = jax.random.split(key)

    N, C, H, W = 2, 4, 16, 16          # inplanes = planes = 4, stride = 1
    x = jax.random.normal(kx, (N, C, H, W), jnp.float32)
    params = init_params(kp, inplanes=C, planes=C)

    fwd = jax.jit(functools.partial(basic_block_forward, params=params))
    out = fwd(x)
    jax.block_until_ready(out)

    assert out.shape == (N, C, H, W)
    assert bool(jnp.all(jnp.isfinite(out)))
    ref = _reference_forward(x, params)
    err = float(jnp.max(jnp.abs(out - ref)))
    assert err < 1e-1, f"mismatch vs reference: max abs err {err}"
    print("KERNEL_OK")
</pallas_src>

<mosaic_0001>
module attributes {stable_mosaic.version = 11 : i64} {
  func.func @_conv3x3_stats_kernel(%arg0: i32, %arg1: i32, %arg2: memref<1x16x16x128xbf16, #tpu.memory_space<vmem>>, %arg3: memref<1x128xf32, #tpu.memory_space<vmem>>, %arg4: memref<1x128xf32, #tpu.memory_space<vmem>>, %arg5: memref<1152x128xbf16, #tpu.memory_space<vmem>>, %arg6: memref<1x256x128xbf16, #tpu.memory_space<vmem>>, %arg7: memref<1x1x128xf32, #tpu.memory_space<vmem>>, %arg8: memref<1x1x128xf32, #tpu.memory_space<vmem>>, %arg9: memref<18x18x128xbf16, #tpu.memory_space<vmem>>, %arg10: memref<256x1152xbf16, #tpu.memory_space<vmem>>) attributes {dimension_semantics = [#tpu.dimension_semantics<parallel>, #tpu.dimension_semantics<parallel>], iteration_bounds = array<i64: 2, 1>, scalar_prefetch = 0 : i64, scratch_operands = 2 : i64, tpu.core_type = #tpu.core_type<tc>, window_params = [{transform_indices = @transform_0, window_bounds = array<i64: 1, 16, 16, 128>}, {pipeline_mode = #tpu.pipeline_mode<synchronous>, transform_indices = @transform_1, window_bounds = array<i64: 1, 128>}, {pipeline_mode = #tpu.pipeline_mode<synchronous>, transform_indices = @transform_2, window_bounds = array<i64: 1, 128>}, {pipeline_mode = #tpu.pipeline_mode<synchronous>, transform_indices = @transform_3, window_bounds = array<i64: 1152, 128>}, {transform_indices = @transform_4, window_bounds = array<i64: 1, 256, 128>}, {transform_indices = @transform_5, window_bounds = array<i64: 1, 1, 128>}, {transform_indices = @transform_6, window_bounds = array<i64: 1, 1, 128>}]} {
    %c16_i32 = arith.constant 16 : i32
    %0 = arith.muli %arg1, %c16_i32 : i32
    %1 = tpu.assume_multiple %0, 16 : i32
    %cst = arith.constant 0.000000e+00 : bf16
    %2 = vector.broadcast %cst : bf16 to vector<18x18x128xbf16>
    %c0 = arith.constant 0 : index
    %c0_0 = arith.constant 0 : index
    %c0_1 = arith.constant 0 : index
    %3 = vector.load %arg9[%c0, %c0_0, %c0_1] : memref<18x18x128xbf16, #tpu.memory_space<vmem>>, vector<18x18x128xbf16>
    tpu.vector_store %arg9[%c0, %c0_0, %c0_1], %2 {strides = array<i32>} : memref<18x18x128xbf16, #tpu.memory_space<vmem>>, vector<18x18x128xbf16>,
    %c0_2 = arith.constant 0 : index
    %4 = arith.index_cast %1 : i32 to index
    %c0_3 = arith.constant 0 : index
    %c0_4 = arith.constant 0 : index
    %5 = vector.load %arg2[%c0_2, %4, %c0_3, %c0_4] : memref<1x16x16x128xbf16, #tpu.memory_space<vmem>>, vector<1x16x16x128xbf16>
    %6 = vector.shape_cast %5 : vector<1x16x16x128xbf16> to vector<16x16x128xbf16>
    %c1 = arith.constant 1 : index
    %c1_5 = arith.constant 1 : index
    %c0_6 = arith.constant 0 : index
    %7 = vector.load %arg9[%c1, %c1_5, %c0_6] : memref<18x18x128xbf16, #tpu.memory_space<vmem>>, vector<16x16x128xbf16>
    tpu.vector_store %arg9[%c1, %c1_5, %c0_6], %6 {strides = array<i32>} : memref<18x18x128xbf16, #tpu.memory_space<vmem>>, vector<16x16x128xbf16>,
    %c0_i32 = arith.constant 0 : i32
    %8 = arith.cmpi sgt, %arg1, %c0_i32 : i32
    %9 = arith.extui %8 : i1 to i32
    %c0_i32_7 = arith.constant 0 : i32
    %10 = arith.cmpi ne, %9, %c0_i32_7 : i32
    scf.if %10 {
      %c1_i32 = arith.constant 1 : i32
      %56 = arith.subi %1, %c1_i32 : i32
      %c0_62 = arith.constant 0 : index
      %57 = arith.index_cast %56 : i32 to index
      %c0_63 = arith.constant 0 : index
      %c0_64 = arith.constant 0 : index
      %58 = vector.load %arg2[%c0_62, %57, %c0_63, %c0_64] : memref<1x16x16x128xbf16, #tpu.memory_space<vmem>>, vector<1x1x16x128xbf16>
      %59 = vector.shape_cast %58 : vector<1x1x16x128xbf16> to vector<1x16x128xbf16>
      %c0_65 = arith.constant 0 : index
      %c1_66 = arith.constant 1 : index
      %c0_67 = arith.constant 0 : index
      %60 = vector.load %arg9[%c0_65, %c1_66, %c0_67] : memref<18x18x128xbf16, #tpu.memory_space<vmem>>, vector<1x16x128xbf16>
      tpu.vector_store %arg9[%c0_65, %c1_66, %c0_67], %59 {strides = array<i32>} : memref<18x18x128xbf16, #tpu.memory_space<vmem>>, vector<1x16x128xbf16>,
    } else {
    }
    %c0_i32_8 = arith.constant 0 : i32
    %11 = arith.cmpi slt, %arg1, %c0_i32_8 : i32
    %12 = arith.extui %11 : i1 to i32
    %c0_i32_9 = arith.constant 0 : i32
    %13 = arith.cmpi ne, %12, %c0_i32_9 : i32
    scf.if %13 {
      %c16_i32_62 = arith.constant 16 : i32
      %56 = arith.addi %1, %c16_i32_62 : i32
      %c0_63 = arith.constant 0 : index
      %57 = arith.index_cast %56 : i32 to index
      %c0_64 = arith.constant 0 : index
      %c0_65 = arith.constant 0 : index
      %58 = vector.load %arg2[%c0_63, %57, %c0_64, %c0_65] : memref<1x16x16x128xbf16, #tpu.memory_space<vmem>>, vector<1x1x16x128xbf16>
      %59 = vector.shape_cast %58 : vector<1x1x16x128xbf16> to vector<1x16x128xbf16>
      %c17 = arith.constant 17 : index
      %c1_66 = arith.constant 1 : index
      %c0_67 = arith.constant 0 : index
      %60 = vector.load %arg9[%c17, %c1_66, %c0_67] : memref<18x18x128xbf16, #tpu.memory_space<vmem>>, vector<1x16x128xbf16>
      tpu.vector_store %arg9[%c17, %c1_66, %c0_67], %59 {strides = array<i32>} : memref<18x18x128xbf16, #tpu.memory_space<vmem>>, vector<1x16x128xbf16>,
    } else {
    }
    %c0_10 = arith.constant 0 : index
    %c0_11 = arith.constant 0 : index
    %c0_12 = arith.constant 0 : index
    %14 = vector.load %arg9[%c0_10, %c0_11, %c0_12] : memref<18x18x128xbf16, #tpu.memory_space<vmem>>, vector<16x16x128xbf16>
    %15 = vector.shape_cast %14 : vector<16x16x128xbf16> to vector<256x128xbf16>
    %c0_13 = arith.constant 0 : index
    %c0_14 = arith.constant 0 : index
    %16 = vector.load %arg10[%c0_13, %c0_14] : memref<256x1152xbf16, #tpu.memory_space<vmem>>, vector<256x128xbf16>
    tpu.vector_store %arg10[%c0_13, %c0_14], %15 {strides = array<i32>} : memref<256x1152xbf16, #tpu.memory_space<vmem>>, vector<256x128xbf16>,
    %c0_15 = arith.constant 0 : index
    %c1_16 = arith.constant 1 : index
    %c0_17 = arith.constant 0 : index
    %17 = vector.load %arg9[%c0_15, %c1_16, %c0_17] : memref<18x18x128xbf16, #tpu.memory_space<vmem>>, vector<16x16x128xbf16>
    %18 = vector.shape_cast %17 : vector<16x16x128xbf16> to vector<256x128xbf16>
    %c0_18 = arith.constant 0 : index
    %c128 = arith.constant 128 : index
    %19 = vector.load %arg10[%c0_18, %c128] : memref<256x1152xbf16, #tpu.memory_space<vmem>>, vector<256x128xbf16>
    tpu.vector_store %arg10[%c0_18, %c128], %18 {strides = array<i32>} : memref<256x1152xbf16, #tpu.memory_space<vmem>>, vector<256x128xbf16>,
    %c0_19 = arith.constant 0 : index
    %c2 = arith.constant 2 : index
    %c0_20 = arith.constant 0 : index
    %20 = vector.load %arg9[%c0_19, %c2, %c0_20] : memref<18x18x128xbf16, #tpu.memory_space<vmem>>, vector<16x16x128xbf16>
    %21 = vector.shape_cast %20 : vector<16x16x128xbf16> to vector<256x128xbf16>
    %c0_21 = arith.constant 0 : index
    %c256 = arith.constant 256 : index
    %22 = vector.load %arg10[%c0_21, %c256] : memref<256x1152xbf16, #tpu.memory_space<vmem>>, vector<256x128xbf16>
    tpu.vector_store %arg10[%c0_21, %c256], %21 {strides = array<i32>} : memref<256x1152xbf16, #tpu.memory_space<vmem>>, vector<256x128xbf16>,
    %c1_22 = arith.constant 1 : index
    %c0_23 = arith.constant 0 : index
    %c0_24 = arith.constant 0 : index
    %23 = vector.load %arg9[%c1_22, %c0_23, %c0_24] : memref<18x18x128xbf16, #tpu.memory_space<vmem>>, vector<16x16x128xbf16>
    %24 = vector.shape_cast %23 : vector<16x16x128xbf16> to vector<256x128xbf16>
    %c0_25 = arith.constant 0 : index
    %c384 = arith.constant 384 : index
    %25 = vector.load %arg10[%c0_25, %c384] : memref<256x1152xbf16, #tpu.memory_space<vmem>>, vector<256x128xbf16>
    tpu.vector_store %arg10[%c0_25, %c384], %24 {strides = array<i32>} : memref<256x1152xbf16, #tpu.memory_space<vmem>>, vector<256x128xbf16>,
    %c1_26 = arith.constant 1 : index
    %c1_27 = arith.constant 1 : index
    %c0_28 = arith.constant 0 : index
    %26 = vector.load %arg9[%c1_26, %c1_27, %c0_28] : memref<18x18x128xbf16, #tpu.memory_space<vmem>>, vector<16x16x128xbf16>
    %27 = vector.shape_cast %26 : vector<16x16x128xbf16> to vector<256x128xbf16>
    %c0_29 = arith.constant 0 : index
    %c512 = arith.constant 512 : index
    %28 = vector.load %arg10[%c0_29, %c512] : memref<256x1152xbf16, #tpu.memory_space<vmem>>, vector<256x128xbf16>
    tpu.vector_store %arg10[%c0_29, %c512], %27 {strides = array<i32>} : memref<256x1152xbf16, #tpu.memory_space<vmem>>, vector<256x128xbf16>,
    %c1_30 = arith.constant 1 : index
    %c2_31 = arith.constant 2 : index
    %c0_32 = arith.constant 0 : index
    %29 = vector.load %arg9[%c1_30, %c2_31, %c0_32] : memref<18x18x128xbf16, #tpu.memory_space<vmem>>, vector<16x16x128xbf16>
    %30 = vector.shape_cast %29 : vector<16x16x128xbf16> to vector<256x128xbf16>
    %c0_33 = arith.constant 0 : index
    %c640 = arith.constant 640 : index
    %31 = vector.load %arg10[%c0_33, %c640] : memref<256x1152xbf16, #tpu.memory_space<vmem>>, vector<256x128xbf16>
    tpu.vector_store %arg10[%c0_33, %c640], %30 {strides = array<i32>} : memref<256x1152xbf16, #tpu.memory_space<vmem>>, vector<256x128xbf16>,
    %c2_34 = arith.constant 2 : index
    %c0_35 = arith.constant 0 : index
    %c0_36 = arith.constant 0 : index
    %32 = vector.load %arg9[%c2_34, %c0_35, %c0_36] : memref<18x18x128xbf16, #tpu.memory_space<vmem>>, vector<16x16x128xbf16>
    %33 = vector.shape_cast %32 : vector<16x16x128xbf16> to vector<256x128xbf16>
    %c0_37 = arith.constant 0 : index
    %c768 = arith.constant 768 : index
    %34 = vector.load %arg10[%c0_37, %c768] : memref<256x1152xbf16, #tpu.memory_space<vmem>>, vector<256x128xbf16>
    tpu.vector_store %arg10[%c0_37, %c768], %33 {strides = array<i32>} : memref<256x1152xbf16, #tpu.memory_space<vmem>>, vector<256x128xbf16>,
    %c2_38 = arith.constant 2 : index
    %c1_39 = arith.constant 1 : index
    %c0_40 = arith.constant 0 : index
    %35 = vector.load %arg9[%c2_38, %c1_39, %c0_40] : memref<18x18x128xbf16, #tpu.memory_space<vmem>>, vector<16x16x128xbf16>
    %36 = vector.shape_cast %35 : vector<16x16x128xbf16> to vector<256x128xbf16>
    %c0_41 = arith.constant 0 : index
    %c896 = arith.constant 896 : index
    %37 = vector.load %arg10[%c0_41, %c896] : memref<256x1152xbf16, #tpu.memory_space<vmem>>, vector<256x128xbf16>
    tpu.vector_store %arg10[%c0_41, %c896], %36 {strides = array<i32>} : memref<256x1152xbf16, #tpu.memory_space<vmem>>, vector<256x128xbf16>,
    %c2_42 = arith.constant 2 : index
    %c2_43 = arith.constant 2 : index
    %c0_44 = arith.constant 0 : index
    %38 = vector.load %arg9[%c2_42, %c2_43, %c0_44] : memref<18x18x128xbf16, #tpu.memory_space<vmem>>, vector<16x16x128xbf16>
    %39 = vector.shape_cast %38 : vector<16x16x128xbf16> to vector<256x128xbf16>
    %c0_45 = arith.constant 0 : index
    %c1024 = arith.constant 1024 : index
    %40 = vector.load %arg10[%c0_45, %c1024] : memref<256x1152xbf16, #tpu.memory_space<vmem>>, vector<256x128xbf16>
    tpu.vector_store %arg10[%c0_45, %c1024], %39 {strides = array<i32>} : memref<256x1152xbf16, #tpu.memory_space<vmem>>, vector<256x128xbf16>,
    %c0_46 = arith.constant 0 : index
    %c0_47 = arith.constant 0 : index
    %41 = vector.load %arg10[%c0_46, %c0_47] : memref<256x1152xbf16, #tpu.memory_space<vmem>>, vector<256x1152xbf16>
    %c0_48 = arith.constant 0 : index
    %c0_49 = arith.constant 0 : index
    %42 = vector.load %arg5[%c0_48, %c0_49] : memref<1152x128xbf16, #tpu.memory_space<vmem>>, vector<1152x128xbf16>
    %cst_50 = arith.constant dense<0.000000e+00> : vector<256x128xf32>
    %43 = tpu.matmul %41, %42, %cst_50 {dimension_numbers = #tpu.dot_dimension_numbers<[1], [0], [0], [1], [0, 0, 1, 1], [], []>} : vector<256x1152xbf16>, vector<1152x128xbf16>, vector<256x128xf32> -> vector<256x128xf32>
    %44 = vector.shape_cast %43 : vector<256x128xf32> to vector<1x256x128xf32>
    %45 = arith.truncf %44 : vector<1x256x128xf32> to vector<1x256x128xbf16>
    %c0_51 = arith.constant 0 : index
    %c0_52 = arith.constant 0 : index
    %c0_53 = arith.constant 0 : index
    %46 = vector.load %arg6[%c0_51, %c0_52, %c0_53] : memref<1x256x128xbf16, #tpu.memory_space<vmem>>, vector<1x256x128xbf16>
    tpu.vector_store %arg6[%c0_51, %c0_52, %c0_53], %45 {strides = array<i32>} : memref<1x256x128xbf16, #tpu.memory_space<vmem>>, vector<1x256x128xbf16>,
    %cst_54 = arith.constant dense<0.000000e+00> : vector<128xf32>
    %47 = vector.multi_reduction <add>, %43, %cst_54 [0] : vector<256x128xf32> to vector<128xf32>
    %48 = vector.shape_cast %47 : vector<128xf32> to vector<1x128xf32>
    %49 = vector.shape_cast %48 : vector<1x128xf32> to vector<1x1x128xf32>
    %c0_55 = arith.constant 0 : index
    %c0_56 = arith.constant 0 : index
    %c0_57 = arith.constant 0 : index
    %50 = vector.load %arg7[%c0_55, %c0_56, %c0_57] : memref<1x1x128xf32, #tpu.memory_space<vmem>>, vector<1x1x128xf32>
    tpu.vector_store %arg7[%c0_55, %c0_56, %c0_57], %49 {strides = array<i32>} : memref<1x1x128xf32, #tpu.memory_space<vmem>>, vector<1x1x128xf32>,
    %51 = arith.mulf %43, %43 : vector<256x128xf32>
    %cst_58 = arith.constant dense<0.000000e+00> : vector<128xf32>
    %52 = vector.multi_reduction <add>, %51, %cst_58 [0] : vector<256x128xf32> to vector<128xf32>
    %53 = vector.shape_cast %52 : vector<128xf32> to vector<1x128xf32>
    %54 = vector.shape_cast %53 : vector<1x128xf32> to vector<1x1x128xf32>
    %c0_59 = arith.constant 0 : index
    %c0_60 = arith.constant 0 : index
    %c0_61 = arith.constant 0 : index
    %55 = vector.load %arg8[%c0_59, %c0_60, %c0_61] : memref<1x1x128xf32, #tpu.memory_space<vmem>>, vector<1x1x128xf32>
    tpu.vector_store %arg8[%c0_59, %c0_60, %c0_61], %54 {strides = array<i32>} : memref<1x1x128xf32, #tpu.memory_space<vmem>>, vector<1x1x128xf32>,
    return
  }
  func.func @transform_0(%arg0: i32, %arg1: i32) -> (i32, i32, i32, i32) {
    %c0_i32 = arith.constant 0 : i32
    %c0_i32_0 = arith.constant 0 : i32
    %c0_i32_1 = arith.constant 0 : i32
    %c0_i32_2 = arith.constant 0 : i32
    return %arg0, %c0_i32, %c0_i32_0, %c0_i32_1 : i32, i32, i32, i32
  }
  func.func @transform_1(%arg0: i32, %arg1: i32) -> (i32, i32) {
    %c0_i32 = arith.constant 0 : i32
    %c0_i32_0 = arith.constant 0 : i32
    %c0_i32_1 = arith.constant 0 : i32
    return %c0_i32, %c0_i32_0 : i32, i32
  }
  func.func @transform_2(%arg0: i32, %arg1: i32) -> (i32, i32) {
    %c0_i32 = arith.constant 0 : i32
    %c0_i32_0 = arith.constant 0 : i32
    %c0_i32_1 = arith.constant 0 : i32
    return %c0_i32, %c0_i32_0 : i32, i32
  }
  func.func @transform_3(%arg0: i32, %arg1: i32) -> (i32, i32) {
    %c0_i32 = arith.constant 0 : i32
    %c0_i32_0 = arith.constant 0 : i32
    %c0_i32_1 = arith.constant 0 : i32
    return %c0_i32, %c0_i32_0 : i32, i32
  }
  func.func @transform_4(%arg0: i32, %arg1: i32) -> (i32, i32, i32) {
    %c1_i32 = arith.constant 1 : i32
    %0 = arith.muli %arg0, %c1_i32 : i32
    %1 = arith.addi %0, %arg1 : i32
    %c0_i32 = arith.constant 0 : i32
    %c0_i32_0 = arith.constant 0 : i32
    %c0_i32_1 = arith.constant 0 : i32
    return %1, %c0_i32, %c0_i32_0 : i32, i32, i32
  }
  func.func @transform_5(%arg0: i32, %arg1: i32) -> (i32, i32, i32) {
    %c1_i32 = arith.constant 1 : i32
    %0 = arith.muli %arg0, %c1_i32 : i32
    %1 = arith.addi %0, %arg1 : i32
    %c0_i32 = arith.constant 0 : i32
    %c0_i32_0 = arith.constant 0 : i32
    %c0_i32_1 = arith.constant 0 : i32
    return %1, %c0_i32, %c0_i32_0 : i32, i32, i32
  }
  func.func @transform_6(%arg0: i32, %arg1: i32) -> (i32, i32, i32) {
    %c1_i32 = arith.constant 1 : i32
    %0 = arith.muli %arg0, %c1_i32 : i32
    %1 = arith.addi %0, %arg1 : i32
    %c0_i32 = arith.constant 0 : i32
    %c0_i32_0 = arith.constant 0 : i32
    %c0_i32_1 = arith.constant 0 : i32
    return %1, %c0_i32, %c0_i32_0 : i32, i32, i32
  }
}

module attributes {stable_mosaic.version = 11 : i64} {
  func.func @_bn_add_relu_kernel(%arg0: i32, %arg1: memref<512x128xbf16, #tpu.memory_space<vmem>>, %arg2: memref<1x128xf32, #tpu.memory_space<vmem>>, %arg3: memref<1x128xf32, #tpu.memory_space<vmem>>, %arg4: memref<512x128xbf16, #tpu.memory_space<vmem>>, %arg5: memref<512x128xf32, #tpu.memory_space<vmem>>) attributes {dimension_semantics = [#tpu.dimension_semantics<parallel>], iteration_bounds = array<i64: 1>, scalar_prefetch = 0 : i64, scratch_operands = 0 : i64, tpu.core_type = #tpu.core_type<tc>, window_params = [{transform_indices = @transform_0, window_bounds = array<i64: 512, 128>}, {pipeline_mode = #tpu.pipeline_mode<synchronous>, transform_indices = @transform_1, window_bounds = array<i64: 1, 128>}, {pipeline_mode = #tpu.pipeline_mode<synchronous>, transform_indices = @transform_2, window_bounds = array<i64: 1, 128>}, {transform_indices = @transform_3, window_bounds = array<i64: 512, 128>}, {transform_indices = @transform_4, window_bounds = array<i64: 512, 128>}]} {
    %c0 = arith.constant 0 : index
    %c0_0 = arith.constant 0 : index
    %0 = vector.load %arg1[%c0, %c0_0] : memref<512x128xbf16, #tpu.memory_space<vmem>>, vector<512x128xbf16>
    %1 = arith.extf %0 : vector<512x128xbf16> to vector<512x128xf32>
    %c0_1 = arith.constant 0 : index
    %c0_2 = arith.constant 0 : index
    %2 = vector.load %arg2[%c0_1, %c0_2] : memref<1x128xf32, #tpu.memory_space<vmem>>, vector<1x128xf32>
    %3 = vector.broadcast %2 : vector<1x128xf32> to vector<512x128xf32>
    %4 = arith.mulf %1, %3 : vector<512x128xf32>
    %c0_3 = arith.constant 0 : index
    %c0_4 = arith.constant 0 : index
    %5 = vector.load %arg3[%c0_3, %c0_4] : memref<1x128xf32, #tpu.memory_space<vmem>>, vector<1x128xf32>
    %6 = vector.broadcast %5 : vector<1x128xf32> to vector<512x128xf32>
    %7 = arith.addf %4, %6 : vector<512x128xf32>
    %c0_5 = arith.constant 0 : index
    %c0_6 = arith.constant 0 : index
    %8 = vector.load %arg4[%c0_5, %c0_6] : memref<512x128xbf16, #tpu.memory_space<vmem>>, vector<512x128xbf16>
    %9 = arith.extf %8 : vector<512x128xbf16> to vector<512x128xf32>
    %10 = arith.addf %7, %9 : vector<512x128xf32>
    %cst = arith.constant 0.000000e+00 : f32
    %11 = vector.broadcast %cst : f32 to vector<512x128xf32>
    %12 = arith.maximumf %10, %11 : vector<512x128xf32>
    %c0_7 = arith.constant 0 : index
    %c0_8 = arith.constant 0 : index
    %13 = vector.load %arg5[%c0_7, %c0_8] : memref<512x128xf32, #tpu.memory_space<vmem>>, vector<512x128xf32>
    tpu.vector_store %arg5[%c0_7, %c0_8], %12 {strides = array<i32>} : memref<512x128xf32, #tpu.memory_space<vmem>>, vector<512x128xf32>,
    return
  }
  func.func @transform_0(%arg0: i32) -> (i32, i32) {
    %c0_i32 = arith.constant 0 : i32
    %c0_i32_0 = arith.constant 0 : i32
    return %arg0, %c0_i32 : i32, i32
  }
  func.func @transform_1(%arg0: i32) -> (i32, i32) {
    %c0_i32 = arith.constant 0 : i32
    %c0_i32_0 = arith.constant 0 : i32
    %c0_i32_1 = arith.constant 0 : i32
    return %c0_i32, %c0_i32_0 : i32, i32
  }
  func.func @transform_2(%arg0: i32) -> (i32, i32) {
    %c0_i32 = arith.constant 0 : i32
    %c0_i32_0 = arith.constant 0 : i32
    %c0_i32_1 = arith.constant 0 : i32
    return %c0_i32, %c0_i32_0 : i32, i32
  }
  func.func @transform_3(%arg0: i32) -> (i32, i32) {
    %c0_i32 = arith.constant 0 : i32
    %c0_i32_0 = arith.constant 0 : i32
    return %arg0, %c0_i32 : i32, i32
  }
  func.func @transform_4(%arg0: i32) -> (i32, i32) {
    %c0_i32 = arith.constant 0 : i32
    %c0_i32_0 = arith.constant 0 : i32
    return %arg0, %c0_i32 : i32, i32
  }
}

module attributes {stable_mosaic.version = 11 : i64} {
  func.func @_conv3x3_stats_kernel(%arg0: i32, %arg1: i32, %arg2: memref<1x16x16x128xbf16, #tpu.memory_space<vmem>>, %arg3: memref<1x128xf32, #tpu.memory_space<vmem>>, %arg4: memref<1x128xf32, #tpu.memory_space<vmem>>, %arg5: memref<1152x128xbf16, #tpu.memory_space<vmem>>, %arg6: memref<1x256x128xbf16, #tpu.memory_space<vmem>>, %arg7: memref<1x1x128xf32, #tpu.memory_space<vmem>>, %arg8: memref<1x1x128xf32, #tpu.memory_space<vmem>>, %arg9: memref<18x18x128xbf16, #tpu.memory_space<vmem>>, %arg10: memref<256x1152xbf16, #tpu.memory_space<vmem>>) attributes {dimension_semantics = [#tpu.dimension_semantics<parallel>, #tpu.dimension_semantics<parallel>], iteration_bounds = array<i64: 2, 1>, scalar_prefetch = 0 : i64, scratch_operands = 2 : i64, tpu.core_type = #tpu.core_type<tc>, window_params = [{transform_indices = @transform_0, window_bounds = array<i64: 1, 16, 16, 128>}, {pipeline_mode = #tpu.pipeline_mode<synchronous>, transform_indices = @transform_1, window_bounds = array<i64: 1, 128>}, {pipeline_mode = #tpu.pipeline_mode<synchronous>, transform_indices = @transform_2, window_bounds = array<i64: 1, 128>}, {pipeline_mode = #tpu.pipeline_mode<synchronous>, transform_indices = @transform_3, window_bounds = array<i64: 1152, 128>}, {transform_indices = @transform_4, window_bounds = array<i64: 1, 256, 128>}, {transform_indices = @transform_5, window_bounds = array<i64: 1, 1, 128>}, {transform_indices = @transform_6, window_bounds = array<i64: 1, 1, 128>}]} {
    %c16_i32 = arith.constant 16 : i32
    %0 = arith.muli %arg1, %c16_i32 : i32
    %1 = tpu.assume_multiple %0, 16 : i32
    %cst = arith.constant 0.000000e+00 : bf16
    %2 = vector.broadcast %cst : bf16 to vector<18x18x128xbf16>
    %c0 = arith.constant 0 : index
    %c0_0 = arith.constant 0 : index
    %c0_1 = arith.constant 0 : index
    %3 = vector.load %arg9[%c0, %c0_0, %c0_1] : memref<18x18x128xbf16, #tpu.memory_space<vmem>>, vector<18x18x128xbf16>
    tpu.vector_store %arg9[%c0, %c0_0, %c0_1], %2 {strides = array<i32>} : memref<18x18x128xbf16, #tpu.memory_space<vmem>>, vector<18x18x128xbf16>,
    %c0_2 = arith.constant 0 : index
    %4 = arith.index_cast %1 : i32 to index
    %c0_3 = arith.constant 0 : index
    %c0_4 = arith.constant 0 : index
    %5 = vector.load %arg2[%c0_2, %4, %c0_3, %c0_4] : memref<1x16x16x128xbf16, #tpu.memory_space<vmem>>, vector<1x16x16x128xbf16>
    %6 = vector.shape_cast %5 : vector<1x16x16x128xbf16> to vector<16x16x128xbf16>
    %7 = arith.extf %6 : vector<16x16x128xbf16> to vector<16x16x128xf32>
    %c0_5 = arith.constant 0 : index
    %c0_6 = arith.constant 0 : index
    %8 = vector.load %arg3[%c0_5, %c0_6] : memref<1x128xf32, #tpu.memory_space<vmem>>, vector<1x128xf32>
    %9 = vector.shape_cast %8 : vector<1x128xf32> to vector<1x1x128xf32>
    %10 = vector.broadcast %9 : vector<1x1x128xf32> to vector<16x16x128xf32>
    %11 = arith.mulf %7, %10 : vector<16x16x128xf32>
    %c0_7 = arith.constant 0 : index
    %c0_8 = arith.constant 0 : index
    %12 = vector.load %arg4[%c0_7, %c0_8] : memref<1x128xf32, #tpu.memory_space<vmem>>, vector<1x128xf32>
    %13 = vector.shape_cast %12 : vector<1x128xf32> to vector<1x1x128xf32>
    %14 = vector.broadcast %13 : vector<1x1x128xf32> to vector<16x16x128xf32>
    %15 = arith.addf %11, %14 : vector<16x16x128xf32>
    %cst_9 = arith.constant 0.000000e+00 : f32
    %16 = vector.broadcast %cst_9 : f32 to vector<16x16x128xf32>
    %17 = arith.maximumf %15, %16 : vector<16x16x128xf32>
    %18 = arith.truncf %17 : vector<16x16x128xf32> to vector<16x16x128xbf16>
    %c1 = arith.constant 1 : index
    %c1_10 = arith.constant 1 : index
    %c0_11 = arith.constant 0 : index
    %19 = vector.load %arg9[%c1, %c1_10, %c0_11] : memref<18x18x128xbf16, #tpu.memory_space<vmem>>, vector<16x16x128xbf16>
    tpu.vector_store %arg9[%c1, %c1_10, %c0_11], %18 {strides = array<i32>} : memref<18x18x128xbf16, #tpu.memory_space<vmem>>, vector<16x16x128xbf16>,
    %c0_i32 = arith.constant 0 : i32
    %20 = arith.cmpi sgt, %arg1, %c0_i32 : i32
    %21 = arith.extui %20 : i1 to i32
    %c0_i32_12 = arith.constant 0 : i32
    %22 = arith.cmpi ne, %21, %c0_i32_12 : i32
    scf.if %22 {
      %c1_i32 = arith.constant 1 : i32
      %68 = arith.subi %1, %c1_i32 : i32
      %c0_67 = arith.constant 0 : index
      %69 = arith.index_cast %68 : i32 to index
      %c0_68 = arith.constant 0 : index
      %c0_69 = arith.constant 0 : index
      %70 = vector.load %arg2[%c0_67, %69, %c0_68, %c0_69] : memref<1x16x16x128xbf16, #tpu.memory_space<vmem>>, vector<1x1x16x128xbf16>
      %71 = vector.shape_cast %70 : vector<1x1x16x128xbf16> to vector<1x16x128xbf16>
      %72 = arith.extf %71 : vector<1x16x128xbf16> to vector<1x16x128xf32>
      %c0_70 = arith.constant 0 : index
      %c0_71 = arith.constant 0 : index
      %73 = vector.load %arg3[%c0_70, %c0_71] : memref<1x128xf32, #tpu.memory_space<vmem>>, vector<1x128xf32>
      %74 = vector.shape_cast %73 : vector<1x128xf32> to vector<1x1x128xf32>
      %75 = vector.broadcast %74 : vector<1x1x128xf32> to vector<1x16x128xf32>
      %76 = arith.mulf %72, %75 : vector<1x16x128xf32>
      %c0_72 = arith.constant 0 : index
      %c0_73 = arith.constant 0 : index
      %77 = vector.load %arg4[%c0_72, %c0_73] : memref<1x128xf32, #tpu.memory_space<vmem>>, vector<1x128xf32>
      %78 = vector.shape_cast %77 : vector<1x128xf32> to vector<1x1x128xf32>
      %79 = vector.broadcast %78 : vector<1x1x128xf32> to vector<1x16x128xf32>
      %80 = arith.addf %76, %79 : vector<1x16x128xf32>
      %cst_74 = arith.constant 0.000000e+00 : f32
      %81 = vector.broadcast %cst_74 : f32 to vector<1x16x128xf32>
      %82 = arith.maximumf %80, %81 : vector<1x16x128xf32>
      %83 = arith.truncf %82 : vector<1x16x128xf32> to vector<1x16x128xbf16>
      %c0_75 = arith.constant 0 : index
      %c1_76 = arith.constant 1 : index
      %c0_77 = arith.constant 0 : index
      %84 = vector.load %arg9[%c0_75, %c1_76, %c0_77] : memref<18x18x128xbf16, #tpu.memory_space<vmem>>, vector<1x16x128xbf16>
      tpu.vector_store %arg9[%c0_75, %c1_76, %c0_77], %83 {strides = array<i32>} : memref<18x18x128xbf16, #tpu.memory_space<vmem>>, vector<1x16x128xbf16>,
    } else {
    }
    %c0_i32_13 = arith.constant 0 : i32
    %23 = arith.cmpi slt, %arg1, %c0_i32_13 : i32
    %24 = arith.extui %23 : i1 to i32
    %c0_i32_14 = arith.constant 0 : i32
    %25 = arith.cmpi ne, %24, %c0_i32_14 : i32
    scf.if %25 {
      %c16_i32_67 = arith.constant 16 : i32
      %68 = arith.addi %1, %c16_i32_67 : i32
      %c0_68 = arith.constant 0 : index
      %69 = arith.index_cast %68 : i32 to index
      %c0_69 = arith.constant 0 : index
      %c0_70 = arith.constant 0 : index
      %70 = vector.load %arg2[%c0_68, %69, %c0_69, %c0_70] : memref<1x16x16x128xbf16, #tpu.memory_space<vmem>>, vector<1x1x16x128xbf16>
      %71 = vector.shape_cast %70 : vector<1x1x16x128xbf16> to vector<1x16x128xbf16>
      %72 = arith.extf %71 : vector<1x16x128xbf16> to vector<1x16x128xf32>
      %c0_71 = arith.constant 0 : index
      %c0_72 = arith.constant 0 : index
      %73 = vector.load %arg3[%c0_71, %c0_72] : memref<1x128xf32, #tpu.memory_space<vmem>>, vector<1x128xf32>
      %74 = vector.shape_cast %73 : vector<1x128xf32> to vector<1x1x128xf32>
      %75 = vector.broadcast %74 : vector<1x1x128xf32> to vector<1x16x128xf32>
      %76 = arith.mulf %72, %75 : vector<1x16x128xf32>
      %c0_73 = arith.constant 0 : index
      %c0_74 = arith.constant 0 : index
      %77 = vector.load %arg4[%c0_73, %c0_74] : memref<1x128xf32, #tpu.memory_space<vmem>>, vector<1x128xf32>
      %78 = vector.shape_cast %77 : vector<1x128xf32> to vector<1x1x128xf32>
      %79 = vector.broadcast %78 : vector<1x1x128xf32> to vector<1x16x128xf32>
      %80 = arith.addf %76, %79 : vector<1x16x128xf32>
      %cst_75 = arith.constant 0.000000e+00 : f32
      %81 = vector.broadcast %cst_75 : f32 to vector<1x16x128xf32>
      %82 = arith.maximumf %80, %81 : vector<1x16x128xf32>
      %83 = arith.truncf %82 : vector<1x16x128xf32> to vector<1x16x128xbf16>
      %c17 = arith.constant 17 : index
      %c1_76 = arith.constant 1 : index
      %c0_77 = arith.constant 0 : index
      %84 = vector.load %arg9[%c17, %c1_76, %c0_77] : memref<18x18x128xbf16, #tpu.memory_space<vmem>>, vector<1x16x128xbf16>
      tpu.vector_store %arg9[%c17, %c1_76, %c0_77], %83 {strides = array<i32>} : memref<18x18x128xbf16, #tpu.memory_space<vmem>>, vector<1x16x128xbf16>,
    } else {
    }
    %c0_15 = arith.constant 0 : index
    %c0_16 = arith.constant 0 : index
    %c0_17 = arith.constant 0 : index
    %26 = vector.load %arg9[%c0_15, %c0_16, %c0_17] : memref<18x18x128xbf16, #tpu.memory_space<vmem>>, vector<16x16x128xbf16>
    %27 = vector.shape_cast %26 : vector<16x16x128xbf16> to vector<256x128xbf16>
    %c0_18 = arith.constant 0 : index
    %c0_19 = arith.constant 0 : index
    %28 = vector.load %arg10[%c0_18, %c0_19] : memref<256x1152xbf16, #tpu.memory_space<vmem>>, vector<256x128xbf16>
    tpu.vector_store %arg10[%c0_18, %c0_19], %27 {strides = array<i32>} : memref<256x1152xbf16, #tpu.memory_space<vmem>>, vector<256x128xbf16>,
    %c0_20 = arith.constant 0 : index
    %c1_21 = arith.constant 1 : index
    %c0_22 = arith.constant 0 : index
    %29 = vector.load %arg9[%c0_20, %c1_21, %c0_22] : memref<18x18x128xbf16, #tpu.memory_space<vmem>>, vector<16x16x128xbf16>
    %30 = vector.shape_cast %29 : vector<16x16x128xbf16> to vector<256x128xbf16>
    %c0_23 = arith.constant 0 : index
    %c128 = arith.constant 128 : index
    %31 = vector.load %arg10[%c0_23, %c128] : memref<256x1152xbf16, #tpu.memory_space<vmem>>, vector<256x128xbf16>
    tpu.vector_store %arg10[%c0_23, %c128], %30 {strides = array<i32>} : memref<256x1152xbf16, #tpu.memory_space<vmem>>, vector<256x128xbf16>,
    %c0_24 = arith.constant 0 : index
    %c2 = arith.constant 2 : index
    %c0_25 = arith.constant 0 : index
    %32 = vector.load %arg9[%c0_24, %c2, %c0_25] : memref<18x18x128xbf16, #tpu.memory_space<vmem>>, vector<16x16x128xbf16>
    %33 = vector.shape_cast %32 : vector<16x16x128xbf16> to vector<256x128xbf16>
    %c0_26 = arith.constant 0 : index
    %c256 = arith.constant 256 : index
    %34 = vector.load %arg10[%c0_26, %c256] : memref<256x1152xbf16, #tpu.memory_space<vmem>>, vector<256x128xbf16>
    tpu.vector_store %arg10[%c0_26, %c256], %33 {strides = array<i32>} : memref<256x1152xbf16, #tpu.memory_space<vmem>>, vector<256x128xbf16>,
    %c1_27 = arith.constant 1 : index
    %c0_28 = arith.constant 0 : index
    %c0_29 = arith.constant 0 : index
    %35 = vector.load %arg9[%c1_27, %c0_28, %c0_29] : memref<18x18x128xbf16, #tpu.memory_space<vmem>>, vector<16x16x128xbf16>
    %36 = vector.shape_cast %35 : vector<16x16x128xbf16> to vector<256x128xbf16>
    %c0_30 = arith.constant 0 : index
    %c384 = arith.constant 384 : index
    %37 = vector.load %arg10[%c0_30, %c384] : memref<256x1152xbf16, #tpu.memory_space<vmem>>, vector<256x128xbf16>
    tpu.vector_store %arg10[%c0_30, %c384], %36 {strides = array<i32>} : memref<256x1152xbf16, #tpu.memory_space<vmem>>, vector<256x128xbf16>,
    %c1_31 = arith.constant 1 : index
    %c1_32 = arith.constant 1 : index
    %c0_33 = arith.constant 0 : index
    %38 = vector.load %arg9[%c1_31, %c1_32, %c0_33] : memref<18x18x128xbf16, #tpu.memory_space<vmem>>, vector<16x16x128xbf16>
    %39 = vector.shape_cast %38 : vector<16x16x128xbf16> to vector<256x128xbf16>
    %c0_34 = arith.constant 0 : index
    %c512 = arith.constant 512 : index
    %40 = vector.load %arg10[%c0_34, %c512] : memref<256x1152xbf16, #tpu.memory_space<vmem>>, vector<256x128xbf16>
    tpu.vector_store %arg10[%c0_34, %c512], %39 {strides = array<i32>} : memref<256x1152xbf16, #tpu.memory_space<vmem>>, vector<256x128xbf16>,
    %c1_35 = arith.constant 1 : index
    %c2_36 = arith.constant 2 : index
    %c0_37 = arith.constant 0 : index
    %41 = vector.load %arg9[%c1_35, %c2_36, %c0_37] : memref<18x18x128xbf16, #tpu.memory_space<vmem>>, vector<16x16x128xbf16>
    %42 = vector.shape_cast %41 : vector<16x16x128xbf16> to vector<256x128xbf16>
    %c0_38 = arith.constant 0 : index
    %c640 = arith.constant 640 : index
    %43 = vector.load %arg10[%c0_38, %c640] : memref<256x1152xbf16, #tpu.memory_space<vmem>>, vector<256x128xbf16>
    tpu.vector_store %arg10[%c0_38, %c640], %42 {strides = array<i32>} : memref<256x1152xbf16, #tpu.memory_space<vmem>>, vector<256x128xbf16>,
    %c2_39 = arith.constant 2 : index
    %c0_40 = arith.constant 0 : index
    %c0_41 = arith.constant 0 : index
    %44 = vector.load %arg9[%c2_39, %c0_40, %c0_41] : memref<18x18x128xbf16, #tpu.memory_space<vmem>>, vector<16x16x128xbf16>
    %45 = vector.shape_cast %44 : vector<16x16x128xbf16> to vector<256x128xbf16>
    %c0_42 = arith.constant 0 : index
    %c768 = arith.constant 768 : index
    %46 = vector.load %arg10[%c0_42, %c768] : memref<256x1152xbf16, #tpu.memory_space<vmem>>, vector<256x128xbf16>
    tpu.vector_store %arg10[%c0_42, %c768], %45 {strides = array<i32>} : memref<256x1152xbf16, #tpu.memory_space<vmem>>, vector<256x128xbf16>,
    %c2_43 = arith.constant 2 : index
    %c1_44 = arith.constant 1 : index
    %c0_45 = arith.constant 0 : index
    %47 = vector.load %arg9[%c2_43, %c1_44, %c0_45] : memref<18x18x128xbf16, #tpu.memory_space<vmem>>, vector<16x16x128xbf16>
    %48 = vector.shape_cast %47 : vector<16x16x128xbf16> to vector<256x128xbf16>
    %c0_46 = arith.constant 0 : index
    %c896 = arith.constant 896 : index
    %49 = vector.load %arg10[%c0_46, %c896] : memref<256x1152xbf16, #tpu.memory_space<vmem>>, vector<256x128xbf16>
    tpu.vector_store %arg10[%c0_46, %c896], %48 {strides = array<i32>} : memref<256x1152xbf16, #tpu.memory_space<vmem>>, vector<256x128xbf16>,
    %c2_47 = arith.constant 2 : index
    %c2_48 = arith.constant 2 : index
    %c0_49 = arith.constant 0 : index
    %50 = vector.load %arg9[%c2_47, %c2_48, %c0_49] : memref<18x18x128xbf16, #tpu.memory_space<vmem>>, vector<16x16x128xbf16>
    %51 = vector.shape_cast %50 : vector<16x16x128xbf16> to vector<256x128xbf16>
    %c0_50 = arith.constant 0 : index
    %c1024 = arith.constant 1024 : index
    %52 = vector.load %arg10[%c0_50, %c1024] : memref<256x1152xbf16, #tpu.memory_space<vmem>>, vector<256x128xbf16>
    tpu.vector_store %arg10[%c0_50, %c1024], %51 {strides = array<i32>} : memref<256x1152xbf16, #tpu.memory_space<vmem>>, vector<256x128xbf16>,
    %c0_51 = arith.constant 0 : index
    %c0_52 = arith.constant 0 : index
    %53 = vector.load %arg10[%c0_51, %c0_52] : memref<256x1152xbf16, #tpu.memory_space<vmem>>, vector<256x1152xbf16>
    %c0_53 = arith.constant 0 : index
    %c0_54 = arith.constant 0 : index
    %54 = vector.load %arg5[%c0_53, %c0_54] : memref<1152x128xbf16, #tpu.memory_space<vmem>>, vector<1152x128xbf16>
    %cst_55 = arith.constant dense<0.000000e+00> : vector<256x128xf32>
    %55 = tpu.matmul %53, %54, %cst_55 {dimension_numbers = #tpu.dot_dimension_numbers<[1], [0], [0], [1], [0, 0, 1, 1], [], []>} : vector<256x1152xbf16>, vector<1152x128xbf16>, vector<256x128xf32> -> vector<256x128xf32>
    %56 = vector.shape_cast %55 : vector<256x128xf32> to vector<1x256x128xf32>
    %57 = arith.truncf %56 : vector<1x256x128xf32> to vector<1x256x128xbf16>
    %c0_56 = arith.constant 0 : index
    %c0_57 = arith.constant 0 : index
    %c0_58 = arith.constant 0 : index
    %58 = vector.load %arg6[%c0_56, %c0_57, %c0_58] : memref<1x256x128xbf16, #tpu.memory_space<vmem>>, vector<1x256x128xbf16>
    tpu.vector_store %arg6[%c0_56, %c0_57, %c0_58], %57 {strides = array<i32>} : memref<1x256x128xbf16, #tpu.memory_space<vmem>>, vector<1x256x128xbf16>,
    %cst_59 = arith.constant dense<0.000000e+00> : vector<128xf32>
    %59 = vector.multi_reduction <add>, %55, %cst_59 [0] : vector<256x128xf32> to vector<128xf32>
    %60 = vector.shape_cast %59 : vector<128xf32> to vector<1x128xf32>
    %61 = vector.shape_cast %60 : vector<1x128xf32> to vector<1x1x128xf32>
    %c0_60 = arith.constant 0 : index
    %c0_61 = arith.constant 0 : index
    %c0_62 = arith.constant 0 : index
    %62 = vector.load %arg7[%c0_60, %c0_61, %c0_62] : memref<1x1x128xf32, #tpu.memory_space<vmem>>, vector<1x1x128xf32>
    tpu.vector_store %arg7[%c0_60, %c0_61, %c0_62], %61 {strides = array<i32>} : memref<1x1x128xf32, #tpu.memory_space<vmem>>, vector<1x1x128xf32>,
    %63 = arith.mulf %55, %55 : vector<256x128xf32>
    %cst_63 = arith.constant dense<0.000000e+00> : vector<128xf32>
    %64 = vector.multi_reduction <add>, %63, %cst_63 [0] : vector<256x128xf32> to vector<128xf32>
    %65 = vector.shape_cast %64 : vector<128xf32> to vector<1x128xf32>
    %66 = vector.shape_cast %65 : vector<1x128xf32> to vector<1x1x128xf32>
    %c0_64 = arith.constant 0 : index
    %c0_65 = arith.constant 0 : index
    %c0_66 = arith.constant 0 : index
    %67 = vector.load %arg8[%c0_64, %c0_65, %c0_66] : memref<1x1x128xf32, #tpu.memory_space<vmem>>, vector<1x1x128xf32>
    tpu.vector_store %arg8[%c0_64, %c0_65, %c0_66], %66 {strides = array<i32>} : memref<1x1x128xf32, #tpu.memory_space<vmem>>, vector<1x1x128xf32>,
    return
  }
  func.func @transform_0(%arg0: i32, %arg1: i32) -> (i32, i32, i32, i32) {
    %c0_i32 = arith.constant 0 : i32
    %c0_i32_0 = arith.constant 0 : i32
    %c0_i32_1 = arith.constant 0 : i32
    %c0_i32_2 = arith.constant 0 : i32
    return %arg0, %c0_i32, %c0_i32_0, %c0_i32_1 : i32, i32, i32, i32
  }
  func.func @transform_1(%arg0: i32, %arg1: i32) -> (i32, i32) {
    %c0_i32 = arith.constant 0 : i32
    %c0_i32_0 = arith.constant 0 : i32
    %c0_i32_1 = arith.constant 0 : i32
    return %c0_i32, %c0_i32_0 : i32, i32
  }
  func.func @transform_2(%arg0: i32, %arg1: i32) -> (i32, i32) {
    %c0_i32 = arith.constant 0 : i32
    %c0_i32_0 = arith.constant 0 : i32
    %c0_i32_1 = arith.constant 0 : i32
    return %c0_i32, %c0_i32_0 : i32, i32
  }
  func.func @transform_3(%arg0: i32, %arg1: i32) -> (i32, i32) {
    %c0_i32 = arith.constant 0 : i32
    %c0_i32_0 = arith.constant 0 : i32
    %c0_i32_1 = arith.constant 0 : i32
    return %c0_i32, %c0_i32_0 : i32, i32
  }
  func.func @transform_4(%arg0: i32, %arg1: i32) -> (i32, i32, i32) {
    %c1_i32 = arith.constant 1 : i32
    %0 = arith.muli %arg0, %c1_i32 : i32
    %1 = arith.addi %0, %arg1 : i32
    %c0_i32 = arith.constant 0 : i32
    %c0_i32_0 = arith.constant 0 : i32
    %c0_i32_1 = arith.constant 0 : i32
    return %1, %c0_i32, %c0_i32_0 : i32, i32, i32
  }
  func.func @transform_5(%arg0: i32, %arg1: i32) -> (i32, i32, i32) {
    %c1_i32 = arith.constant 1 : i32
    %0 = arith.muli %arg0, %c1_i32 : i32
    %1 = arith.addi %0, %arg1 : i32
    %c0_i32 = arith.constant 0 : i32
    %c0_i32_0 = arith.constant 0 : i32
    %c0_i32_1 = arith.constant 0 : i32
    return %1, %c0_i32, %c0_i32_0 : i32, i32, i32
  }
  func.func @transform_6(%arg0: i32, %arg1: i32) -> (i32, i32, i32) {
    %c1_i32 = arith.constant 1 : i32
    %0 = arith.muli %arg0, %c1_i32 : i32
    %1 = arith.addi %0, %arg1 : i32
    %c0_i32 = arith.constant 0 : i32
    %c0_i32_0 = arith.constant 0 : i32
    %c0_i32_1 = arith.constant 0 : i32
    return %1, %c0_i32, %c0_i32_0 : i32, i32, i32
  }
}

</mosaic_0001>

<bundles_post_ra>
// kernel: basic_block_forward.5
= control target key start
LH: loop header
LB: loop body
LE: loop exit
PB: predicated region body
PF: predicated region fallthrough
CT: control target
= control target key end

     0   :  { %s1478_s0 = inlined_call_operand.vmem [shape: bf16[512,128], index: 0, kind: input, shape index: {}]   ;;  %s1479_s1 = inlined_call_operand.vmem [shape: f32[1,128], index: 1, kind: input, shape index: {}]   ;;  %s1480_s2 = inlined_call_operand.vmem [shape: f32[1,128], index: 2, kind: input, shape index: {}]   ;;  %s1481_s3 = inlined_call_operand.vmem [shape: bf16[512,128], index: 3, kind: input, shape index: {}]   ;;  %s1482_s4 = inlined_call_operand.vmem [shape: f32[512,128], index: 4, kind: output, shape index: {}]  }
   0x1   :  { %v614_v0 = vld [vmem:[%s1478_s0] sm:$0xff]   ;;  %v869_v5 = vld [vmem:[%s1478_s0 + $0x8] sm:$0xff]   ;;  %v870_v12 = vld [vmem:[%s1478_s0 + $0x10] sm:$0xff]  }
   0x2   :  { %v962_v1 = vld [vmem:[%s1479_s1] ss:$0 sm:$0xff]  ;;  %v615_v2 = vunpack.c.l.bf16 %v614_v0  ;;  %v616_v4 = vunpack.c.h.bf16 %v614_v0  ;;  %v900_v6 = vld [vmem:[%s1481_s3 + $0x8] sm:$0xff]   ;;  %v619_v10 = vunpack.c.l.bf16 %v869_v5  ;;  %v901_v13 = vld [vmem:[%s1481_s3 + $0x10] sm:$0xff]   ;;  %v620_v16 = vunpack.c.h.bf16 %v869_v5 }
   0x3   :  { %v742_v3 = vld [vmem:[%s1481_s3] sm:$0xff]   ;;  %v747_v11 = vunpack.c.l.bf16 %v900_v6  ;;  %v748_v17 = vunpack.c.h.bf16 %v900_v6  ;;  %v871_v18 = vld [vmem:[%s1478_s0 + $0x18] sm:$0xff]   ;;  %v623_v20 = vunpack.c.l.bf16 %v870_v12  ;;  %v751_v21 = vunpack.c.l.bf16 %v901_v13  ;;  %v873_v54 = vld [vmem:[%s1478_s0 + $0x28] sm:$0xff]  }
   0x4   :  { %v976_v7 = vld [vmem:[%s1480_s2] ss:$0 sm:$0xff]  ;;  %v743_v8 = vunpack.c.l.bf16 %v742_v3  ;;  %v744_v9 = vunpack.c.h.bf16 %v742_v3  ;;  %v152_v14 = vmul.f32 %v615_v2, %v962_v1  ;;  %v153_v15 = vmul.f32 %v616_v4, %v962_v1  ;;  %v902_v23 = vld [vmem:[%s1481_s3 + $0x18] sm:$0xff]   ;;  %v904_v55 = vld [vmem:[%s1481_s3 + $0x28] sm:$0xff]  }
   0x5   :  { %v154_v19 = vmul.f32 %v619_v10, %v962_v1  ;;  %v624_v22 = vunpack.c.h.bf16 %v870_v12  ;;  %v155_v26 = vmul.f32 %v620_v16, %v962_v1  ;;  %v752_v27 = vunpack.c.h.bf16 %v901_v13  ;;  %v872_v40 = vld [vmem:[%s1478_s0 + $0x20] sm:$0xff]   ;;  %v874_v0 = vld [vmem:[%s1478_s0 + $0x30] sm:$0xff]   ;;  %v875_v16 = vld [vmem:[%s1478_s0 + $0x38] sm:$0xff]  }
   0x6   :  { %v223_v24 = vadd.f32 %v976_v7, %v152_v14  ;;  %v224_v25 = vadd.f32 %v976_v7, %v153_v15  ;;  %v156_v29 = vmul.f32 %v623_v20, %v962_v1  ;;  %v627_v31 = vunpack.c.l.bf16 %v871_v18  ;;  %v903_v45 = vld [vmem:[%s1481_s3 + $0x20] sm:$0xff]   ;;  %v905_v2 = vld [vmem:[%s1481_s3 + $0x30] sm:$0xff]  }
   0x7   :  { %v225_v28 = vadd.f32 %v976_v7, %v154_v19  ;;  %v157_v30 = vmul.f32 %v624_v22, %v962_v1  ;;  %v226_v34 = vadd.f32 %v976_v7, %v155_v26  ;;  %v755_v35 = vunpack.c.l.bf16 %v902_v23 }
   0x8   :  { %v415_v32 = vadd.f32 %v743_v8, %v223_v24  ;;  %v416_v33 = vadd.f32 %v744_v9, %v224_v25  ;;  %v227_v37 = vadd.f32 %v976_v7, %v156_v29  ;;  %v158_v39 = vmul.f32 %v627_v31, %v962_v1 }
   0x9   :  { %v417_v36 = vadd.f32 %v747_v11, %v225_v28  ;;  %v228_v38 = vadd.f32 %v976_v7, %v157_v30  ;;  %v418_v43 = vadd.f32 %v748_v17, %v226_v34  ;;  %v628_v44 = vunpack.c.h.bf16 %v871_v18  ;;  %v876_v34 = vld [vmem:[%s1478_s0 + $0x40] sm:$0xff]  }
   0xa   :  { %v479_v41 = vmax.f32 %v415_v32, 0.0  ;;  %v480_v42 = vmax.f32 %v416_v33, 0.0  ;;  %v419_v47 = vadd.f32 %v751_v21, %v227_v37  ;;  %v229_v49 = vadd.f32 %v976_v7, %v158_v39  ;;  %v906_v21 = vld [vmem:[%s1481_s3 + $0x38] sm:$0xff]   ;;  %v907_v39 = vld [vmem:[%s1481_s3 + $0x40] sm:$0xff]  }
   0xb   :  { %v481_v46 = vmax.f32 %v417_v36, 0.0  ;;  %v420_v48 = vadd.f32 %v752_v27, %v228_v38  ;;  %v482_v50 = vmax.f32 %v418_v43, 0.0  ;;  %v159_v51 = vmul.f32 %v628_v44, %v962_v1 }
   0xc   :  { %543 = vst [vmem:[%s1482_s4] sm:$0xff] %v479_v41  ;;  %544 = vst [vmem:[%s1482_s4 + $0x8] sm:$0xff] %v480_v42  ;;  %v756_v52 = vunpack.c.h.bf16 %v902_v23  ;;  %v631_v53 = vunpack.c.l.bf16 %v872_v40  ;;  %v483_v56 = vmax.f32 %v419_v47, 0.0  ;;  %v421_v58 = vadd.f32 %v755_v35, %v229_v49  ;;  %v908_v49 = vld [vmem:[%s1481_s3 + $0x48] sm:$0xff]  }
   0xd   :  { %545 = vst [vmem:[%s1482_s4 + $0x10] sm:$0xff] %v481_v46  ;;  %v484_v57 = vmax.f32 %v420_v48, 0.0  ;;  %v759_v59 = vunpack.c.l.bf16 %v903_v45  ;;  %546 = vst [vmem:[%s1482_s4 + $0x18] sm:$0xff] %v482_v50  ;;  %v230_v60 = vadd.f32 %v976_v7, %v159_v51  ;;  %v632_v62 = vunpack.c.h.bf16 %v872_v40  ;;  %v877_v48 = vld [vmem:[%s1478_s0 + $0x48] sm:$0xff]  }
   0xe   :  { %v160_v61 = vmul.f32 %v631_v53, %v962_v1  ;;  %v760_v63 = vunpack.c.h.bf16 %v903_v45  ;;  %547 = vst [vmem:[%s1482_s4 + $0x20] sm:$0xff] %v483_v56  ;;  %v485_v3 = vmax.f32 %v421_v58, 0.0  ;;  %v635_v4 = vunpack.c.l.bf16 %v873_v54  ;;  %v878_v58 = vld [vmem:[%s1478_s0 + $0x50] sm:$0xff]  }
   0xf   :  { %548 = vst [vmem:[%s1482_s4 + $0x28] sm:$0xff] %v484_v57  ;;  %v763_v5 = vunpack.c.l.bf16 %v904_v55  ;;  %v636_v6 = vunpack.c.h.bf16 %v873_v54  ;;  %v422_v8 = vadd.f32 %v756_v52, %v230_v60  ;;  %v161_v10 = vmul.f32 %v632_v62, %v962_v1 }
  0x10   :  { %v231_v9 = vadd.f32 %v976_v7, %v160_v61  ;;  %v764_v11 = vunpack.c.h.bf16 %v904_v55  ;;  %549 = vst [vmem:[%s1482_s4 + $0x30] sm:$0xff] %v485_v3  ;;  %v162_v12 = vmul.f32 %v635_v4, %v962_v1  ;;  %v639_v14 = vunpack.c.l.bf16 %v874_v0 }
  0x11   :  { %v163_v13 = vmul.f32 %v636_v6, %v962_v1  ;;  %v767_v15 = vunpack.c.l.bf16 %v905_v2  ;;  %v486_v17 = vmax.f32 %v422_v8, 0.0  ;;  %v232_v19 = vadd.f32 %v976_v7, %v161_v10  ;;  %v879_v10 = vld [vmem:[%s1478_s0 + $0x58] sm:$0xff]  }
  0x12   :  { %v423_v18 = vadd.f32 %v759_v59, %v231_v9  ;;  %v640_v20 = vunpack.c.h.bf16 %v874_v0  ;;  %v233_v22 = vadd.f32 %v976_v7, %v162_v12  ;;  %v164_v24 = vmul.f32 %v639_v14, %v962_v1 }
  0x13   :  { %v234_v23 = vadd.f32 %v976_v7, %v163_v13  ;;  %v768_v25 = vunpack.c.h.bf16 %v905_v2  ;;  %550 = vst [vmem:[%s1482_s4 + $0x38] sm:$0xff] %v486_v17  ;;  %v424_v27 = vadd.f32 %v760_v63, %v232_v19  ;;  %v643_v29 = vunpack.c.l.bf16 %v875_v16  ;;  %v909_v63 = vld [vmem:[%s1481_s3 + $0x50] sm:$0xff]   ;;  %v910_v19 = vld [vmem:[%s1481_s3 + $0x58] sm:$0xff]  }
  0x14   :  { %v487_v26 = vmax.f32 %v423_v18, 0.0  ;;  %v165_v28 = vmul.f32 %v640_v20, %v962_v1  ;;  %v425_v30 = vadd.f32 %v763_v5, %v233_v22  ;;  %v235_v32 = vadd.f32 %v976_v7, %v164_v24 }
  0x15   :  { %v426_v31 = vadd.f32 %v764_v11, %v234_v23  ;;  %v771_v33 = vunpack.c.l.bf16 %v906_v21  ;;  %v488_v35 = vmax.f32 %v424_v27, 0.0  ;;  %v166_v37 = vmul.f32 %v643_v29, %v962_v1 }
  0x16   :  { %551 = vst [vmem:[%s1482_s4 + $0x40] sm:$0xff] %v487_v26  ;;  %v236_v36 = vadd.f32 %v976_v7, %v165_v28  ;;  %v644_v38 = vunpack.c.h.bf16 %v875_v16  ;;  %v489_v40 = vmax.f32 %v425_v30, 0.0  ;;  %v427_v42 = vadd.f32 %v767_v15, %v235_v32  ;;  %v880_v28 = vld [vmem:[%s1478_s0 + $0x60] sm:$0xff]  }
  0x17   :  { %v490_v41 = vmax.f32 %v426_v31, 0.0  ;;  %v772_v43 = vunpack.c.h.bf16 %v906_v21  ;;  %552 = vst [vmem:[%s1482_s4 + $0x48] sm:$0xff] %v488_v35  ;;  %v237_v45 = vadd.f32 %v976_v7, %v166_v37  ;;  %v647_v47 = vunpack.c.l.bf16 %v876_v34 }
  0x18   :  { %v428_v44 = vadd.f32 %v768_v25, %v236_v36  ;;  %v167_v46 = vmul.f32 %v644_v38, %v962_v1  ;;  %553 = vst [vmem:[%s1482_s4 + $0x50] sm:$0xff] %v489_v40  ;;  %v491_v50 = vmax.f32 %v427_v42, 0.0  ;;  %v775_v51 = vunpack.c.l.bf16 %v907_v39  ;;  %v881_v42 = vld [vmem:[%s1478_s0 + $0x68] sm:$0xff]  }
  0x19   :  { %554 = vst [vmem:[%s1482_s4 + $0x58] sm:$0xff] %v490_v41  ;;  %v648_v52 = vunpack.c.h.bf16 %v876_v34  ;;  %v776_v53 = vunpack.c.h.bf16 %v907_v39  ;;  %v429_v55 = vadd.f32 %v771_v33, %v237_v45  ;;  %v168_v57 = vmul.f32 %v647_v47, %v962_v1  ;;  %v911_v33 = vld [vmem:[%s1481_s3 + $0x60] sm:$0xff]  }
  0x1a   :  { %v492_v54 = vmax.f32 %v428_v44, 0.0  ;;  %v238_v56 = vadd.f32 %v976_v7, %v167_v46  ;;  %555 = vst [vmem:[%s1482_s4 + $0x60] sm:$0xff] %v491_v50  ;;  %v651_v60 = vunpack.c.l.bf16 %v877_v48  ;;  %v779_v61 = vunpack.c.l.bf16 %v908_v49 }
  0x1b   :  { %v169_v59 = vmul.f32 %v648_v52, %v962_v1  ;;  %v652_v62 = vunpack.c.h.bf16 %v877_v48  ;;  %v493_v0 = vmax.f32 %v429_v55, 0.0  ;;  %v239_v3 = vadd.f32 %v976_v7, %v168_v57  ;;  %v882_v52 = vld [vmem:[%s1478_s0 + $0x70] sm:$0xff]  }
  0x1c   :  { %556 = vst [vmem:[%s1482_s4 + $0x68] sm:$0xff] %v492_v54  ;;  %v430_v2 = vadd.f32 %v772_v43, %v238_v56  ;;  %v780_v4 = vunpack.c.h.bf16 %v908_v49  ;;  %v170_v6 = vmul.f32 %v651_v60, %v962_v1  ;;  %v655_v9 = vunpack.c.l.bf16 %v878_v58  ;;  %v912_v43 = vld [vmem:[%s1481_s3 + $0x68] sm:$0xff]   ;;  %v913_v57 = vld [vmem:[%s1481_s3 + $0x70] sm:$0xff]  }
  0x1d   :  { %v240_v5 = vadd.f32 %v976_v7, %v169_v59  ;;  %v171_v8 = vmul.f32 %v652_v62, %v962_v1  ;;  %557 = vst [vmem:[%s1482_s4 + $0x70] sm:$0xff] %v493_v0  ;;  %v431_v12 = vadd.f32 %v775_v51, %v239_v3  ;;  %v783_v13 = vunpack.c.l.bf16 %v909_v63  ;;  %v883_v3 = vld [vmem:[%s1478_s0 + $0x78] sm:$0xff]  }
  0x1e   :  { %v494_v11 = vmax.f32 %v430_v2, 0.0  ;;  %v656_v14 = vunpack.c.h.bf16 %v878_v58  ;;  %v241_v16 = vadd.f32 %v976_v7, %v170_v6  ;;  %v172_v18 = vmul.f32 %v655_v9, %v962_v1 }
  0x1f   :  { %v432_v15 = vadd.f32 %v776_v53, %v240_v5  ;;  %v242_v17 = vadd.f32 %v976_v7, %v171_v8  ;;  %v495_v20 = vmax.f32 %v431_v12, 0.0  ;;  %v784_v22 = vunpack.c.h.bf16 %v909_v63 }
  0x20   :  { %558 = vst [vmem:[%s1482_s4 + $0x78] sm:$0xff] %v494_v11  ;;  %v173_v21 = vmul.f32 %v656_v14, %v962_v1  ;;  %v659_v23 = vunpack.c.l.bf16 %v879_v10  ;;  %v433_v25 = vadd.f32 %v779_v61, %v241_v16  ;;  %v243_v27 = vadd.f32 %v976_v7, %v172_v18 }
  0x21   :  { %v496_v24 = vmax.f32 %v432_v15, 0.0  ;;  %v434_v26 = vadd.f32 %v780_v4, %v242_v17  ;;  %559 = vst [vmem:[%s1482_s4 + $0x80] sm:$0xff] %v495_v20  ;;  %v787_v31 = vunpack.c.l.bf16 %v910_v19  ;;  %v660_v32 = vunpack.c.h.bf16 %v879_v10 }
  0x22   :  { %v244_v29 = vadd.f32 %v976_v7, %v173_v21  ;;  %v174_v30 = vmul.f32 %v659_v23, %v962_v1  ;;  %v497_v34 = vmax.f32 %v433_v25, 0.0  ;;  %v435_v36 = vadd.f32 %v783_v13, %v243_v27  ;;  %v914_v13 = vld [vmem:[%s1481_s3 + $0x78] sm:$0xff]   ;;  %v915_v27 = vld [vmem:[%s1481_s3 + $0x80] sm:$0xff]  }
  0x23   :  { %560 = vst [vmem:[%s1482_s4 + $0x88] sm:$0xff] %v496_v24  ;;  %v498_v35 = vmax.f32 %v434_v26, 0.0  ;;  %v788_v37 = vunpack.c.h.bf16 %v910_v19  ;;  %v175_v40 = vmul.f32 %v660_v32, %v962_v1  ;;  %v663_v41 = vunpack.c.l.bf16 %v880_v28 }
  0x24   :  { %v436_v38 = vadd.f32 %v784_v22, %v244_v29  ;;  %v245_v39 = vadd.f32 %v976_v7, %v174_v30  ;;  %561 = vst [vmem:[%s1482_s4 + $0x90] sm:$0xff] %v497_v34  ;;  %v499_v44 = vmax.f32 %v435_v36, 0.0  ;;  %v791_v45 = vunpack.c.l.bf16 %v911_v33  ;;  %v884_v22 = vld [vmem:[%s1478_s0 + $0x80] sm:$0xff]   ;;  %v885_v36 = vld [vmem:[%s1478_s0 + $0x88] sm:$0xff]  }
  0x25   :  { %562 = vst [vmem:[%s1482_s4 + $0x98] sm:$0xff] %v498_v35  ;;  %v664_v46 = vunpack.c.h.bf16 %v880_v28  ;;  %v792_v47 = vunpack.c.h.bf16 %v911_v33  ;;  %v246_v50 = vadd.f32 %v976_v7, %v175_v40  ;;  %v176_v51 = vmul.f32 %v663_v41, %v962_v1 }
  0x26   :  { %v500_v48 = vmax.f32 %v436_v38, 0.0  ;;  %v437_v49 = vadd.f32 %v787_v31, %v245_v39  ;;  %563 = vst [vmem:[%s1482_s4 + $0xa0] sm:$0xff] %v499_v44  ;;  %v667_v54 = vunpack.c.l.bf16 %v881_v42  ;;  %v795_v55 = vunpack.c.l.bf16 %v912_v43 }
  0x27   :  { %v177_v53 = vmul.f32 %v664_v46, %v962_v1  ;;  %v668_v56 = vunpack.c.h.bf16 %v881_v42  ;;  %v438_v59 = vadd.f32 %v788_v37, %v246_v50  ;;  %v247_v60 = vadd.f32 %v976_v7, %v176_v51  ;;  %v916_v37 = vld [vmem:[%s1481_s3 + $0x88] sm:$0xff]   ;;  %v886_v46 = vld [vmem:[%s1478_s0 + $0x90] sm:$0xff]  }
  0x28   :  { %564 = vst [vmem:[%s1482_s4 + $0xa8] sm:$0xff] %v500_v48  ;;  %v501_v58 = vmax.f32 %v437_v49, 0.0  ;;  %v796_v61 = vunpack.c.h.bf16 %v912_v43  ;;  %v178_v63 = vmul.f32 %v667_v54, %v962_v1  ;;  %v671_v2 = vunpack.c.l.bf16 %v882_v52  ;;  %v917_v51 = vld [vmem:[%s1481_s3 + $0x90] sm:$0xff]  }
  0x29   :  { %v248_v62 = vadd.f32 %v976_v7, %v177_v53  ;;  %v179_v0 = vmul.f32 %v668_v56, %v962_v1  ;;  %v502_v4 = vmax.f32 %v438_v59, 0.0  ;;  %v439_v5 = vadd.f32 %v791_v45, %v247_v60  ;;  %v887_v60 = vld [vmem:[%s1478_s0 + $0x98] sm:$0xff]  }
  0x2a   :  { %565 = vst [vmem:[%s1482_s4 + $0xb0] sm:$0xff] %v501_v58  ;;  %v799_v6 = vunpack.c.l.bf16 %v913_v57  ;;  %v672_v8 = vunpack.c.h.bf16 %v882_v52  ;;  %v249_v10 = vadd.f32 %v976_v7, %v178_v63  ;;  %v180_v12 = vmul.f32 %v671_v2, %v962_v1 }
  0x2b   :  { %v440_v9 = vadd.f32 %v792_v47, %v248_v62  ;;  %v250_v11 = vadd.f32 %v976_v7, %v179_v0  ;;  %566 = vst [vmem:[%s1482_s4 + $0xb8] sm:$0xff] %v502_v4  ;;  %v503_v14 = vmax.f32 %v439_v5, 0.0  ;;  %v800_v16 = vunpack.c.h.bf16 %v913_v57 }
  0x2c   :  { %v181_v15 = vmul.f32 %v672_v8, %v962_v1  ;;  %v675_v17 = vunpack.c.l.bf16 %v883_v3  ;;  %v441_v19 = vadd.f32 %v795_v55, %v249_v10  ;;  %v251_v21 = vadd.f32 %v976_v7, %v180_v12 }
  0x2d   :  { %v504_v18 = vmax.f32 %v440_v9, 0.0  ;;  %v442_v20 = vadd.f32 %v796_v61, %v250_v11  ;;  %567 = vst [vmem:[%s1482_s4 + $0xc0] sm:$0xff] %v503_v14  ;;  %v803_v25 = vunpack.c.l.bf16 %v914_v13  ;;  %v676_v26 = vunpack.c.h.bf16 %v883_v3 }
  0x2e   :  { %v252_v23 = vadd.f32 %v976_v7, %v181_v15  ;;  %v182_v24 = vmul.f32 %v675_v17, %v962_v1  ;;  %v505_v28 = vmax.f32 %v441_v19, 0.0  ;;  %v443_v30 = vadd.f32 %v799_v6, %v251_v21  ;;  %v918_v6 = vld [vmem:[%s1481_s3 + $0x98] sm:$0xff]   ;;  %v919_v21 = vld [vmem:[%s1481_s3 + $0xa0] sm:$0xff]  }
  0x2f   :  { %568 = vst [vmem:[%s1482_s4 + $0xc8] sm:$0xff] %v504_v18  ;;  %v506_v29 = vmax.f32 %v442_v20, 0.0  ;;  %v804_v31 = vunpack.c.h.bf16 %v914_v13  ;;  %v183_v34 = vmul.f32 %v676_v26, %v962_v1  ;;  %v679_v35 = vunpack.c.l.bf16 %v884_v22 }
  0x30   :  { %v444_v32 = vadd.f32 %v800_v16, %v252_v23  ;;  %v253_v33 = vadd.f32 %v976_v7, %v182_v24  ;;  %569 = vst [vmem:[%s1482_s4 + $0xd0] sm:$0xff] %v505_v28  ;;  %v507_v38 = vmax.f32 %v443_v30, 0.0  ;;  %v807_v39 = vunpack.c.l.bf16 %v915_v27  ;;  %v888_v16 = vld [vmem:[%s1478_s0 + $0xa0] sm:$0xff]   ;;  %v889_v30 = vld [vmem:[%s1478_s0 + $0xa8] sm:$0xff]  }
  0x31   :  { %570 = vst [vmem:[%s1482_s4 + $0xd8] sm:$0xff] %v506_v29  ;;  %v680_v40 = vunpack.c.h.bf16 %v884_v22  ;;  %v808_v41 = vunpack.c.h.bf16 %v915_v27  ;;  %v254_v44 = vadd.f32 %v976_v7, %v183_v34  ;;  %v184_v45 = vmul.f32 %v679_v35, %v962_v1 }
  0x32   :  { %v508_v42 = vmax.f32 %v444_v32, 0.0  ;;  %v445_v43 = vadd.f32 %v803_v25, %v253_v33  ;;  %571 = vst [vmem:[%s1482_s4 + $0xe0] sm:$0xff] %v507_v38  ;;  %v683_v48 = vunpack.c.l.bf16 %v885_v36  ;;  %v811_v49 = vunpack.c.l.bf16 %v916_v37 }
  0x33   :  { %v185_v47 = vmul.f32 %v680_v40, %v962_v1  ;;  %v684_v50 = vunpack.c.h.bf16 %v885_v36  ;;  %v446_v53 = vadd.f32 %v804_v31, %v254_v44  ;;  %v255_v54 = vadd.f32 %v976_v7, %v184_v45  ;;  %v920_v31 = vld [vmem:[%s1481_s3 + $0xa8] sm:$0xff]   ;;  %v890_v40 = vld [vmem:[%s1478_s0 + $0xb0] sm:$0xff]  }
  0x34   :  { %572 = vst [vmem:[%s1482_s4 + $0xe8] sm:$0xff] %v508_v42  ;;  %v509_v52 = vmax.f32 %v445_v43, 0.0  ;;  %v812_v55 = vunpack.c.h.bf16 %v916_v37  ;;  %v186_v57 = vmul.f32 %v683_v48, %v962_v1  ;;  %v687_v59 = vunpack.c.l.bf16 %v886_v46  ;;  %v921_v45 = vld [vmem:[%s1481_s3 + $0xb0] sm:$0xff]  }
  0x35   :  { %v256_v56 = vadd.f32 %v976_v7, %v185_v47  ;;  %v187_v58 = vmul.f32 %v684_v50, %v962_v1  ;;  %v510_v61 = vmax.f32 %v446_v53, 0.0  ;;  %v447_v62 = vadd.f32 %v807_v39, %v255_v54  ;;  %v891_v54 = vld [vmem:[%s1478_s0 + $0xb8] sm:$0xff]  }
  0x36   :  { %573 = vst [vmem:[%s1482_s4 + $0xf0] sm:$0xff] %v509_v52  ;;  %v815_v63 = vunpack.c.l.bf16 %v917_v51  ;;  %v688_v0 = vunpack.c.h.bf16 %v886_v46  ;;  %v257_v3 = vadd.f32 %v976_v7, %v186_v57  ;;  %v188_v5 = vmul.f32 %v687_v59, %v962_v1 }
  0x37   :  { %v448_v2 = vadd.f32 %v808_v41, %v256_v56  ;;  %v258_v4 = vadd.f32 %v976_v7, %v187_v58  ;;  %574 = vst [vmem:[%s1482_s4 + $0xf8] sm:$0xff] %v510_v61  ;;  %v511_v8 = vmax.f32 %v447_v62, 0.0  ;;  %v816_v10 = vunpack.c.h.bf16 %v917_v51 }
  0x38   :  { %v189_v9 = vmul.f32 %v688_v0, %v962_v1  ;;  %v691_v11 = vunpack.c.l.bf16 %v887_v60  ;;  %v449_v13 = vadd.f32 %v811_v49, %v257_v3  ;;  %v259_v15 = vadd.f32 %v976_v7, %v188_v5 }
  0x39   :  { %v512_v12 = vmax.f32 %v448_v2, 0.0  ;;  %v450_v14 = vadd.f32 %v812_v55, %v258_v4  ;;  %575 = vst [vmem:[%s1482_s4 + $0x100] sm:$0xff] %v511_v8  ;;  %v819_v19 = vunpack.c.l.bf16 %v918_v6  ;;  %v692_v20 = vunpack.c.h.bf16 %v887_v60 }
  0x3a   :  { %v260_v17 = vadd.f32 %v976_v7, %v189_v9  ;;  %v190_v18 = vmul.f32 %v691_v11, %v962_v1  ;;  %v513_v22 = vmax.f32 %v449_v13, 0.0  ;;  %v451_v24 = vadd.f32 %v815_v63, %v259_v15  ;;  %v922_v63 = vld [vmem:[%s1481_s3 + $0xb8] sm:$0xff]   ;;  %v923_v15 = vld [vmem:[%s1481_s3 + $0xc0] sm:$0xff]  }
  0x3b   :  { %576 = vst [vmem:[%s1482_s4 + $0x108] sm:$0xff] %v512_v12  ;;  %v514_v23 = vmax.f32 %v450_v14, 0.0  ;;  %v820_v25 = vunpack.c.h.bf16 %v918_v6  ;;  %v191_v28 = vmul.f32 %v692_v20, %v962_v1  ;;  %v695_v29 = vunpack.c.l.bf16 %v888_v16 }
  0x3c   :  { %v452_v26 = vadd.f32 %v816_v10, %v260_v17  ;;  %v261_v27 = vadd.f32 %v976_v7, %v190_v18  ;;  %577 = vst [vmem:[%s1482_s4 + $0x110] sm:$0xff] %v513_v22  ;;  %v515_v32 = vmax.f32 %v451_v24, 0.0  ;;  %v823_v33 = vunpack.c.l.bf16 %v919_v21  ;;  %v892_v10 = vld [vmem:[%s1478_s0 + $0xc0] sm:$0xff]   ;;  %v893_v24 = vld [vmem:[%s1478_s0 + $0xc8] sm:$0xff]  }
  0x3d   :  { %578 = vst [vmem:[%s1482_s4 + $0x118] sm:$0xff] %v514_v23  ;;  %v696_v34 = vunpack.c.h.bf16 %v888_v16  ;;  %v824_v35 = vunpack.c.h.bf16 %v919_v21  ;;  %v262_v38 = vadd.f32 %v976_v7, %v191_v28  ;;  %v192_v39 = vmul.f32 %v695_v29, %v962_v1 }
  0x3e   :  { %v516_v36 = vmax.f32 %v452_v26, 0.0  ;;  %v453_v37 = vadd.f32 %v819_v19, %v261_v27  ;;  %579 = vst [vmem:[%s1482_s4 + $0x120] sm:$0xff] %v515_v32  ;;  %v699_v42 = vunpack.c.l.bf16 %v889_v30  ;;  %v827_v43 = vunpack.c.l.bf16 %v920_v31 }
  0x3f   :  { %v193_v41 = vmul.f32 %v696_v34, %v962_v1  ;;  %v700_v44 = vunpack.c.h.bf16 %v889_v30  ;;  %v454_v47 = vadd.f32 %v820_v25, %v262_v38  ;;  %v263_v48 = vadd.f32 %v976_v7, %v192_v39  ;;  %v924_v25 = vld [vmem:[%s1481_s3 + $0xc8] sm:$0xff]   ;;  %v894_v34 = vld [vmem:[%s1478_s0 + $0xd0] sm:$0xff]  }
  0x40   :  { %580 = vst [vmem:[%s1482_s4 + $0x128] sm:$0xff] %v516_v36  ;;  %v517_v46 = vmax.f32 %v453_v37, 0.0  ;;  %v828_v49 = vunpack.c.h.bf16 %v920_v31  ;;  %v194_v51 = vmul.f32 %v699_v42, %v962_v1  ;;  %v703_v53 = vunpack.c.l.bf16 %v890_v40  ;;  %v925_v39 = vld [vmem:[%s1481_s3 + $0xd0] sm:$0xff]  }
  0x41   :  { %v264_v50 = vadd.f32 %v976_v7, %v193_v41  ;;  %v195_v52 = vmul.f32 %v700_v44, %v962_v1  ;;  %v518_v55 = vmax.f32 %v454_v47, 0.0  ;;  %v455_v56 = vadd.f32 %v823_v33, %v263_v48  ;;  %v895_v48 = vld [vmem:[%s1478_s0 + $0xd8] sm:$0xff]  }
  0x42   :  { %581 = vst [vmem:[%s1482_s4 + $0x130] sm:$0xff] %v517_v46  ;;  %v831_v57 = vunpack.c.l.bf16 %v921_v45  ;;  %v704_v58 = vunpack.c.h.bf16 %v890_v40  ;;  %v265_v60 = vadd.f32 %v976_v7, %v194_v51  ;;  %v196_v62 = vmul.f32 %v703_v53, %v962_v1 }
  0x43   :  { %v456_v59 = vadd.f32 %v824_v35, %v264_v50  ;;  %v266_v61 = vadd.f32 %v976_v7, %v195_v52  ;;  %582 = vst [vmem:[%s1482_s4 + $0x138] sm:$0xff] %v518_v55  ;;  %v519_v0 = vmax.f32 %v455_v56, 0.0  ;;  %v832_v3 = vunpack.c.h.bf16 %v921_v45 }
  0x44   :  { %v197_v2 = vmul.f32 %v704_v58, %v962_v1  ;;  %v707_v4 = vunpack.c.l.bf16 %v891_v54  ;;  %v457_v6 = vadd.f32 %v827_v43, %v265_v60  ;;  %v267_v9 = vadd.f32 %v976_v7, %v196_v62 }
  0x45   :  { %v520_v5 = vmax.f32 %v456_v59, 0.0  ;;  %v458_v8 = vadd.f32 %v828_v49, %v266_v61  ;;  %583 = vst [vmem:[%s1482_s4 + $0x140] sm:$0xff] %v519_v0  ;;  %v835_v13 = vunpack.c.l.bf16 %v922_v63  ;;  %v708_v14 = vunpack.c.h.bf16 %v891_v54 }
  0x46   :  { %v268_v11 = vadd.f32 %v976_v7, %v197_v2  ;;  %v198_v12 = vmul.f32 %v707_v4, %v962_v1  ;;  %v521_v16 = vmax.f32 %v457_v6, 0.0  ;;  %v459_v18 = vadd.f32 %v831_v57, %v267_v9  ;;  %v926_v57 = vld [vmem:[%s1481_s3 + $0xd8] sm:$0xff]   ;;  %v927_v9 = vld [vmem:[%s1481_s3 + $0xe0] sm:$0xff]  }
  0x47   :  { %584 = vst [vmem:[%s1482_s4 + $0x148] sm:$0xff] %v520_v5  ;;  %v522_v17 = vmax.f32 %v458_v8, 0.0  ;;  %v836_v19 = vunpack.c.h.bf16 %v922_v63  ;;  %v199_v22 = vmul.f32 %v708_v14, %v962_v1  ;;  %v711_v23 = vunpack.c.l.bf16 %v892_v10 }
  0x48   :  { %v460_v20 = vadd.f32 %v832_v3, %v268_v11  ;;  %v269_v21 = vadd.f32 %v976_v7, %v198_v12  ;;  %585 = vst [vmem:[%s1482_s4 + $0x150] sm:$0xff] %v521_v16  ;;  %v523_v26 = vmax.f32 %v459_v18, 0.0  ;;  %v839_v27 = vunpack.c.l.bf16 %v923_v15  ;;  %v896_v3 = vld [vmem:[%s1478_s0 + $0xe0] sm:$0xff]   ;;  %v897_v18 = vld [vmem:[%s1478_s0 + $0xe8] sm:$0xff]  }
  0x49   :  { %586 = vst [vmem:[%s1482_s4 + $0x158] sm:$0xff] %v522_v17  ;;  %v712_v28 = vunpack.c.h.bf16 %v892_v10  ;;  %v840_v29 = vunpack.c.h.bf16 %v923_v15  ;;  %v270_v32 = vadd.f32 %v976_v7, %v199_v22  ;;  %v200_v33 = vmul.f32 %v711_v23, %v962_v1 }
  0x4a   :  { %v524_v30 = vmax.f32 %v460_v20, 0.0  ;;  %v461_v31 = vadd.f32 %v835_v13, %v269_v21  ;;  %587 = vst [vmem:[%s1482_s4 + $0x160] sm:$0xff] %v523_v26  ;;  %v715_v36 = vunpack.c.l.bf16 %v893_v24  ;;  %v843_v37 = vunpack.c.l.bf16 %v924_v25 }
  0x4b   :  { %v201_v35 = vmul.f32 %v712_v28, %v962_v1  ;;  %v716_v38 = vunpack.c.h.bf16 %v893_v24  ;;  %v462_v41 = vadd.f32 %v836_v19, %v270_v32  ;;  %v271_v42 = vadd.f32 %v976_v7, %v200_v33  ;;  %v928_v19 = vld [vmem:[%s1481_s3 + $0xe8] sm:$0xff]   ;;  %v898_v28 = vld [vmem:[%s1478_s0 + $0xf0] sm:$0xff]  }
  0x4c   :  { %588 = vst [vmem:[%s1482_s4 + $0x168] sm:$0xff] %v524_v30  ;;  %v525_v40 = vmax.f32 %v461_v31, 0.0  ;;  %v844_v43 = vunpack.c.h.bf16 %v924_v25  ;;  %v202_v45 = vmul.f32 %v715_v36, %v962_v1  ;;  %v719_v47 = vunpack.c.l.bf16 %v894_v34  ;;  %v929_v33 = vld [vmem:[%s1481_s3 + $0xf0] sm:$0xff]  }
  0x4d   :  { %v272_v44 = vadd.f32 %v976_v7, %v201_v35  ;;  %v203_v46 = vmul.f32 %v716_v38, %v962_v1  ;;  %v526_v49 = vmax.f32 %v462_v41, 0.0  ;;  %v463_v50 = vadd.f32 %v839_v27, %v271_v42  ;;  %v899_v42 = vld [vmem:[%s1478_s0 + $0xf8] sm:$0xff]  }
  0x4e   :  { %589 = vst [vmem:[%s1482_s4 + $0x170] sm:$0xff] %v525_v40  ;;  %v847_v51 = vunpack.c.l.bf16 %v925_v39  ;;  %v720_v52 = vunpack.c.h.bf16 %v894_v34  ;;  %v273_v54 = vadd.f32 %v976_v7, %v202_v45  ;;  %v204_v56 = vmul.f32 %v719_v47, %v962_v1 }
  0x4f   :  { %v464_v53 = vadd.f32 %v840_v29, %v272_v44  ;;  %v274_v55 = vadd.f32 %v976_v7, %v203_v46  ;;  %590 = vst [vmem:[%s1482_s4 + $0x178] sm:$0xff] %v526_v49  ;;  %v527_v58 = vmax.f32 %v463_v50, 0.0  ;;  %v848_v60 = vunpack.c.h.bf16 %v925_v39 }
  0x50   :  { %v205_v59 = vmul.f32 %v720_v52, %v962_v1  ;;  %v723_v61 = vunpack.c.l.bf16 %v895_v48  ;;  %v465_v63 = vadd.f32 %v843_v37, %v273_v54  ;;  %v275_v2 = vadd.f32 %v976_v7, %v204_v56 }
  0x51   :  { %v528_v62 = vmax.f32 %v464_v53, 0.0  ;;  %v466_v0 = vadd.f32 %v844_v43, %v274_v55  ;;  %591 = vst [vmem:[%s1482_s4 + $0x180] sm:$0xff] %v527_v58  ;;  %v851_v6 = vunpack.c.l.bf16 %v926_v57  ;;  %v724_v8 = vunpack.c.h.bf16 %v895_v48 }
  0x52   :  { %v276_v4 = vadd.f32 %v976_v7, %v205_v59  ;;  %v206_v5 = vmul.f32 %v723_v61, %v962_v1  ;;  %v529_v10 = vmax.f32 %v465_v63, 0.0  ;;  %v467_v12 = vadd.f32 %v847_v51, %v275_v2  ;;  %v930_v51 = vld [vmem:[%s1481_s3 + $0xf8] sm:$0xff]  }
  0x53   :  { %592 = vst [vmem:[%s1482_s4 + $0x188] sm:$0xff] %v528_v62  ;;  %v530_v11 = vmax.f32 %v466_v0, 0.0  ;;  %v852_v13 = vunpack.c.h.bf16 %v926_v57  ;;  %v207_v16 = vmul.f32 %v724_v8, %v962_v1  ;;  %v727_v17 = vunpack.c.l.bf16 %v896_v3 }
  0x54   :  { %v468_v14 = vadd.f32 %v848_v60, %v276_v4  ;;  %v277_v15 = vadd.f32 %v976_v7, %v206_v5  ;;  %593 = vst [vmem:[%s1482_s4 + $0x190] sm:$0xff] %v529_v10  ;;  %v531_v20 = vmax.f32 %v467_v12, 0.0  ;;  %v855_v21 = vunpack.c.l.bf16 %v927_v9 }
  0x55   :  { %594 = vst [vmem:[%s1482_s4 + $0x198] sm:$0xff] %v530_v11  ;;  %v728_v22 = vunpack.c.h.bf16 %v896_v3  ;;  %v856_v23 = vunpack.c.h.bf16 %v927_v9  ;;  %v278_v26 = vadd.f32 %v976_v7, %v207_v16  ;;  %v208_v27 = vmul.f32 %v727_v17, %v962_v1 }
  0x56   :  { %v532_v24 = vmax.f32 %v468_v14, 0.0  ;;  %v469_v25 = vadd.f32 %v851_v6, %v277_v15  ;;  %595 = vst [vmem:[%s1482_s4 + $0x1a0] sm:$0xff] %v531_v20  ;;  %v731_v30 = vunpack.c.l.bf16 %v897_v18  ;;  %v859_v31 = vunpack.c.l.bf16 %v928_v19 }
  0x57   :  { %v209_v29 = vmul.f32 %v728_v22, %v962_v1  ;;  %v732_v32 = vunpack.c.h.bf16 %v897_v18  ;;  %v470_v35 = vadd.f32 %v852_v13, %v278_v26  ;;  %v279_v36 = vadd.f32 %v976_v7, %v208_v27 }
  0x58   :  { %596 = vst [vmem:[%s1482_s4 + $0x1a8] sm:$0xff] %v532_v24  ;;  %v533_v34 = vmax.f32 %v469_v25, 0.0  ;;  %v860_v37 = vunpack.c.h.bf16 %v928_v19  ;;  %v210_v39 = vmul.f32 %v731_v30, %v962_v1  ;;  %v735_v41 = vunpack.c.l.bf16 %v898_v28 }
  0x59   :  { %v280_v38 = vadd.f32 %v976_v7, %v209_v29  ;;  %v211_v40 = vmul.f32 %v732_v32, %v962_v1  ;;  %v534_v43 = vmax.f32 %v470_v35, 0.0  ;;  %v471_v44 = vadd.f32 %v855_v21, %v279_v36 }
  0x5a   :  { %597 = vst [vmem:[%s1482_s4 + $0x1b0] sm:$0xff] %v533_v34  ;;  %v863_v45 = vunpack.c.l.bf16 %v929_v33  ;;  %v736_v46 = vunpack.c.h.bf16 %v898_v28  ;;  %v281_v48 = vadd.f32 %v976_v7, %v210_v39  ;;  %v212_v50 = vmul.f32 %v735_v41, %v962_v1 }
  0x5b   :  { %v472_v47 = vadd.f32 %v856_v23, %v280_v38  ;;  %v282_v49 = vadd.f32 %v976_v7, %v211_v40  ;;  %598 = vst [vmem:[%s1482_s4 + $0x1b8] sm:$0xff] %v534_v43  ;;  %v535_v52 = vmax.f32 %v471_v44, 0.0  ;;  %v864_v54 = vunpack.c.h.bf16 %v929_v33 }
  0x5c   :  { %v213_v53 = vmul.f32 %v736_v46, %v962_v1  ;;  %v739_v55 = vunpack.c.l.bf16 %v899_v42  ;;  %v473_v57 = vadd.f32 %v859_v31, %v281_v48  ;;  %v283_v59 = vadd.f32 %v976_v7, %v212_v50 }
  0x5d   :  { %v536_v56 = vmax.f32 %v472_v47, 0.0  ;;  %v474_v58 = vadd.f32 %v860_v37, %v282_v49  ;;  %599 = vst [vmem:[%s1482_s4 + $0x1c0] sm:$0xff] %v535_v52  ;;  %v867_v62 = vunpack.c.l.bf16 %v930_v51  ;;  %v740_v63 = vunpack.c.h.bf16 %v899_v42 }
  0x5e   :  { %v284_v60 = vadd.f32 %v976_v7, %v213_v53  ;;  %v214_v61 = vmul.f32 %v739_v55, %v962_v1  ;;  %v537_v0 = vmax.f32 %v473_v57, 0.0  ;;  %v475_v3 = vadd.f32 %v863_v45, %v283_v59 }
  0x5f   :  { %600 = vst [vmem:[%s1482_s4 + $0x1c8] sm:$0xff] %v536_v56  ;;  %v538_v2 = vmax.f32 %v474_v58, 0.0  ;;  %v215_v6 = vmul.f32 %v740_v63, %v962_v1  ;;  %v868_v8 = vunpack.c.h.bf16 %v930_v51 }
  0x60   :  { %v476_v4 = vadd.f32 %v864_v54, %v284_v60  ;;  %v285_v5 = vadd.f32 %v976_v7, %v214_v61  ;;  %601 = vst [vmem:[%s1482_s4 + $0x1d0] sm:$0xff] %v537_v0  ;;  %v539_v9 = vmax.f32 %v475_v3, 0.0 }
  0x61   :  { %602 = vst [vmem:[%s1482_s4 + $0x1d8] sm:$0xff] %v538_v2  ;;  %v286_v12 = vadd.f32 %v976_v7, %v215_v6 }
  0x62   :  { %v540_v10 = vmax.f32 %v476_v4, 0.0  ;;  %v477_v11 = vadd.f32 %v867_v62, %v285_v5  ;;  %603 = vst [vmem:[%s1482_s4 + $0x1e0] sm:$0xff] %v539_v9 }
  0x63   :  { %v478_v13 = vadd.f32 %v868_v8, %v286_v12 }
  0x64   :  { %604 = vst [vmem:[%s1482_s4 + $0x1e8] sm:$0xff] %v540_v10  ;;  %v541_v1 = vmax.f32 %v477_v11, 0.0 }
  0x65   :  { %v542_v14 = vmax.f32 %v478_v13, 0.0 }
  0x66   :  { %605 = vst [vmem:[%s1482_s4 + $0x1f0] sm:$0xff] %v541_v1 }
  0x67   :  { %606 = vst [vmem:[%s1482_s4 + $0x1f8] sm:$0xff] %v542_v14 }

// kernel: basic_block_forward.3
= control target key start
LH: loop header
LB: loop body
LE: loop exit
PB: predicated region body
PF: predicated region fallthrough
CT: control target
= control target key end

     0   :  { %s7424_s21 = smov 0   ;;  %s7426_s22 = smov 0   ;;  %s8717_s0 = inlined_call_operand.vmem [shape: bf16[2,16,16,128], index: 0, kind: input, shape index: {}]   ;;  %s8718_s1 = inlined_call_operand.vmem [shape: f32[1,128], index: 1, kind: input, shape index: {}]   ;;  %s8719_s2 = inlined_call_operand.vmem [shape: f32[1,128], index: 2, kind: input, shape index: {}]   ;;  %s8720_s3 = inlined_call_operand.vmem [shape: bf16[1152,128], index: 3, kind: input, shape index: {}]   ;;  %s8721_s4 = inlined_call_operand.vmem [shape: bf16[2,256,128], index: 4, kind: output, shape index: {0}]   ;;  %s8722_s5 = inlined_call_operand.vmem [shape: f32[2,1,128], index: 5, kind: output, shape index: {1}]   ;;  %s8723_s6 = inlined_call_operand.vmem [shape: f32[2,1,128], index: 6, kind: output, shape index: {2}]  }
   0x1   :  { %s7428_s1 = smov 0  }
   0x2 LB: > { %s29_s2 = sadd.s32 1, %s7382_s22  ;;  %p6086_p0 = scmp.ge.s32.totalorder %s7386_s1, 1  ;;  %s7386_s1 = sphi %s7428_s1, %s17_s1   ;;  %s7382_s22 = sphi %s7426_s22, %s8764_s22   ;;  %s7378_s21 = sphi %s7424_s21, %s8763_s21  }
   0x3   : > { %p31_p1 = scmp.ge.s32.totalorder %s29_s2, 2  ;;  %p235_p2 = scmp.lt.s32.totalorder %s7386_s1, 3 }
   0x5   : > { %s8766_s2 = smov (%p31_p1, %s29_s2), 0  ;;  %p236_p3 = pnand %p6086_p0, %p235_p2 }
   0x7   : > { %239 = sbr.rel (%p236_p3) target bundleno = 754 (0x2f2), region = 36 }
   0xc   : > { %v7083_v0 = vld [vmem:[%s8720_s3 + $0x78] sm:$0xff]   ;;  %v7388_v2 = vmov 0   ;;  %v7085_v3 = vld [vmem:[%s8720_s3 + $0x70] sm:$0xff]   ;;  %v7087_v5 = vld [vmem:[%s8720_s3 + $0x68] sm:$0xff]   ;;  %p274_p4 = scmp.lt.s32.totalorder %s7378_s21, 1  ;;  %vm711_vm0 = vcmask 1043456  }
   0xd   : > { %v7084_v1 = vld [vmem:[%s8720_s3 + $0x38] sm:$0xff]   ;;  %298 = vst [vmem:[#allocation2] sm:$0xf] %v7388_v2  ;;  %299 = vst [vmem:[#allocation2 + $0x4] sm:$0xf] %v7388_v2  ;;  %6522 = vmatprep.subr.bf16.mxu0 %v7083_v0  ;;  %7042 = vmatprep.subr.bf16.mxu1 %v7083_v0  ;;  %v7086_v4 = vld [vmem:[%s8720_s3 + $0x30] sm:$0xff]  }
   0xe   : > { %300 = vst [vmem:[#allocation2 + $0x8] sm:$0x1] %v7388_v2  ;;  %301 = vst [vmem:[#allocation2 + $0xc] sm:$0xf] %v7388_v2  ;;  %6523 = vmatpush3.bf16.msra.mxu0 %v7084_v1  ;;  %7050 = vmatpush3.bf16.msra.mxu1 %v7084_v1  ;;  %v7088_v6 = vld [vmem:[%s8720_s3 + $0x28] sm:$0xff]   ;;  %v7089_v7 = vld [vmem:[%s8720_s3 + $0x60] sm:$0xff]  }
   0xf   : > { %302 = vst [vmem:[#allocation2 + $0x10] sm:$0xf] %v7388_v2  ;;  %303 = vst [vmem:[#allocation2 + $0x14] sm:$0x1] %v7388_v2  ;;  %6524 = vmatprep.subr.bf16.mxu0 %v7085_v3  ;;  %7043 = vmatprep.subr.bf16.mxu1 %v7085_v3  ;;  %s8768_s21 = smov (!%p274_p4, %s7378_s21), 1  ;;  %v7090_v8 = vld [vmem:[%s8720_s3 + $0x20] sm:$0xff]  }
  0x10   : > { %304 = vst [vmem:[#allocation2 + $0x18] sm:$0xf] %v7388_v2  ;;  %305 = vst [vmem:[#allocation2 + $0x1c] sm:$0xf] %v7388_v2  ;;  %v7091_v9 = vld [vmem:[%s8720_s3 + $0x58] sm:$0xff]   ;;  %s6393_s17 = sshll.u32 %s8768_s21, 7  ;;  %s289_s10 = scalar_lea.vmem %s8722_s5, %s8768_s21 }
  0x11   : > { %306 = vst [vmem:[#allocation2 + $0x20] sm:$0x1] %v7388_v2  ;;  %307 = vst [vmem:[#allocation2 + $0x24] sm:$0xf] %v7388_v2  ;;  %v7092_v10 = vld [vmem:[%s8720_s3 + $0x18] sm:$0xff]   ;;  %v7093_v11 = vld [vmem:[%s8720_s3 + $0x50] sm:$0xff]   ;;  %s7487_s26 = scalar_lea.vmem %s8717_s0, %s6393_s17  ;;  %s8617_s8 = scalar_lea.vmem %s8721_s4, %s6393_s17 }
  0x12   : > { %308 = vst [vmem:[#allocation2 + $0x28] sm:$0xf] %v7388_v2  ;;  %309 = vst [vmem:[#allocation2 + $0x2c] sm:$0x1] %v7388_v2  ;;  %6525 = vmatpush3.bf16.msra.mxu0 %v7086_v4  ;;  %7051 = vmatpush3.bf16.msra.mxu1 %v7086_v4  ;;  %vm1015_vm1 = vsmask.f32 3328  ;;  %s294_s13 = scalar_lea.vmem %s8723_s6, %s8768_s21 }
  0x13   : > { %310 = vst [vmem:[#allocation2 + $0x30] sm:$0xf] %v7388_v2  ;;  %311 = vst [vmem:[#allocation2 + $0x34] sm:$0xf] %v7388_v2  ;;  %6526 = vmatprep.subr.bf16.mxu0 %v7087_v5  ;;  %7044 = vmatprep.subr.bf16.mxu1 %v7087_v5  ;;  %v7094_v17 = vld [vmem:[%s8720_s3 + $0x10] sm:$0xff]   ;;  %v7095_v25 = vld [vmem:[%s8720_s3 + $0x48] sm:$0xff]  }
  0x14   : > { %312 = vst [vmem:[#allocation2 + $0x38] sm:$0x1] %v7388_v2  ;;  %313 = vst [vmem:[#allocation2 + $0x3c] sm:$0xf] %v7388_v2  ;;  %v903_v12 = vld [vmem:[#allocation2] sm:$0xf] }
  0x15   : > { %314 = vst [vmem:[#allocation2 + $0x40] sm:$0xf] %v7388_v2  ;;  %315 = vst [vmem:[#allocation2 + $0x44] sm:$0x1] %v7388_v2  ;;  %v904_v13 = vld [vmem:[#allocation2 + $0x4] sm:$0xf] }
  0x16   : > { %316 = vst [vmem:[#allocation2 + $0x48] sm:$0xf] %v7388_v2  ;;  %317 = vst [vmem:[#allocation2 + $0x4c] sm:$0xf] %v7388_v2  ;;  %6527 = vmatpush3.bf16.msra.mxu0 %v7088_v6  ;;  %7052 = vmatpush3.bf16.msra.mxu1 %v7088_v6  ;;  %v967_v14 = vld [vmem:[#allocation2] sm:$0xf] }
  0x17   : > { %318 = vst [vmem:[#allocation2 + $0x50] sm:$0x1] %v7388_v2  ;;  %319 = vst [vmem:[#allocation2 + $0x54] sm:$0xf] %v7388_v2  ;;  %6528 = vmatprep.subr.bf16.mxu0 %v7089_v7  ;;  %7045 = vmatprep.subr.bf16.mxu1 %v7089_v7  ;;  %v968_v15 = vld [vmem:[#allocation2 + $0x4] sm:$0xf] }
  0x18   : > { %320 = vst [vmem:[#allocation2 + $0x58] sm:$0xf] %v7388_v2  ;;  %321 = vst [vmem:[#allocation2 + $0x5c] sm:$0x1] %v7388_v2  ;;  %v969_v16 = vld [vmem:[#allocation2 + $0x8] sm:$0x1] }
  0x19   : > { %322 = vst [vmem:[#allocation2 + $0x60] sm:$0xf] %v7388_v2  ;;  %323 = vst [vmem:[#allocation2 + $0x64] sm:$0xf] %v7388_v2  ;;  %vm1016_vm2 = vsmask.f32 7440 }
  0x1a   : > { %324 = vst [vmem:[#allocation2 + $0x68] sm:$0x1] %v7388_v2  ;;  %325 = vst [vmem:[#allocation2 + $0x6c] sm:$0xf] %v7388_v2  ;;  %6529 = vmatpush3.bf16.msra.mxu0 %v7090_v8  ;;  %7053 = vmatpush3.bf16.msra.mxu1 %v7090_v8  ;;  %v1019_v18 = vshrl.u32 %v967_v14, 16  ;;  %v1022_v19 = vshll.u32 %v967_v14, 16 }
  0x1b   : > { %326 = vst [vmem:[#allocation2 + $0x70] sm:$0xf] %v7388_v2  ;;  %327 = vst [vmem:[#allocation2 + $0x74] sm:$0x1] %v7388_v2  ;;  %6530 = vmatprep.subr.bf16.mxu0 %v7091_v9  ;;  %7046 = vmatprep.subr.bf16.mxu1 %v7091_v9  ;;  %v1028_v20 = vshll.u32 %v968_v15, 16  ;;  %v1032_v21 = vshrl.u32 %v968_v15, 16 }
  0x1c   : > { %328 = vst [vmem:[#allocation2 + $0x78] sm:$0xf] %v7388_v2  ;;  %329 = vst [vmem:[#allocation2 + $0x7c] sm:$0xf] %v7388_v2  ;;  %v1038_v22 = vshll.u32 %v969_v16, 16  ;;  %v1021_v26 = vrot.slane %v1019_v18, 4 }
  0x1d   : > { %330 = vst [vmem:[#allocation2 + $0x80] sm:$0x1] %v7388_v2  ;;  %331 = vst [vmem:[#allocation2 + $0x84] sm:$0xf] %v7388_v2  ;;  %v377_v23 = vld [vmem:[%s7487_s26 + $0x58] sm:$0xf] }
  0x1e   : > { %332 = vst [vmem:[#allocation2 + $0x88] sm:$0xf] %v7388_v2  ;;  %333 = vst [vmem:[#allocation2 + $0x8c] sm:$0x1] %v7388_v2  ;;  %6531 = vmatpush3.bf16.msra.mxu0 %v7092_v10  ;;  %7054 = vmatpush3.bf16.msra.mxu1 %v7092_v10  ;;  %v378_v24 = vld [vmem:[%s7487_s26 + $0x5c] sm:$0xf] }
  0x1f   : > { %334 = vst [vmem:[#allocation2 + $0x90] sm:$0xf] %v7388_v2  ;;  %335 = vst [vmem:[#allocation2 + $0x94] sm:$0xf] %v7388_v2  ;;  %6532 = vmatprep.subr.bf16.mxu0 %v7093_v11  ;;  %7047 = vmatprep.subr.bf16.mxu1 %v7093_v11  ;;  %v1024_v27 = vrot.slane %v1022_v19, 5  ;;  %v1030_v28 = vrot.slane %v1028_v20, 5 }
  0x20   : > { %336 = vst [vmem:[#allocation2 + $0x98] sm:$0x1] %v7388_v2  ;;  %337 = vst [vmem:[#allocation2 + $0x9c] sm:$0xf] %v7388_v2  ;;  %vm718_vm3 = vcmask 1040384   ;;  %v7096_v29 = vld [vmem:[%s8720_s3 + $0x8] sm:$0xff]  }
  0x21   : > { %338 = vst [vmem:[#allocation2 + $0xa0] sm:$0xf] %v7388_v2  ;;  %339 = vst [vmem:[#allocation2 + $0xa4] sm:$0x1] %v7388_v2  ;;  %v1034_v30 = vrot.slane %v1032_v21, 4  ;;  %v578_v31 = vshrl.u32 %v377_v23, 16  ;;  %v1025_v34 = vor.u32 %v1024_v27, %v1021_v26 }
  0x22   : > { %340 = vst [vmem:[#allocation2 + $0xa8] sm:$0xf] %v7388_v2  ;;  %341 = vst [vmem:[#allocation2 + $0xac] sm:$0xf] %v7388_v2  ;;  %vm387_vm4 = vsmask.f32 256  ;;  %6533 = vmatpush3.bf16.msra.mxu0 %v7094_v17  ;;  %7055 = vmatpush3.bf16.msra.mxu1 %v7094_v17 }
  0x23   : > { %342 = vst [vmem:[#allocation2 + $0xb0] sm:$0x1] %v7388_v2  ;;  %343 = vst [vmem:[#allocation2 + $0xb4] sm:$0xf] %v7388_v2  ;;  %vm388_vm5 = vsmask.f32 4368  ;;  %v1035_v39 = vor.u32 %v1034_v30, %v1030_v28  ;;  %6534 = vmatprep.subr.bf16.mxu0 %v7095_v25  ;;  %7048 = vmatprep.subr.bf16.mxu1 %v7095_v25 }
  0x24   : > { %344 = vst [vmem:[#allocation2 + $0xb8] sm:$0xf] %v7388_v2  ;;  %345 = vst [vmem:[#allocation2 + $0xbc] sm:$0x1] %v7388_v2  ;;  %v7097_v32 = vld [vmem:[%s8720_s3 + $0x40] sm:$0xff]   ;;  %v581_v35 = vshll.u32 %v377_v23, 16 }
  0x25   : > { %346 = vst [vmem:[#allocation2 + $0xc0] sm:$0xf] %v7388_v2  ;;  %347 = vst [vmem:[#allocation2 + $0xc4] sm:$0xf] %v7388_v2  ;;  %v586_v36 = vshrl.u32 %v378_v24, 16  ;;  %v589_v37 = vshll.u32 %v378_v24, 16 }
  0x26   : > { %348 = vst [vmem:[#allocation2 + $0xc8] sm:$0x1] %v7388_v2  ;;  %349 = vst [vmem:[#allocation2 + $0xcc] sm:$0xf] %v7388_v2  ;;  %v793_v38 = vld [vmem:[#allocation2 + $0x90] sm:$0xf]  ;;  %6535 = vmatpush3.bf16.msra.mxu0 %v7096_v29  ;;  %7056 = vmatpush3.bf16.msra.mxu1 %v7096_v29 }
  0x27   : > { %350 = vst [vmem:[#allocation2 + $0xd0] sm:$0xf] %v7388_v2  ;;  %351 = vst [vmem:[#allocation2 + $0xd4] sm:$0x1] %v7388_v2  ;;  %v1040_v40 = vrot.slane %v1038_v22, 5  ;;  %v580_v41 = vrot.slane %v578_v31, 7  ;;  %6536 = vmatprep.subr.bf16.mxu0 %v7097_v32  ;;  %7049 = vmatprep.subr.bf16.mxu1 %v7097_v32 }
  0x28   : > { %935 = vst [vmem:[#allocation3] sm:$0xf] %v903_v12  ;;  %936 = vst [vmem:[#allocation3 + $0x24] sm:$0xf] %v904_v13  ;;  %vm712_vm7 = vsmask.f32 7938 }
  0x29   : > { %vm7505_vm6 = vmor %vm1015_vm1, %vm1016_vm2  ;;  %v797_v43 = vld [vmem:[#allocation2 + $0x98] sm:$0x1]  ;;  %v1026_v44 = vrot.slane %v1025_v34, 4  ;;  %v588_v45 = vrot.slane %v586_v36, 7  ;;  %v1036_v47 = vrot.slane %v1035_v39, 4  ;;  %v583_v49 = vor.u32 %v581_v35, %v580_v41  ;;  %v7098_v56 = vld [vmem:[%s8720_s3] sm:$0xff]  }
  0x2a   : > { %vm7511_vm8 = vmand %vm718_vm3, %vm387_vm4  ;;  %v584_v50 = vrot.slane %v580_v41, 4  ;;  %v355_v54 = vld [vmem:[%s7487_s26] sm:$0xf]  ;;  %v356_v55 = vld [vmem:[%s7487_s26 + $0x4] sm:$0xf]  ;;  %6537 = vmatpush3.bf16.msra.mxu0 %v7098_v56  ;;  %7057 = vmatpush3.bf16.msra.mxu1 %v7098_v56  ;;  %vm1562_vm11 = vcmask 1042432  }
  0x2b   : > { %vm7516_vm9 = vmand %vm711_vm0, %vm712_vm7  ;;  %v1031_v51 = vsel %vm7505_vm6, %v1026_v44, %v1030_v28  ;;  %v591_v52 = vor.u32 %v589_v37, %v588_v45  ;;  %v593_v53 = vrot.slane %v588_v45, 4  ;;  %v1041_v57 = vsel %vm7505_vm6, %v1036_v47, %v1040_v40  ;;  %v7105_v59 = vld [vmem:[%s8720_s3 + $0xf8] sm:$0xff]   ;;  %v714_v3 = vld [vmem:[#allocation2 + $0xc] sm:$0xf] }
  0x2c   : > { %vm7522_vm10 = vmor %vm387_vm4, %vm388_vm5  ;;  %1434 = vst [vmem:[#allocation3 + $0x4] sm:$0xf] %v1031_v51  ;;  %v794_v58 = vsel %vm7516_vm9, %v583_v49, %v793_v38  ;;  %v7106_v60 = vld [vmem:[%s8720_s3 + $0x178] sm:$0xff]   ;;  %v391_v61 = vshrl.u32 %v355_v54, 16  ;;  %v394_v62 = vshll.u32 %v355_v54, 16  ;;  %v399_v1 = vshrl.u32 %v356_v55, 16  ;;  %6634 = vmatprep.subr.bf16.mxu1 %v7105_v59 }
  0x2d   : > { %1435 = vst [vmem:[#allocation3 + $0x28] sm:$0xf] %v1041_v57  ;;  %v592_v63 = vsel %vm7522_vm10, %v584_v50, %v591_v52  ;;  %795 = vst [vmem:[#allocation2 + $0x90] sm:$0xf] %v794_v58  ;;  %v798_v0 = vsel %vm7511_vm8, %v593_v53, %v797_v43  ;;  %v402_v2 = vshll.u32 %v356_v55, 16  ;;  %6746 = vmatprep.subr.bf16.mxu0 %v7106_v60  ;;  %v7110_v14 = vld [vmem:[%s8720_s3 + $0x138] sm:$0xff]  }
  0x2e   : > { %796 = vst [vmem:[#allocation2 + $0x94] sm:$0xf] %v592_v63  ;;  %799 = vst [vmem:[#allocation2 + $0x98] sm:$0x1] %v798_v0  ;;  %v393_v4 = vrot.slane %v391_v61, 7  ;;  %v401_v6 = vrot.slane %v399_v1, 7 }
  0x2f   : > { %v720_v5 = vld [vmem:[#allocation2 + $0x14] sm:$0x1]  ;;  %v379_v11 = vld [vmem:[%s7487_s26 + $0x60] sm:$0xf]  ;;  %v380_v12 = vld [vmem:[%s7487_s26 + $0x64] sm:$0xf] }
  0x30   : > { %v396_v7 = vor.u32 %v394_v62, %v393_v4  ;;  %v397_v8 = vrot.slane %v393_v4, 4  ;;  %v404_v9 = vor.u32 %v402_v2, %v401_v6  ;;  %v406_v10 = vrot.slane %v401_v6, 4  ;;  %v800_v21 = vld [vmem:[#allocation2 + $0x9c] sm:$0xf]  ;;  %v7123_v22 = vld [vmem:[%s8720_s3 + $0x170] sm:$0xff]  }
  0x31   : > { %v595_v15 = vshrl.u32 %v379_v11, 16  ;;  %v598_v16 = vshll.u32 %v379_v11, 16  ;;  %v603_v17 = vshrl.u32 %v380_v12, 16  ;;  %v606_v20 = vshll.u32 %v380_v12, 16  ;;  %v7099_v23 = vld [vmem:[#allocation3] ss:$36 sps:$4 sm:$0xff]  }
  0x32   : > { %v715_v13 = vsel %vm7516_vm9, %v396_v7, %v714_v3  ;;  %v405_v18 = vsel %vm7522_vm10, %v397_v8, %v404_v9  ;;  %v721_v19 = vsel %vm7511_vm8, %v406_v10, %v720_v5  ;;  %v357_v44 = vld [vmem:[%s7487_s26 + $0x8] sm:$0xf]  ;;  %v7125_v45 = vld [vmem:[%s8720_s3 + $0x130] sm:$0xff]   ;;  %v804_v2 = vld [vmem:[#allocation2 + $0xa4] sm:$0x1]  ;;  %vm1563_vm12 = vcmask 1046532  }
  0x33   : > { %716 = vst [vmem:[#allocation2 + $0xc] sm:$0xf] %v715_v13  ;;  %717 = vst [vmem:[#allocation2 + $0x10] sm:$0xf] %v405_v18  ;;  %v597_v25 = vrot.slane %v595_v15, 7  ;;  %v605_v41 = vrot.slane %v603_v17, 7 }
  0x34   : > { %v7101_v24 = vld [vmem:[#allocation3 + $0x4] ss:$36 sps:$4 sm:$0xff]   ;;  %722 = vst [vmem:[#allocation2 + $0x14] sm:$0x1] %v721_v19  ;;  %v927_v26 = vld [vmem:[#allocation2 + $0x90] sm:$0xf]  ;;  %vm7703_vm13 = vmor %vm1562_vm11, %vm1563_vm12 }
  0x35   : > { %v928_v27 = vld [vmem:[#allocation2 + $0x94] sm:$0xf]  ;;  %v1003_v28 = vld [vmem:[#allocation2 + $0x90] sm:$0xf]  ;;  %4910 = vmatprep.mubr.bf16.mxu0 %v7101_v24  ;;  %959 = vst [vmem:[#allocation3 + $0x360] sm:$0xf] %v927_v26  ;;  %v600_v34 = vor.u32 %v598_v16, %v597_v25  ;;  %v608_v55 = vor.u32 %v606_v20, %v605_v41 }
  0x36   : > { %960 = vst [vmem:[#allocation3 + $0x384] sm:$0xf] %v928_v27  ;;  %v1004_v29 = vld [vmem:[#allocation2 + $0x94] sm:$0xf]  ;;  %v1005_v30 = vld [vmem:[#allocation2 + $0x98] sm:$0x1]  ;;  %4911 = vmatmul.mubr.bf16.vlgmr.msra.gmra.mxu0 %v7099_v23 }
  0x37   : > { %v1307_v31 = vshrl.u32 %v1003_v28, 16  ;;  %v1310_v32 = vshll.u32 %v1003_v28, 16  ;;  %v1316_v35 = vshll.u32 %v1004_v29, 16  ;;  %v1320_v36 = vshrl.u32 %v1004_v29, 16  ;;  %6747 = vmatpush3.bf16.msra.mxu0 %v7110_v14  ;;  %v358_v7 = vld [vmem:[%s7487_s26 + $0xc] sm:$0xf] }
  0x38   : > { %v1326_v37 = vshll.u32 %v1005_v30, 16  ;;  %v601_v38 = vrot.slane %v597_v25, 4  ;;  %v801_v43 = vsel %vm7516_vm9, %v600_v34, %v800_v21  ;;  %v408_v51 = vshrl.u32 %v357_v44, 16  ;;  %6748 = vmatprep.subr.bf16.mxu0 %v7123_v22  ;;  %v723_v16 = vld [vmem:[#allocation2 + $0x18] sm:$0xf] }
  0x39   : > { %v1309_v39 = vrot.slane %v1307_v31, 4  ;;  %v1312_v40 = vrot.slane %v1310_v32, 5  ;;  %v1318_v47 = vrot.slane %v1316_v35, 5  ;;  %v1322_v49 = vrot.slane %v1320_v36, 4  ;;  %802 = vst [vmem:[#allocation2 + $0x9c] sm:$0xf] %v801_v43 }
  0x3a   : > { %v1328_v50 = vrot.slane %v1326_v37, 5  ;;  %v905_v53 = vld [vmem:[#allocation2 + $0xc] sm:$0xf]  ;;  %v610_v56 = vrot.slane %v605_v41, 4  ;;  %v411_v57 = vshll.u32 %v357_v44, 16  ;;  %v609_v6 = vsel %vm7522_vm10, %v601_v38, %v608_v55  ;;  %v7109_v41 = vld [vmem:[%s8720_s3 + $0xb8] sm:$0xff]  }
  0x3b   : > { %v1313_v52 = vor.u32 %v1312_v40, %v1309_v39  ;;  %v970_v54 = vld [vmem:[#allocation2 + $0xc] sm:$0xf]  ;;  %v1323_v58 = vor.u32 %v1322_v49, %v1318_v47  ;;  %v906_v59 = vld [vmem:[#allocation2 + $0x10] sm:$0xf]  ;;  %937 = vst [vmem:[#allocation3 + $0x48] sm:$0xf] %v905_v53  ;;  %6749 = vmatpush3.bf16.msra.mxu0 %v7125_v45 }
  0x3c   : > { %v971_v60 = vld [vmem:[#allocation2 + $0x10] sm:$0xf]  ;;  %v972_v61 = vld [vmem:[#allocation2 + $0x14] sm:$0x1]  ;;  %938 = vst [vmem:[#allocation3 + $0x6c] sm:$0xf] %v906_v59  ;;  %v805_v15 = vsel %vm7511_vm8, %v610_v56, %v804_v2 }
  0x3d   : > { %v1314_v62 = vrot.slane %v1313_v52, 4  ;;  %v1043_v63 = vshrl.u32 %v970_v54, 16  ;;  %v1046_v0 = vshll.u32 %v970_v54, 16  ;;  %v1052_v1 = vshll.u32 %v971_v60, 16  ;;  %803 = vst [vmem:[#allocation2 + $0xa0] sm:$0xf] %v609_v6 }
  0x3e   : > { %v1324_v3 = vrot.slane %v1323_v58, 4  ;;  %v1056_v4 = vshrl.u32 %v971_v60, 16  ;;  %v1062_v5 = vshll.u32 %v972_v61, 16  ;;  %806 = vst [vmem:[#allocation2 + $0xa4] sm:$0x1] %v805_v15  ;;  %v410_v20 = vrot.slane %v408_v51, 7 }
  0x3f   : > { %v1319_v8 = vsel %vm7505_vm6, %v1314_v62, %v1318_v47  ;;  %v1045_v9 = vrot.slane %v1043_v63, 4  ;;  %v1048_v10 = vrot.slane %v1046_v0, 5  ;;  %v1054_v11 = vrot.slane %v1052_v1, 5  ;;  %v727_v26 = vld [vmem:[#allocation2 + $0x20] sm:$0x1]  ;;  %v7139_v39 = vld [vmem:[%s8720_s3 + $0x168] sm:$0xff]  }
  0x40   : > { %v1329_v12 = vsel %vm7505_vm6, %v1324_v3, %v1328_v50  ;;  %1458 = vst [vmem:[#allocation3 + $0x364] sm:$0xf] %v1319_v8  ;;  %v1058_v13 = vrot.slane %v1056_v4, 4  ;;  %v1064_v14 = vrot.slane %v1062_v5, 5  ;;  %v929_v18 = vld [vmem:[#allocation2 + $0x9c] sm:$0xf]  ;;  %v413_v28 = vor.u32 %v411_v57, %v410_v20  ;;  %6750 = vmatprep.subr.bf16.mxu0 %v7139_v39 }
  0x41   : > { %1459 = vst [vmem:[#allocation3 + $0x388] sm:$0xf] %v1329_v12  ;;  %v1049_v17 = vor.u32 %v1048_v10, %v1045_v9  ;;  %v1006_v19 = vld [vmem:[#allocation2 + $0x9c] sm:$0xf]  ;;  %v416_v21 = vshrl.u32 %v358_v7, 16  ;;  %v419_v25 = vshll.u32 %v358_v7, 16 }
  0x42   : > { %v1059_v22 = vor.u32 %v1058_v13, %v1054_v11  ;;  %961 = vst [vmem:[#allocation3 + $0x3a8] sm:$0xf] %v929_v18  ;;  %v1331_v23 = vshrl.u32 %v1006_v19, 16  ;;  %v1334_v24 = vshll.u32 %v1006_v19, 16  ;;  %v414_v29 = vrot.slane %v410_v20, 4  ;;  %v7112_v47 = vld [vmem:[%s8720_s3 + $0xf0] sm:$0xff]  }
  0x43   : > { %v1050_v27 = vrot.slane %v1049_v17, 4  ;;  %v418_v30 = vrot.slane %v416_v21, 7  ;;  %v724_v38 = vsel %vm7516_vm9, %v413_v28, %v723_v16  ;;  %v7102_v53 = vld [vmem:[#allocation3 + $0x360] ss:$36 sps:$4 sm:$0xff]   ;;  %v381_v59 = vld [vmem:[%s7487_s26 + $0x68] sm:$0xf] }
  0x44   : > { %v1060_v31 = vrot.slane %v1059_v22, 4  ;;  %v1333_v32 = vrot.slane %v1331_v23, 4  ;;  %v1336_v34 = vrot.slane %v1334_v24, 5  ;;  %v930_v43 = vld [vmem:[#allocation2 + $0xa0] sm:$0xf]  ;;  %v612_v62 = vshrl.u32 %v381_v59, 16 }
  0x45   : > { %v1055_v35 = vsel %vm7505_vm6, %v1050_v27, %v1054_v11  ;;  %v421_v36 = vor.u32 %v419_v25, %v418_v30  ;;  %v423_v37 = vrot.slane %v418_v30, 4  ;;  %v1007_v44 = vld [vmem:[#allocation2 + $0xa0] sm:$0xf]  ;;  %725 = vst [vmem:[#allocation2 + $0x18] sm:$0xf] %v724_v38  ;;  %v615_v63 = vshll.u32 %v381_v59, 16 }
  0x46   : > { %v1065_v40 = vsel %vm7505_vm6, %v1060_v31, %v1064_v14  ;;  %1436 = vst [vmem:[#allocation3 + $0x4c] sm:$0xf] %v1055_v35  ;;  %v1337_v45 = vor.u32 %v1336_v34, %v1333_v32  ;;  %962 = vst [vmem:[#allocation3 + $0x3cc] sm:$0xf] %v930_v43  ;;  %v1340_v49 = vshll.u32 %v1007_v44, 16  ;;  %v1344_v50 = vshrl.u32 %v1007_v44, 16 }
  0x47   : > { %1437 = vst [vmem:[#allocation3 + $0x70] sm:$0xf] %v1065_v40  ;;  %v422_v51 = vsel %vm7522_vm10, %v414_v29, %v421_v36  ;;  %v728_v52 = vsel %vm7511_vm8, %v423_v37, %v727_v26  ;;  %v1008_v56 = vld [vmem:[#allocation2 + $0xa4] sm:$0x1]  ;;  %v382_v61 = vld [vmem:[%s7487_s26 + $0x6c] sm:$0xf] }
  0x48   : > { %v7104_v54 = vld [vmem:[#allocation3 + $0x364] ss:$36 sps:$4 sm:$0xff]   ;;  %v1338_v55 = vrot.slane %v1337_v45, 4  ;;  %726 = vst [vmem:[#allocation2 + $0x1c] sm:$0xf] %v422_v51  ;;  %v1342_v57 = vrot.slane %v1340_v49, 5 }
  0x49   : > { %729 = vst [vmem:[#allocation2 + $0x20] sm:$0x1] %v728_v52  ;;  %v1346_v58 = vrot.slane %v1344_v50, 4  ;;  %5006 = vmatprep.mubr.bf16.mxu1 %v7104_v54  ;;  %v1350_v60 = vshll.u32 %v1008_v56, 16  ;;  %v7144_v0 = vld [vmem:[%s8720_s3 + $0x128] sm:$0xff]   ;;  %v7113_v1 = vld [vmem:[%s8720_s3 + $0xb0] sm:$0xff]  }
  0x4a   : > { %5007 = vmatmul.mubr.bf16.vlgmr.msra.gmra.mxu1 %v7102_v53  ;;  %v1343_v2 = vsel %vm7505_vm6, %v1338_v55, %v1342_v57  ;;  %v7116_v4 = vld [vmem:[%s8720_s3 + $0xe8] sm:$0xff]   ;;  %v620_v5 = vshrl.u32 %v382_v61, 16  ;;  %v623_v6 = vshll.u32 %v382_v61, 16  ;;  %v614_v8 = vrot.slane %v612_v62, 7  ;;  %6751 = vmatpush3.bf16.msra.mxu0 %v7144_v0  ;;  %v7111_v14 = vld [vmem:[#allocation3 + $0x48] ss:$36 sps:$4 sm:$0xff]  }
  0x4b   : > { %v1347_v3 = vor.u32 %v1346_v58, %v1342_v57  ;;  %6635 = vmatpush3.bf16.msra.mxu1 %v7109_v41  ;;  %v1352_v7 = vrot.slane %v1350_v60, 5  ;;  %1460 = vst [vmem:[#allocation3 + $0x3ac] sm:$0xf] %v1343_v2  ;;  %v807_v9 = vld [vmem:[#allocation2 + $0xa8] sm:$0xf]  ;;  %v7122_v28 = vld [vmem:[%s8720_s3 + $0xe0] sm:$0xff]  }
  0x4c   : > { %6636 = vmatprep.subr.bf16.mxu1 %v7112_v47  ;;  %v907_v11 = vld [vmem:[#allocation2 + $0x18] sm:$0xf]  ;;  %v7120_v16 = vld [vmem:[%s8720_s3 + $0xa8] sm:$0xff]   ;;  %v617_v17 = vor.u32 %v615_v63, %v614_v8  ;;  %v359_v26 = vld [vmem:[%s7487_s26 + $0x10] sm:$0xf]  ;;  %v618_v29 = vrot.slane %v614_v8, 4 }
  0x4d   : > { %v1348_v10 = vrot.slane %v1347_v3, 4  ;;  %v973_v12 = vld [vmem:[#allocation2 + $0x18] sm:$0xf]  ;;  %939 = vst [vmem:[#allocation3 + $0x90] sm:$0xf] %v907_v11  ;;  %v622_v30 = vrot.slane %v620_v5, 7 }
  0x4e   : > { %v7107_v13 = vld [vmem:[#allocation3 + $0x4c] ss:$36 sps:$4 sm:$0xff]   ;;  %v1067_v15 = vshrl.u32 %v973_v12, 16  ;;  %v1070_v23 = vshll.u32 %v973_v12, 16  ;;  %v808_v31 = vsel %vm7516_vm9, %v617_v17, %v807_v9  ;;  %v360_v32 = vld [vmem:[%s7487_s26 + $0x14] sm:$0xf] }
  0x4f   : > { %v1353_v18 = vsel %vm7505_vm6, %v1348_v10, %v1352_v7  ;;  %v908_v19 = vld [vmem:[#allocation2 + $0x1c] sm:$0xf]  ;;  %4918 = vmatprep.mubr.bf16.mxu0 %v7107_v13  ;;  %6637 = vmatpush3.bf16.msra.mxu1 %v7113_v1  ;;  %v7124_v37 = vld [vmem:[%s8720_s3 + $0xa0] sm:$0xff]   ;;  %809 = vst [vmem:[#allocation2 + $0xa8] sm:$0xf] %v808_v31  ;;  %v425_v39 = vshrl.u32 %v359_v26, 16  ;;  %v625_v41 = vor.u32 %v623_v6, %v622_v30 }
  0x50   : > { %v974_v20 = vld [vmem:[#allocation2 + $0x1c] sm:$0xf]  ;;  %v975_v21 = vld [vmem:[#allocation2 + $0x20] sm:$0x1]  ;;  %1461 = vst [vmem:[#allocation3 + $0x3d0] sm:$0xf] %v1353_v18  ;;  %4919 = vmatmul.mubr.bf16.gmra.mxu0 %v7111_v14  ;;  %6638 = vmatprep.subr.bf16.mxu1 %v7116_v4 }
  0x51   : > { %940 = vst [vmem:[#allocation3 + $0xb4] sm:$0xf] %v908_v19  ;;  %v1069_v22 = vrot.slane %v1067_v15, 4  ;;  %v1076_v24 = vshll.u32 %v974_v20, 16  ;;  %v1080_v25 = vshrl.u32 %v974_v20, 16  ;;  %v1086_v27 = vshll.u32 %v975_v21, 16 }
  0x52   : > { %v1072_v34 = vrot.slane %v1070_v23, 5  ;;  %v811_v38 = vld [vmem:[#allocation2 + $0xb0] sm:$0x1]  ;;  %v627_v43 = vrot.slane %v622_v30, 4  ;;  %v428_v44 = vshll.u32 %v359_v26, 16  ;;  %v427_v50 = vrot.slane %v425_v39, 7 }
  0x53   : > { %v1078_v35 = vrot.slane %v1076_v24, 5  ;;  %v1082_v36 = vrot.slane %v1080_v25, 4  ;;  %v1088_v40 = vrot.slane %v1086_v27, 5  ;;  %v730_v45 = vld [vmem:[#allocation2 + $0x24] sm:$0xf]  ;;  %6639 = vmatpush3.bf16.msra.mxu1 %v7120_v16  ;;  %v433_v51 = vshrl.u32 %v360_v32, 16 }
  0x54   : > { %v1073_v47 = vor.u32 %v1072_v34, %v1069_v22  ;;  %6640 = vmatprep.subr.bf16.mxu1 %v7122_v28  ;;  %v626_v52 = vsel %vm7522_vm10, %v618_v29, %v625_v41  ;;  %v812_v53 = vsel %vm7511_vm8, %v627_v43, %v811_v38  ;;  %v7128_v54 = vld [vmem:[%s8720_s3 + $0xd8] sm:$0xff]   ;;  %v436_v55 = vshll.u32 %v360_v32, 16  ;;  %v734_v60 = vld [vmem:[#allocation2 + $0x2c] sm:$0x1]  ;;  %v7119_v63 = vld [vmem:[#allocation3 + $0x3a8] ss:$36 sps:$4 sm:$0xff]  }
  0x55   : > { %v1083_v49 = vor.u32 %v1082_v36, %v1078_v35  ;;  %810 = vst [vmem:[#allocation2 + $0xac] sm:$0xf] %v626_v52  ;;  %813 = vst [vmem:[#allocation2 + $0xb0] sm:$0x1] %v812_v53  ;;  %v430_v58 = vor.u32 %v428_v44, %v427_v50  ;;  %v431_v59 = vrot.slane %v427_v50, 4  ;;  %v7132_v61 = vld [vmem:[%s8720_s3 + $0x98] sm:$0xff]  }
  0x56   : > { %v1074_v56 = vrot.slane %v1073_v47, 4  ;;  %v435_v0 = vrot.slane %v433_v51, 7  ;;  %v7134_v1 = vld [vmem:[%s8720_s3 + $0xd0] sm:$0xff]   ;;  %v931_v7 = vld [vmem:[#allocation2 + $0xa8] sm:$0xf]  ;;  %v7146_v44 = vld [vmem:[%s8720_s3 + $0xc0] sm:$0xff]  }
  0x57   : > { %v1084_v57 = vrot.slane %v1083_v49, 4  ;;  %v7114_v62 = vld [vmem:[#allocation3 + $0x3ac] ss:$36 sps:$4 sm:$0xff]   ;;  %6641 = vmatpush3.bf16.msra.mxu1 %v7124_v37  ;;  %v731_v4 = vsel %vm7516_vm9, %v430_v58, %v730_v45  ;;  %v383_v5 = vld [vmem:[%s7487_s26 + $0x70] sm:$0xf] }
  0x58   : > { %v1079_v2 = vsel %vm7505_vm6, %v1074_v56, %v1078_v35  ;;  %v384_v6 = vld [vmem:[%s7487_s26 + $0x74] sm:$0xf]  ;;  %5014 = vmatprep.mubr.bf16.mxu1 %v7114_v62  ;;  %v1009_v8 = vld [vmem:[#allocation2 + $0xa8] sm:$0xf]  ;;  %6642 = vmatprep.subr.bf16.mxu1 %v7128_v54  ;;  %v438_v9 = vor.u32 %v436_v55, %v435_v0  ;;  %v440_v10 = vrot.slane %v435_v0, 4  ;;  %v629_v11 = vshrl.u32 %v383_v5, 16 }
  0x59   : > { %v1089_v3 = vsel %vm7505_vm6, %v1084_v57, %v1088_v40  ;;  %1438 = vst [vmem:[#allocation3 + $0x94] sm:$0xf] %v1079_v2  ;;  %732 = vst [vmem:[#allocation2 + $0x24] sm:$0xf] %v731_v4  ;;  %5015 = vmatmul.mubr.bf16.gmra.mxu1 %v7119_v63  ;;  %v1355_v12 = vshrl.u32 %v1009_v8, 16  ;;  %v1358_v13 = vshll.u32 %v1009_v8, 16 }
  0x5a   : > { %1439 = vst [vmem:[#allocation3 + $0xb8] sm:$0xf] %v1089_v3  ;;  %963 = vst [vmem:[#allocation3 + $0x3f0] sm:$0xf] %v931_v7  ;;  %v7135_v14 = vld [vmem:[%s8720_s3 + $0x90] sm:$0xff]   ;;  %v632_v15 = vshll.u32 %v383_v5, 16  ;;  %v439_v17 = vsel %vm7522_vm10, %v431_v59, %v438_v9  ;;  %v735_v18 = vsel %vm7511_vm8, %v440_v10, %v734_v60 }
  0x5b   : > { %v637_v16 = vshrl.u32 %v384_v6, 16  ;;  %v631_v19 = vrot.slane %v629_v11, 7  ;;  %v640_v20 = vshll.u32 %v384_v6, 16  ;;  %v814_v21 = vld [vmem:[#allocation2 + $0xb4] sm:$0xf]  ;;  %v1357_v22 = vrot.slane %v1355_v12, 4  ;;  %6643 = vmatpush3.bf16.msra.mxu1 %v7132_v61 }
  0x5c   : > { %v1360_v23 = vrot.slane %v1358_v13, 5  ;;  %733 = vst [vmem:[#allocation2 + $0x28] sm:$0xf] %v439_v17  ;;  %736 = vst [vmem:[#allocation2 + $0x2c] sm:$0x1] %v735_v18  ;;  %v7138_v26 = vld [vmem:[%s8720_s3 + $0xc8] sm:$0xff]   ;;  %6644 = vmatprep.subr.bf16.mxu1 %v7134_v1 }
  0x5d   : > { %v639_v24 = vrot.slane %v637_v16, 7  ;;  %v818_v25 = vld [vmem:[#allocation2 + $0xbc] sm:$0x1]  ;;  %v932_v27 = vld [vmem:[#allocation2 + $0xac] sm:$0xf]  ;;  %v634_v30 = vor.u32 %v632_v15, %v631_v19  ;;  %v7156_v37 = vld [vmem:[%s8720_s3 + $0x160] sm:$0xff]  }
  0x5e   : > { %v1010_v28 = vld [vmem:[#allocation2 + $0xac] sm:$0xf]  ;;  %v1011_v29 = vld [vmem:[#allocation2 + $0xb0] sm:$0x1]  ;;  %964 = vst [vmem:[#allocation3 + $0x414] sm:$0xf] %v932_v27  ;;  %v1361_v31 = vor.u32 %v1360_v23, %v1357_v22  ;;  %6752 = vmatprep.subr.bf16.mxu0 %v7156_v37 }
  0x5f   : > { %v1364_v32 = vshll.u32 %v1010_v28, 16  ;;  %v1368_v34 = vshrl.u32 %v1010_v28, 16  ;;  %v1374_v35 = vshll.u32 %v1011_v29, 16  ;;  %v7143_v36 = vld [vmem:[%s8720_s3 + $0x88] sm:$0xff]   ;;  %v635_v38 = vrot.slane %v631_v19, 4  ;;  %6645 = vmatpush3.bf16.msra.mxu1 %v7135_v14  ;;  %v7147_v5 = vld [vmem:[%s8720_s3 + $0x80] sm:$0xff]  }
  0x60   : > { %v642_v39 = vor.u32 %v640_v20, %v639_v24  ;;  %v644_v40 = vrot.slane %v639_v24, 4  ;;  %v815_v41 = vsel %vm7516_vm9, %v634_v30, %v814_v21  ;;  %v361_v43 = vld [vmem:[%s7487_s26 + $0x18] sm:$0xf]  ;;  %v1362_v47 = vrot.slane %v1361_v31, 4  ;;  %v7121_v50 = vld [vmem:[#allocation3 + $0x90] ss:$36 sps:$4 sm:$0xff]   ;;  %6646 = vmatprep.subr.bf16.mxu1 %v7138_v26 }
  0x61   : > { %v7117_v45 = vld [vmem:[#allocation3 + $0x94] ss:$36 sps:$4 sm:$0xff]   ;;  %v1366_v49 = vrot.slane %v1364_v32, 5  ;;  %816 = vst [vmem:[#allocation2 + $0xb4] sm:$0xf] %v815_v41  ;;  %v1370_v51 = vrot.slane %v1368_v34, 4 }
  0x62   : > { %v1376_v52 = vrot.slane %v1374_v35, 5  ;;  %v909_v53 = vld [vmem:[#allocation2 + $0x24] sm:$0xf]  ;;  %v643_v54 = vsel %vm7522_vm10, %v635_v38, %v642_v39  ;;  %v819_v55 = vsel %vm7511_vm8, %v644_v40, %v818_v25  ;;  %4926 = vmatprep.mubr.bf16.mxu0 %v7117_v45  ;;  %v7673_v58 = vld [vmem:[%s7487_s26 + $0x1c] sm:$0xf]  ;;  %v442_v59 = vshrl.u32 %v361_v43, 16 }
  0x63   : > { %v1367_v56 = vsel %vm7505_vm6, %v1362_v47, %v1366_v49  ;;  %941 = vst [vmem:[#allocation3 + $0xd8] sm:$0xf] %v909_v53  ;;  %v976_v57 = vld [vmem:[#allocation2 + $0x24] sm:$0xf]  ;;  %817 = vst [vmem:[#allocation2 + $0xb8] sm:$0xf] %v643_v54  ;;  %4927 = vmatmul.mubr.bf16.gmra.mxu0 %v7121_v50  ;;  %v1371_v61 = vor.u32 %v1370_v51, %v1366_v49  ;;  %6647 = vmatpush3.bf16.msra.mxu1 %v7143_v36 }
  0x64   : > { %820 = vst [vmem:[#allocation2 + $0xbc] sm:$0x1] %v819_v55  ;;  %v445_v60 = vshll.u32 %v361_v43, 16  ;;  %1462 = vst [vmem:[#allocation3 + $0x3f4] sm:$0xf] %v1367_v56  ;;  %v1091_v1 = vshrl.u32 %v976_v57, 16  ;;  %6648 = vmatprep.subr.bf16.mxu1 %v7146_v44 }
  0x65   : > { %v910_v62 = vld [vmem:[#allocation2 + $0x28] sm:$0xf]  ;;  %v978_v0 = vld [vmem:[#allocation2 + $0x2c] sm:$0x1]  ;;  %v1094_v2 = vshll.u32 %v976_v57, 16  ;;  %v7151_v6 = vld [vmem:[%s8720_s3 + $0x1f8] sm:$0xff]  }
  0x66   : > { %v977_v63 = vld [vmem:[#allocation2 + $0x28] sm:$0xf]  ;;  %942 = vst [vmem:[#allocation3 + $0xfc] sm:$0xf] %v910_v62  ;;  %v1372_v7 = vrot.slane %v1371_v61, 4  ;;  %v1110_v8 = vshll.u32 %v978_v0, 16 }
  0x67   : > { %v1100_v3 = vshll.u32 %v977_v63, 16  ;;  %v1104_v4 = vshrl.u32 %v977_v63, 16  ;;  %v7681_v9 = vrot.slane %v442_v59, 7  ;;  %v450_v10 = vshrl.u32 %v7673_v58, 16  ;;  %v737_v11 = vld [vmem:[#allocation2 + $0x30] sm:$0xf]  ;;  %6649 = vmatpush3.bf16.msra.mxu1 %v7147_v5 }
  0x68   : > { %v1093_v12 = vrot.slane %v1091_v1, 4  ;;  %v1096_v13 = vrot.slane %v1094_v2, 5  ;;  %v1377_v16 = vsel %vm7505_vm6, %v1372_v7, %v1376_v52  ;;  %v1112_v17 = vrot.slane %v1110_v8, 5  ;;  %v933_v18 = vld [vmem:[#allocation2 + $0xb4] sm:$0xf]  ;;  %6858 = vmatprep.subr.bf16.mxu1 %v7151_v6  ;;  %v7157_v36 = vld [vmem:[%s8720_s3 + $0x120] sm:$0xff]  }
  0x69   : > { %v1102_v14 = vrot.slane %v1100_v3, 5  ;;  %v1106_v15 = vrot.slane %v1104_v4, 4  ;;  %v1012_v19 = vld [vmem:[#allocation2 + $0xb4] sm:$0xf]  ;;  %v447_v20 = vor.u32 %v445_v60, %v7681_v9  ;;  %v448_v21 = vrot.slane %v7681_v9, 4  ;;  %6753 = vmatpush3.bf16.msra.mxu0 %v7157_v36  ;;  %v7166_v47 = vld [vmem:[%s8720_s3 + $0x158] sm:$0xff]  }
  0x6a   : > { %1463 = vst [vmem:[#allocation3 + $0x418] sm:$0xf] %v1377_v16  ;;  %v1097_v22 = vor.u32 %v1096_v13, %v1093_v12  ;;  %965 = vst [vmem:[#allocation3 + $0x438] sm:$0xf] %v933_v18  ;;  %v1379_v24 = vshrl.u32 %v1012_v19, 16  ;;  %v1382_v25 = vshll.u32 %v1012_v19, 16  ;;  %6754 = vmatprep.subr.bf16.mxu0 %v7166_v47 }
  0x6b   : > { %v1107_v23 = vor.u32 %v1106_v15, %v1102_v14  ;;  %v934_v26 = vld [vmem:[#allocation2 + $0xb8] sm:$0xf]  ;;  %v1014_v28 = vld [vmem:[#allocation2 + $0xbc] sm:$0x1]  ;;  %v738_v29 = vsel %vm7516_vm9, %v447_v20, %v737_v11  ;;  %v452_v40 = vrot.slane %v450_v10, 7  ;;  %v453_v45 = vshll.u32 %v7673_v58, 16 }
  0x6c   : > { %v1013_v27 = vld [vmem:[#allocation2 + $0xb8] sm:$0xf]  ;;  %v1098_v30 = vrot.slane %v1097_v22, 4  ;;  %966 = vst [vmem:[#allocation3 + $0x45c] sm:$0xf] %v934_v26  ;;  %v1381_v32 = vrot.slane %v1379_v24, 4 }
  0x6d   : > { %v1108_v31 = vrot.slane %v1107_v23, 4  ;;  %v1384_v34 = vrot.slane %v1382_v25, 5  ;;  %739 = vst [vmem:[#allocation2 + $0x30] sm:$0xf] %v738_v29  ;;  %v741_v35 = vld [vmem:[#allocation2 + $0x38] sm:$0x1]  ;;  %v455_v54 = vor.u32 %v453_v45, %v452_v40 }
  0x6e   : > { %v1388_v37 = vshll.u32 %v1013_v27, 16  ;;  %v1392_v38 = vshrl.u32 %v1013_v27, 16  ;;  %v1398_v39 = vshll.u32 %v1014_v28, 16  ;;  %v1103_v41 = vsel %vm7505_vm6, %v1098_v30, %v1102_v14  ;;  %v1466_v55 = vld [vmem:[#allocation2] sm:$0xe]  ;;  %v7171_v11 = vld [vmem:[%s8720_s3 + $0x118] sm:$0xff]  }
  0x6f   : > { %v1113_v43 = vsel %vm7505_vm6, %v1108_v31, %v1112_v17  ;;  %v1385_v44 = vor.u32 %v1384_v34, %v1381_v32  ;;  %1440 = vst [vmem:[#allocation3 + $0xdc] sm:$0xf] %v1103_v41  ;;  %v457_v51 = vrot.slane %v452_v40, 4  ;;  %v7131_v58 = vld [vmem:[#allocation3 + $0x3f0] ss:$36 sps:$4 sm:$0xff]   ;;  %v6095_v61 = vrot.slane %v1466_v55, 9  ;;  %6755 = vmatpush3.bf16.msra.mxu0 %v7171_v11 }
  0x70   : > { %1441 = vst [vmem:[#allocation3 + $0x100] sm:$0xf] %v1113_v43  ;;  %v1390_v49 = vrot.slane %v1388_v37, 5  ;;  %v1394_v50 = vrot.slane %v1392_v38, 4  ;;  %v1400_v53 = vrot.slane %v1398_v39, 5  ;;  %v456_v63 = vsel %vm7522_vm10, %v448_v21, %v455_v54  ;;  %v7180_v25 = vld [vmem:[%s8720_s3 + $0x150] sm:$0xff]  }
  0x71   : > { %v1386_v52 = vrot.slane %v1385_v44, 4  ;;  %v7126_v57 = vld [vmem:[#allocation3 + $0x3f4] ss:$36 sps:$4 sm:$0xff]   ;;  %v742_v60 = vsel %vm7511_vm8, %v457_v51, %v741_v35  ;;  %v1467_v0 = vld [vmem:[#allocation2 + $0x4] sm:$0xf]  ;;  %6756 = vmatprep.subr.bf16.mxu0 %v7180_v25 }
  0x72   : > { %v1395_v59 = vor.u32 %v1394_v50, %v1390_v49  ;;  %743 = vst [vmem:[#allocation2 + $0x38] sm:$0x1] %v742_v60  ;;  %v1468_v1 = vld [vmem:[#allocation2 + $0x8] sm:$0x1]  ;;  %v1741_v2 = vld [vmem:[#allocation2 + $0xc] sm:$0xf]  ;;  %5022 = vmatprep.mubr.bf16.mxu1 %v7126_v57 }
  0x73   : > { %v1391_v62 = vsel %vm7505_vm6, %v1386_v52, %v1390_v49  ;;  %740 = vst [vmem:[#allocation2 + $0x34] sm:$0xf] %v456_v63  ;;  %v1567_v6 = vrot.slane %v1467_v0, 5  ;;  %1773 = vst [vmem:[#allocation3 + $0xc] sm:$0xf] %v1741_v2  ;;  %5023 = vmatmul.mubr.bf16.gmra.mxu1 %v7131_v58  ;;  %v1570_v9 = vrot.slane %v1468_v1, 5 }
  0x74   : > { %v1396_v3 = vrot.slane %v1395_v59, 4  ;;  %1464 = vst [vmem:[#allocation3 + $0x43c] sm:$0xf] %v1391_v62  ;;  %v911_v4 = vld [vmem:[#allocation2 + $0x30] sm:$0xf]  ;;  %v7192_v63 = vld [vmem:[%s8720_s3 + $0x148] sm:$0xff]  }
  0x75   : > { %v979_v5 = vld [vmem:[#allocation2 + $0x30] sm:$0xf]  ;;  %943 = vst [vmem:[#allocation3 + $0x120] sm:$0xf] %v911_v4  ;;  %v1568_v13 = vsel %vm7703_vm13, %v6095_v61, %v1567_v6  ;;  %v1569_v14 = vrot.slane %v1567_v6, 4 }
  0x76   : > { %v1115_v7 = vshrl.u32 %v979_v5, 16  ;;  %v1118_v8 = vshll.u32 %v979_v5, 16  ;;  %v1742_v10 = vld [vmem:[#allocation2 + $0x10] sm:$0xf]  ;;  %v1401_v12 = vsel %vm7505_vm6, %v1396_v3, %v1400_v53  ;;  %1709 = vst [vmem:[#allocation3 + $0x8] sm:$0xf] %v1568_v13 }
  0x77   : > { %1774 = vst [vmem:[#allocation3 + $0x30] sm:$0xf] %v1742_v10  ;;  %v7129_v15 = vld [vmem:[#allocation3 + $0xdc] ss:$36 sps:$4 sm:$0xff]   ;;  %1465 = vst [vmem:[#allocation3 + $0x460] sm:$0xf] %v1401_v12  ;;  %v1571_v19 = vsel %vm7703_vm13, %v1569_v14, %v1570_v9 }
  0x78   : > { %v1117_v16 = vrot.slane %v1115_v7, 4  ;;  %v1120_v17 = vrot.slane %v1118_v8, 5  ;;  %v7133_v18 = vld [vmem:[#allocation3 + $0xd8] ss:$36 sps:$4 sm:$0xff]   ;;  %v363_v20 = vld [vmem:[%s7487_s26 + $0x20] sm:$0xf]  ;;  %4934 = vmatprep.mubr.bf16.mxu0 %v7129_v15 }
  0x79   : > { %v364_v21 = vld [vmem:[%s7487_s26 + $0x24] sm:$0xf]  ;;  %1710 = vst [vmem:[#allocation3 + $0x2c] sm:$0xf] %v1571_v19  ;;  %v459_v23 = vshrl.u32 %v363_v20, 16  ;;  %4935 = vmatmul.mubr.bf16.gmra.mxu0 %v7133_v18  ;;  %v462_v27 = vshll.u32 %v363_v20, 16 }
  0x7a   : > { %v1121_v22 = vor.u32 %v1120_v17, %v1117_v16  ;;  %v467_v24 = vshrl.u32 %v364_v21, 16  ;;  %v981_v26 = vld [vmem:[#allocation2 + $0x38] sm:$0x1]  ;;  %v470_v28 = vshll.u32 %v364_v21, 16  ;;  %v7181_v29 = vld [vmem:[%s8720_s3 + $0x110] sm:$0xff]   ;;  %v7196_v9 = vld [vmem:[%s8720_s3 + $0x108] sm:$0xff]  }
  0x7b   : > { %v912_v30 = vld [vmem:[#allocation2 + $0x34] sm:$0xf]  ;;  %v744_v34 = vld [vmem:[#allocation2 + $0x3c] sm:$0xf]  ;;  %v1134_v37 = vshll.u32 %v981_v26, 16  ;;  %v461_v38 = vrot.slane %v459_v23, 7  ;;  %6757 = vmatpush3.bf16.msra.mxu0 %v7181_v29 }
  0x7c   : > { %v980_v31 = vld [vmem:[#allocation2 + $0x34] sm:$0xf]  ;;  %v1122_v32 = vrot.slane %v1121_v22, 4  ;;  %944 = vst [vmem:[#allocation3 + $0x144] sm:$0xf] %v912_v30  ;;  %v469_v40 = vrot.slane %v467_v24, 7  ;;  %6758 = vmatprep.subr.bf16.mxu0 %v7192_v63 }
  0x7d   : > { %v1124_v35 = vshll.u32 %v980_v31, 16  ;;  %v1128_v36 = vshrl.u32 %v980_v31, 16  ;;  %v748_v39 = vld [vmem:[#allocation2 + $0x44] sm:$0x1]  ;;  %v464_v45 = vor.u32 %v462_v27, %v461_v38  ;;  %v7142_v47 = vld [vmem:[#allocation3 + $0x438] ss:$36 sps:$4 sm:$0xff]  }
  0x7e   : > { %v7136_v41 = vld [vmem:[#allocation3 + $0x43c] ss:$36 sps:$4 sm:$0xff]   ;;  %v465_v49 = vrot.slane %v461_v38, 4  ;;  %v472_v50 = vor.u32 %v470_v28, %v469_v40  ;;  %v474_v51 = vrot.slane %v469_v40, 4  ;;  %v1136_v54 = vrot.slane %v1134_v37, 5 }
  0x7f   : > { %v1126_v43 = vrot.slane %v1124_v35, 5  ;;  %v1130_v44 = vrot.slane %v1128_v36, 4  ;;  %5030 = vmatprep.mubr.bf16.mxu1 %v7136_v41  ;;  %v7150_v55 = vld [vmem:[#allocation3 + $0xc] ss:$36 sps:$4 sm:$0xff]   ;;  %v745_v57 = vsel %vm7516_vm9, %v464_v45, %v744_v34  ;;  %v1469_v61 = vld [vmem:[#allocation2 + $0xc] sm:$0xe]  ;;  %6759 = vmatpush3.bf16.msra.mxu0 %v7196_v9 }
  0x80   : > { %5031 = vmatmul.mubr.bf16.gmra.mxu1 %v7142_v47  ;;  %v473_v58 = vsel %vm7522_vm10, %v465_v49, %v472_v50  ;;  %746 = vst [vmem:[#allocation2 + $0x3c] sm:$0xf] %v745_v57  ;;  %v749_v59 = vsel %vm7511_vm8, %v474_v51, %v748_v39  ;;  %v1470_v62 = vld [vmem:[#allocation2 + $0x10] sm:$0xf]  ;;  %v7148_v0 = vld [vmem:[#allocation3 + $0x8] ss:$36 sps:$4 sm:$0xff]  }
  0x81   : > { %v1127_v52 = vsel %vm7505_vm6, %v1122_v32, %v1126_v43  ;;  %v1131_v53 = vor.u32 %v1130_v44, %v1126_v43  ;;  %5071 = vmatprep.mubr.bf16.mxu1 %v7150_v55  ;;  %747 = vst [vmem:[#allocation2 + $0x40] sm:$0xf] %v473_v58  ;;  %750 = vst [vmem:[#allocation2 + $0x44] sm:$0x1] %v749_v59  ;;  %v1471_v1 = vld [vmem:[#allocation2 + $0x14] sm:$0x1] }
  0x82   : > { %1442 = vst [vmem:[#allocation3 + $0x124] sm:$0xf] %v1127_v52  ;;  %v6096_v2 = vrot.slane %v1469_v61, 9  ;;  %v1574_v3 = vrot.slane %v1470_v62, 5  ;;  %v1743_v4 = vld [vmem:[#allocation2 + $0x18] sm:$0xf] }
  0x83   : > { %v1132_v60 = vrot.slane %v1131_v53, 4  ;;  %v1577_v6 = vrot.slane %v1471_v1, 5  ;;  %v1744_v7 = vld [vmem:[#allocation2 + $0x1c] sm:$0xf]  ;;  %1775 = vst [vmem:[#allocation3 + $0x54] sm:$0xf] %v1743_v4 }
  0x84   : > { %v365_v8 = vld [vmem:[%s7487_s26 + $0x28] sm:$0xf]  ;;  %v1575_v10 = vsel %vm7703_vm13, %v6096_v2, %v1574_v3  ;;  %v1576_v11 = vrot.slane %v1574_v3, 4  ;;  %1776 = vst [vmem:[#allocation3 + $0x78] sm:$0xf] %v1744_v7  ;;  %v7154_v15 = vld [vmem:[%s8720_s3 + $0x1b8] sm:$0xff]  }
  0x85   : > { %v1137_v5 = vsel %vm7505_vm6, %v1132_v60, %v1136_v54  ;;  %v366_v12 = vld [vmem:[%s7487_s26 + $0x2c] sm:$0xf]  ;;  %v476_v13 = vshrl.u32 %v365_v8, 16  ;;  %v479_v14 = vshll.u32 %v365_v8, 16  ;;  %1711 = vst [vmem:[#allocation3 + $0x50] sm:$0xf] %v1575_v10 }
  0x86   : > { %1443 = vst [vmem:[#allocation3 + $0x148] sm:$0xf] %v1137_v5  ;;  %v484_v16 = vshrl.u32 %v366_v12, 16  ;;  %v1578_v17 = vsel %vm7703_vm13, %v1576_v11, %v1577_v6  ;;  %v487_v19 = vshll.u32 %v366_v12, 16  ;;  %v751_v20 = vld [vmem:[#allocation2 + $0x48] sm:$0xf] }
  0x87   : > { %v478_v18 = vrot.slane %v476_v13, 7  ;;  %v7167_v21 = vld [vmem:[%s8720_s3 + $0x1f0] sm:$0xff]   ;;  %v913_v22 = vld [vmem:[#allocation2 + $0x3c] sm:$0xf]  ;;  %1712 = vst [vmem:[#allocation3 + $0x74] sm:$0xf] %v1578_v17 }
  0x88   : > { %v982_v23 = vld [vmem:[#allocation2 + $0x3c] sm:$0xf]  ;;  %v486_v24 = vrot.slane %v484_v16, 7  ;;  %v7172_v25 = vld [vmem:[%s8720_s3 + $0x1b0] sm:$0xff]   ;;  %v914_v26 = vld [vmem:[#allocation2 + $0x40] sm:$0xf]  ;;  %5072 = vmatmul.mubr.bf16.vlgmr.msra.gmra.mxu1 %v7148_v0 }
  0x89   : > { %945 = vst [vmem:[#allocation3 + $0x168] sm:$0xf] %v913_v22  ;;  %v983_v27 = vld [vmem:[#allocation2 + $0x40] sm:$0xf]  ;;  %v984_v28 = vld [vmem:[#allocation2 + $0x44] sm:$0x1]  ;;  %v481_v29 = vor.u32 %v479_v14, %v478_v18  ;;  %6859 = vmatpush3.bf16.msra.mxu1 %v7154_v15 }
  0x8a   : > { %v755_v30 = vld [vmem:[#allocation2 + $0x50] sm:$0x1]  ;;  %v1472_v31 = vld [vmem:[#allocation2 + $0x18] sm:$0xe]  ;;  %v1473_v32 = vld [vmem:[#allocation2 + $0x1c] sm:$0xf]  ;;  %v489_v43 = vor.u32 %v487_v19, %v486_v24  ;;  %6860 = vmatprep.subr.bf16.mxu1 %v7167_v21 }
  0x8b   : > { %v7184_v34 = vld [vmem:[%s8720_s3 + $0x1e8] sm:$0xff]   ;;  %946 = vst [vmem:[#allocation3 + $0x18c] sm:$0xf] %v914_v26  ;;  %v1139_v35 = vshrl.u32 %v982_v23, 16  ;;  %v1142_v36 = vshll.u32 %v982_v23, 16  ;;  %v1148_v37 = vshll.u32 %v983_v27, 16  ;;  %v752_v52 = vsel %vm7516_vm9, %v481_v29, %v751_v20 }
  0x8c   : > { %v1152_v38 = vshrl.u32 %v983_v27, 16  ;;  %v1474_v39 = vld [vmem:[#allocation2 + $0x20] sm:$0x1]  ;;  %v1158_v40 = vshll.u32 %v984_v28, 16  ;;  %v482_v41 = vrot.slane %v478_v18, 4  ;;  %v491_v44 = vrot.slane %v486_v24, 4 }
  0x8d   : > { %v1745_v45 = vld [vmem:[#allocation2 + $0x24] sm:$0xf]  ;;  %v7140_v49 = vld [vmem:[#allocation3 + $0x124] ss:$36 sps:$4 sm:$0xff]   ;;  %v1141_v51 = vrot.slane %v1139_v35, 4  ;;  %v1144_v53 = vrot.slane %v1142_v36, 5  ;;  %6861 = vmatpush3.bf16.msra.mxu1 %v7172_v25 }
  0x8e   : > { %v7206_v47 = vld [vmem:[%s8720_s3 + $0x140] sm:$0xff]   ;;  %v7145_v50 = vld [vmem:[#allocation3 + $0x120] ss:$36 sps:$4 sm:$0xff]   ;;  %1777 = vst [vmem:[#allocation3 + $0x9c] sm:$0xf] %v1745_v45  ;;  %v1150_v54 = vrot.slane %v1148_v37, 5  ;;  %4942 = vmatprep.mubr.bf16.mxu0 %v7140_v49  ;;  %v490_v60 = vsel %vm7522_vm10, %v482_v41, %v489_v43  ;;  %v756_v61 = vsel %vm7511_vm8, %v491_v44, %v755_v30  ;;  %6862 = vmatprep.subr.bf16.mxu1 %v7184_v34 }
  0x8f   : > { %v1154_v55 = vrot.slane %v1152_v38, 4  ;;  %v1160_v57 = vrot.slane %v1158_v40, 5  ;;  %753 = vst [vmem:[#allocation2 + $0x48] sm:$0xf] %v752_v52  ;;  %v7188_v58 = vld [vmem:[%s8720_s3 + $0x1a8] sm:$0xff]   ;;  %6760 = vmatprep.subr.bf16.mxu0 %v7206_v47  ;;  %v7207_v59 = vld [vmem:[%s8720_s3 + $0x100] sm:$0xff]   ;;  %4943 = vmatmul.mubr.bf16.gmra.mxu0 %v7145_v50  ;;  %v1145_v1 = vor.u32 %v1144_v53, %v1141_v51 }
  0x90   : > { %v6097_v62 = vrot.slane %v1472_v31, 9  ;;  %v1581_v63 = vrot.slane %v1473_v32, 5  ;;  %v1746_v0 = vld [vmem:[#allocation2 + $0x28] sm:$0xf]  ;;  %v7158_v3 = vld [vmem:[#allocation3 + $0x54] ss:$36 sps:$4 sm:$0xff]   ;;  %6761 = vmatpush3.bf16.msra.mxu0 %v7207_v59 }
  0x91   : > { %v1155_v2 = vor.u32 %v1154_v55, %v1150_v54  ;;  %754 = vst [vmem:[#allocation2 + $0x4c] sm:$0xf] %v490_v60  ;;  %757 = vst [vmem:[#allocation2 + $0x50] sm:$0x1] %v756_v61  ;;  %v7162_v4 = vld [vmem:[#allocation3 + $0x50] ss:$36 sps:$4 sm:$0xff]   ;;  %5079 = vmatprep.mubr.bf16.mxu1 %v7158_v3  ;;  %6863 = vmatpush3.bf16.msra.mxu1 %v7188_v58 }
  0x92   : > { %v1584_v5 = vrot.slane %v1474_v39, 5  ;;  %1778 = vst [vmem:[#allocation3 + $0xc0] sm:$0xf] %v1746_v0  ;;  %v1582_v6 = vsel %vm7703_vm13, %v6097_v62, %v1581_v63  ;;  %v1583_v7 = vrot.slane %v1581_v63, 4  ;;  %v7200_v8 = vld [vmem:[%s8720_s3 + $0x1e0] sm:$0xff]   ;;  %v1146_v9 = vrot.slane %v1145_v1, 4  ;;  %5080 = vmatmul.mubr.bf16.gmra.mxu1 %v7162_v4 }
  0x93   : > { %v1156_v10 = vrot.slane %v1155_v2, 4  ;;  %1713 = vst [vmem:[#allocation3 + $0x98] sm:$0xf] %v1582_v6  ;;  %v367_v11 = vld [vmem:[%s7487_s26 + $0x30] sm:$0xf]  ;;  %v7204_v20 = vld [vmem:[%s8720_s3 + $0x1a0] sm:$0xff]   ;;  %6864 = vmatprep.subr.bf16.mxu1 %v7200_v8 }
  0x94   : > { %v1585_v12 = vsel %vm7703_vm13, %v1583_v7, %v1584_v5  ;;  %v368_v13 = vld [vmem:[%s7487_s26 + $0x34] sm:$0xf]  ;;  %v493_v14 = vshrl.u32 %v367_v11, 16  ;;  %v496_v15 = vshll.u32 %v367_v11, 16  ;;  %v1151_v16 = vsel %vm7505_vm6, %v1146_v9, %v1150_v54  ;;  %v7216_v21 = vld [vmem:[%s8720_s3 + $0x1d8] sm:$0xff]  }
  0x95   : > { %v1161_v17 = vsel %vm7505_vm6, %v1156_v10, %v1160_v57  ;;  %1714 = vst [vmem:[#allocation3 + $0xbc] sm:$0xf] %v1585_v12  ;;  %v501_v18 = vshrl.u32 %v368_v13, 16  ;;  %v504_v19 = vshll.u32 %v368_v13, 16  ;;  %1444 = vst [vmem:[#allocation3 + $0x16c] sm:$0xf] %v1151_v16  ;;  %6865 = vmatpush3.bf16.msra.mxu1 %v7204_v20 }
  0x96   : > { %1445 = vst [vmem:[#allocation3 + $0x190] sm:$0xf] %v1161_v17  ;;  %v915_v22 = vld [vmem:[#allocation2 + $0x48] sm:$0xf]  ;;  %v495_v24 = vrot.slane %v493_v14, 7  ;;  %v7217_v26 = vld [vmem:[%s8720_s3 + $0x238] sm:$0xff]   ;;  %6866 = vmatprep.subr.bf16.mxu1 %v7216_v21 }
  0x97   : > { %v985_v23 = vld [vmem:[#allocation2 + $0x48] sm:$0xf]  ;;  %v758_v25 = vld [vmem:[#allocation2 + $0x54] sm:$0xf]  ;;  %947 = vst [vmem:[#allocation3 + $0x1b0] sm:$0xf] %v915_v22  ;;  %6994 = vmatprep.subr.bf16.mxu0 %v7217_v26 }
  0x98   : > { %v1163_v27 = vshrl.u32 %v985_v23, 16  ;;  %v1166_v28 = vshll.u32 %v985_v23, 16  ;;  %v503_v29 = vrot.slane %v501_v18, 7  ;;  %v762_v30 = vld [vmem:[#allocation2 + $0x5c] sm:$0x1]  ;;  %v498_v36 = vor.u32 %v496_v15, %v495_v24  ;;  %v7231_v3 = vld [vmem:[%s8720_s3 + $0x1d0] sm:$0xff]  }
  0x99   : > { %v7221_v31 = vld [vmem:[%s8720_s3 + $0x198] sm:$0xff]   ;;  %v916_v32 = vld [vmem:[#allocation2 + $0x4c] sm:$0xf]  ;;  %v987_v35 = vld [vmem:[#allocation2 + $0x50] sm:$0x1]  ;;  %v499_v43 = vrot.slane %v495_v24, 4 }
  0x9a   : > { %v986_v34 = vld [vmem:[#allocation2 + $0x4c] sm:$0xf]  ;;  %948 = vst [vmem:[#allocation3 + $0x1d4] sm:$0xf] %v916_v32  ;;  %v1165_v37 = vrot.slane %v1163_v27, 4  ;;  %v1168_v38 = vrot.slane %v1166_v28, 5  ;;  %v506_v44 = vor.u32 %v504_v19, %v503_v29  ;;  %v759_v51 = vsel %vm7516_vm9, %v498_v36, %v758_v25  ;;  %6867 = vmatpush3.bf16.msra.mxu1 %v7221_v31 }
  0x9b   : > { %v1172_v39 = vshll.u32 %v986_v34, 16  ;;  %v1176_v40 = vshrl.u32 %v986_v34, 16  ;;  %v1182_v41 = vshll.u32 %v987_v35, 16  ;;  %v508_v45 = vrot.slane %v503_v29, 4  ;;  %v1475_v52 = vld [vmem:[#allocation2 + $0x24] sm:$0xe]  ;;  %6868 = vmatprep.subr.bf16.mxu1 %v7231_v3 }
  0x9c   : > { %v1169_v47 = vor.u32 %v1168_v38, %v1165_v37  ;;  %v1476_v53 = vld [vmem:[#allocation2 + $0x28] sm:$0xf]  ;;  %v7164_v55 = vld [vmem:[#allocation3 + $0x9c] ss:$36 sps:$4 sm:$0xff]   ;;  %v507_v57 = vsel %vm7522_vm10, %v499_v43, %v506_v44  ;;  %760 = vst [vmem:[#allocation2 + $0x54] sm:$0xf] %v759_v51 }
  0x9d   : > { %v1174_v49 = vrot.slane %v1172_v39, 5  ;;  %v1178_v50 = vrot.slane %v1176_v40, 4  ;;  %v1184_v54 = vrot.slane %v1182_v41, 5  ;;  %v763_v58 = vsel %vm7511_vm8, %v508_v45, %v762_v30  ;;  %v7170_v59 = vld [vmem:[#allocation3 + $0x98] ss:$36 sps:$4 sm:$0xff]   ;;  %5087 = vmatprep.mubr.bf16.mxu1 %v7164_v55  ;;  %v7246_v20 = vld [vmem:[%s8720_s3 + $0x1c8] sm:$0xff]  }
  0x9e   : > { %v7152_v60 = vld [vmem:[#allocation3 + $0x16c] ss:$36 sps:$4 sm:$0xff]   ;;  %v1170_v61 = vrot.slane %v1169_v47, 4  ;;  %761 = vst [vmem:[#allocation2 + $0x58] sm:$0xf] %v507_v57  ;;  %v6098_v63 = vrot.slane %v1475_v52, 9  ;;  %5088 = vmatmul.mubr.bf16.gmra.mxu1 %v7170_v59 }
  0x9f   : > { %v1179_v62 = vor.u32 %v1178_v50, %v1174_v49  ;;  %764 = vst [vmem:[#allocation2 + $0x5c] sm:$0x1] %v763_v58  ;;  %v7155_v0 = vld [vmem:[#allocation3 + $0x168] ss:$36 sps:$4 sm:$0xff]   ;;  %v1477_v1 = vld [vmem:[#allocation2 + $0x2c] sm:$0x1]  ;;  %4950 = vmatprep.mubr.bf16.mxu0 %v7152_v60 }
  0xa0   : > { %v1588_v2 = vrot.slane %v1476_v53, 5  ;;  %v1175_v4 = vsel %vm7505_vm6, %v1170_v61, %v1174_v49  ;;  %v1591_v6 = vrot.slane %v1477_v1, 5  ;;  %v1747_v7 = vld [vmem:[#allocation2 + $0x30] sm:$0xf]  ;;  %v1748_v8 = vld [vmem:[#allocation2 + $0x34] sm:$0xf]  ;;  %4951 = vmatmul.mubr.bf16.gmra.mxu0 %v7155_v0 }
  0xa1   : > { %v1180_v5 = vrot.slane %v1179_v62, 4  ;;  %1446 = vst [vmem:[#allocation3 + $0x1b4] sm:$0xf] %v1175_v4  ;;  %1779 = vst [vmem:[#allocation3 + $0xe4] sm:$0xf] %v1747_v7  ;;  %v7236_v16 = vld [vmem:[%s8720_s3 + $0x190] sm:$0xff]  }
  0xa2   : > { %v1589_v9 = vsel %vm7703_vm13, %v6098_v63, %v1588_v2  ;;  %v1590_v10 = vrot.slane %v1588_v2, 4  ;;  %1780 = vst [vmem:[#allocation3 + $0x108] sm:$0xf] %v1748_v8  ;;  %v369_v11 = vld [vmem:[%s7487_s26 + $0x38] sm:$0xf]  ;;  %6869 = vmatpush3.bf16.msra.mxu1 %v7236_v16  ;;  %v7251_v50 = vld [vmem:[%s8720_s3 + $0x188] sm:$0xff]  }
  0xa3   : > { %v370_v12 = vld [vmem:[%s7487_s26 + $0x3c] sm:$0xf]  ;;  %v1185_v13 = vsel %vm7505_vm6, %v1180_v5, %v1184_v54  ;;  %1715 = vst [vmem:[#allocation3 + $0xe0] sm:$0xf] %v1589_v9  ;;  %v510_v14 = vshrl.u32 %v369_v11, 16  ;;  %v513_v18 = vshll.u32 %v369_v11, 16  ;;  %6870 = vmatprep.subr.bf16.mxu1 %v7246_v20 }
  0xa4   : > { %v518_v15 = vshrl.u32 %v370_v12, 16  ;;  %1447 = vst [vmem:[#allocation3 + $0x1d8] sm:$0xf] %v1185_v13  ;;  %v1592_v17 = vsel %vm7703_vm13, %v1590_v10, %v1591_v6  ;;  %v521_v19 = vshll.u32 %v370_v12, 16  ;;  %v917_v21 = vld [vmem:[#allocation2 + $0x54] sm:$0xf] }
  0xa5   : > { %v988_v22 = vld [vmem:[#allocation2 + $0x54] sm:$0xf]  ;;  %1716 = vst [vmem:[#allocation3 + $0x104] sm:$0xf] %v1592_v17  ;;  %v512_v23 = vrot.slane %v510_v14, 7  ;;  %v7261_v12 = vld [vmem:[%s8720_s3 + $0x1c0] sm:$0xff]  }
  0xa6   : > { %v520_v24 = vrot.slane %v518_v15, 7  ;;  %v765_v25 = vld [vmem:[#allocation2 + $0x60] sm:$0xf]  ;;  %v918_v26 = vld [vmem:[#allocation2 + $0x58] sm:$0xf]  ;;  %v1187_v29 = vshrl.u32 %v988_v22, 16  ;;  %6871 = vmatpush3.bf16.msra.mxu1 %v7251_v50 }
  0xa7   : > { %949 = vst [vmem:[#allocation3 + $0x1f8] sm:$0xf] %v917_v21  ;;  %v989_v27 = vld [vmem:[#allocation2 + $0x58] sm:$0xf]  ;;  %v990_v28 = vld [vmem:[#allocation2 + $0x5c] sm:$0x1]  ;;  %v515_v36 = vor.u32 %v513_v18, %v512_v23  ;;  %6872 = vmatprep.subr.bf16.mxu1 %v7261_v12 }
  0xa8   : > { %950 = vst [vmem:[#allocation3 + $0x21c] sm:$0xf] %v918_v26  ;;  %v1190_v30 = vshll.u32 %v988_v22, 16  ;;  %v1196_v31 = vshll.u32 %v989_v27, 16  ;;  %v1200_v32 = vshrl.u32 %v989_v27, 16  ;;  %v1206_v35 = vshll.u32 %v990_v28, 16 }
  0xa9   : > { %v769_v34 = vld [vmem:[#allocation2 + $0x68] sm:$0x1]  ;;  %v516_v37 = vrot.slane %v512_v23, 4  ;;  %v523_v38 = vor.u32 %v521_v19, %v520_v24  ;;  %v1189_v39 = vrot.slane %v1187_v29, 4  ;;  %v525_v45 = vrot.slane %v520_v24, 4 }
  0xaa   : > { %v1192_v40 = vrot.slane %v1190_v30, 5  ;;  %v1198_v41 = vrot.slane %v1196_v31, 5  ;;  %v1202_v43 = vrot.slane %v1200_v32, 4  ;;  %v766_v47 = vsel %vm7516_vm9, %v515_v36, %v765_v25  ;;  %v1478_v49 = vld [vmem:[#allocation2 + $0x30] sm:$0xe] }
  0xab   : > { %v524_v44 = vsel %vm7522_vm10, %v516_v37, %v523_v38  ;;  %v7160_v51 = vld [vmem:[#allocation3 + $0x1b4] ss:$36 sps:$4 sm:$0xff]   ;;  %v1208_v55 = vrot.slane %v1206_v35, 5  ;;  %767 = vst [vmem:[#allocation2 + $0x60] sm:$0xf] %v766_v47  ;;  %v770_v58 = vsel %vm7511_vm8, %v525_v45, %v769_v34  ;;  %v6099_v60 = vrot.slane %v1478_v49, 9 }
  0xac   : > { %v7163_v52 = vld [vmem:[#allocation3 + $0x1b0] ss:$36 sps:$4 sm:$0xff]   ;;  %v1193_v53 = vor.u32 %v1192_v40, %v1189_v39  ;;  %v1203_v54 = vor.u32 %v1202_v43, %v1198_v41  ;;  %768 = vst [vmem:[#allocation2 + $0x64] sm:$0xf] %v524_v44  ;;  %v7174_v57 = vld [vmem:[#allocation3 + $0xe4] ss:$36 sps:$4 sm:$0xff]   ;;  %4958 = vmatprep.mubr.bf16.mxu0 %v7160_v51 }
  0xad   : > { %v7178_v59 = vld [vmem:[#allocation3 + $0xe0] ss:$36 sps:$4 sm:$0xff]   ;;  %771 = vst [vmem:[#allocation2 + $0x68] sm:$0x1] %v770_v58  ;;  %v1479_v63 = vld [vmem:[#allocation2 + $0x34] sm:$0xf]  ;;  %4959 = vmatmul.mubr.bf16.gmra.mxu0 %v7163_v52  ;;  %5095 = vmatprep.mubr.bf16.mxu1 %v7174_v57 }
  0xae   : > { %v1194_v61 = vrot.slane %v1193_v53, 4  ;;  %v1204_v62 = vrot.slane %v1203_v54, 4  ;;  %v1480_v0 = vld [vmem:[#allocation2 + $0x38] sm:$0x1]  ;;  %v1595_v1 = vrot.slane %v1479_v63, 5  ;;  %5096 = vmatmul.mubr.bf16.gmra.mxu1 %v7178_v59 }
  0xaf   : > { %v1598_v2 = vrot.slane %v1480_v0, 5  ;;  %v1749_v3 = vld [vmem:[#allocation2 + $0x3c] sm:$0xf]  ;;  %v1750_v4 = vld [vmem:[#allocation2 + $0x40] sm:$0xf] }
  0xb0   : > { %v1199_v5 = vsel %vm7505_vm6, %v1194_v61, %v1198_v41  ;;  %v1209_v6 = vsel %vm7505_vm6, %v1204_v62, %v1208_v55  ;;  %1781 = vst [vmem:[#allocation3 + $0x12c] sm:$0xf] %v1749_v3  ;;  %1782 = vst [vmem:[#allocation3 + $0x150] sm:$0xf] %v1750_v4  ;;  %v371_v7 = vld [vmem:[%s7487_s26 + $0x40] sm:$0xf]  ;;  %v1596_v8 = vsel %vm7703_vm13, %v6099_v60, %v1595_v1 }
  0xb1   : > { %1448 = vst [vmem:[#allocation3 + $0x1fc] sm:$0xf] %v1199_v5  ;;  %1449 = vst [vmem:[#allocation3 + $0x220] sm:$0xf] %v1209_v6  ;;  %v1597_v9 = vrot.slane %v1595_v1, 4  ;;  %v527_v11 = vshrl.u32 %v371_v7, 16 }
  0xb2   : > { %v372_v10 = vld [vmem:[%s7487_s26 + $0x44] sm:$0xf]  ;;  %1717 = vst [vmem:[#allocation3 + $0x128] sm:$0xf] %v1596_v8  ;;  %v530_v13 = vshll.u32 %v371_v7, 16 }
  0xb3   : > { %v535_v14 = vshrl.u32 %v372_v10, 16  ;;  %v538_v15 = vshll.u32 %v372_v10, 16  ;;  %v919_v16 = vld [vmem:[#allocation2 + $0x60] sm:$0xf]  ;;  %v920_v17 = vld [vmem:[#allocation2 + $0x64] sm:$0xf]  ;;  %v1599_v19 = vsel %vm7703_vm13, %v1597_v9, %v1598_v2 }
  0xb4   : > { %v991_v18 = vld [vmem:[#allocation2 + $0x60] sm:$0xf]  ;;  %v772_v20 = vld [vmem:[#allocation2 + $0x6c] sm:$0xf]  ;;  %951 = vst [vmem:[#allocation3 + $0x240] sm:$0xf] %v919_v16 }
  0xb5   : > { %952 = vst [vmem:[#allocation3 + $0x264] sm:$0xf] %v920_v17  ;;  %v992_v21 = vld [vmem:[#allocation2 + $0x64] sm:$0xf]  ;;  %v1211_v22 = vshrl.u32 %v991_v18, 16  ;;  %v1214_v23 = vshll.u32 %v991_v18, 16 }
  0xb6   : > { %1718 = vst [vmem:[#allocation3 + $0x14c] sm:$0xf] %v1599_v19  ;;  %v529_v24 = vrot.slane %v527_v11, 7  ;;  %v537_v25 = vrot.slane %v535_v14, 7  ;;  %v993_v26 = vld [vmem:[#allocation2 + $0x68] sm:$0x1] }
  0xb7   : > { %v1220_v27 = vshll.u32 %v992_v21, 16  ;;  %v1224_v28 = vshrl.u32 %v992_v21, 16  ;;  %v776_v29 = vld [vmem:[#allocation2 + $0x74] sm:$0x1]  ;;  %v1213_v30 = vrot.slane %v1211_v22, 4  ;;  %v1216_v31 = vrot.slane %v1214_v23, 5 }
  0xb8   : > { %v1230_v32 = vshll.u32 %v993_v26, 16  ;;  %v532_v34 = vor.u32 %v530_v13, %v529_v24  ;;  %v533_v37 = vrot.slane %v529_v24, 4  ;;  %v540_v38 = vor.u32 %v538_v15, %v537_v25  ;;  %v1481_v39 = vld [vmem:[#allocation2 + $0x3c] sm:$0xe]  ;;  %v7168_v40 = vld [vmem:[#allocation3 + $0x1fc] ss:$36 sps:$4 sm:$0xff]  }
  0xb9   : > { %v1222_v35 = vrot.slane %v1220_v27, 5  ;;  %v1226_v36 = vrot.slane %v1224_v28, 4  ;;  %v1217_v41 = vor.u32 %v1216_v31, %v1213_v30  ;;  %v542_v44 = vrot.slane %v537_v25, 4  ;;  %v7173_v47 = vld [vmem:[#allocation3 + $0x1f8] ss:$36 sps:$4 sm:$0xff]   ;;  %4966 = vmatprep.mubr.bf16.mxu0 %v7168_v40  ;;  %v7266_v10 = vld [vmem:[%s8720_s3 + $0x180] sm:$0xff]  }
  0xba   : > { %v1232_v43 = vrot.slane %v1230_v32, 5  ;;  %v773_v45 = vsel %vm7516_vm9, %v532_v34, %v772_v20  ;;  %v541_v50 = vsel %vm7522_vm10, %v533_v37, %v540_v38  ;;  %v1482_v51 = vld [vmem:[#allocation2 + $0x40] sm:$0xf]  ;;  %v6100_v52 = vrot.slane %v1481_v39, 9  ;;  %v1483_v55 = vld [vmem:[#allocation2 + $0x44] sm:$0x1]  ;;  %4967 = vmatmul.mubr.bf16.gmra.mxu0 %v7173_v47  ;;  %6873 = vmatpush3.bf16.msra.mxu1 %v7266_v10 }
  0xbb   : > { %v1227_v49 = vor.u32 %v1226_v36, %v1222_v35  ;;  %774 = vst [vmem:[#allocation2 + $0x6c] sm:$0xf] %v773_v45  ;;  %v1218_v53 = vrot.slane %v1217_v41, 4  ;;  %775 = vst [vmem:[#allocation2 + $0x70] sm:$0xf] %v541_v50  ;;  %v777_v54 = vsel %vm7511_vm8, %v542_v44, %v776_v29  ;;  %v1602_v57 = vrot.slane %v1482_v51, 5 }
  0xbc   : > { %v1751_v58 = vld [vmem:[#allocation2 + $0x48] sm:$0xf]  ;;  %778 = vst [vmem:[#allocation2 + $0x74] sm:$0x1] %v777_v54  ;;  %v1605_v1 = vrot.slane %v1483_v55, 5 }
  0xbd   : > { %v1228_v59 = vrot.slane %v1227_v49, 4  ;;  %v7182_v60 = vld [vmem:[#allocation3 + $0x12c] ss:$36 sps:$4 sm:$0xff]   ;;  %1783 = vst [vmem:[#allocation3 + $0x174] sm:$0xf] %v1751_v58  ;;  %v1223_v62 = vsel %vm7505_vm6, %v1218_v53, %v1222_v35  ;;  %v1603_v63 = vsel %vm7703_vm13, %v6100_v52, %v1602_v57  ;;  %v1604_v0 = vrot.slane %v1602_v57, 4 }
  0xbe   : > { %v7187_v61 = vld [vmem:[#allocation3 + $0x128] ss:$36 sps:$4 sm:$0xff]   ;;  %v1752_v2 = vld [vmem:[#allocation2 + $0x4c] sm:$0xf]  ;;  %1450 = vst [vmem:[#allocation3 + $0x244] sm:$0xf] %v1223_v62  ;;  %5103 = vmatprep.mubr.bf16.mxu1 %v7182_v60 }
  0xbf   : > { %v1233_v3 = vsel %vm7505_vm6, %v1228_v59, %v1232_v43  ;;  %1719 = vst [vmem:[#allocation3 + $0x170] sm:$0xf] %v1603_v63  ;;  %1784 = vst [vmem:[#allocation3 + $0x198] sm:$0xf] %v1752_v2  ;;  %v373_v4 = vld [vmem:[%s7487_s26 + $0x48] sm:$0xf]  ;;  %5104 = vmatmul.mubr.bf16.gmra.mxu1 %v7187_v61  ;;  %v1606_v6 = vsel %vm7703_vm13, %v1604_v0, %v1605_v1 }
  0xc0   : > { %v374_v5 = vld [vmem:[%s7487_s26 + $0x4c] sm:$0xf]  ;;  %1451 = vst [vmem:[#allocation3 + $0x268] sm:$0xf] %v1233_v3  ;;  %v544_v7 = vshrl.u32 %v373_v4, 16  ;;  %v547_v8 = vshll.u32 %v373_v4, 16 }
  0xc1   : > { %v552_v9 = vshrl.u32 %v374_v5, 16  ;;  %1720 = vst [vmem:[#allocation3 + $0x194] sm:$0xf] %v1606_v6  ;;  %v555_v11 = vshll.u32 %v374_v5, 16  ;;  %v779_v12 = vld [vmem:[#allocation2 + $0x78] sm:$0xf] }
  0xc2   : > { %v921_v13 = vld [vmem:[#allocation2 + $0x6c] sm:$0xf]  ;;  %v546_v15 = vrot.slane %v544_v7, 7  ;;  %v922_v17 = vld [vmem:[#allocation2 + $0x70] sm:$0xf] }
  0xc3   : > { %v994_v14 = vld [vmem:[#allocation2 + $0x6c] sm:$0xf]  ;;  %v554_v16 = vrot.slane %v552_v9, 7  ;;  %953 = vst [vmem:[#allocation3 + $0x288] sm:$0xf] %v921_v13 }
  0xc4   : > { %v995_v18 = vld [vmem:[#allocation2 + $0x70] sm:$0xf]  ;;  %v1235_v19 = vshrl.u32 %v994_v14, 16  ;;  %v1238_v20 = vshll.u32 %v994_v14, 16  ;;  %v783_v21 = vld [vmem:[#allocation2 + $0x80] sm:$0x1]  ;;  %v549_v25 = vor.u32 %v547_v8, %v546_v15 }
  0xc5   : > { %954 = vst [vmem:[#allocation3 + $0x2ac] sm:$0xf] %v922_v17  ;;  %v996_v22 = vld [vmem:[#allocation2 + $0x74] sm:$0x1]  ;;  %v1244_v23 = vshll.u32 %v995_v18, 16  ;;  %v1248_v24 = vshrl.u32 %v995_v18, 16  ;;  %v557_v30 = vor.u32 %v555_v11, %v554_v16 }
  0xc6   : > { %v550_v26 = vrot.slane %v546_v15, 4  ;;  %v1237_v27 = vrot.slane %v1235_v19, 4  ;;  %v1240_v28 = vrot.slane %v1238_v20, 5  ;;  %v1254_v29 = vshll.u32 %v996_v22, 16  ;;  %v7179_v37 = vld [vmem:[#allocation3 + $0x240] ss:$36 sps:$4 sm:$0xff]  }
  0xc7   : > { %v1246_v31 = vrot.slane %v1244_v23, 5  ;;  %v1250_v32 = vrot.slane %v1248_v24, 4  ;;  %v559_v34 = vrot.slane %v554_v16, 4  ;;  %v780_v35 = vsel %vm7516_vm9, %v549_v25, %v779_v12  ;;  %v7176_v36 = vld [vmem:[#allocation3 + $0x244] ss:$36 sps:$4 sm:$0xff]  }
  0xc8   : > { %v1241_v38 = vor.u32 %v1240_v28, %v1237_v27  ;;  %v558_v39 = vsel %vm7522_vm10, %v550_v26, %v557_v30  ;;  %781 = vst [vmem:[#allocation2 + $0x78] sm:$0xf] %v780_v35  ;;  %v1256_v41 = vrot.slane %v1254_v29, 5  ;;  %v7190_v43 = vld [vmem:[#allocation3 + $0x174] ss:$36 sps:$4 sm:$0xff]   ;;  %4974 = vmatprep.mubr.bf16.mxu0 %v7176_v36 }
  0xc9   : > { %v1251_v40 = vor.u32 %v1250_v32, %v1246_v31  ;;  %782 = vst [vmem:[#allocation2 + $0x7c] sm:$0xf] %v558_v39  ;;  %v784_v44 = vsel %vm7511_vm8, %v559_v34, %v783_v21  ;;  %v7195_v45 = vld [vmem:[#allocation3 + $0x170] ss:$36 sps:$4 sm:$0xff]   ;;  %4975 = vmatmul.mubr.bf16.gmra.mxu0 %v7179_v37  ;;  %5111 = vmatprep.mubr.bf16.mxu1 %v7190_v43  ;;  %v1486_v52 = vld [vmem:[#allocation2 + $0x50] sm:$0x1] }
  0xca   : > { %v1242_v47 = vrot.slane %v1241_v38, 4  ;;  %785 = vst [vmem:[#allocation2 + $0x80] sm:$0x1] %v784_v44  ;;  %v1484_v49 = vld [vmem:[#allocation2 + $0x48] sm:$0xe]  ;;  %5112 = vmatmul.mubr.bf16.gmra.mxu1 %v7195_v45  ;;  %v1612_v57 = vrot.slane %v1486_v52, 5 }
  0xcb   : > { %v1485_v50 = vld [vmem:[#allocation2 + $0x4c] sm:$0xf]  ;;  %v1252_v51 = vrot.slane %v1251_v40, 4  ;;  %v6101_v53 = vrot.slane %v1484_v49, 9  ;;  %v1753_v58 = vld [vmem:[#allocation2 + $0x54] sm:$0xf] }
  0xcc   : > { %v1609_v54 = vrot.slane %v1485_v50, 5  ;;  %v1247_v55 = vsel %vm7505_vm6, %v1242_v47, %v1246_v31  ;;  %v1754_v59 = vld [vmem:[#allocation2 + $0x58] sm:$0xf]  ;;  %1785 = vst [vmem:[#allocation3 + $0x1bc] sm:$0xf] %v1753_v58 }
  0xcd   : > { %v1257_v60 = vsel %vm7505_vm6, %v1252_v51, %v1256_v41  ;;  %1452 = vst [vmem:[#allocation3 + $0x28c] sm:$0xf] %v1247_v55  ;;  %1786 = vst [vmem:[#allocation3 + $0x1e0] sm:$0xf] %v1754_v59  ;;  %v375_v63 = vld [vmem:[%s7487_s26 + $0x50] sm:$0xf] }
  0xce   : > { %v1610_v61 = vsel %vm7703_vm13, %v6101_v53, %v1609_v54  ;;  %v1611_v62 = vrot.slane %v1609_v54, 4  ;;  %1453 = vst [vmem:[#allocation3 + $0x2b0] sm:$0xf] %v1257_v60  ;;  %v376_v0 = vld [vmem:[%s7487_s26 + $0x54] sm:$0xf]  ;;  %v561_v4 = vshrl.u32 %v375_v63, 16 }
  0xcf   : > { %1721 = vst [vmem:[#allocation3 + $0x1b8] sm:$0xf] %v1610_v61  ;;  %v923_v1 = vld [vmem:[#allocation2 + $0x78] sm:$0xf]  ;;  %v564_v5 = vshll.u32 %v375_v63, 16  ;;  %v569_v14 = vshrl.u32 %v376_v0, 16 }
  0xd0   : > { %v997_v2 = vld [vmem:[#allocation2 + $0x78] sm:$0xf]  ;;  %v1613_v3 = vsel %vm7703_vm13, %v1611_v62, %v1612_v57  ;;  %v924_v6 = vld [vmem:[#allocation2 + $0x7c] sm:$0xf]  ;;  %955 = vst [vmem:[#allocation3 + $0x2d0] sm:$0xf] %v923_v1 }
  0xd1   : > { %v998_v7 = vld [vmem:[#allocation2 + $0x7c] sm:$0xf]  ;;  %v1259_v8 = vshrl.u32 %v997_v2, 16  ;;  %v1262_v9 = vshll.u32 %v997_v2, 16  ;;  %1722 = vst [vmem:[#allocation3 + $0x1dc] sm:$0xf] %v1613_v3 }
  0xd2   : > { %956 = vst [vmem:[#allocation3 + $0x2f4] sm:$0xf] %v924_v6  ;;  %v999_v10 = vld [vmem:[#allocation2 + $0x80] sm:$0x1]  ;;  %v1268_v11 = vshll.u32 %v998_v7, 16  ;;  %v1272_v12 = vshrl.u32 %v998_v7, 16 }
  0xd3   : > { %v563_v13 = vrot.slane %v561_v4, 7  ;;  %v1261_v15 = vrot.slane %v1259_v8, 4  ;;  %v1264_v16 = vrot.slane %v1262_v9, 5  ;;  %v1278_v17 = vshll.u32 %v999_v10, 16  ;;  %v786_v19 = vld [vmem:[#allocation2 + $0x84] sm:$0xf] }
  0xd4   : > { %v572_v18 = vshll.u32 %v376_v0, 16  ;;  %v1270_v20 = vrot.slane %v1268_v11, 5  ;;  %v1274_v21 = vrot.slane %v1272_v12, 4  ;;  %v790_v23 = vld [vmem:[#allocation2 + $0x8c] sm:$0x1]  ;;  %v571_v26 = vrot.slane %v569_v14, 7 }
  0xd5   : > { %v566_v22 = vor.u32 %v564_v5, %v563_v13  ;;  %v1265_v24 = vor.u32 %v1264_v16, %v1261_v15  ;;  %v567_v25 = vrot.slane %v563_v13, 4  ;;  %v7185_v27 = vld [vmem:[#allocation3 + $0x28c] ss:$36 sps:$4 sm:$0xff]   ;;  %v1280_v30 = vrot.slane %v1278_v17, 5  ;;  %v7198_v37 = vld [vmem:[#allocation3 + $0x1bc] ss:$36 sps:$4 sm:$0xff]  }
  0xd6   : > { %v7189_v28 = vld [vmem:[#allocation3 + $0x288] ss:$36 sps:$4 sm:$0xff]   ;;  %v1275_v29 = vor.u32 %v1274_v21, %v1270_v20  ;;  %v574_v34 = vor.u32 %v572_v18, %v571_v26  ;;  %v576_v35 = vrot.slane %v571_v26, 4  ;;  %4982 = vmatprep.mubr.bf16.mxu0 %v7185_v27  ;;  %5119 = vmatprep.mubr.bf16.mxu1 %v7198_v37  ;;  %v1487_v44 = vld [vmem:[#allocation2 + $0x54] sm:$0xe] }
  0xd7   : > { %v787_v31 = vsel %vm7516_vm9, %v566_v22, %v786_v19  ;;  %v1266_v32 = vrot.slane %v1265_v24, 4  ;;  %4983 = vmatmul.mubr.bf16.gmra.mxu0 %v7189_v28  ;;  %v1488_v45 = vld [vmem:[#allocation2 + $0x58] sm:$0xf]  ;;  %v1489_v47 = vld [vmem:[#allocation2 + $0x5c] sm:$0x1]  ;;  %v6102_v49 = vrot.slane %v1487_v44, 9 }
  0xd8   : > { %788 = vst [vmem:[#allocation2 + $0x84] sm:$0xf] %v787_v31  ;;  %v1276_v36 = vrot.slane %v1275_v29, 4  ;;  %v7203_v38 = vld [vmem:[#allocation3 + $0x1b8] ss:$36 sps:$4 sm:$0xff]   ;;  %v575_v40 = vsel %vm7522_vm10, %v567_v25, %v574_v34  ;;  %v791_v41 = vsel %vm7511_vm8, %v576_v35, %v790_v23  ;;  %v1616_v50 = vrot.slane %v1488_v45, 5 }
  0xd9   : > { %v1271_v39 = vsel %vm7505_vm6, %v1266_v32, %v1270_v20  ;;  %789 = vst [vmem:[#allocation2 + $0x88] sm:$0xf] %v575_v40  ;;  %792 = vst [vmem:[#allocation2 + $0x8c] sm:$0x1] %v791_v41  ;;  %5120 = vmatmul.mubr.bf16.gmra.mxu1 %v7203_v38  ;;  %v1619_v51 = vrot.slane %v1489_v47, 5 }
  0xda   : > { %v1281_v43 = vsel %vm7505_vm6, %v1276_v36, %v1280_v30  ;;  %1454 = vst [vmem:[#allocation3 + $0x2d4] sm:$0xf] %v1271_v39  ;;  %v1755_v52 = vld [vmem:[#allocation2 + $0x60] sm:$0xf]  ;;  %v1756_v53 = vld [vmem:[#allocation2 + $0x64] sm:$0xf]  ;;  %v1617_v57 = vsel %vm7703_vm13, %v6102_v49, %v1616_v50 }
  0xdb   : > { %1455 = vst [vmem:[#allocation3 + $0x2f8] sm:$0xf] %v1281_v43  ;;  %1787 = vst [vmem:[#allocation3 + $0x204] sm:$0xf] %v1755_v52  ;;  %v1805_v54 = vld [vmem:[#allocation2 + $0xc] sm:$0xf] }
  0xdc   : > { %v1806_v55 = vld [vmem:[#allocation2 + $0x10] sm:$0xf]  ;;  %v1618_v58 = vrot.slane %v1616_v50, 4  ;;  %1788 = vst [vmem:[#allocation3 + $0x228] sm:$0xf] %v1756_v53  ;;  %v1854_v60 = vshrl.u32 %v1805_v54, 16 }
  0xdd   : > { %v1807_v59 = vld [vmem:[#allocation2 + $0x14] sm:$0x1]  ;;  %v1857_v61 = vshll.u32 %v1805_v54, 16  ;;  %1723 = vst [vmem:[#allocation3 + $0x200] sm:$0xf] %v1617_v57  ;;  %v1863_v0 = vshll.u32 %v1806_v55, 16 }
  0xde   : > { %v1867_v1 = vshrl.u32 %v1806_v55, 16  ;;  %v1620_v4 = vsel %vm7703_vm13, %v1618_v58, %v1619_v51  ;;  %v1856_v5 = vrot.slane %v1854_v60, 4  ;;  %v2301_v6 = vld [vmem:[#allocation2 + $0xc] sm:$0xe]  ;;  %v1873_v10 = vshll.u32 %v1807_v59, 16 }
  0xdf   : > { %v925_v62 = vld [vmem:[#allocation2 + $0x84] sm:$0xf]  ;;  %1724 = vst [vmem:[#allocation3 + $0x224] sm:$0xf] %v1620_v4  ;;  %v1859_v7 = vrot.slane %v1857_v61, 5  ;;  %v1865_v8 = vrot.slane %v1863_v0, 5 }
  0xe0   : > { %v1000_v63 = vld [vmem:[#allocation2 + $0x84] sm:$0xf]  ;;  %957 = vst [vmem:[#allocation3 + $0x318] sm:$0xf] %v925_v62  ;;  %v1869_v9 = vrot.slane %v1867_v1, 4  ;;  %v1875_v23 = vrot.slane %v1873_v10, 5 }
  0xe1   : > { %v1283_v2 = vshrl.u32 %v1000_v63, 16  ;;  %v1286_v3 = vshll.u32 %v1000_v63, 16  ;;  %v2302_v11 = vld [vmem:[#allocation2 + $0x10] sm:$0xf]  ;;  %v926_v12 = vld [vmem:[#allocation2 + $0x88] sm:$0xf]  ;;  %v1860_v18 = vor.u32 %v1859_v7, %v1856_v5 }
  0xe2   : > { %v1001_v13 = vld [vmem:[#allocation2 + $0x88] sm:$0xf]  ;;  %v7193_v15 = vld [vmem:[#allocation3 + $0x2d4] ss:$36 sps:$4 sm:$0xff]   ;;  %958 = vst [vmem:[#allocation3 + $0x33c] sm:$0xf] %v926_v12  ;;  %v1870_v19 = vor.u32 %v1869_v9, %v1865_v8 }
  0xe3   : > { %v1285_v14 = vrot.slane %v1283_v2, 4  ;;  %v7197_v16 = vld [vmem:[#allocation3 + $0x2d0] ss:$36 sps:$4 sm:$0xff]   ;;  %v1288_v17 = vrot.slane %v1286_v3, 5  ;;  %v1292_v21 = vshll.u32 %v1001_v13, 16  ;;  %v1296_v22 = vshrl.u32 %v1001_v13, 16  ;;  %4990 = vmatprep.mubr.bf16.mxu0 %v7193_v15 }
  0xe4   : > { %v1002_v20 = vld [vmem:[#allocation2 + $0x8c] sm:$0x1]  ;;  %v6111_v24 = vrot.slane %v2301_v6, 9  ;;  %v1861_v27 = vrot.slane %v1860_v18, 4  ;;  %v1871_v28 = vrot.slane %v1870_v19, 4  ;;  %4991 = vmatmul.mubr.bf16.gmra.mxu0 %v7197_v16  ;;  %v2399_v32 = vrot.slane %v2302_v11, 5 }
  0xe5   : > { %v1289_v25 = vor.u32 %v1288_v17, %v1285_v14  ;;  %v1302_v26 = vshll.u32 %v1002_v20, 16  ;;  %v2303_v29 = vld [vmem:[#allocation2 + $0x14] sm:$0x1]  ;;  %v1294_v30 = vrot.slane %v1292_v21, 5  ;;  %v1298_v31 = vrot.slane %v1296_v22, 4 }
  0xe6   : > { %v2402_v34 = vrot.slane %v2303_v29, 5  ;;  %v1866_v37 = vsel %vm7505_vm6, %v1861_v27, %v1865_v8  ;;  %v1876_v38 = vsel %vm7505_vm6, %v1871_v28, %v1875_v23  ;;  %v1490_v39 = vld [vmem:[#allocation2 + $0x60] sm:$0xe]  ;;  %v1491_v40 = vld [vmem:[#allocation2 + $0x64] sm:$0xf]  ;;  %v2400_v45 = vsel %vm7703_vm13, %v6111_v24, %v2399_v32 }
  0xe7   : > { %v1290_v35 = vrot.slane %v1289_v25, 4  ;;  %v1304_v36 = vrot.slane %v1302_v26, 5  ;;  %v1299_v41 = vor.u32 %v1298_v31, %v1294_v30  ;;  %v7208_v43 = vld [vmem:[#allocation3 + $0x204] ss:$36 sps:$4 sm:$0xff]   ;;  %2269 = vst [vmem:[#allocation3 + $0x10] sm:$0xf] %v1866_v37 }
  0xe8   : > { %v7210_v44 = vld [vmem:[#allocation3 + $0x200] ss:$36 sps:$4 sm:$0xff]   ;;  %2270 = vst [vmem:[#allocation3 + $0x34] sm:$0xf] %v1876_v38  ;;  %v2401_v47 = vrot.slane %v2399_v32, 4  ;;  %v6103_v51 = vrot.slane %v1490_v39, 9  ;;  %5127 = vmatprep.mubr.bf16.mxu1 %v7208_v43 }
  0xe9   : > { %v1295_v49 = vsel %vm7505_vm6, %v1290_v35, %v1294_v30  ;;  %2541 = vst [vmem:[#allocation3 + $0x14] sm:$0xf] %v2400_v45  ;;  %v1492_v50 = vld [vmem:[#allocation2 + $0x68] sm:$0x1]  ;;  %v1623_v52 = vrot.slane %v1491_v40, 5  ;;  %v1300_v54 = vrot.slane %v1299_v41, 4  ;;  %5128 = vmatmul.mubr.bf16.gmra.mxu1 %v7210_v44 }
  0xea   : > { %v1757_v53 = vld [vmem:[#allocation2 + $0x6c] sm:$0xf]  ;;  %1456 = vst [vmem:[#allocation3 + $0x31c] sm:$0xf] %v1295_v49  ;;  %v2403_v55 = vsel %vm7703_vm13, %v2401_v47, %v2402_v34  ;;  %v1626_v57 = vrot.slane %v1492_v50, 5 }
  0xeb   : > { %v1758_v58 = vld [vmem:[#allocation2 + $0x70] sm:$0xf]  ;;  %1789 = vst [vmem:[#allocation3 + $0x24c] sm:$0xf] %v1757_v53  ;;  %2542 = vst [vmem:[#allocation3 + $0x38] sm:$0xf] %v2403_v55  ;;  %v1624_v59 = vsel %vm7703_vm13, %v6103_v51, %v1623_v52  ;;  %v1305_v61 = vsel %vm7505_vm6, %v1300_v54, %v1304_v36 }
  0xec   : > { %v1625_v60 = vrot.slane %v1623_v52, 4  ;;  %1790 = vst [vmem:[#allocation3 + $0x270] sm:$0xf] %v1758_v58  ;;  %1725 = vst [vmem:[#allocation3 + $0x248] sm:$0xf] %v1624_v59 }
  0xed   : > { %v1808_v62 = vld [vmem:[#allocation2 + $0x18] sm:$0xf]  ;;  %v1809_v63 = vld [vmem:[#allocation2 + $0x1c] sm:$0xf]  ;;  %1457 = vst [vmem:[#allocation3 + $0x340] sm:$0xf] %v1305_v61 }
  0xee   : > { %v1627_v0 = vsel %vm7703_vm13, %v1625_v60, %v1626_v57  ;;  %v1810_v1 = vld [vmem:[#allocation2 + $0x20] sm:$0x1]  ;;  %v1878_v2 = vshrl.u32 %v1808_v62, 16  ;;  %v1881_v3 = vshll.u32 %v1808_v62, 16  ;;  %v1887_v4 = vshll.u32 %v1809_v63, 16 }
  0xef   : > { %1726 = vst [vmem:[#allocation3 + $0x26c] sm:$0xf] %v1627_v0  ;;  %v1891_v5 = vshrl.u32 %v1809_v63, 16  ;;  %v1897_v6 = vshll.u32 %v1810_v1, 16  ;;  %v2304_v7 = vld [vmem:[#allocation2 + $0x18] sm:$0xe] }
  0xf0   : > { %v2305_v8 = vld [vmem:[#allocation2 + $0x1c] sm:$0xf]  ;;  %v1880_v9 = vrot.slane %v1878_v2, 4  ;;  %v1883_v10 = vrot.slane %v1881_v3, 5  ;;  %v1889_v11 = vrot.slane %v1887_v4, 5  ;;  %v6112_v13 = vrot.slane %v2304_v7, 9 }
  0xf1   : > { %v2306_v12 = vld [vmem:[#allocation2 + $0x20] sm:$0x1]  ;;  %v1893_v14 = vrot.slane %v1891_v5, 4  ;;  %v2406_v15 = vrot.slane %v2305_v8, 5  ;;  %v1899_v20 = vrot.slane %v1897_v6, 5 }
  0xf2   : > { %v2409_v16 = vrot.slane %v2306_v12, 5  ;;  %v1884_v17 = vor.u32 %v1883_v10, %v1880_v9  ;;  %v7213_v18 = vld [vmem:[#allocation3 + $0x14] ss:$36 sps:$4 sm:$0xff]   ;;  %v1495_v36 = vld [vmem:[#allocation2 + $0x74] sm:$0x1] }
  0xf3   : > { %v1894_v19 = vor.u32 %v1893_v14, %v1889_v11  ;;  %v2407_v21 = vsel %vm7703_vm13, %v6112_v13, %v2406_v15  ;;  %v2408_v22 = vrot.slane %v2406_v15, 4  ;;  %v1493_v24 = vld [vmem:[#allocation2 + $0x6c] sm:$0xe]  ;;  %v1494_v25 = vld [vmem:[#allocation2 + $0x70] sm:$0xf]  ;;  %v1633_v39 = vrot.slane %v1495_v36, 5 }
  0xf4   : > { %v1885_v23 = vrot.slane %v1884_v17, 4  ;;  %2543 = vst [vmem:[#allocation3 + $0x5c] sm:$0xf] %v2407_v21  ;;  %v7201_v26 = vld [vmem:[#allocation3 + $0x31c] ss:$36 sps:$4 sm:$0xff]   ;;  %v6104_v34 = vrot.slane %v1493_v24, 9 }
  0xf5   : > { %v7205_v27 = vld [vmem:[#allocation3 + $0x318] ss:$36 sps:$4 sm:$0xff]   ;;  %v1895_v28 = vrot.slane %v1894_v19, 4  ;;  %v2410_v29 = vsel %vm7703_vm13, %v2408_v22, %v2409_v16  ;;  %v7214_v30 = vld [vmem:[#allocation3 + $0x24c] ss:$36 sps:$4 sm:$0xff]   ;;  %4998 = vmatprep.mubr.bf16.mxu0 %v7201_v26  ;;  %v1630_v37 = vrot.slane %v1494_v25, 5 }
  0xf6   : > { %v7218_v31 = vld [vmem:[#allocation3 + $0x248] ss:$36 sps:$4 sm:$0xff]   ;;  %v1890_v32 = vsel %vm7505_vm6, %v1885_v23, %v1889_v11  ;;  %2544 = vst [vmem:[#allocation3 + $0x80] sm:$0xf] %v2410_v29  ;;  %v1759_v38 = vld [vmem:[#allocation2 + $0x78] sm:$0xf]  ;;  %4999 = vmatmul.mubr.bf16.gmra.mxu0 %v7205_v27  ;;  %5135 = vmatprep.mubr.bf16.mxu1 %v7214_v30 }
  0xf7   : > { %v1900_v35 = vsel %vm7505_vm6, %v1895_v28, %v1899_v20  ;;  %2271 = vst [vmem:[#allocation3 + $0x58] sm:$0xf] %v1890_v32  ;;  %v1760_v40 = vld [vmem:[#allocation2 + $0x7c] sm:$0xf]  ;;  %1791 = vst [vmem:[#allocation3 + $0x294] sm:$0xf] %v1759_v38  ;;  %5232 = vmatprep.mubr.bf16.mxu0 %v7213_v18  ;;  %5136 = vmatmul.mubr.bf16.gmra.mxu1 %v7218_v31  ;;  %v1631_v43 = vsel %vm7703_vm13, %v6104_v34, %v1630_v37 }
  0xf8   : > { %2272 = vst [vmem:[#allocation3 + $0x7c] sm:$0xf] %v1900_v35  ;;  %v1811_v41 = vld [vmem:[#allocation2 + $0x24] sm:$0xf]  ;;  %v1632_v44 = vrot.slane %v1630_v37, 4  ;;  %v7232_v12 = vld [vmem:[%s8720_s3 + $0x230] sm:$0xff]  }
  0xf9   : > { %1792 = vst [vmem:[#allocation3 + $0x2b8] sm:$0xf] %v1760_v40  ;;  %v1812_v45 = vld [vmem:[#allocation2 + $0x28] sm:$0xf]  ;;  %v1813_v47 = vld [vmem:[#allocation2 + $0x2c] sm:$0x1] }
  0xfa   : > { %v1902_v49 = vshrl.u32 %v1811_v41, 16  ;;  %v7211_v50 = vld [vmem:[#allocation3 + $0x10] ss:$36 sps:$4 sm:$0xff]   ;;  %1727 = vst [vmem:[#allocation3 + $0x290] sm:$0xf] %v1631_v43  ;;  %v1905_v51 = vshll.u32 %v1811_v41, 16  ;;  %v1634_v57 = vsel %vm7703_vm13, %v1632_v44, %v1633_v39 }
  0xfb   : > { %v1911_v52 = vshll.u32 %v1812_v45, 16  ;;  %v1915_v53 = vshrl.u32 %v1812_v45, 16  ;;  %v1921_v54 = vshll.u32 %v1813_v47, 16  ;;  %v2307_v55 = vld [vmem:[#allocation2 + $0x24] sm:$0xe]  ;;  %v7247_v21 = vld [vmem:[%s8720_s3 + $0x228] sm:$0xff]  }
  0xfc   : > { %v1904_v58 = vrot.slane %v1902_v49, 4  ;;  %v2308_v59 = vld [vmem:[#allocation2 + $0x28] sm:$0xf]  ;;  %v2309_v60 = vld [vmem:[#allocation2 + $0x2c] sm:$0x1]  ;;  %v6113_v61 = vrot.slane %v2307_v55, 9 }
  0xfd   : > { %1728 = vst [vmem:[#allocation3 + $0x2b4] sm:$0xf] %v1634_v57  ;;  %v1907_v62 = vrot.slane %v1905_v51, 5  ;;  %v1913_v63 = vrot.slane %v1911_v52, 5  ;;  %v1917_v0 = vrot.slane %v1915_v53, 4  ;;  %v1923_v1 = vrot.slane %v1921_v54, 5 }
  0xfe   : > { %v1496_v2 = vld [vmem:[#allocation2 + $0x78] sm:$0xe]  ;;  %v2413_v3 = vrot.slane %v2308_v59, 5  ;;  %v2416_v4 = vrot.slane %v2309_v60, 5  ;;  %v1497_v5 = vld [vmem:[#allocation2 + $0x7c] sm:$0xf]  ;;  %5233 = vmatmul.mubr.bf16.vlgmr.msra.gmra.mxu0 %v7211_v50  ;;  %v6538_v50 = vpop.f32.mrf.mxu0 }
  0xff   : > { %v1498_v6 = vld [vmem:[#allocation2 + $0x80] sm:$0x1]  ;;  %v1908_v7 = vor.u32 %v1907_v62, %v1904_v58  ;;  %v1918_v8 = vor.u32 %v1917_v0, %v1913_v63  ;;  %v6105_v9 = vrot.slane %v1496_v2, 9  ;;  %v1637_v10 = vrot.slane %v1497_v5, 5  ;;  %v1761_v11 = vld [vmem:[#allocation2 + $0x84] sm:$0xf] }
 0x100   : > { %v7219_v13 = vld [vmem:[#allocation3 + $0x5c] ss:$36 sps:$4 sm:$0xff]   ;;  %v2414_v14 = vsel %vm7703_vm13, %v6113_v61, %v2413_v3  ;;  %v2415_v15 = vrot.slane %v2413_v3, 4  ;;  %1793 = vst [vmem:[#allocation3 + $0x2dc] sm:$0xf] %v1761_v11  ;;  %v1640_v24 = vrot.slane %v1498_v6, 5  ;;  %v6539_v2 = vpop.f32.mrf.mxu0 }
 0x101   : > { %v1909_v16 = vrot.slane %v1908_v7, 4  ;;  %v1919_v17 = vrot.slane %v1918_v8, 4  ;;  %2545 = vst [vmem:[#allocation3 + $0xa4] sm:$0xf] %v2414_v14  ;;  %v1638_v18 = vsel %vm7703_vm13, %v6105_v9, %v1637_v10  ;;  %v1639_v19 = vrot.slane %v1637_v10, 4  ;;  %5240 = vmatprep.mubr.bf16.mxu0 %v7219_v13  ;;  %v7363_v22 = vld [vmem:[%s8720_s3 + $0x238] sm:$0xff]  }
 0x102   : > { %v1762_v20 = vld [vmem:[#allocation2 + $0x88] sm:$0xf]  ;;  %6995 = vmatpush3.bf16.msra.mxu0 %v7363_v22  ;;  %v2417_v23 = vsel %vm7703_vm13, %v2415_v15, %v2416_v4  ;;  %1729 = vst [vmem:[#allocation3 + $0x2d8] sm:$0xf] %v1638_v18  ;;  %v7222_v25 = vld [vmem:[#allocation3 + $0x58] ss:$36 sps:$4 sm:$0xff]   ;;  %v7957_v6 = vadd.f32 %v6539_v2, %v6538_v50 }
 0x103   : > { %1794 = vst [vmem:[#allocation3 + $0x300] sm:$0xf] %v1762_v20  ;;  %v1914_v26 = vsel %vm7505_vm6, %v1909_v16, %v1913_v63  ;;  %v1924_v27 = vsel %vm7505_vm6, %v1919_v17, %v1923_v1  ;;  %2546 = vst [vmem:[#allocation3 + $0xc8] sm:$0xf] %v2417_v23  ;;  %6996 = vmatprep.subr.bf16.mxu0 %v7232_v12  ;;  %v1814_v28 = vld [vmem:[#allocation2 + $0x30] sm:$0xf]  ;;  %v1641_v31 = vsel %vm7703_vm13, %v1639_v19, %v1640_v24 }
 0x104   : > { %v7223_v29 = vld [vmem:[#allocation3 + $0x294] ss:$36 sps:$4 sm:$0xff]   ;;  %2273 = vst [vmem:[#allocation3 + $0xa0] sm:$0xf] %v1914_v26  ;;  %2274 = vst [vmem:[#allocation3 + $0xc4] sm:$0xf] %v1924_v27 }
 0x105   : > { %v7225_v30 = vld [vmem:[#allocation3 + $0x290] ss:$36 sps:$4 sm:$0xff]   ;;  %v1926_v32 = vshrl.u32 %v1814_v28, 16  ;;  %1730 = vst [vmem:[#allocation3 + $0x2fc] sm:$0xf] %v1641_v31  ;;  %v1929_v36 = vshll.u32 %v1814_v28, 16  ;;  %5143 = vmatprep.mubr.bf16.mxu1 %v7223_v29 }
 0x106   : > { %v1815_v34 = vld [vmem:[#allocation2 + $0x34] sm:$0xf]  ;;  %v1816_v35 = vld [vmem:[#allocation2 + $0x38] sm:$0x1]  ;;  %v7262_v37 = vld [vmem:[%s8720_s3 + $0x220] sm:$0xff]   ;;  %6997 = vmatpush3.bf16.msra.mxu0 %v7232_v12  ;;  %5144 = vmatmul.mubr.bf16.gmra.mxu1 %v7225_v30 }
 0x107   : > { %v1928_v38 = vrot.slane %v1926_v32, 4  ;;  %v1935_v39 = vshll.u32 %v1815_v34, 16  ;;  %v1939_v40 = vshrl.u32 %v1815_v34, 16  ;;  %v1945_v41 = vshll.u32 %v1816_v35, 16  ;;  %v2310_v43 = vld [vmem:[#allocation2 + $0x30] sm:$0xe]  ;;  %6998 = vmatprep.subr.bf16.mxu0 %v7247_v21  ;;  %5241 = vmatmul.mubr.bf16.gmra.mxu0 %v7222_v25 }
 0x108   : > { %v1931_v44 = vrot.slane %v1929_v36, 5  ;;  %v2311_v45 = vld [vmem:[#allocation2 + $0x34] sm:$0xf]  ;;  %v2312_v47 = vld [vmem:[#allocation2 + $0x38] sm:$0x1]  ;;  %v6114_v49 = vrot.slane %v2310_v43, 9 }
 0x109   : > { %v1937_v51 = vrot.slane %v1935_v39, 5  ;;  %v1941_v52 = vrot.slane %v1939_v40, 4  ;;  %v1947_v53 = vrot.slane %v1945_v41, 5  ;;  %v2420_v54 = vrot.slane %v2311_v45, 5  ;;  %v1499_v58 = vld [vmem:[#allocation2 + $0x84] sm:$0xe] }
 0x10a   : > { %v1932_v55 = vor.u32 %v1931_v44, %v1928_v38  ;;  %v2423_v57 = vrot.slane %v2312_v47, 5  ;;  %v7277_v59 = vld [vmem:[%s8720_s3 + $0x218] sm:$0xff]   ;;  %v1500_v63 = vld [vmem:[#allocation2 + $0x88] sm:$0xf]  ;;  %v1501_v0 = vld [vmem:[#allocation2 + $0x8c] sm:$0x1]  ;;  %6999 = vmatpush3.bf16.msra.mxu0 %v7247_v21 }
 0x10b   : > { %v1942_v60 = vor.u32 %v1941_v52, %v1937_v51  ;;  %v2421_v61 = vsel %vm7703_vm13, %v6114_v49, %v2420_v54  ;;  %v2422_v62 = vrot.slane %v2420_v54, 4  ;;  %v6106_v1 = vrot.slane %v1499_v58, 9  ;;  %v7226_v3 = vld [vmem:[#allocation3 + $0xa4] ss:$36 sps:$4 sm:$0xff]   ;;  %7000 = vmatprep.subr.bf16.mxu0 %v7262_v37  ;;  %v7229_v8 = vld [vmem:[#allocation3 + $0x2dc] ss:$36 sps:$4 sm:$0xff]  }
 0x10c   : > { %v1933_v4 = vrot.slane %v1932_v55, 4  ;;  %2547 = vst [vmem:[#allocation3 + $0xec] sm:$0xf] %v2421_v61  ;;  %v1644_v5 = vrot.slane %v1500_v63, 5  ;;  %v7228_v7 = vld [vmem:[#allocation3 + $0xa0] ss:$36 sps:$4 sm:$0xff]   ;;  %5248 = vmatprep.mubr.bf16.mxu0 %v7226_v3  ;;  %5151 = vmatprep.mubr.bf16.mxu1 %v7229_v8 }
 0x10d   : > { %v1943_v9 = vrot.slane %v1942_v60, 4  ;;  %v2424_v10 = vsel %vm7703_vm13, %v2422_v62, %v2423_v57  ;;  %v7233_v11 = vld [vmem:[#allocation3 + $0x2d8] ss:$36 sps:$4 sm:$0xff]   ;;  %v1647_v15 = vrot.slane %v1501_v0, 5  ;;  %v1817_v19 = vld [vmem:[#allocation2 + $0x3c] sm:$0xf] }
 0x10e   : > { %v1938_v12 = vsel %vm7505_vm6, %v1933_v4, %v1937_v51  ;;  %2548 = vst [vmem:[#allocation3 + $0x110] sm:$0xf] %v2424_v10  ;;  %v1645_v13 = vsel %vm7703_vm13, %v6106_v1, %v1644_v5  ;;  %v1646_v14 = vrot.slane %v1644_v5, 4  ;;  %v1763_v16 = vld [vmem:[#allocation2 + $0x90] sm:$0xf]  ;;  %7001 = vmatpush3.bf16.msra.mxu0 %v7262_v37  ;;  %5152 = vmatmul.mubr.bf16.gmra.mxu1 %v7233_v11  ;;  %v1950_v23 = vshrl.u32 %v1817_v19, 16  ;;  %v7985_v5 = vpop.f32.mrf.mxu0 }
 0x10f   : > { %v1948_v17 = vsel %vm7505_vm6, %v1943_v9, %v1947_v53  ;;  %2275 = vst [vmem:[#allocation3 + $0xe8] sm:$0xf] %v1938_v12  ;;  %1731 = vst [vmem:[#allocation3 + $0x320] sm:$0xf] %v1645_v13  ;;  %v1764_v18 = vld [vmem:[#allocation2 + $0x94] sm:$0xf]  ;;  %7002 = vmatprep.subr.bf16.mxu0 %v7277_v59  ;;  %5249 = vmatmul.mubr.bf16.gmra.mxu0 %v7228_v7 }
 0x110   : > { %1795 = vst [vmem:[#allocation3 + $0x324] sm:$0xf] %v1763_v16  ;;  %v1818_v20 = vld [vmem:[#allocation2 + $0x40] sm:$0xf]  ;;  %2276 = vst [vmem:[#allocation3 + $0x10c] sm:$0xf] %v1948_v17  ;;  %v1648_v21 = vsel %vm7703_vm13, %v1646_v14, %v1647_v15  ;;  %v6610_v16 = vpop.f32.mrf.mxu1 }
 0x111   : > { %1796 = vst [vmem:[#allocation3 + $0x348] sm:$0xf] %v1764_v18  ;;  %v1819_v22 = vld [vmem:[#allocation2 + $0x44] sm:$0x1]  ;;  %v1953_v24 = vshll.u32 %v1817_v19, 16  ;;  %v1959_v25 = vshll.u32 %v1818_v20, 16 }
 0x112   : > { %v7289_v26 = vld [vmem:[%s8720_s3 + $0x210] sm:$0xff]   ;;  %1732 = vst [vmem:[#allocation3 + $0x344] sm:$0xf] %v1648_v21  ;;  %v1963_v27 = vshrl.u32 %v1818_v20, 16  ;;  %v1969_v28 = vshll.u32 %v1819_v22, 16  ;;  %v1952_v31 = vrot.slane %v1950_v23, 4  ;;  %7003 = vmatpush3.bf16.msra.mxu0 %v7277_v59 }
 0x113   : > { %v2313_v29 = vld [vmem:[#allocation2 + $0x3c] sm:$0xe]  ;;  %v2314_v30 = vld [vmem:[#allocation2 + $0x40] sm:$0xf]  ;;  %v1955_v32 = vrot.slane %v1953_v24, 5  ;;  %v1961_v34 = vrot.slane %v1959_v25, 5  ;;  %7004 = vmatprep.subr.bf16.mxu0 %v7289_v26  ;;  %v7989_v25 = vpop.f32.mrf.mxu0 }
 0x114   : > { %v2315_v35 = vld [vmem:[#allocation2 + $0x44] sm:$0x1]  ;;  %v6115_v36 = vrot.slane %v2313_v29, 9  ;;  %v1965_v37 = vrot.slane %v1963_v27, 4  ;;  %v2427_v38 = vrot.slane %v2314_v30, 5  ;;  %v7302_v41 = vld [vmem:[%s8720_s3 + $0x208] sm:$0xff]  }
 0x115   : > { %v2430_v39 = vrot.slane %v2315_v35, 5  ;;  %v1502_v40 = vld [vmem:[#allocation2 + $0x90] sm:$0xe]  ;;  %v1956_v43 = vor.u32 %v1955_v32, %v1952_v31  ;;  %v1971_v44 = vrot.slane %v1969_v28, 5  ;;  %v1503_v45 = vld [vmem:[#allocation2 + $0x94] sm:$0xf] }
 0x116   : > { %v1504_v47 = vld [vmem:[#allocation2 + $0x98] sm:$0x1]  ;;  %v6107_v49 = vrot.slane %v1502_v40, 9  ;;  %v1966_v50 = vor.u32 %v1965_v37, %v1961_v34  ;;  %v2428_v51 = vsel %vm7703_vm13, %v6115_v36, %v2427_v38  ;;  %v2429_v52 = vrot.slane %v2427_v38, 4  ;;  %v1765_v54 = vld [vmem:[#allocation2 + $0x9c] sm:$0xf]  ;;  %7005 = vmatpush3.bf16.msra.mxu0 %v7289_v26  ;;  %v6611_v26 = vpop.f32.mrf.mxu1 }
 0x117   : > { %v1651_v53 = vrot.slane %v1503_v45, 5  ;;  %v1766_v55 = vld [vmem:[#allocation2 + $0xa0] sm:$0xf]  ;;  %v1957_v57 = vrot.slane %v1956_v43, 4  ;;  %2549 = vst [vmem:[#allocation3 + $0x134] sm:$0xf] %v2428_v51  ;;  %7006 = vmatprep.subr.bf16.mxu0 %v7302_v41  ;;  %v7991_v29 = vadd.f32 %v6611_v26, %v6610_v16 }
 0x118   : > { %v1654_v58 = vrot.slane %v1504_v47, 5  ;;  %1797 = vst [vmem:[#allocation3 + $0x36c] sm:$0xf] %v1765_v54  ;;  %1798 = vst [vmem:[#allocation3 + $0x390] sm:$0xf] %v1766_v55  ;;  %v1967_v61 = vrot.slane %v1966_v50, 4  ;;  %v2431_v62 = vsel %vm7703_vm13, %v2429_v52, %v2430_v39  ;;  %v6544_v47 = vpop.f32.mrf.mxu0  ;;  %v8002_v54 = vpop.f32.mrf.mxu1 }
 0x119   : > { %v7234_v59 = vld [vmem:[#allocation3 + $0xec] ss:$36 sps:$4 sm:$0xff]   ;;  %v1652_v63 = vsel %vm7703_vm13, %v6107_v49, %v1651_v53  ;;  %v7238_v0 = vld [vmem:[#allocation3 + $0x324] ss:$36 sps:$4 sm:$0xff]   ;;  %v1962_v2 = vsel %vm7505_vm6, %v1957_v57, %v1961_v34  ;;  %2550 = vst [vmem:[#allocation3 + $0x158] sm:$0xf] %v2431_v62 }
 0x11a   : > { %v7237_v60 = vld [vmem:[#allocation3 + $0xe8] ss:$36 sps:$4 sm:$0xff]   ;;  %v7240_v1 = vld [vmem:[#allocation3 + $0x320] ss:$36 sps:$4 sm:$0xff]   ;;  %v1653_v3 = vrot.slane %v1651_v53, 4  ;;  %5256 = vmatprep.mubr.bf16.mxu0 %v7234_v59  ;;  %v1972_v4 = vsel %vm7505_vm6, %v1967_v61, %v1971_v44  ;;  %5159 = vmatprep.mubr.bf16.mxu1 %v7238_v0  ;;  %v6545_v61 = vpop.f32.mrf.mxu0 }
 0x11b   : > { %1733 = vst [vmem:[#allocation3 + $0x368] sm:$0xf] %v1652_v63  ;;  %2277 = vst [vmem:[#allocation3 + $0x130] sm:$0xf] %v1962_v2  ;;  %5257 = vmatmul.mubr.bf16.gmra.mxu0 %v7237_v60  ;;  %v1820_v8 = vld [vmem:[#allocation2 + $0x48] sm:$0xf]  ;;  %5160 = vmatmul.mubr.bf16.gmra.mxu1 %v7240_v1  ;;  %v8008_v2 = vadd.f32 %v6545_v61, %v6544_v47 }
 0x11c   : > { %2278 = vst [vmem:[#allocation3 + $0x154] sm:$0xf] %v1972_v4  ;;  %v1655_v7 = vsel %vm7703_vm13, %v1653_v3, %v1654_v58  ;;  %v1821_v9 = vld [vmem:[#allocation2 + $0x4c] sm:$0xf]  ;;  %v1822_v10 = vld [vmem:[#allocation2 + $0x50] sm:$0x1]  ;;  %7007 = vmatpush3.bf16.msra.mxu0 %v7302_v41 }
 0x11d   : > { %1734 = vst [vmem:[#allocation3 + $0x38c] sm:$0xf] %v1655_v7  ;;  %v1974_v11 = vshrl.u32 %v1820_v8, 16  ;;  %v1977_v12 = vshll.u32 %v1820_v8, 16  ;;  %v1983_v13 = vshll.u32 %v1821_v9, 16  ;;  %v1987_v14 = vshrl.u32 %v1821_v9, 16 }
 0x11e   : > { %v2316_v15 = vld [vmem:[#allocation2 + $0x48] sm:$0xe]  ;;  %v1993_v17 = vshll.u32 %v1822_v10, 16  ;;  %v2317_v18 = vld [vmem:[#allocation2 + $0x4c] sm:$0xf]  ;;  %v7315_v30 = vld [vmem:[%s8720_s3 + $0x200] sm:$0xff]  }
 0x11f   : > { %v2318_v19 = vld [vmem:[#allocation2 + $0x50] sm:$0x1]  ;;  %v6116_v20 = vrot.slane %v2316_v15, 9  ;;  %v1976_v21 = vrot.slane %v1974_v11, 4  ;;  %v1979_v22 = vrot.slane %v1977_v12, 5  ;;  %v1985_v23 = vrot.slane %v1983_v13, 5  ;;  %7008 = vmatprep.subr.bf16.mxu0 %v7315_v30 }
 0x120   : > { %v1989_v24 = vrot.slane %v1987_v14, 4  ;;  %v2434_v27 = vrot.slane %v2317_v18, 5  ;;  %v2437_v28 = vrot.slane %v2318_v19, 5  ;;  %v1995_v34 = vrot.slane %v1993_v17, 5  ;;  %v1505_v35 = vld [vmem:[#allocation2 + $0x9c] sm:$0xe]  ;;  %7009 = vmatpush3.bf16.msra.mxu0 %v7315_v30  ;;  %v8012_v14 = vpop.f32.mrf.mxu1 }
 0x121   : > { %v1980_v31 = vor.u32 %v1979_v22, %v1976_v21  ;;  %v1506_v36 = vld [vmem:[#allocation2 + $0xa0] sm:$0xf]  ;;  %v1507_v39 = vld [vmem:[#allocation2 + $0xa4] sm:$0x1]  ;;  %v6108_v40 = vrot.slane %v1505_v35, 9 }
 0x122   : > { %v1990_v32 = vor.u32 %v1989_v24, %v1985_v23  ;;  %v2435_v37 = vsel %vm7703_vm13, %v6116_v20, %v2434_v27  ;;  %v2436_v38 = vrot.slane %v2434_v27, 4  ;;  %v1658_v41 = vrot.slane %v1506_v36, 5  ;;  %v7241_v43 = vld [vmem:[#allocation3 + $0x134] ss:$36 sps:$4 sm:$0xff]   ;;  %v7244_v49 = vld [vmem:[#allocation3 + $0x36c] ss:$36 sps:$4 sm:$0xff]  }
 0x123   : > { %v7243_v44 = vld [vmem:[#allocation3 + $0x130] ss:$36 sps:$4 sm:$0xff]   ;;  %v1981_v45 = vrot.slane %v1980_v31, 4  ;;  %2551 = vst [vmem:[#allocation3 + $0x17c] sm:$0xf] %v2435_v37  ;;  %5264 = vmatprep.mubr.bf16.mxu0 %v7241_v43  ;;  %v1661_v58 = vrot.slane %v1507_v39, 5  ;;  %5167 = vmatprep.mubr.bf16.mxu1 %v7244_v49  ;;  %v8018_v43 = vpop.f32.mrf.mxu0 }
 0x124   : > { %v7248_v50 = vld [vmem:[#allocation3 + $0x368] ss:$36 sps:$4 sm:$0xff]   ;;  %v1991_v51 = vrot.slane %v1990_v32, 4  ;;  %v2438_v52 = vsel %vm7703_vm13, %v2436_v38, %v2437_v28  ;;  %v1659_v53 = vsel %vm7703_vm13, %v6108_v40, %v1658_v41  ;;  %v1660_v57 = vrot.slane %v1658_v41, 4  ;;  %v1767_v59 = vld [vmem:[#allocation2 + $0xa8] sm:$0xf]  ;;  %5265 = vmatmul.mubr.bf16.gmra.mxu0 %v7243_v44  ;;  %v6616_v38 = vpop.f32.mrf.mxu1 }
 0x125   : > { %v1986_v55 = vsel %vm7505_vm6, %v1981_v45, %v1985_v23  ;;  %2552 = vst [vmem:[#allocation3 + $0x1a0] sm:$0xf] %v2438_v52  ;;  %1735 = vst [vmem:[#allocation3 + $0x3b0] sm:$0xf] %v1659_v53  ;;  %v1768_v60 = vld [vmem:[#allocation2 + $0xac] sm:$0xf]  ;;  %5168 = vmatmul.mubr.bf16.gmra.mxu1 %v7248_v50 }
 0x126   : > { %v1996_v62 = vsel %vm7505_vm6, %v1991_v51, %v1995_v34  ;;  %2279 = vst [vmem:[#allocation3 + $0x178] sm:$0xf] %v1986_v55  ;;  %1799 = vst [vmem:[#allocation3 + $0x3b4] sm:$0xf] %v1767_v59  ;;  %v1823_v63 = vld [vmem:[#allocation2 + $0x54] sm:$0xf]  ;;  %v1662_v3 = vsel %vm7703_vm13, %v1660_v57, %v1661_v58  ;;  %v6617_v50 = vpop.f32.mrf.mxu1 }
 0x127   : > { %1800 = vst [vmem:[#allocation3 + $0x3d8] sm:$0xf] %v1768_v60  ;;  %v1824_v0 = vld [vmem:[#allocation2 + $0x58] sm:$0xf]  ;;  %v1825_v1 = vld [vmem:[#allocation2 + $0x5c] sm:$0x1]  ;;  %v8026_v57 = vadd.f32 %v6617_v50, %v6616_v38 }
 0x128   : > { %2280 = vst [vmem:[#allocation3 + $0x19c] sm:$0xf] %v1996_v62  ;;  %v1998_v4 = vshrl.u32 %v1823_v63, 16  ;;  %v2001_v7 = vshll.u32 %v1823_v63, 16  ;;  %v2007_v8 = vshll.u32 %v1824_v0, 16  ;;  %v2011_v10 = vshrl.u32 %v1824_v0, 16  ;;  %v8030_v0 = vpop.f32.mrf.mxu0 }
 0x129   : > { %v2319_v9 = vld [vmem:[#allocation2 + $0x54] sm:$0xe]  ;;  %1736 = vst [vmem:[#allocation3 + $0x3d4] sm:$0xf] %v1662_v3  ;;  %v2017_v11 = vshll.u32 %v1825_v1, 16 }
 0x12a   : > { %v2320_v12 = vld [vmem:[#allocation2 + $0x58] sm:$0xf]  ;;  %v2321_v13 = vld [vmem:[#allocation2 + $0x5c] sm:$0x1]  ;;  %v2000_v15 = vrot.slane %v1998_v4, 4  ;;  %v2003_v16 = vrot.slane %v2001_v7, 5 }
 0x12b   : > { %v2009_v17 = vrot.slane %v2007_v8, 5  ;;  %v6117_v18 = vrot.slane %v2319_v9, 9  ;;  %v1508_v19 = vld [vmem:[#allocation2 + $0xa8] sm:$0xe]  ;;  %v2013_v20 = vrot.slane %v2011_v10, 4  ;;  %v2019_v21 = vrot.slane %v2017_v11, 5 }
 0x12c   : > { %v2441_v22 = vrot.slane %v2320_v12, 5  ;;  %v2444_v23 = vrot.slane %v2321_v13, 5  ;;  %v1509_v24 = vld [vmem:[#allocation2 + $0xac] sm:$0xf]  ;;  %v2004_v26 = vor.u32 %v2003_v16, %v2000_v15  ;;  %v1510_v27 = vld [vmem:[#allocation2 + $0xb0] sm:$0x1] }
 0x12d   : > { %v6109_v28 = vrot.slane %v1508_v19, 9  ;;  %v1665_v30 = vrot.slane %v1509_v24, 5  ;;  %v1769_v31 = vld [vmem:[#allocation2 + $0xb4] sm:$0xf]  ;;  %v2014_v32 = vor.u32 %v2013_v20, %v2009_v17  ;;  %v1668_v36 = vrot.slane %v1510_v27, 5  ;;  %v6550_v19 = vpop.f32.mrf.mxu0 }
 0x12e   : > { %v2442_v34 = vsel %vm7703_vm13, %v6117_v18, %v2441_v22  ;;  %v2443_v35 = vrot.slane %v2441_v22, 4  ;;  %v1770_v37 = vld [vmem:[#allocation2 + $0xb8] sm:$0xf]  ;;  %1801 = vst [vmem:[#allocation3 + $0x3fc] sm:$0xf] %v1769_v31  ;;  %v2005_v39 = vrot.slane %v2004_v26, 4 }
 0x12f   : > { %2553 = vst [vmem:[#allocation3 + $0x1c4] sm:$0xf] %v2442_v34  ;;  %v1666_v40 = vsel %vm7703_vm13, %v6109_v28, %v1665_v30  ;;  %v1667_v41 = vrot.slane %v1665_v30, 4  ;;  %1802 = vst [vmem:[#allocation3 + $0x420] sm:$0xf] %v1770_v37  ;;  %v2015_v47 = vrot.slane %v2014_v32, 4  ;;  %v6551_v30 = vpop.f32.mrf.mxu0 }
 0x130   : > { %v7249_v44 = vld [vmem:[#allocation3 + $0x17c] ss:$36 sps:$4 sm:$0xff]   ;;  %v2445_v49 = vsel %vm7703_vm13, %v2443_v35, %v2444_v23  ;;  %1737 = vst [vmem:[#allocation3 + $0x3f8] sm:$0xf] %v1666_v40  ;;  %v7253_v51 = vld [vmem:[#allocation3 + $0x3b4] ss:$36 sps:$4 sm:$0xff]   ;;  %v2010_v53 = vsel %vm7505_vm6, %v2005_v39, %v2009_v17  ;;  %v8036_v35 = vadd.f32 %v6551_v30, %v6550_v19 }
 0x131   : > { %v7252_v45 = vld [vmem:[#allocation3 + $0x178] ss:$36 sps:$4 sm:$0xff]   ;;  %v7255_v52 = vld [vmem:[#allocation3 + $0x3b0] ss:$36 sps:$4 sm:$0xff]   ;;  %2554 = vst [vmem:[#allocation3 + $0x1e8] sm:$0xf] %v2445_v49  ;;  %v1669_v55 = vsel %vm7703_vm13, %v1667_v41, %v1668_v36  ;;  %5272 = vmatprep.mubr.bf16.mxu0 %v7249_v44  ;;  %v2020_v58 = vsel %vm7505_vm6, %v2015_v47, %v2019_v21  ;;  %5175 = vmatprep.mubr.bf16.mxu1 %v7253_v51 }
 0x132   : > { %2281 = vst [vmem:[#allocation3 + $0x1c0] sm:$0xf] %v2010_v53  ;;  %1738 = vst [vmem:[#allocation3 + $0x41c] sm:$0xf] %v1669_v55  ;;  %v1826_v59 = vld [vmem:[#allocation2 + $0x60] sm:$0xf]  ;;  %5273 = vmatmul.mubr.bf16.gmra.mxu0 %v7252_v45  ;;  %5176 = vmatmul.mubr.bf16.gmra.mxu1 %v7255_v52 }
 0x133   : > { %2282 = vst [vmem:[#allocation3 + $0x1e4] sm:$0xf] %v2020_v58  ;;  %v1827_v60 = vld [vmem:[#allocation2 + $0x64] sm:$0xf]  ;;  %v1828_v61 = vld [vmem:[#allocation2 + $0x68] sm:$0x1] }
 0x134   : > { %v2022_v62 = vshrl.u32 %v1826_v59, 16  ;;  %v2025_v63 = vshll.u32 %v1826_v59, 16  ;;  %v2031_v1 = vshll.u32 %v1827_v60, 16  ;;  %v2035_v3 = vshrl.u32 %v1827_v60, 16  ;;  %v2322_v7 = vld [vmem:[#allocation2 + $0x60] sm:$0xe] }
 0x135   : > { %v2041_v4 = vshll.u32 %v1828_v61, 16  ;;  %v2323_v10 = vld [vmem:[#allocation2 + $0x64] sm:$0xf]  ;;  %v2324_v11 = vld [vmem:[#allocation2 + $0x68] sm:$0x1]  ;;  %v6118_v15 = vrot.slane %v2322_v7, 9 }
 0x136   : > { %v2024_v8 = vrot.slane %v2022_v62, 4  ;;  %v2027_v9 = vrot.slane %v2025_v63, 5  ;;  %v2033_v12 = vrot.slane %v2031_v1, 5  ;;  %v2037_v13 = vrot.slane %v2035_v3, 4  ;;  %v385_v22 = vld [vmem:[%s7487_s26 + $0x78] sm:$0xf]  ;;  %v8046_v63 = vpop.f32.mrf.mxu1 }
 0x137   : > { %v2448_v17 = vrot.slane %v2323_v10, 5  ;;  %v2451_v18 = vrot.slane %v2324_v11, 5  ;;  %v2043_v21 = vrot.slane %v2041_v4, 5  ;;  %v386_v23 = vld [vmem:[%s7487_s26 + $0x7c] sm:$0xf]  ;;  %v646_v39 = vshrl.u32 %v385_v22, 16 }
 0x138   : > { %v2028_v16 = vor.u32 %v2027_v9, %v2024_v8  ;;  %v2038_v20 = vor.u32 %v2037_v13, %v2033_v12  ;;  %v7259_v24 = vld [vmem:[#allocation3 + $0x3fc] ss:$36 sps:$4 sm:$0xff]   ;;  %v7256_v31 = vld [vmem:[#allocation3 + $0x1c4] ss:$36 sps:$4 sm:$0xff]   ;;  %v649_v40 = vshll.u32 %v385_v22, 16  ;;  %v654_v45 = vshrl.u32 %v386_v23, 16  ;;  %v8057_v46 = vpop.f32.mrf.mxu1 }
 0x139   : > { %v2449_v27 = vsel %vm7703_vm13, %v6118_v15, %v2448_v17  ;;  %v2450_v28 = vrot.slane %v2448_v17, 4  ;;  %5183 = vmatprep.mubr.bf16.mxu1 %v7259_v24  ;;  %v7263_v36 = vld [vmem:[#allocation3 + $0x3f8] ss:$36 sps:$4 sm:$0xff]   ;;  %5280 = vmatprep.mubr.bf16.mxu0 %v7256_v31  ;;  %v657_v47 = vshll.u32 %v386_v23, 16  ;;  %v1512_v49 = vld [vmem:[#allocation2 + $0xb8] sm:$0xf] }
 0x13a   : > { %v2029_v26 = vrot.slane %v2028_v16, 4  ;;  %v7258_v32 = vld [vmem:[#allocation3 + $0x1c0] ss:$36 sps:$4 sm:$0xff]   ;;  %v2039_v34 = vrot.slane %v2038_v20, 4  ;;  %2555 = vst [vmem:[#allocation3 + $0x20c] sm:$0xf] %v2449_v27  ;;  %5184 = vmatmul.mubr.bf16.gmra.mxu1 %v7263_v36 }
 0x13b   : > { %v2452_v38 = vsel %vm7703_vm13, %v2450_v28, %v2451_v18  ;;  %v1511_v41 = vld [vmem:[#allocation2 + $0xb4] sm:$0xe]  ;;  %v1513_v50 = vld [vmem:[#allocation2 + $0xbc] sm:$0x1]  ;;  %5281 = vmatmul.mubr.bf16.gmra.mxu0 %v7258_v32  ;;  %v648_v51 = vrot.slane %v646_v39, 7  ;;  %v1672_v53 = vrot.slane %v1512_v49, 5 }
 0x13c   : > { %v2034_v37 = vsel %vm7505_vm6, %v2029_v26, %v2033_v12  ;;  %v2044_v44 = vsel %vm7505_vm6, %v2039_v34, %v2043_v21  ;;  %2556 = vst [vmem:[#allocation3 + $0x230] sm:$0xf] %v2452_v38  ;;  %v6110_v52 = vrot.slane %v1511_v41, 9  ;;  %v1675_v55 = vrot.slane %v1513_v50, 5  ;;  %v1829_v58 = vld [vmem:[#allocation2 + $0x6c] sm:$0xf]  ;;  %v8059_v34 = vpop.f32.mrf.mxu0 }
 0x13d   : > { %2283 = vst [vmem:[#allocation3 + $0x208] sm:$0xf] %v2034_v37  ;;  %2284 = vst [vmem:[#allocation3 + $0x22c] sm:$0xf] %v2044_v44  ;;  %v8044_v59 = vrot.slane %v654_v45, 7  ;;  %v2046_v62 = vshrl.u32 %v1829_v58, 16  ;;  %v651_v1 = vor.u32 %v649_v40, %v648_v51 }
 0x13e   : > { %v821_v60 = vld [vmem:[#allocation2 + $0xc0] sm:$0xf]  ;;  %v1830_v61 = vld [vmem:[#allocation2 + $0x70] sm:$0xf]  ;;  %v652_v3 = vrot.slane %v648_v51, 4  ;;  %v1673_v4 = vsel %vm7703_vm13, %v6110_v52, %v1672_v53  ;;  %v1674_v7 = vrot.slane %v1672_v53, 4  ;;  %v6622_v53 = vpop.f32.mrf.mxu1 }
 0x13f   : > { %v1831_v8 = vld [vmem:[#allocation2 + $0x74] sm:$0x1]  ;;  %v2325_v9 = vld [vmem:[#allocation2 + $0x6c] sm:$0xe]  ;;  %v659_v10 = vor.u32 %v657_v47, %v8044_v59  ;;  %1739 = vst [vmem:[#allocation3 + $0x440] sm:$0xf] %v1673_v4  ;;  %v822_v16 = vsel %vm7516_vm9, %v651_v1, %v821_v60 }
 0x140   : > { %v2048_v11 = vrot.slane %v2046_v62, 4  ;;  %v2049_v12 = vshll.u32 %v1829_v58, 16  ;;  %v2326_v13 = vld [vmem:[#allocation2 + $0x70] sm:$0xf]  ;;  %v2327_v15 = vld [vmem:[#allocation2 + $0x74] sm:$0x1]  ;;  %v1676_v17 = vsel %vm7703_vm13, %v1674_v7, %v1675_v55  ;;  %v8065_v62 = vpop.f32.mrf.mxu0 }
 0x141   : > { %v2055_v18 = vshll.u32 %v1830_v61, 16  ;;  %v2059_v19 = vshrl.u32 %v1830_v61, 16  ;;  %v2574_v20 = vld [vmem:[#allocation2 + $0x18] sm:$0xf]  ;;  %v2575_v21 = vld [vmem:[#allocation2 + $0x1c] sm:$0xf]  ;;  %v660_v22 = vsel %vm7522_vm10, %v652_v3, %v659_v10 }
 0x142   : > { %823 = vst [vmem:[#allocation2 + $0xc0] sm:$0xf] %v822_v16  ;;  %1740 = vst [vmem:[#allocation3 + $0x464] sm:$0xf] %v1676_v17  ;;  %v2051_v23 = vrot.slane %v2049_v12, 5  ;;  %v2065_v24 = vshll.u32 %v1831_v8, 16 }
 0x143   : > { %v6119_v26 = vrot.slane %v2325_v9, 9  ;;  %2606 = vst [vmem:[#allocation3 + $0x18] sm:$0xf] %v2574_v20  ;;  %2607 = vst [vmem:[#allocation3 + $0x3c] sm:$0xf] %v2575_v21  ;;  %v2057_v28 = vrot.slane %v2055_v18, 5  ;;  %v6623_v9 = vpop.f32.mrf.mxu1 }
 0x144   : > { %v2638_v27 = vld [vmem:[#allocation2 + $0x18] sm:$0xf]  ;;  %824 = vst [vmem:[#allocation2 + $0xc4] sm:$0xf] %v660_v22  ;;  %v2061_v30 = vrot.slane %v2059_v19, 4  ;;  %v2455_v31 = vrot.slane %v2326_v13, 5  ;;  %v2052_v37 = vor.u32 %v2051_v23, %v2048_v11  ;;  %v8071_v16 = vadd.f32 %v6623_v9, %v6622_v53 }
 0x145   : > { %v2458_v32 = vrot.slane %v2327_v15, 5  ;;  %v7264_v36 = vld [vmem:[#allocation3 + $0x20c] ss:$36 sps:$4 sm:$0xff]   ;;  %v2067_v38 = vrot.slane %v2065_v24, 5  ;;  %v2639_v44 = vld [vmem:[#allocation2 + $0x1c] sm:$0xf]  ;;  %v8073_v23 = vpop.f32.mrf.mxu1 }
 0x146   : > { %v7267_v48 = vld [vmem:[#allocation3 + $0x208] ss:$36 sps:$4 sm:$0xff]   ;;  %v2062_v39 = vor.u32 %v2061_v30, %v2057_v28  ;;  %v2456_v40 = vsel %vm7703_vm13, %v6119_v26, %v2455_v31  ;;  %v2457_v41 = vrot.slane %v2455_v31, 4  ;;  %v2687_v47 = vshrl.u32 %v2638_v27, 16  ;;  %5288 = vmatprep.mubr.bf16.mxu0 %v7264_v36  ;;  %v1832_v8 = vld [vmem:[#allocation2 + $0x78] sm:$0xf]  ;;  %v6556_v30 = vpop.f32.mrf.mxu0 }
 0x147   : > { %v2640_v45 = vld [vmem:[#allocation2 + $0x20] sm:$0x1]  ;;  %v2053_v49 = vrot.slane %v2052_v37, 4  ;;  %2557 = vst [vmem:[#allocation3 + $0x254] sm:$0xf] %v2456_v40  ;;  %v2690_v50 = vshll.u32 %v2638_v27, 16  ;;  %5289 = vmatmul.mubr.bf16.gmra.mxu0 %v7267_v48 }
 0x148   : > { %v2696_v51 = vshll.u32 %v2639_v44, 16  ;;  %v2700_v52 = vshrl.u32 %v2639_v44, 16  ;;  %v2063_v55 = vrot.slane %v2062_v39, 4  ;;  %v2459_v58 = vsel %vm7703_vm13, %v2457_v41, %v2458_v32  ;;  %v1833_v13 = vld [vmem:[#allocation2 + $0x7c] sm:$0xf]  ;;  %v6557_v53 = vpop.f32.mrf.mxu0 }
 0x149   : > { %v2689_v60 = vrot.slane %v2687_v47, 4  ;;  %v2706_v61 = vshll.u32 %v2640_v45, 16  ;;  %v2058_v1 = vsel %vm7505_vm6, %v2053_v49, %v2057_v28  ;;  %2558 = vst [vmem:[#allocation3 + $0x278] sm:$0xf] %v2459_v58  ;;  %v2692_v3 = vrot.slane %v2690_v50, 5 }
 0x14a   : > { %v2698_v4 = vrot.slane %v2696_v51, 5  ;;  %v2702_v7 = vrot.slane %v2700_v52, 4  ;;  %v1771_v10 = vld [vmem:[#allocation2 + $0xc0] sm:$0xf]  ;;  %v2068_v11 = vsel %vm7505_vm6, %v2063_v55, %v2067_v38  ;;  %2285 = vst [vmem:[#allocation3 + $0x250] sm:$0xf] %v2058_v1  ;;  %v8079_v55 = vpop.f32.mrf.mxu1 }
 0x14b   : > { %v2708_v12 = vrot.slane %v2706_v61, 5  ;;  %v2070_v15 = vshrl.u32 %v1832_v8, 16  ;;  %v1772_v17 = vld [vmem:[#allocation2 + $0xc4] sm:$0xf]  ;;  %1803 = vst [vmem:[#allocation3 + $0x444] sm:$0xf] %v1771_v10  ;;  %v2693_v18 = vor.u32 %v2692_v3, %v2689_v60 }
 0x14c   : > { %2286 = vst [vmem:[#allocation3 + $0x274] sm:$0xf] %v2068_v11  ;;  %v2703_v19 = vor.u32 %v2702_v7, %v2698_v4  ;;  %v1834_v20 = vld [vmem:[#allocation2 + $0x80] sm:$0x1]  ;;  %v2073_v21 = vshll.u32 %v1832_v8, 16  ;;  %v2079_v22 = vshll.u32 %v1833_v13, 16 }
 0x14d   : > { %1804 = vst [vmem:[#allocation3 + $0x468] sm:$0xf] %v1772_v17  ;;  %v2072_v24 = vrot.slane %v2070_v15, 4  ;;  %v2083_v26 = vshrl.u32 %v1833_v13, 16  ;;  %v2089_v27 = vshll.u32 %v1834_v20, 16  ;;  %v2694_v31 = vrot.slane %v2693_v18, 4 }
 0x14e   : > { %v2328_v28 = vld [vmem:[#allocation2 + $0x78] sm:$0xe]  ;;  %v2704_v32 = vrot.slane %v2703_v19, 4  ;;  %v2075_v36 = vrot.slane %v2073_v21, 5  ;;  %v2081_v48 = vrot.slane %v2079_v22, 5  ;;  %v6628_v21 = vpop.f32.mrf.mxu1 }
 0x14f   : > { %v2329_v37 = vld [vmem:[#allocation2 + $0x7c] sm:$0xf]  ;;  %v2085_v38 = vrot.slane %v2083_v26, 4  ;;  %v2091_v39 = vrot.slane %v2089_v27, 5  ;;  %v2330_v40 = vld [vmem:[#allocation2 + $0x80] sm:$0x1]  ;;  %v2699_v45 = vsel %vm7505_vm6, %v2694_v31, %v2698_v4  ;;  %v8083_v4 = vadd.f32 %v6557_v53, %v6556_v30 }
 0x150   : > { %v6120_v41 = vrot.slane %v2328_v28, 9  ;;  %v2462_v44 = vrot.slane %v2329_v37, 5  ;;  %v2709_v47 = vsel %vm7505_vm6, %v2704_v32, %v2708_v12  ;;  %v2076_v49 = vor.u32 %v2075_v36, %v2072_v24  ;;  %v2576_v51 = vld [vmem:[#allocation2 + $0x24] sm:$0xf]  ;;  %v2577_v52 = vld [vmem:[#allocation2 + $0x28] sm:$0xf]  ;;  %v6629_v36 = vpop.f32.mrf.mxu1 }
 0x151   : > { %v2465_v50 = vrot.slane %v2330_v40, 5  ;;  %3102 = vst [vmem:[#allocation3 + $0x1c] sm:$0xf] %v2699_v45  ;;  %3103 = vst [vmem:[#allocation3 + $0x40] sm:$0xf] %v2709_v47  ;;  %v2086_v58 = vor.u32 %v2085_v38, %v2081_v48 }
 0x152   : > { %v2463_v60 = vsel %vm7703_vm13, %v6120_v41, %v2462_v44  ;;  %v2464_v61 = vrot.slane %v2462_v44, 4  ;;  %2608 = vst [vmem:[#allocation3 + $0x60] sm:$0xf] %v2576_v51  ;;  %2609 = vst [vmem:[#allocation3 + $0x84] sm:$0xf] %v2577_v52  ;;  %v2077_v7 = vrot.slane %v2076_v49, 4  ;;  %v8093_v47 = vpop.f32.mrf.mxu1 }
 0x153   : > { %v2641_v1 = vld [vmem:[#allocation2 + $0x24] sm:$0xf]  ;;  %v2642_v3 = vld [vmem:[#allocation2 + $0x28] sm:$0xf]  ;;  %2559 = vst [vmem:[#allocation3 + $0x29c] sm:$0xf] %v2463_v60 }
 0x154   : > { %v2643_v8 = vld [vmem:[#allocation2 + $0x2c] sm:$0x1]  ;;  %v2711_v9 = vshrl.u32 %v2641_v1, 16  ;;  %v2714_v10 = vshll.u32 %v2641_v1, 16  ;;  %v2087_v12 = vrot.slane %v2086_v58, 4  ;;  %v2466_v13 = vsel %vm7703_vm13, %v2464_v61, %v2465_v50  ;;  %8734 = vst [vmem:[#allocation4_spill] sm:$0xff] %v8093_v47 }
 0x155   : > { %v7271_v11 = vld [vmem:[#allocation3 + $0x254] ss:$36 sps:$4 sm:$0xff]   ;;  %v2720_v15 = vshll.u32 %v2642_v3, 16  ;;  %v7268_v17 = vld [vmem:[#allocation3 + $0x444] ss:$36 sps:$4 sm:$0xff]   ;;  %v2082_v19 = vsel %vm7505_vm6, %v2077_v7, %v2081_v48  ;;  %v2724_v28 = vshrl.u32 %v2642_v3, 16  ;;  %v8095_v7 = vpop.f32.mrf.mxu0 }
 0x156   : > { %v7270_v18 = vld [vmem:[#allocation3 + $0x440] ss:$36 sps:$4 sm:$0xff]   ;;  %2560 = vst [vmem:[#allocation3 + $0x2c0] sm:$0xf] %v2466_v13  ;;  %v2713_v20 = vrot.slane %v2711_v9, 4  ;;  %5296 = vmatprep.mubr.bf16.mxu0 %v7271_v11  ;;  %v2092_v24 = vsel %vm7505_vm6, %v2087_v12, %v2091_v39  ;;  %v2716_v26 = vrot.slane %v2714_v10, 5  ;;  %5191 = vmatprep.mubr.bf16.mxu1 %v7268_v17  ;;  %v8091_v39 = vadd.f32 %v6629_v36, %v6628_v21 }
 0x157   : > { %v7273_v22 = vld [vmem:[#allocation3 + $0x250] ss:$36 sps:$4 sm:$0xff]   ;;  %2287 = vst [vmem:[#allocation3 + $0x298] sm:$0xf] %v2082_v19  ;;  %v2722_v27 = vrot.slane %v2720_v15, 5  ;;  %v2730_v30 = vshll.u32 %v2643_v8, 16  ;;  %5192 = vmatmul.mubr.bf16.gmra.mxu1 %v7270_v18  ;;  %v8097_v8 = vpop.f32.mrf.mxu1 }
 0x158   : > { %2288 = vst [vmem:[#allocation3 + $0x2bc] sm:$0xf] %v2092_v24  ;;  %v1835_v31 = vld [vmem:[#allocation2 + $0x84] sm:$0xf]  ;;  %v1836_v32 = vld [vmem:[#allocation2 + $0x88] sm:$0xf]  ;;  %5297 = vmatmul.mubr.bf16.gmra.mxu0 %v7273_v22  ;;  %v2717_v48 = vor.u32 %v2716_v26, %v2713_v20 }
 0x159   : > { %v2726_v37 = vrot.slane %v2724_v28, 4  ;;  %v1837_v38 = vld [vmem:[#allocation2 + $0x8c] sm:$0x1]  ;;  %v2094_v40 = vshrl.u32 %v1835_v31, 16  ;;  %v2097_v41 = vshll.u32 %v1835_v31, 16  ;;  %v2732_v44 = vrot.slane %v2730_v30, 5  ;;  %v6650_v20 = vpop.f32.mrf.mxu1 }
 0x15a   : > { %v2103_v45 = vshll.u32 %v1836_v32, 16  ;;  %v7274_v49 = vld [vmem:[#allocation3 + $0x18] ss:$36 sps:$4 sm:$0xff]   ;;  %v2718_v51 = vrot.slane %v2717_v48, 4  ;;  %v2107_v61 = vshrl.u32 %v1836_v32, 16  ;;  %v2113_v1 = vshll.u32 %v1837_v38, 16  ;;  %v8105_v48 = vpop.f32.mrf.mxu0 }
 0x15b   : > { %v7276_v50 = vld [vmem:[#allocation3 + $0x1c] ss:$36 sps:$4 sm:$0xff]   ;;  %v2727_v52 = vor.u32 %v2726_v37, %v2722_v27  ;;  %v2096_v53 = vrot.slane %v2094_v40, 4  ;;  %v2099_v58 = vrot.slane %v2097_v41, 5  ;;  %v2331_v3 = vld [vmem:[#allocation2 + $0x84] sm:$0xe]  ;;  %v6651_v37 = vpop.f32.mrf.mxu1 }
 0x15c   : > { %v2105_v60 = vrot.slane %v2103_v45, 5  ;;  %8735 = vst [vmem:[#allocation5_spill] sm:$0xff] %v8097_v8  ;;  %5393 = vmatprep.mubr.bf16.mxu1 %v7276_v50  ;;  %v2723_v9 = vsel %vm7505_vm6, %v2718_v51, %v2722_v27  ;;  %v2332_v12 = vld [vmem:[#allocation2 + $0x88] sm:$0xf]  ;;  %v2333_v13 = vld [vmem:[#allocation2 + $0x8c] sm:$0x1]  ;;  %v6652_v45 = vadd.f32 %v6651_v37, %v6650_v20 }
 0x15d   : > { %v2728_v10 = vrot.slane %v2727_v52, 4  ;;  %v2100_v11 = vor.u32 %v2099_v58, %v2096_v53  ;;  %v6121_v15 = vrot.slane %v2331_v3, 9  ;;  %3104 = vst [vmem:[#allocation3 + $0x64] sm:$0xf] %v2723_v9  ;;  %v2109_v17 = vrot.slane %v2107_v61, 4  ;;  %v6653_v58 = vpop.f32.mrf.mxu1 }
 0x15e   : > { %v2469_v18 = vrot.slane %v2332_v12, 5  ;;  %v2472_v19 = vrot.slane %v2333_v13, 5  ;;  %v7278_v21 = vld [vmem:[#allocation3 + $0x29c] ss:$36 sps:$4 sm:$0xff]   ;;  %v2115_v30 = vrot.slane %v2113_v1, 5  ;;  %v8112_v1 = vadd.f32 %v6652_v45, %v7957_v6 }
 0x15f   : > { %v7280_v22 = vld [vmem:[#allocation3 + $0x298] ss:$36 sps:$4 sm:$0xff]   ;;  %v2733_v24 = vsel %vm7505_vm6, %v2728_v10, %v2732_v44  ;;  %v2101_v26 = vrot.slane %v2100_v11, 4  ;;  %v2110_v28 = vor.u32 %v2109_v17, %v2105_v60  ;;  %5304 = vmatprep.mubr.bf16.mxu0 %v7278_v21  ;;  %5394 = vmatmul.mubr.bf16.vlgmr.msra.gmra.mxu1 %v7274_v49  ;;  %v2646_v44 = vld [vmem:[#allocation2 + $0x38] sm:$0x1]  ;;  %v6543_v13 = vadd.f32 %v7989_v25, %v7985_v5  ;;  %v6654_v17 = vpop.f32.mrf.mxu1 }
 0x160   : > { %3105 = vst [vmem:[#allocation3 + $0x88] sm:$0xf] %v2733_v24  ;;  %v2470_v27 = vsel %vm7703_vm13, %v6121_v15, %v2469_v18  ;;  %v2471_v31 = vrot.slane %v2469_v18, 4  ;;  %v2578_v32 = vld [vmem:[#allocation2 + $0x30] sm:$0xf]  ;;  %5305 = vmatmul.mubr.bf16.gmra.mxu0 %v7280_v22  ;;  %v6562_v15 = vpop.f32.mrf.mxu0  ;;  %v6655_v22 = vadd.f32 %v6654_v17, %v6653_v58 }
 0x161   : > { %v2579_v36 = vld [vmem:[#allocation2 + $0x34] sm:$0xf]  ;;  %v2106_v38 = vsel %vm7505_vm6, %v2101_v26, %v2105_v60  ;;  %2561 = vst [vmem:[#allocation3 + $0x2e4] sm:$0xf] %v2470_v27  ;;  %2610 = vst [vmem:[#allocation3 + $0xa8] sm:$0xf] %v2578_v32  ;;  %v6656_v25 = vpop.f32.mrf.mxu1 }
 0x162   : > { %2611 = vst [vmem:[#allocation3 + $0xcc] sm:$0xf] %v2579_v36  ;;  %v2644_v40 = vld [vmem:[#allocation2 + $0x30] sm:$0xf]  ;;  %v2645_v41 = vld [vmem:[#allocation2 + $0x34] sm:$0xf]  ;;  %v2473_v51 = vsel %vm7703_vm13, %v2471_v31, %v2472_v19  ;;  %v6563_v27 = vpop.f32.mrf.mxu0  ;;  %v8120_v5 = vadd.f32 %v6655_v22, %v6543_v13 }
 0x163   : > { %v2111_v50 = vrot.slane %v2110_v28, 4  ;;  %2289 = vst [vmem:[#allocation3 + $0x2e0] sm:$0xf] %v2106_v38  ;;  %v2735_v52 = vshrl.u32 %v2644_v40, 16  ;;  %v2738_v53 = vshll.u32 %v2644_v40, 16  ;;  %v2744_v49 = vshll.u32 %v2645_v41, 16 }
 0x164   : > { %2562 = vst [vmem:[#allocation3 + $0x308] sm:$0xf] %v2473_v51  ;;  %v2748_v61 = vshrl.u32 %v2645_v41, 16  ;;  %v2754_v60 = vshll.u32 %v2646_v44, 16  ;;  %v1838_v11 = vld [vmem:[#allocation2 + $0x90] sm:$0xf]  ;;  %v8118_v38 = vadd.f32 %v6563_v27, %v6562_v15  ;;  %v8126_v22 = vpop.f32.mrf.mxu0 }
 0x165   : > { %v2116_v3 = vsel %vm7505_vm6, %v2111_v50, %v2115_v30  ;;  %v2737_v9 = vrot.slane %v2735_v52, 4  ;;  %v2740_v10 = vrot.slane %v2738_v53, 5  ;;  %v1839_v12 = vld [vmem:[#allocation2 + $0x94] sm:$0xf]  ;;  %v2746_v18 = vrot.slane %v2744_v49, 5  ;;  %v6657_v49 = vpop.f32.mrf.mxu1 }
 0x166   : > { %2290 = vst [vmem:[#allocation3 + $0x304] sm:$0xf] %v2116_v3  ;;  %v2750_v19 = vrot.slane %v2748_v61, 4  ;;  %v2756_v20 = vrot.slane %v2754_v60, 5  ;;  %v1840_v21 = vld [vmem:[#allocation2 + $0x98] sm:$0x1] }
 0x167   : > { %v2741_v6 = vor.u32 %v2740_v10, %v2737_v9  ;;  %v2118_v24 = vshrl.u32 %v1838_v11, 16  ;;  %v2121_v26 = vshll.u32 %v1838_v11, 16  ;;  %v2127_v28 = vshll.u32 %v1839_v12, 16  ;;  %v2334_v30 = vld [vmem:[#allocation2 + $0x90] sm:$0xe] }
 0x168   : > { %v7281_v31 = vld [vmem:[#allocation3 + $0x64] ss:$36 sps:$4 sm:$0xff]   ;;  %v2751_v36 = vor.u32 %v2750_v19, %v2746_v18  ;;  %v2131_v37 = vshrl.u32 %v1839_v12, 16  ;;  %v2335_v50 = vld [vmem:[#allocation2 + $0x94] sm:$0xf]  ;;  %v2137_v53 = vshll.u32 %v1840_v21, 16 }
 0x169   : > { %v7285_v32 = vld [vmem:[#allocation3 + $0x60] ss:$36 sps:$4 sm:$0xff]   ;;  %v2742_v40 = vrot.slane %v2741_v6, 4  ;;  %v2120_v41 = vrot.slane %v2118_v24, 4  ;;  %v2123_v44 = vrot.slane %v2121_v26, 5  ;;  %v2129_v45 = vrot.slane %v2127_v28, 5  ;;  %5401 = vmatprep.mubr.bf16.mxu1 %v7281_v31  ;;  %v6659_v6 = vpop.f32.mrf.mxu1 }
 0x16a   : > { %v2752_v51 = vrot.slane %v2751_v36, 4  ;;  %v2133_v52 = vrot.slane %v2131_v37, 4  ;;  %v2336_v58 = vld [vmem:[#allocation2 + $0x98] sm:$0x1]  ;;  %5402 = vmatmul.mubr.bf16.gmra.mxu1 %v7285_v32  ;;  %v6122_v3 = vrot.slane %v2334_v30, 9  ;;  %v2476_v9 = vrot.slane %v2335_v50, 5 }
 0x16b   : > { %v2747_v61 = vsel %vm7505_vm6, %v2742_v40, %v2746_v18  ;;  %v2124_v60 = vor.u32 %v2123_v44, %v2120_v41  ;;  %v2580_v10 = vld [vmem:[#allocation2 + $0x3c] sm:$0xf]  ;;  %v2581_v11 = vld [vmem:[#allocation2 + $0x40] sm:$0xf]  ;;  %v2139_v15 = vrot.slane %v2137_v53, 5  ;;  %v2479_v17 = vrot.slane %v2336_v58, 5 }
 0x16c   : > { %v2757_v12 = vsel %vm7505_vm6, %v2752_v51, %v2756_v20  ;;  %3106 = vst [vmem:[#allocation3 + $0xac] sm:$0xf] %v2747_v61  ;;  %v2134_v13 = vor.u32 %v2133_v52, %v2129_v45  ;;  %2612 = vst [vmem:[#allocation3 + $0xf0] sm:$0xf] %v2580_v10  ;;  %v2647_v19 = vld [vmem:[#allocation2 + $0x3c] sm:$0xf]  ;;  %v2477_v28 = vsel %vm7703_vm13, %v6122_v3, %v2476_v9  ;;  %v6660_v51 = vpop.f32.mrf.mxu1 }
 0x16d   : > { %2613 = vst [vmem:[#allocation3 + $0x114] sm:$0xf] %v2581_v11  ;;  %v2648_v21 = vld [vmem:[#allocation2 + $0x40] sm:$0xf]  ;;  %v7286_v24 = vld [vmem:[#allocation3 + $0x2e0] ss:$36 sps:$4 sm:$0xff]   ;;  %v6658_v30 = vadd.f32 %v6657_v49, %v6656_v25 }
 0x16e   : > { %v7283_v18 = vld [vmem:[#allocation3 + $0x2e4] ss:$36 sps:$4 sm:$0xff]   ;;  %3107 = vst [vmem:[#allocation3 + $0xd0] sm:$0xf] %v2757_v12  ;;  %v2125_v26 = vrot.slane %v2124_v60, 4  ;;  %v2135_v20 = vrot.slane %v2134_v13, 4  ;;  %v8136_v60 = vpop.f32.mrf.mxu0 }
 0x16f   : > { %v2478_v27 = vrot.slane %v2476_v9, 4  ;;  %2563 = vst [vmem:[#allocation3 + $0x32c] sm:$0xf] %v2477_v28  ;;  %v2649_v31 = vld [vmem:[#allocation2 + $0x44] sm:$0x1]  ;;  %v2759_v32 = vshrl.u32 %v2647_v19, 16  ;;  %5312 = vmatprep.mubr.bf16.mxu0 %v7283_v18 }
 0x170   : > { %v2762_v36 = vshll.u32 %v2647_v19, 16  ;;  %v2130_v37 = vsel %vm7505_vm6, %v2125_v26, %v2129_v45  ;;  %v2768_v40 = vshll.u32 %v2648_v21, 16  ;;  %v2772_v41 = vshrl.u32 %v2648_v21, 16  ;;  %v1841_v50 = vld [vmem:[#allocation2 + $0x9c] sm:$0xf]  ;;  %5313 = vmatmul.mubr.bf16.gmra.mxu0 %v7286_v24 }
 0x171   : > { %v2778_v44 = vshll.u32 %v2649_v31, 16  ;;  %v2140_v52 = vsel %vm7505_vm6, %v2135_v20, %v2139_v15  ;;  %2291 = vst [vmem:[#allocation3 + $0x328] sm:$0xf] %v2130_v37  ;;  %v2480_v25 = vsel %vm7703_vm13, %v2478_v27, %v2479_v17  ;;  %v2761_v53 = vrot.slane %v2759_v32, 4  ;;  %v1842_v49 = vld [vmem:[#allocation2 + $0xa0] sm:$0xf]  ;;  %v6662_v20 = vpop.f32.mrf.mxu1  ;;  %v6568_v37 = vpop.f32.mrf.mxu0 }
 0x172   : > { %v2764_v58 = vrot.slane %v2762_v36, 5  ;;  %v1843_v61 = vld [vmem:[#allocation2 + $0xa4] sm:$0x1]  ;;  %2292 = vst [vmem:[#allocation3 + $0x34c] sm:$0xf] %v2140_v52  ;;  %v2770_v45 = vrot.slane %v2768_v40, 5  ;;  %v6549_v36 = vadd.f32 %v8030_v0, %v8018_v43  ;;  %v8141_v40 = vadd.f32 %v6658_v30, %v8008_v2 }
 0x173   : > { %2564 = vst [vmem:[#allocation3 + $0x350] sm:$0xf] %v2480_v25  ;;  %v2774_v3 = vrot.slane %v2772_v41, 4  ;;  %v2780_v9 = vrot.slane %v2778_v44, 5  ;;  %v2142_v10 = vshrl.u32 %v1841_v50, 16  ;;  %v2145_v13 = vshll.u32 %v1841_v50, 16  ;;  %v6569_v43 = vpop.f32.mrf.mxu0 }
 0x174   : > { %v2337_v11 = vld [vmem:[#allocation2 + $0x9c] sm:$0xe]  ;;  %v2765_v12 = vor.u32 %v2764_v58, %v2761_v53  ;;  %v2151_v15 = vshll.u32 %v1842_v49, 16  ;;  %v2155_v19 = vshrl.u32 %v1842_v49, 16  ;;  %v2338_v21 = vld [vmem:[#allocation2 + $0xa0] sm:$0xf]  ;;  %v6661_v41 = vadd.f32 %v6660_v51, %v6659_v6  ;;  %v6663_v58 = vpop.f32.mrf.mxu1 }
 0x175   : > { %v2775_v18 = vor.u32 %v2774_v3, %v2770_v45  ;;  %v2144_v17 = vrot.slane %v2142_v10, 4  ;;  %v2161_v24 = vshll.u32 %v1843_v61, 16  ;;  %v2339_v26 = vld [vmem:[#allocation2 + $0xa4] sm:$0x1]  ;;  %v6123_v28 = vrot.slane %v2337_v11, 9 }
 0x176   : > { %v7287_v27 = vld [vmem:[#allocation3 + $0xac] ss:$36 sps:$4 sm:$0xff]   ;;  %v2766_v32 = vrot.slane %v2765_v12, 4  ;;  %v2147_v50 = vrot.slane %v2145_v13, 5  ;;  %v2153_v52 = vrot.slane %v2151_v15, 5  ;;  %v2157_v25 = vrot.slane %v2155_v19, 4 }
 0x177   : > { %v7292_v31 = vld [vmem:[#allocation3 + $0xa8] ss:$36 sps:$4 sm:$0xff]   ;;  %v2776_v44 = vrot.slane %v2775_v18, 4  ;;  %v2582_v53 = vld [vmem:[#allocation2 + $0x48] sm:$0xf]  ;;  %5409 = vmatprep.mubr.bf16.mxu1 %v7287_v27  ;;  %v2163_v61 = vrot.slane %v2161_v24, 5  ;;  %v8147_v12 = vadd.f32 %v6569_v43, %v6568_v37  ;;  %v8153_v18 = vadd.f32 %v6661_v41, %v6549_v36  ;;  %v6665_v24 = vpop.f32.mrf.mxu1 }
 0x178   : > { %v2771_v49 = vsel %vm7505_vm6, %v2766_v32, %v2770_v45  ;;  %v2483_v3 = vrot.slane %v2338_v21, 5  ;;  %v2486_v10 = vrot.slane %v2339_v26, 5  ;;  %v2583_v11 = vld [vmem:[#allocation2 + $0x4c] sm:$0xf]  ;;  %2614 = vst [vmem:[#allocation3 + $0x138] sm:$0xf] %v2582_v53  ;;  %5410 = vmatmul.mubr.bf16.gmra.mxu1 %v7292_v31  ;;  %v2148_v0 = vor.u32 %v2147_v50, %v2144_v17  ;;  %v8151_v21 = vpop.f32.mrf.mxu0 }
 0x179   : > { %v2781_v2 = vsel %vm7505_vm6, %v2776_v44, %v2780_v9  ;;  %3108 = vst [vmem:[#allocation3 + $0xf4] sm:$0xf] %v2771_v49  ;;  %v2158_v6 = vor.u32 %v2157_v25, %v2153_v52  ;;  %2615 = vst [vmem:[#allocation3 + $0x15c] sm:$0xf] %v2583_v11  ;;  %v2650_v30 = vld [vmem:[#allocation2 + $0x48] sm:$0xf]  ;;  %v6664_v9 = vadd.f32 %v6663_v58, %v6662_v20 }
 0x17a   : > { %v2651_v51 = vld [vmem:[#allocation2 + $0x4c] sm:$0xf]  ;;  %v7290_v13 = vld [vmem:[#allocation3 + $0x32c] ss:$36 sps:$4 sm:$0xff]   ;;  %3109 = vst [vmem:[#allocation3 + $0x118] sm:$0xf] %v2781_v2  ;;  %v2484_v15 = vsel %vm7703_vm13, %v6123_v28, %v2483_v3  ;;  %v8162_v43 = vpop.f32.mrf.mxu0  ;;  %v6666_v2 = vpop.f32.mrf.mxu1 }
 0x17b   : > { %v7293_v45 = vld [vmem:[#allocation3 + $0x328] ss:$36 sps:$4 sm:$0xff]   ;;  %v2485_v19 = vrot.slane %v2483_v3, 4  ;;  %v2149_v17 = vrot.slane %v2148_v0, 4  ;;  %v2159_v26 = vrot.slane %v2158_v6, 4  ;;  %v2783_v31 = vshrl.u32 %v2650_v30, 16  ;;  %5320 = vmatprep.mubr.bf16.mxu0 %v7290_v13 }
 0x17c   : > { %2565 = vst [vmem:[#allocation3 + $0x374] sm:$0xf] %v2484_v15  ;;  %v2652_v27 = vld [vmem:[#allocation2 + $0x50] sm:$0x1]  ;;  %v2786_v32 = vshll.u32 %v2650_v30, 16  ;;  %v2792_v44 = vshll.u32 %v2651_v51, 16  ;;  %5321 = vmatmul.mubr.bf16.gmra.mxu0 %v7293_v45 }
 0x17d   : > { %v2487_v37 = vsel %vm7703_vm13, %v2485_v19, %v2486_v10  ;;  %v2796_v50 = vshrl.u32 %v2651_v51, 16  ;;  %v2802_v28 = vshll.u32 %v2652_v27, 16  ;;  %v2154_v36 = vsel %vm7505_vm6, %v2149_v17, %v2153_v52  ;;  %v1844_v53 = vld [vmem:[#allocation2 + $0xa8] sm:$0xf]  ;;  %v1845_v10 = vld [vmem:[#allocation2 + $0xac] sm:$0xf] }
 0x17e   : > { %v2164_v20 = vsel %vm7505_vm6, %v2159_v26, %v2163_v61  ;;  %2566 = vst [vmem:[#allocation3 + $0x398] sm:$0xf] %v2487_v37  ;;  %v2785_v41 = vrot.slane %v2783_v31, 4  ;;  %v2788_v25 = vrot.slane %v2786_v32, 5  ;;  %2293 = vst [vmem:[#allocation3 + $0x370] sm:$0xf] %v2154_v36  ;;  %v6555_v31 = vadd.f32 %v8065_v62, %v8059_v34 }
 0x17f   : > { %2294 = vst [vmem:[#allocation3 + $0x394] sm:$0xf] %v2164_v20  ;;  %v2794_v49 = vrot.slane %v2792_v44, 5  ;;  %v2798_v3 = vrot.slane %v2796_v50, 4  ;;  %v2166_v11 = vshrl.u32 %v1844_v53, 16  ;;  %v2169_v6 = vshll.u32 %v1844_v53, 16 }
 0x180   : > { %v2789_v0 = vor.u32 %v2788_v25, %v2785_v41  ;;  %v1846_v52 = vld [vmem:[#allocation2 + $0xb0] sm:$0x1]  ;;  %v2175_v30 = vshll.u32 %v1845_v10, 16  ;;  %v2179_v61 = vshrl.u32 %v1845_v10, 16  ;;  %v2804_v13 = vrot.slane %v2802_v28, 5  ;;  %v6574_v25 = vpop.f32.mrf.mxu0 }
 0x181   : > { %v2799_v51 = vor.u32 %v2798_v3, %v2794_v49  ;;  %v2168_v45 = vrot.slane %v2166_v11, 4  ;;  %v2185_v15 = vshll.u32 %v1846_v52, 16  ;;  %v2340_v19 = vld [vmem:[#allocation2 + $0xa8] sm:$0xe]  ;;  %v7294_v17 = vld [vmem:[#allocation3 + $0xf4] ss:$36 sps:$4 sm:$0xff]   ;;  %v8167_v32 = vadd.f32 %v6664_v9, %v8036_v35 }
 0x182   : > { %v7298_v26 = vld [vmem:[#allocation3 + $0xf0] ss:$36 sps:$4 sm:$0xff]   ;;  %v2790_v27 = vrot.slane %v2789_v0, 4  ;;  %v6667_v37 = vadd.f32 %v6666_v2, %v6665_v24  ;;  %v2171_v50 = vrot.slane %v2169_v6, 5  ;;  %v2177_v36 = vrot.slane %v2175_v30, 5  ;;  %5417 = vmatprep.mubr.bf16.mxu1 %v7294_v17  ;;  %v6668_v0 = vpop.f32.mrf.mxu1  ;;  %v6575_v52 = vpop.f32.mrf.mxu0 }
 0x183   : > { %v2800_v44 = vrot.slane %v2799_v51, 4  ;;  %v2181_v20 = vrot.slane %v2179_v61, 4  ;;  %v2341_v41 = vld [vmem:[#allocation2 + $0xac] sm:$0xf]  ;;  %v2187_v53 = vrot.slane %v2185_v15, 5  ;;  %v6124_v10 = vrot.slane %v2340_v19, 9  ;;  %5418 = vmatmul.mubr.bf16.gmra.mxu1 %v7298_v26 }
 0x184   : > { %v2795_v28 = vsel %vm7505_vm6, %v2790_v27, %v2794_v49  ;;  %v2342_v3 = vld [vmem:[#allocation2 + $0xb0] sm:$0x1]  ;;  %v2490_v11 = vrot.slane %v2341_v41, 5  ;;  %v2172_v34 = vor.u32 %v2171_v50, %v2168_v45  ;;  %v2584_v24 = vld [vmem:[#allocation2 + $0x54] sm:$0xf]  ;;  %v8175_v61 = vadd.f32 %v6575_v52, %v6574_v25  ;;  %v8179_v26 = vpop.f32.mrf.mxu0 }
 0x185   : > { %v2805_v35 = vsel %vm7505_vm6, %v2800_v44, %v2804_v13  ;;  %3110 = vst [vmem:[#allocation3 + $0x13c] sm:$0xf] %v2795_v28  ;;  %v2182_v62 = vor.u32 %v2181_v20, %v2177_v36  ;;  %v2493_v9 = vrot.slane %v2342_v3, 5  ;;  %v2585_v2 = vld [vmem:[#allocation2 + $0x58] sm:$0xf]  ;;  %v8177_v51 = vadd.f32 %v6667_v37, %v6555_v31  ;;  %v6669_v13 = vpop.f32.mrf.mxu1 }
 0x186   : > { %v7296_v6 = vld [vmem:[#allocation3 + $0x374] ss:$36 sps:$4 sm:$0xff]   ;;  %3111 = vst [vmem:[#allocation3 + $0x160] sm:$0xf] %v2805_v35  ;;  %v2491_v49 = vsel %vm7703_vm13, %v6124_v10, %v2490_v11  ;;  %v2492_v30 = vrot.slane %v2490_v11, 4  ;;  %v2173_v45 = vrot.slane %v2172_v34, 4  ;;  %v6670_v27 = vadd.f32 %v6669_v13, %v6668_v0 }
 0x187   : > { %2616 = vst [vmem:[#allocation3 + $0x180] sm:$0xf] %v2584_v24  ;;  %2617 = vst [vmem:[#allocation3 + $0x1a4] sm:$0xf] %v2585_v2  ;;  %v7299_v15 = vld [vmem:[#allocation3 + $0x370] ss:$36 sps:$4 sm:$0xff]   ;;  %5328 = vmatprep.mubr.bf16.mxu0 %v7296_v6  ;;  %v6671_v24 = vpop.f32.mrf.mxu1 }
 0x188   : > { %v2183_v19 = vrot.slane %v2182_v62, 4  ;;  %2567 = vst [vmem:[#allocation3 + $0x3bc] sm:$0xf] %v2491_v49  ;;  %v2653_v17 = vld [vmem:[#allocation2 + $0x54] sm:$0xf]  ;;  %v2494_v44 = vsel %vm7703_vm13, %v2492_v30, %v2493_v9  ;;  %5329 = vmatmul.mubr.bf16.gmra.mxu0 %v7299_v15  ;;  %v2178_v31 = vsel %vm7505_vm6, %v2173_v45, %v2177_v36  ;;  %v8187_v30 = vpop.f32.mrf.mxu0 }
 0x189   : > { %v2654_v50 = vld [vmem:[#allocation2 + $0x58] sm:$0xf]  ;;  %v2655_v20 = vld [vmem:[#allocation2 + $0x5c] sm:$0x1]  ;;  %v2807_v41 = vshrl.u32 %v2653_v17, 16  ;;  %v2810_v25 = vshll.u32 %v2653_v17, 16 }
 0x18a   : > { %v2188_v37 = vsel %vm7505_vm6, %v2183_v19, %v2187_v53  ;;  %2568 = vst [vmem:[#allocation3 + $0x3e0] sm:$0xf] %v2494_v44  ;;  %v2816_v28 = vshll.u32 %v2654_v50, 16  ;;  %v2820_v3 = vshrl.u32 %v2654_v50, 16  ;;  %v1847_v10 = vld [vmem:[#allocation2 + $0xb4] sm:$0xf] }
 0x18b   : > { %v1848_v11 = vld [vmem:[#allocation2 + $0xb8] sm:$0xf]  ;;  %2295 = vst [vmem:[#allocation3 + $0x3b8] sm:$0xf] %v2178_v31  ;;  %2296 = vst [vmem:[#allocation3 + $0x3dc] sm:$0xf] %v2188_v37 }
 0x18c   : > { %v2809_v0 = vrot.slane %v2807_v41, 4  ;;  %v2812_v35 = vrot.slane %v2810_v25, 5  ;;  %v2826_v34 = vshll.u32 %v2655_v20, 16  ;;  %v1849_v62 = vld [vmem:[#allocation2 + $0xbc] sm:$0x1]  ;;  %v2190_v9 = vshrl.u32 %v1847_v10, 16 }
 0x18d   : > { %v2818_v2 = vrot.slane %v2816_v28, 5  ;;  %v2822_v52 = vrot.slane %v2820_v3, 4  ;;  %v2193_v6 = vshll.u32 %v1847_v10, 16  ;;  %v2199_v36 = vshll.u32 %v1848_v11, 16  ;;  %v2343_v49 = vld [vmem:[#allocation2 + $0xb4] sm:$0xe] }
 0x18e   : > { %v2813_v53 = vor.u32 %v2812_v35, %v2809_v0  ;;  %v2828_v13 = vrot.slane %v2826_v34, 5  ;;  %v2192_v15 = vrot.slane %v2190_v9, 4  ;;  %v2203_v45 = vshrl.u32 %v1848_v11, 16  ;;  %v2344_v19 = vld [vmem:[#allocation2 + $0xb8] sm:$0xf]  ;;  %v6672_v0 = vpop.f32.mrf.mxu1 }
 0x18f   : > { %v7300_v17 = vld [vmem:[#allocation3 + $0x13c] ss:$36 sps:$4 sm:$0xff]   ;;  %v2823_v50 = vor.u32 %v2822_v52, %v2818_v2  ;;  %v2195_v41 = vrot.slane %v2193_v6, 5  ;;  %v6561_v20 = vadd.f32 %v8105_v48, %v8095_v7  ;;  %v8192_v25 = vadd.f32 %v6670_v27, %v8083_v4  ;;  %v2345_v10 = vld [vmem:[#allocation2 + $0xbc] sm:$0x1]  ;;  %v6580_v52 = vpop.f32.mrf.mxu0 }
 0x190   : > { %v7305_v44 = vld [vmem:[#allocation3 + $0x138] ss:$36 sps:$4 sm:$0xff]   ;;  %v2814_v31 = vrot.slane %v2813_v53, 4  ;;  %v2201_v37 = vrot.slane %v2199_v36, 5  ;;  %v2205_v28 = vrot.slane %v2203_v45, 4  ;;  %v2209_v3 = vshll.u32 %v1849_v62, 16  ;;  %5425 = vmatprep.mubr.bf16.mxu1 %v7300_v17 }
 0x191   : > { %v2824_v35 = vrot.slane %v2823_v50, 4  ;;  %v2196_v11 = vor.u32 %v2195_v41, %v2192_v15  ;;  %v6125_v34 = vrot.slane %v2343_v49, 9  ;;  %v2497_v9 = vrot.slane %v2344_v19, 5  ;;  %v2586_v58 = vld [vmem:[#allocation2 + $0x60] sm:$0xf]  ;;  %5426 = vmatmul.mubr.bf16.gmra.mxu1 %v7305_v44  ;;  %v6581_v19 = vpop.f32.mrf.mxu0 }
 0x192   : > { %v2819_v7 = vsel %vm7505_vm6, %v2814_v31, %v2818_v2  ;;  %v2206_v48 = vor.u32 %v2205_v28, %v2201_v37  ;;  %v2211_v4 = vrot.slane %v2209_v3, 5  ;;  %v2500_v27 = vrot.slane %v2345_v10, 5  ;;  %v2587_v6 = vld [vmem:[#allocation2 + $0x64] sm:$0xf]  ;;  %2618 = vst [vmem:[#allocation3 + $0x1c8] sm:$0xf] %v2586_v58  ;;  %v6674_v31 = vpop.f32.mrf.mxu1 }
 0x193   : > { %v2656_v36 = vld [vmem:[#allocation2 + $0x60] sm:$0xf]  ;;  %v7303_v62 = vld [vmem:[#allocation3 + $0x3bc] ss:$36 sps:$4 sm:$0xff]   ;;  %v2829_v53 = vsel %vm7505_vm6, %v2824_v35, %v2828_v13  ;;  %3112 = vst [vmem:[#allocation3 + $0x184] sm:$0xf] %v2819_v7  ;;  %v2498_v49 = vsel %vm7703_vm13, %v6125_v34, %v2497_v9  ;;  %v8200_v58 = vadd.f32 %v6581_v19, %v6580_v52  ;;  %v6673_v41 = vadd.f32 %v6672_v0, %v6671_v24  ;;  %v8208_v0 = vpop.f32.mrf.mxu0 }
 0x194   : > { %v2197_v15 = vrot.slane %v2196_v11, 4  ;;  %v2499_v45 = vrot.slane %v2497_v9, 4  ;;  %2619 = vst [vmem:[#allocation3 + $0x1ec] sm:$0xf] %v2587_v6  ;;  %v7306_v17 = vld [vmem:[#allocation3 + $0x3b8] ss:$36 sps:$4 sm:$0xff]   ;;  %5336 = vmatprep.mubr.bf16.mxu0 %v7303_v62  ;;  %v6675_v52 = vpop.f32.mrf.mxu1 }
 0x195   : > { %3113 = vst [vmem:[#allocation3 + $0x1a8] sm:$0xf] %v2829_v53  ;;  %v2207_v2 = vrot.slane %v2206_v48, 4  ;;  %2569 = vst [vmem:[#allocation3 + $0x404] sm:$0xf] %v2498_v49  ;;  %v2831_v50 = vshrl.u32 %v2656_v36, 16  ;;  %5337 = vmatmul.mubr.bf16.gmra.mxu0 %v7306_v17  ;;  %v8210_v6 = vadd.f32 %v6673_v41, %v6561_v20 }
 0x196   : > { %v2657_v44 = vld [vmem:[#allocation2 + $0x64] sm:$0xf]  ;;  %v2202_v13 = vsel %vm7505_vm6, %v2197_v15, %v2201_v37  ;;  %v2501_v28 = vsel %vm7703_vm13, %v2499_v45, %v2500_v27  ;;  %v2658_v3 = vld [vmem:[#allocation2 + $0x68] sm:$0x1]  ;;  %v2834_v10 = vshll.u32 %v2656_v36, 16  ;;  %v6676_v36 = vadd.f32 %v6675_v52, %v6674_v31  ;;  %v6677_v45 = vpop.f32.mrf.mxu1 }
 0x197   : > { %v2840_v35 = vshll.u32 %v2657_v44, 16  ;;  %v2212_v11 = vsel %vm7505_vm6, %v2207_v2, %v2211_v4  ;;  %2297 = vst [vmem:[#allocation3 + $0x400] sm:$0xf] %v2202_v13  ;;  %2570 = vst [vmem:[#allocation3 + $0x428] sm:$0xf] %v2501_v28  ;;  %v2833_v34 = vrot.slane %v2831_v50, 4 }
 0x198   : > { %v2844_v9 = vshrl.u32 %v2657_v44, 16  ;;  %v2850_v24 = vshll.u32 %v2658_v3, 16  ;;  %2298 = vst [vmem:[#allocation3 + $0x424] sm:$0xf] %v2212_v11  ;;  %v2836_v37 = vrot.slane %v2834_v10, 5  ;;  %v8736_v53 = vrot.slane %v8044_v59, 4  ;;  %v8216_v3 = vpop.f32.mrf.mxu0  ;;  %v6678_v59 = vpop.f32.mrf.mxu1 }
 0x199   : > { %v2842_v7 = vrot.slane %v2840_v35, 5  ;;  %v825_v48 = vld [vmem:[#allocation2 + $0xc8] sm:$0x1]  ;;  %v1850_v27 = vld [vmem:[#allocation2 + $0xc0] sm:$0xf]  ;;  %v6567_v11 = vadd.f32 %v8136_v60, %v8126_v22 }
 0x19a   : > { %v2846_v62 = vrot.slane %v2844_v9, 4  ;;  %v826_v4 = vsel %vm7511_vm8, %v8736_v53, %v825_v48  ;;  %v1851_v15 = vld [vmem:[#allocation2 + $0xc4] sm:$0xf]  ;;  %v2214_v49 = vshrl.u32 %v1850_v27, 16  ;;  %v2837_v19 = vor.u32 %v2836_v37, %v2833_v34  ;;  %v2346_v50 = vld [vmem:[#allocation2 + $0xc0] sm:$0xe] }
 0x19b   : > { %827 = vst [vmem:[#allocation2 + $0xc8] sm:$0x1] %v826_v4  ;;  %v2217_v17 = vshll.u32 %v1850_v27, 16  ;;  %v2223_v2 = vshll.u32 %v1851_v15, 16  ;;  %v2227_v44 = vshrl.u32 %v1851_v15, 16  ;;  %v2852_v28 = vrot.slane %v2850_v24, 5 }
 0x19c   : > { %v2847_v13 = vor.u32 %v2846_v62, %v2842_v7  ;;  %v2216_v20 = vrot.slane %v2214_v49, 4  ;;  %v2347_v41 = vld [vmem:[#allocation2 + $0xc4] sm:$0xf]  ;;  %v6126_v31 = vrot.slane %v2346_v50, 9  ;;  %v7307_v10 = vld [vmem:[#allocation3 + $0x184] ss:$36 sps:$4 sm:$0xff]   ;;  %v8221_v34 = vadd.f32 %v6676_v36, %v8118_v38 }
 0x19d   : > { %v7311_v42 = vld [vmem:[#allocation3 + $0x180] ss:$36 sps:$4 sm:$0xff]   ;;  %v2838_v35 = vrot.slane %v2837_v19, 4  ;;  %v6679_v9 = vadd.f32 %v6678_v59, %v6677_v45  ;;  %v2219_v37 = vrot.slane %v2217_v17, 5  ;;  %v2225_v48 = vrot.slane %v2223_v2, 5  ;;  %5433 = vmatprep.mubr.bf16.mxu1 %v7307_v10  ;;  %v6586_v17 = vpop.f32.mrf.mxu0 }
 0x19e   : > { %v2848_v52 = vrot.slane %v2847_v13, 4  ;;  %v2229_v24 = vrot.slane %v2227_v44, 4  ;;  %v2588_v27 = vld [vmem:[#allocation2 + $0x6c] sm:$0xf]  ;;  %v2504_v53 = vrot.slane %v2347_v41, 5  ;;  %5434 = vmatmul.mubr.bf16.gmra.mxu1 %v7311_v42  ;;  %v8231_v41 = vpop.f32.mrf.mxu1 }
 0x19f   : > { %v2843_v62 = vsel %vm7505_vm6, %v2838_v35, %v2842_v7  ;;  %v2589_v4 = vld [vmem:[#allocation2 + $0x70] sm:$0xf]  ;;  %2620 = vst [vmem:[#allocation3 + $0x210] sm:$0xf] %v2588_v27  ;;  %v2659_v15 = vld [vmem:[#allocation2 + $0x6c] sm:$0xf]  ;;  %v8225_v49 = vadd.f32 %v6679_v9, %v6567_v11  ;;  %v2220_v36 = vor.u32 %v2219_v37, %v2216_v20  ;;  %v8235_v20 = vadd.f32 %v8162_v43, %v8151_v21  ;;  %v6587_v35 = vpop.f32.mrf.mxu0 }
 0x1a0   : > { %v7309_v22 = vld [vmem:[#allocation3 + $0x404] ss:$36 sps:$4 sm:$0xff]   ;;  %v2853_v60 = vsel %vm7505_vm6, %v2848_v52, %v2852_v28  ;;  %3114 = vst [vmem:[#allocation3 + $0x1cc] sm:$0xf] %v2843_v62  ;;  %v2230_v45 = vor.u32 %v2229_v24, %v2225_v48  ;;  %2621 = vst [vmem:[#allocation3 + $0x234] sm:$0xf] %v2589_v4  ;;  %v2505_v7 = vsel %vm7703_vm13, %v6126_v31, %v2504_v53  ;;  %v6681_v24 = vpop.f32.mrf.mxu1 }
 0x1a1   : > { %v7312_v38 = vld [vmem:[#allocation3 + $0x400] ss:$36 sps:$4 sm:$0xff]   ;;  %v2855_v19 = vshrl.u32 %v2659_v15, 16  ;;  %3115 = vst [vmem:[#allocation3 + $0x1f0] sm:$0xf] %v2853_v60  ;;  %v2506_v2 = vrot.slane %v2504_v53, 4  ;;  %5344 = vmatprep.mubr.bf16.mxu0 %v7309_v22  ;;  %v6589_v22 = vpop.f32.mrf.mxu0 }
 0x1a2   : > { %v2660_v44 = vld [vmem:[#allocation2 + $0x70] sm:$0xf]  ;;  %v2661_v50 = vld [vmem:[#allocation2 + $0x74] sm:$0x1]  ;;  %v2858_v13 = vshll.u32 %v2659_v15, 16  ;;  %v2221_v10 = vrot.slane %v2220_v36, 4  ;;  %5345 = vmatmul.mubr.bf16.gmra.mxu0 %v7312_v38 }
 0x1a3   : > { %v1852_v59 = vld [vmem:[#allocation2 + $0xc8] sm:$0x1]  ;;  %v2231_v28 = vrot.slane %v2230_v45, 4  ;;  %2571 = vst [vmem:[#allocation3 + $0x44c] sm:$0xf] %v2505_v7  ;;  %v2857_v9 = vrot.slane %v2855_v19, 4  ;;  %v6683_v19 = vpop.f32.mrf.mxu1 }
 0x1a4   : > { %v2348_v42 = vld [vmem:[#allocation2 + $0xc8] sm:$0x1]  ;;  %v2233_v11 = vshll.u32 %v1852_v59, 16  ;;  %v2860_v52 = vrot.slane %v2858_v13, 5  ;;  %v3134_v37 = vld [vmem:[#allocation2 + $0x18] sm:$0xe]  ;;  %v2226_v27 = vsel %vm7505_vm6, %v2221_v10, %v2225_v48 }
 0x1a5   : > { %v2507_v31 = vrot.slane %v2348_v42, 5  ;;  %v2864_v62 = vshll.u32 %v2660_v44, 16  ;;  %v2868_v53 = vshrl.u32 %v2660_v44, 16  ;;  %v2874_v4 = vshll.u32 %v2661_v50, 16  ;;  %v3135_v15 = vld [vmem:[#allocation2 + $0x1c] sm:$0xf]  ;;  %v6590_v44 = vpop.f32.mrf.mxu0 }
 0x1a6   : > { %v2235_v60 = vrot.slane %v2233_v11, 5  ;;  %2299 = vst [vmem:[#allocation3 + $0x448] sm:$0xf] %v2226_v27  ;;  %v2861_v43 = vor.u32 %v2860_v52, %v2857_v9  ;;  %v3136_v38 = vld [vmem:[#allocation2 + $0x20] sm:$0x1]  ;;  %v6127_v36 = vrot.slane %v3134_v37, 9 }
 0x1a7   : > { %v2508_v21 = vsel %vm7703_vm13, %v2506_v2, %v2507_v31  ;;  %v3137_v45 = vld [vmem:[#allocation2 + $0x24] sm:$0xe]  ;;  %v2866_v7 = vrot.slane %v2864_v62, 5  ;;  %v2870_v13 = vrot.slane %v2868_v53, 4  ;;  %v2876_v59 = vrot.slane %v2874_v4, 5  ;;  %v6684_v2 = vpop.f32.mrf.mxu1 }
 0x1a8   : > { %2572 = vst [vmem:[#allocation3 + $0x470] sm:$0xf] %v2508_v21  ;;  %v3232_v48 = vrot.slane %v3135_v15, 5  ;;  %v3138_v10 = vld [vmem:[#allocation2 + $0x28] sm:$0xf]  ;;  %v2236_v50 = vsel %vm7505_vm6, %v2231_v28, %v2235_v60  ;;  %v2862_v42 = vrot.slane %v2861_v43, 4  ;;  %v8245_v53 = vadd.f32 %v6587_v35, %v6586_v17 }
 0x1a9   : > { %v3235_v11 = vrot.slane %v3136_v38, 5  ;;  %v3139_v27 = vld [vmem:[#allocation2 + $0x2c] sm:$0x1]  ;;  %v6128_v8 = vrot.slane %v3137_v45, 9  ;;  %v7313_v31 = vld [vmem:[#allocation3 + $0x1cc] ss:$36 sps:$4 sm:$0xff]   ;;  %v2871_v52 = vor.u32 %v2870_v13, %v2866_v7  ;;  %v8249_v43 = vadd.f32 %v6590_v44, %v6589_v22 }
 0x1aa   : > { %2300 = vst [vmem:[#allocation3 + $0x46c] sm:$0xf] %v2236_v50  ;;  %v7318_v9 = vld [vmem:[#allocation3 + $0x1c8] ss:$36 sps:$4 sm:$0xff]   ;;  %v3233_v37 = vsel %vm7703_vm13, %v6127_v36, %v3232_v48  ;;  %v3234_v62 = vrot.slane %v3232_v48, 4  ;;  %v2867_v4 = vsel %vm7505_vm6, %v2862_v42, %v2866_v7  ;;  %v3239_v28 = vrot.slane %v3138_v10, 5  ;;  %5441 = vmatprep.mubr.bf16.mxu1 %v7313_v31 }
 0x1ab   : > { %3374 = vst [vmem:[#allocation3 + $0x20] sm:$0xf] %v3233_v37  ;;  %v3242_v15 = vrot.slane %v3139_v27, 5  ;;  %v2590_v60 = vld [vmem:[#allocation2 + $0x78] sm:$0xf]  ;;  %v2872_v38 = vrot.slane %v2871_v52, 4  ;;  %v6682_v36 = vadd.f32 %v6681_v24, %v8231_v41  ;;  %v6685_v7 = vadd.f32 %v6684_v2, %v6683_v19  ;;  %5442 = vmatmul.mubr.bf16.gmra.mxu1 %v7318_v9  ;;  %v6592_v9 = vpop.f32.mrf.mxu0 }
 0x1ac   : > { %v2591_v21 = vld [vmem:[#allocation2 + $0x7c] sm:$0xf]  ;;  %3116 = vst [vmem:[#allocation3 + $0x214] sm:$0xf] %v2867_v4  ;;  %v3236_v45 = vsel %vm7703_vm13, %v3234_v62, %v3235_v11  ;;  %2622 = vst [vmem:[#allocation3 + $0x258] sm:$0xf] %v2590_v60  ;;  %v3240_v13 = vsel %vm7703_vm13, %v6128_v8, %v3239_v28 }
 0x1ad   : > { %2623 = vst [vmem:[#allocation3 + $0x27c] sm:$0xf] %v2591_v21  ;;  %v2662_v17 = vld [vmem:[#allocation2 + $0x78] sm:$0xf]  ;;  %v2663_v35 = vld [vmem:[#allocation2 + $0x7c] sm:$0xf]  ;;  %v2877_v50 = vsel %vm7505_vm6, %v2872_v38, %v2876_v59  ;;  %v8261_v52 = vadd.f32 %v6682_v36, %v8147_v12 }
 0x1ae   : > { %3375 = vst [vmem:[#allocation3 + $0x44] sm:$0xf] %v3236_v45  ;;  %v3241_v22 = vrot.slane %v3239_v28, 4  ;;  %v2664_v48 = vld [vmem:[#allocation2 + $0x80] sm:$0x1]  ;;  %v2879_v10 = vshrl.u32 %v2662_v17, 16 }
 0x1af   : > { %v2882_v44 = vshll.u32 %v2662_v17, 16  ;;  %3376 = vst [vmem:[#allocation3 + $0x68] sm:$0xf] %v3240_v13  ;;  %v2888_v42 = vshll.u32 %v2663_v35, 16  ;;  %v2892_v11 = vshrl.u32 %v2663_v35, 16  ;;  %v2898_v27 = vshll.u32 %v2664_v48, 16  ;;  %v6593_v17 = vpop.f32.mrf.mxu0  ;;  %v6686_v35 = vpop.f32.mrf.mxu1 }
 0x1b0   : > { %v3140_v31 = vld [vmem:[#allocation2 + $0x30] sm:$0xe]  ;;  %3117 = vst [vmem:[#allocation3 + $0x238] sm:$0xf] %v2877_v50  ;;  %v3243_v41 = vsel %vm7703_vm13, %v3241_v22, %v3242_v15  ;;  %v2881_v24 = vrot.slane %v2879_v10, 4  ;;  %v8264_v15 = vadd.f32 %v6685_v7, %v8235_v20  ;;  %v8266_v36 = vadd.f32 %v6593_v17, %v6592_v9 }
 0x1b1   : > { %v2884_v19 = vrot.slane %v2882_v44, 5  ;;  %v3141_v2 = vld [vmem:[#allocation2 + $0x34] sm:$0xf]  ;;  %v3142_v8 = vld [vmem:[#allocation2 + $0x38] sm:$0x1]  ;;  %v2890_v37 = vrot.slane %v2888_v42, 5 }
 0x1b2   : > { %3377 = vst [vmem:[#allocation3 + $0x8c] sm:$0xf] %v3243_v41  ;;  %v2894_v59 = vrot.slane %v2892_v11, 4  ;;  %v2900_v62 = vrot.slane %v2898_v27, 5  ;;  %v6129_v4 = vrot.slane %v3140_v31, 9  ;;  %v3246_v45 = vrot.slane %v3141_v2, 5  ;;  %v6595_v27 = vpop.f32.mrf.mxu0  ;;  %v6687_v31 = vpop.f32.mrf.mxu1 }
 0x1b3   : > { %v3143_v28 = vld [vmem:[#allocation2 + $0x3c] sm:$0xe]  ;;  %v7316_v60 = vld [vmem:[#allocation3 + $0x44c] ss:$36 sps:$4 sm:$0xff]   ;;  %v2885_v38 = vor.u32 %v2884_v19, %v2881_v24  ;;  %v3249_v22 = vrot.slane %v3142_v8, 5  ;;  %v6688_v24 = vadd.f32 %v6687_v31, %v6686_v35 }
 0x1b4   : > { %v7319_v21 = vld [vmem:[#allocation3 + $0x448] ss:$36 sps:$4 sm:$0xff]   ;;  %v2895_v13 = vor.u32 %v2894_v59, %v2890_v37  ;;  %v6130_v12 = vrot.slane %v3143_v28, 9  ;;  %5352 = vmatprep.mubr.bf16.mxu0 %v7316_v60  ;;  %v3247_v44 = vsel %vm7703_vm13, %v6129_v4, %v3246_v45  ;;  %v3248_v50 = vrot.slane %v3246_v45, 4  ;;  %v6596_v4 = vpop.f32.mrf.mxu0  ;;  %v6689_v28 = vpop.f32.mrf.mxu1 }
 0x1b5   : > { %v3144_v48 = vld [vmem:[#allocation2 + $0x40] sm:$0xf]  ;;  %v2886_v10 = vrot.slane %v2885_v38, 4  ;;  %v3145_v42 = vld [vmem:[#allocation2 + $0x44] sm:$0x1]  ;;  %5353 = vmatmul.mubr.bf16.gmra.mxu0 %v7319_v21  ;;  %v8281_v45 = vadd.f32 %v6688_v24, %v8175_v61 }
 0x1b6   : > { %v3253_v11 = vrot.slane %v3144_v48, 5  ;;  %v7323_v20 = vld [vmem:[#allocation3 + $0x20] ss:$36 sps:$4 sm:$0xff]   ;;  %v2896_v7 = vrot.slane %v2895_v13, 4  ;;  %3378 = vst [vmem:[#allocation3 + $0xb0] sm:$0xf] %v3247_v44  ;;  %v3250_v2 = vsel %vm7703_vm13, %v3248_v50, %v3249_v22  ;;  %v6690_v22 = vpop.f32.mrf.mxu1 }
 0x1b7   : > { %v3256_v41 = vrot.slane %v3145_v42, 5  ;;  %v2891_v19 = vsel %vm7505_vm6, %v2886_v10, %v2890_v37  ;;  %v2592_v59 = vld [vmem:[#allocation2 + $0x84] sm:$0xf]  ;;  %v7320_v60 = vld [vmem:[#allocation3 + $0x214] ss:$36 sps:$4 sm:$0xff]   ;;  %7010 = vmatprep.mubr.bf16.mxu0 %v7323_v20  ;;  %v8278_v37 = vadd.f32 %v6596_v4, %v6595_v27  ;;  %v6579_v10 = vadd.f32 %v8187_v30, %v8179_v26 }
 0x1b8   : > { %v3254_v8 = vsel %vm7703_vm13, %v6130_v12, %v3253_v11  ;;  %v3255_v9 = vrot.slane %v3253_v11, 4  ;;  %v7322_v21 = vld [vmem:[#allocation3 + $0x210] ss:$36 sps:$4 sm:$0xff]   ;;  %v2901_v38 = vsel %vm7505_vm6, %v2896_v7, %v2900_v62  ;;  %3118 = vst [vmem:[#allocation3 + $0x25c] sm:$0xf] %v2891_v19  ;;  %5449 = vmatprep.mubr.bf16.mxu1 %v7320_v60  ;;  %v6691_v44 = vadd.f32 %v6690_v22, %v6689_v28 }
 0x1b9   : > { %3379 = vst [vmem:[#allocation3 + $0xd4] sm:$0xf] %v3250_v2  ;;  %3380 = vst [vmem:[#allocation3 + $0xf8] sm:$0xf] %v3254_v8  ;;  %v7324_v17 = vld [vmem:[#allocation3 + $0x68] ss:$36 sps:$4 sm:$0xff]   ;;  %5450 = vmatmul.mubr.bf16.gmra.mxu1 %v7322_v21 }
 0x1ba   : > { %2624 = vst [vmem:[#allocation3 + $0x2a0] sm:$0xf] %v2592_v59  ;;  %3119 = vst [vmem:[#allocation3 + $0x280] sm:$0xf] %v2901_v38  ;;  %v3257_v35 = vsel %vm7703_vm13, %v3255_v9, %v3256_v41  ;;  %v2593_v13 = vld [vmem:[#allocation2 + $0x88] sm:$0xf]  ;;  %v8287_v24 = vadd.f32 %v6691_v44, %v6579_v10  ;;  %v6598_v59 = vpop.f32.mrf.mxu0 }
 0x1bb   : > { %3381 = vst [vmem:[#allocation3 + $0x11c] sm:$0xf] %v3257_v35  ;;  %2625 = vst [vmem:[#allocation3 + $0x2c4] sm:$0xf] %v2593_v13  ;;  %v2665_v62 = vld [vmem:[#allocation2 + $0x84] sm:$0xf] }
 0x1bc   : > { %v2666_v48 = vld [vmem:[#allocation2 + $0x88] sm:$0xf]  ;;  %v2667_v12 = vld [vmem:[#allocation2 + $0x8c] sm:$0x1]  ;;  %v2903_v61 = vshrl.u32 %v2665_v62, 16  ;;  %v2906_v50 = vshll.u32 %v2665_v62, 16  ;;  %v6599_v13 = vpop.f32.mrf.mxu0 }
 0x1bd   : > { %v2912_v42 = vshll.u32 %v2666_v48, 16  ;;  %v2916_v11 = vshrl.u32 %v2666_v48, 16  ;;  %v3146_v27 = vld [vmem:[#allocation2 + $0x48] sm:$0xe]  ;;  %v2922_v31 = vshll.u32 %v2667_v12, 16  ;;  %7011 = vmatmul.mubr.bf16.vlgmr.msra.gmra.mxu0 %v7324_v17  ;;  %v8291_v10 = vadd.f32 %v6599_v13, %v6598_v59 }
 0x1be   : > { %v3147_v20 = vld [vmem:[#allocation2 + $0x4c] sm:$0xf]  ;;  %v3148_v7 = vld [vmem:[#allocation2 + $0x50] sm:$0x1]  ;;  %v6131_v41 = vrot.slane %v3146_v27, 9  ;;  %v2905_v19 = vrot.slane %v2903_v61, 4  ;;  %v6601_v17 = vpop.f32.mrf.mxu0 }
 0x1bf   : > { %v2908_v2 = vrot.slane %v2906_v50, 5  ;;  %v2914_v8 = vrot.slane %v2912_v42, 5  ;;  %v2918_v9 = vrot.slane %v2916_v11, 4  ;;  %v2924_v26 = vrot.slane %v2922_v31, 5  ;;  %v3149_v28 = vld [vmem:[#allocation2 + $0x54] sm:$0xe]  ;;  %v6692_v31 = vpop.f32.mrf.mxu1 }
 0x1c0   : > { %v3260_v30 = vrot.slane %v3147_v20, 5  ;;  %v3263_v4 = vrot.slane %v3148_v7, 5  ;;  %v7328_v60 = vld [vmem:[#allocation3 + $0xb0] ss:$36 sps:$4 sm:$0xff]   ;;  %v6132_v35 = vrot.slane %v3149_v28, 9 }
 0x1c1   : > { %v2909_v21 = vor.u32 %v2908_v2, %v2905_v19  ;;  %v2919_v38 = vor.u32 %v2918_v9, %v2914_v8  ;;  %v7325_v22 = vld [vmem:[#allocation3 + $0x258] ss:$36 sps:$4 sm:$0xff]   ;;  %7014 = vmatprep.mubr.bf16.mxu0 %v7328_v60  ;;  %v3150_v11 = vld [vmem:[#allocation2 + $0x58] sm:$0xf]  ;;  %v3151_v27 = vld [vmem:[#allocation2 + $0x5c] sm:$0x1]  ;;  %v6602_v2 = vpop.f32.mrf.mxu0 }
 0x1c2   : > { %v7327_v62 = vld [vmem:[#allocation3 + $0x25c] ss:$36 sps:$4 sm:$0xff]   ;;  %v3261_v48 = vsel %vm7703_vm13, %v6131_v41, %v3260_v30  ;;  %v3262_v12 = vrot.slane %v3260_v30, 4  ;;  %v3267_v20 = vrot.slane %v3150_v11, 5  ;;  %v3270_v7 = vrot.slane %v3151_v27, 5 }
 0x1c3   : > { %v7329_v44 = vld [vmem:[#allocation3 + $0xf8] ss:$36 sps:$4 sm:$0xff]   ;;  %3382 = vst [vmem:[#allocation3 + $0x140] sm:$0xf] %v3261_v48  ;;  %5457 = vmatprep.mubr.bf16.mxu1 %v7327_v62  ;;  %v2910_v61 = vrot.slane %v2909_v21, 4  ;;  %v2920_v50 = vrot.slane %v2919_v38, 4  ;;  %v8299_v60 = vadd.f32 %v6602_v2, %v6601_v17  ;;  %v6693_v21 = vpop.f32.mrf.mxu1 }
 0x1c4   : > { %v3264_v42 = vsel %vm7703_vm13, %v3262_v12, %v3263_v4  ;;  %5458 = vmatmul.mubr.bf16.gmra.mxu1 %v7325_v22  ;;  %v2594_v41 = vld [vmem:[#allocation2 + $0x90] sm:$0xf]  ;;  %v2595_v19 = vld [vmem:[#allocation2 + $0x94] sm:$0xf]  ;;  %v2670_v28 = vld [vmem:[#allocation2 + $0x98] sm:$0x1]  ;;  %v3268_v38 = vsel %vm7703_vm13, %v6132_v35, %v3267_v20 }
 0x1c5   : > { %3383 = vst [vmem:[#allocation3 + $0x164] sm:$0xf] %v3264_v42  ;;  %v2915_v9 = vsel %vm7505_vm6, %v2910_v61, %v2914_v8  ;;  %v2925_v59 = vsel %vm7505_vm6, %v2920_v50, %v2924_v26  ;;  %2626 = vst [vmem:[#allocation3 + $0x2e8] sm:$0xf] %v2594_v41  ;;  %v2668_v30 = vld [vmem:[#allocation2 + $0x90] sm:$0xf]  ;;  %7015 = vmatmul.mubr.bf16.gmra.mxu0 %v7329_v44  ;;  %v6695_v42 = vpop.f32.mrf.mxu1 }
 0x1c6   : > { %2627 = vst [vmem:[#allocation3 + $0x30c] sm:$0xf] %v2595_v19  ;;  %v2669_v4 = vld [vmem:[#allocation2 + $0x94] sm:$0xf]  ;;  %3120 = vst [vmem:[#allocation3 + $0x2a4] sm:$0xf] %v2915_v9 }
 0x1c7   : > { %3121 = vst [vmem:[#allocation3 + $0x2c8] sm:$0xf] %v2925_v59  ;;  %v3269_v13 = vrot.slane %v3267_v20, 4  ;;  %v2927_v22 = vshrl.u32 %v2668_v30, 16  ;;  %v2930_v62 = vshll.u32 %v2668_v30, 16  ;;  %v2936_v26 = vshll.u32 %v2669_v4, 16  ;;  %v6696_v44 = vpop.f32.mrf.mxu1 }
 0x1c8   : > { %v3152_v8 = vld [vmem:[#allocation2 + $0x60] sm:$0xe]  ;;  %3384 = vst [vmem:[#allocation3 + $0x188] sm:$0xf] %v3268_v38  ;;  %v2940_v48 = vshrl.u32 %v2669_v4, 16  ;;  %v2946_v12 = vshll.u32 %v2670_v28, 16 }
 0x1c9   : > { %v3153_v61 = vld [vmem:[#allocation2 + $0x64] sm:$0xf]  ;;  %v6133_v50 = vrot.slane %v3152_v8, 9  ;;  %v3271_v17 = vsel %vm7703_vm13, %v3269_v13, %v3270_v7  ;;  %v2929_v11 = vrot.slane %v2927_v22, 4  ;;  %v2932_v27 = vrot.slane %v2930_v62, 5 }
 0x1ca   : > { %v3154_v41 = vld [vmem:[#allocation2 + $0x68] sm:$0x1]  ;;  %v3274_v19 = vrot.slane %v3153_v61, 5  ;;  %3385 = vst [vmem:[#allocation3 + $0x1ac] sm:$0xf] %v3271_v17  ;;  %v2938_v35 = vrot.slane %v2936_v26, 5  ;;  %v6694_v8 = vadd.f32 %v6693_v21, %v6692_v31  ;;  %v6585_v22 = vadd.f32 %v8216_v3, %v8208_v0 }
 0x1cb   : > { %v2942_v20 = vrot.slane %v2940_v48, 4  ;;  %v2948_v2 = vrot.slane %v2946_v12, 5  ;;  %v3277_v9 = vrot.slane %v3154_v41, 5  ;;  %v2933_v59 = vor.u32 %v2932_v27, %v2929_v11  ;;  %v3155_v28 = vld [vmem:[#allocation2 + $0x6c] sm:$0xe] }
 0x1cc   : > { %v3275_v30 = vsel %vm7703_vm13, %v6133_v50, %v3274_v19  ;;  %v3276_v4 = vrot.slane %v3274_v19, 4  ;;  %v3156_v38 = vld [vmem:[#allocation2 + $0x70] sm:$0xf]  ;;  %v7333_v47 = vld [vmem:[#allocation3 + $0x140] ss:$36 sps:$4 sm:$0xff]   ;;  %v6697_v62 = vadd.f32 %v6696_v44, %v6695_v42  ;;  %v6134_v12 = vrot.slane %v3155_v28, 9 }
 0x1cd   : > { %v2943_v7 = vor.u32 %v2942_v20, %v2938_v35  ;;  %3386 = vst [vmem:[#allocation3 + $0x1d0] sm:$0xf] %v3275_v30  ;;  %v3157_v13 = vld [vmem:[#allocation2 + $0x74] sm:$0x1]  ;;  %v2934_v26 = vrot.slane %v2933_v59, 4  ;;  %v3281_v61 = vrot.slane %v3156_v38, 5  ;;  %7018 = vmatprep.mubr.bf16.mxu0 %v7333_v47  ;;  %v8312_v21 = vadd.f32 %v6694_v8, %v8200_v58  ;;  %v6604_v58 = vpop.f32.mrf.mxu0  ;;  %v6698_v30 = vpop.f32.mrf.mxu1 }
 0x1ce   : > { %v3278_v48 = vsel %vm7703_vm13, %v3276_v4, %v3277_v9  ;;  %v2596_v17 = vld [vmem:[#allocation2 + $0x9c] sm:$0xf]  ;;  %v3284_v31 = vrot.slane %v3157_v13, 5  ;;  %v8314_v27 = vadd.f32 %v6697_v62, %v6585_v22  ;;  %v2597_v19 = vld [vmem:[#allocation2 + $0xa0] sm:$0xf] }
 0x1cf   : > { %v7330_v50 = vld [vmem:[#allocation3 + $0x2a0] ss:$36 sps:$4 sm:$0xff]   ;;  %v2944_v11 = vrot.slane %v2943_v7, 4  ;;  %3387 = vst [vmem:[#allocation3 + $0x1f4] sm:$0xf] %v3278_v48  ;;  %v2939_v3 = vsel %vm7505_vm6, %v2934_v26, %v2938_v35  ;;  %v3282_v42 = vsel %vm7703_vm13, %v6134_v12, %v3281_v61  ;;  %v3283_v41 = vrot.slane %v3281_v61, 4  ;;  %v6605_v7 = vpop.f32.mrf.mxu0  ;;  %v6699_v48 = vpop.f32.mrf.mxu1 }
 0x1d0   : > { %2628 = vst [vmem:[#allocation3 + $0x330] sm:$0xf] %v2596_v17  ;;  %v7332_v0 = vld [vmem:[#allocation3 + $0x2a4] ss:$36 sps:$4 sm:$0xff]   ;;  %3122 = vst [vmem:[#allocation3 + $0x2ec] sm:$0xf] %v2939_v3  ;;  %v8324_v26 = vadd.f32 %v6605_v7, %v6604_v58 }
 0x1d1   : > { %v2949_v47 = vsel %vm7505_vm6, %v2944_v11, %v2948_v2  ;;  %3388 = vst [vmem:[#allocation3 + $0x218] sm:$0xf] %v3282_v42  ;;  %v2671_v20 = vld [vmem:[#allocation2 + $0x9c] sm:$0xf]  ;;  %v2672_v9 = vld [vmem:[#allocation2 + $0xa0] sm:$0xf]  ;;  %5465 = vmatprep.mubr.bf16.mxu1 %v7332_v0  ;;  %v3285_v59 = vsel %vm7703_vm13, %v3283_v41, %v3284_v31  ;;  %v6700_v42 = vadd.f32 %v6699_v48, %v6698_v30  ;;  %v6701_v41 = vpop.f32.mrf.mxu1 }
 0x1d2   : > { %v7334_v44 = vld [vmem:[#allocation3 + $0x188] ss:$36 sps:$4 sm:$0xff]   ;;  %3123 = vst [vmem:[#allocation3 + $0x310] sm:$0xf] %v2949_v47  ;;  %2629 = vst [vmem:[#allocation3 + $0x354] sm:$0xf] %v2597_v19  ;;  %5466 = vmatmul.mubr.bf16.gmra.mxu1 %v7330_v50  ;;  %v6607_v50 = vpop.f32.mrf.mxu0 }
 0x1d3   : > { %v2673_v35 = vld [vmem:[#allocation2 + $0xa4] sm:$0x1]  ;;  %3389 = vst [vmem:[#allocation3 + $0x23c] sm:$0xf] %v3285_v59  ;;  %v2951_v4 = vshrl.u32 %v2671_v20, 16  ;;  %v2954_v28 = vshll.u32 %v2671_v20, 16  ;;  %7019 = vmatmul.mubr.bf16.gmra.mxu0 %v7334_v44  ;;  %v6702_v30 = vpop.f32.mrf.mxu1 }
 0x1d4   : > { %v2960_v2 = vshll.u32 %v2672_v9, 16  ;;  %v2964_v38 = vshrl.u32 %v2672_v9, 16  ;;  %v3158_v8 = vld [vmem:[#allocation2 + $0x78] sm:$0xe]  ;;  %v2970_v13 = vshll.u32 %v2673_v35, 16  ;;  %v6608_v35 = vpop.f32.mrf.mxu0  ;;  %v6703_v48 = vadd.f32 %v6702_v30, %v6701_v41 }
 0x1d5   : > { %v3159_v22 = vld [vmem:[#allocation2 + $0x7c] sm:$0xf]  ;;  %v6135_v62 = vrot.slane %v3158_v8, 9  ;;  %v2953_v12 = vrot.slane %v2951_v4, 4  ;;  %v2956_v61 = vrot.slane %v2954_v28, 5 }
 0x1d6   : > { %v2962_v17 = vrot.slane %v2960_v2, 5  ;;  %v2966_v11 = vrot.slane %v2964_v38, 4  ;;  %v3160_v31 = vld [vmem:[#allocation2 + $0x80] sm:$0x1]  ;;  %v7338_v0 = vld [vmem:[#allocation3 + $0x1d0] ss:$36 sps:$4 sm:$0xff]   ;;  %v8328_v2 = vadd.f32 %v6608_v35, %v6607_v50  ;;  %v8331_v38 = vadd.f32 %v6700_v42, %v8245_v53 }
 0x1d7   : > { %v3288_v3 = vrot.slane %v3159_v22, 5  ;;  %v2957_v47 = vor.u32 %v2956_v61, %v2953_v12  ;;  %v2972_v20 = vrot.slane %v2970_v13, 5  ;;  %v3291_v9 = vrot.slane %v3160_v31, 5  ;;  %v3161_v44 = vld [vmem:[#allocation2 + $0x84] sm:$0xe]  ;;  %7022 = vmatprep.mubr.bf16.mxu0 %v7338_v0  ;;  %v6762_v13 = vpop.f32.mrf.mxu0 }
 0x1d8   : > { %v2967_v19 = vor.u32 %v2966_v11, %v2962_v17  ;;  %v3162_v59 = vld [vmem:[#allocation2 + $0x88] sm:$0xf]  ;;  %v3163_v28 = vld [vmem:[#allocation2 + $0x8c] sm:$0x1]  ;;  %v7335_v8 = vld [vmem:[#allocation3 + $0x2e8] ss:$36 sps:$4 sm:$0xff]  }
 0x1d9   : > { %v3289_v58 = vsel %vm7703_vm13, %v6135_v62, %v3288_v3  ;;  %v3290_v4 = vrot.slane %v3288_v3, 4  ;;  %v7337_v7 = vld [vmem:[#allocation3 + $0x2ec] ss:$36 sps:$4 sm:$0xff]   ;;  %v2958_v22 = vrot.slane %v2957_v47, 4  ;;  %v6136_v62 = vrot.slane %v3161_v44, 9  ;;  %v6763_v42 = vpop.f32.mrf.mxu0 }
 0x1da   : > { %3390 = vst [vmem:[#allocation3 + $0x260] sm:$0xf] %v3289_v58  ;;  %v7339_v12 = vld [vmem:[#allocation3 + $0x218] ss:$36 sps:$4 sm:$0xff]   ;;  %v2968_v61 = vrot.slane %v2967_v19, 4  ;;  %5473 = vmatprep.mubr.bf16.mxu1 %v7337_v7  ;;  %v3295_v53 = vrot.slane %v3162_v59, 5  ;;  %v8338_v47 = vadd.f32 %v6703_v48, %v8249_v43  ;;  %v6764_v44 = vadd.f32 %v6763_v42, %v6762_v13 }
 0x1db   : > { %v3292_v11 = vsel %vm7703_vm13, %v3290_v4, %v3291_v9  ;;  %v2963_v31 = vsel %vm7505_vm6, %v2958_v22, %v2962_v17  ;;  %v3298_v50 = vrot.slane %v3163_v28, 5  ;;  %v2598_v0 = vld [vmem:[#allocation2 + $0xa8] sm:$0xf]  ;;  %v2599_v3 = vld [vmem:[#allocation2 + $0xac] sm:$0xf]  ;;  %5474 = vmatmul.mubr.bf16.gmra.mxu1 %v7335_v8  ;;  %7023 = vmatmul.mubr.bf16.gmra.mxu0 %v7339_v12  ;;  %v6765_v28 = vpop.f32.mrf.mxu0 }
 0x1dc   : > { %3391 = vst [vmem:[#allocation3 + $0x284] sm:$0xf] %v3292_v11  ;;  %8737 = vst [vmem:[#allocation6_spill] sm:$0xff] %v8338_v47  ;;  %v2973_v41 = vsel %vm7505_vm6, %v2968_v61, %v2972_v20  ;;  %v2674_v19 = vld [vmem:[#allocation2 + $0xa8] sm:$0xf]  ;;  %v3296_v59 = vsel %vm7703_vm13, %v6136_v62, %v3295_v53  ;;  %v3297_v35 = vrot.slane %v3295_v53, 4  ;;  %v6704_v62 = vpop.f32.mrf.mxu1 }
 0x1dd   : > { %3124 = vst [vmem:[#allocation3 + $0x334] sm:$0xf] %v2963_v31  ;;  %2630 = vst [vmem:[#allocation3 + $0x378] sm:$0xf] %v2598_v0  ;;  %v2675_v9 = vld [vmem:[#allocation2 + $0xac] sm:$0xf]  ;;  %v6766_v31 = vpop.f32.mrf.mxu0 }
 0x1de   : > { %2631 = vst [vmem:[#allocation3 + $0x39c] sm:$0xf] %v2599_v3  ;;  %v2676_v17 = vld [vmem:[#allocation2 + $0xb0] sm:$0x1]  ;;  %3125 = vst [vmem:[#allocation3 + $0x358] sm:$0xf] %v2973_v41  ;;  %v3299_v48 = vsel %vm7703_vm13, %v3297_v35, %v3298_v50  ;;  %v8349_v50 = vadd.f32 %v6764_v44, %v8112_v1 }
 0x1df   : > { %v2975_v58 = vshrl.u32 %v2674_v19, 16  ;;  %v2978_v43 = vshll.u32 %v2674_v19, 16  ;;  %v3164_v4 = vld [vmem:[#allocation2 + $0x90] sm:$0xe]  ;;  %3392 = vst [vmem:[#allocation3 + $0x2a8] sm:$0xf] %v3296_v59  ;;  %v6768_v35 = vpop.f32.mrf.mxu0 }
 0x1e0   : > { %v2984_v30 = vshll.u32 %v2675_v9, 16  ;;  %v2988_v8 = vshrl.u32 %v2675_v9, 16  ;;  %v2994_v20 = vshll.u32 %v2676_v17, 16  ;;  %v3165_v7 = vld [vmem:[#allocation2 + $0x94] sm:$0xf]  ;;  %v6137_v22 = vrot.slane %v3164_v4, 9 }
 0x1e1   : > { %v2977_v12 = vrot.slane %v2975_v58, 4  ;;  %v2980_v13 = vrot.slane %v2978_v43, 5  ;;  %v3166_v61 = vld [vmem:[#allocation2 + $0x98] sm:$0x1]  ;;  %v3302_v11 = vrot.slane %v3165_v7, 5  ;;  %v6705_v58 = vpop.f32.mrf.mxu1 }
 0x1e2   : > { %3393 = vst [vmem:[#allocation3 + $0x2cc] sm:$0xf] %v3299_v48  ;;  %v2986_v53 = vrot.slane %v2984_v30, 5  ;;  %v2990_v0 = vrot.slane %v2988_v8, 4  ;;  %v2996_v3 = vrot.slane %v2994_v20, 5  ;;  %v3305_v42 = vrot.slane %v3166_v61, 5  ;;  %v6769_v61 = vpop.f32.mrf.mxu0 }
 0x1e3   : > { %v2981_v41 = vor.u32 %v2980_v13, %v2977_v12  ;;  %v3303_v19 = vsel %vm7703_vm13, %v6137_v22, %v3302_v11  ;;  %v3304_v9 = vrot.slane %v3302_v11, 4  ;;  %v3167_v17 = vld [vmem:[#allocation2 + $0x9c] sm:$0xe]  ;;  %v3168_v59 = vld [vmem:[#allocation2 + $0xa0] sm:$0xf]  ;;  %v6767_v30 = vadd.f32 %v6766_v31, %v6765_v28  ;;  %v6707_v11 = vpop.f32.mrf.mxu1 }
 0x1e4   : > { %v7343_v43 = vld [vmem:[#allocation3 + $0x260] ss:$36 sps:$4 sm:$0xff]   ;;  %v2991_v4 = vor.u32 %v2990_v0, %v2986_v53  ;;  %3394 = vst [vmem:[#allocation3 + $0x2f0] sm:$0xf] %v3303_v19  ;;  %v3169_v7 = vld [vmem:[#allocation2 + $0xa4] sm:$0x1]  ;;  %v6706_v8 = vadd.f32 %v6705_v58, %v6704_v62  ;;  %v6770_v28 = vadd.f32 %v6769_v61, %v6768_v35 }
 0x1e5   : > { %v2982_v20 = vrot.slane %v2981_v41, 4  ;;  %v3306_v48 = vsel %vm7703_vm13, %v3304_v9, %v3305_v42  ;;  %v6138_v12 = vrot.slane %v3167_v17, 9  ;;  %v3309_v22 = vrot.slane %v3168_v59, 5  ;;  %v2600_v13 = vld [vmem:[#allocation2 + $0xb4] sm:$0xf]  ;;  %7026 = vmatprep.mubr.bf16.mxu0 %v7343_v43  ;;  %v6771_v17 = vpop.f32.mrf.mxu0  ;;  %v6708_v59 = vpop.f32.mrf.mxu1 }
 0x1e6   : > { %v7340_v47 = vld [vmem:[#allocation3 + $0x330] ss:$36 sps:$4 sm:$0xff]   ;;  %v2992_v44 = vrot.slane %v2991_v4, 4  ;;  %3395 = vst [vmem:[#allocation3 + $0x314] sm:$0xf] %v3306_v48  ;;  %v8354_v0 = vadd.f32 %v6767_v30, %v8120_v5  ;;  %v8357_v31 = vadd.f32 %v6706_v8, %v8266_v36  ;;  %v3312_v19 = vrot.slane %v3169_v7, 5 }
 0x1e7   : > { %v7342_v1 = vld [vmem:[#allocation3 + $0x334] ss:$36 sps:$4 sm:$0xff]   ;;  %2632 = vst [vmem:[#allocation3 + $0x3c0] sm:$0xf] %v2600_v13  ;;  %v2987_v62 = vsel %vm7505_vm6, %v2982_v20, %v2986_v53  ;;  %v3310_v42 = vsel %vm7703_vm13, %v6138_v12, %v3309_v22  ;;  %v3311_v41 = vrot.slane %v3309_v22, 4  ;;  %v8366_v53 = vadd.f32 %v6770_v28, %v8141_v40  ;;  %v6772_v20 = vpop.f32.mrf.mxu0 }
 0x1e8   : > { %v2601_v9 = vld [vmem:[#allocation2 + $0xb8] sm:$0xf]  ;;  %5481 = vmatprep.mubr.bf16.mxu1 %v7342_v1  ;;  %v2997_v5 = vsel %vm7505_vm6, %v2992_v44, %v2996_v3  ;;  %3126 = vst [vmem:[#allocation3 + $0x37c] sm:$0xf] %v2987_v62  ;;  %3396 = vst [vmem:[#allocation3 + $0x338] sm:$0xf] %v3310_v42  ;;  %v6709_v43 = vadd.f32 %v6708_v59, %v6707_v11  ;;  %v6710_v3 = vpop.f32.mrf.mxu1  ;;  %v6773_v61 = vadd.f32 %v6772_v20, %v6771_v17 }
 0x1e9   : > { %2633 = vst [vmem:[#allocation3 + $0x3e4] sm:$0xf] %v2601_v9  ;;  %v2677_v36 = vld [vmem:[#allocation2 + $0xb4] sm:$0xf]  ;;  %v2678_v35 = vld [vmem:[#allocation2 + $0xb8] sm:$0xf]  ;;  %5482 = vmatmul.mubr.bf16.gmra.mxu1 %v7340_v47  ;;  %v3313_v7 = vsel %vm7703_vm13, %v3311_v41, %v3312_v19  ;;  %v6774_v47 = vpop.f32.mrf.mxu0 }
 0x1ea   : > { %v2679_v58 = vld [vmem:[#allocation2 + $0xbc] sm:$0x1]  ;;  %v7344_v4 = vld [vmem:[#allocation3 + $0x2a8] ss:$36 sps:$4 sm:$0xff]   ;;  %3127 = vst [vmem:[#allocation3 + $0x3a0] sm:$0xf] %v2997_v5  ;;  %v8371_v44 = vadd.f32 %v6709_v43, %v8278_v37  ;;  %v6711_v28 = vpop.f32.mrf.mxu1  ;;  %v8374_v17 = vadd.f32 %v6773_v61, %v8153_v18 }
 0x1eb   : > { %v2999_v30 = vshrl.u32 %v2677_v36, 16  ;;  %v3002_v8 = vshll.u32 %v2677_v36, 16  ;;  %3397 = vst [vmem:[#allocation3 + $0x35c] sm:$0xf] %v3313_v7  ;;  %v3008_v48 = vshll.u32 %v2678_v35, 16  ;;  %v3012_v12 = vshrl.u32 %v2678_v35, 16  ;;  %7027 = vmatmul.mubr.bf16.gmra.mxu0 %v7344_v4 }
 0x1ec   : > { %v3018_v22 = vshll.u32 %v2679_v58, 16  ;;  %v3170_v13 = vld [vmem:[#allocation2 + $0xa8] sm:$0xe]  ;;  %v3171_v11 = vld [vmem:[#allocation2 + $0xac] sm:$0xf]  ;;  %v6775_v58 = vpop.f32.mrf.mxu0  ;;  %v6713_v4 = vpop.f32.mrf.mxu1  ;;  %v6712_v20 = vadd.f32 %v6711_v28, %v6710_v3 }
 0x1ed   : > { %v3001_v40 = vrot.slane %v2999_v30, 4  ;;  %v3004_v1 = vrot.slane %v3002_v8, 5  ;;  %v3010_v62 = vrot.slane %v3008_v48, 5  ;;  %v3014_v42 = vrot.slane %v3012_v12, 4  ;;  %v3172_v19 = vld [vmem:[#allocation2 + $0xb0] sm:$0x1] }
 0x1ee   : > { %v3020_v41 = vrot.slane %v3018_v22, 5  ;;  %v6139_v9 = vrot.slane %v3170_v13, 9  ;;  %v7348_v59 = vld [vmem:[#allocation3 + $0x2f0] ss:$36 sps:$4 sm:$0xff]   ;;  %v3316_v36 = vrot.slane %v3171_v11, 5  ;;  %v3319_v35 = vrot.slane %v3172_v19, 5 }
 0x1ef   : > { %v3005_v5 = vor.u32 %v3004_v1, %v3001_v40  ;;  %v3015_v7 = vor.u32 %v3014_v42, %v3010_v62  ;;  %v3173_v30 = vld [vmem:[#allocation2 + $0xb4] sm:$0xe]  ;;  %v3174_v8 = vld [vmem:[#allocation2 + $0xb8] sm:$0xf]  ;;  %v3175_v37 = vld [vmem:[#allocation2 + $0xbc] sm:$0x1]  ;;  %v6776_v43 = vadd.f32 %v6775_v58, %v6774_v47  ;;  %7030 = vmatprep.mubr.bf16.mxu0 %v7348_v59  ;;  %v6777_v40 = vpop.f32.mrf.mxu0  ;;  %v6714_v1 = vpop.f32.mrf.mxu1  ;;  %v8382_v19 = vadd.f32 %v6712_v20, %v8291_v10 }
 0x1f0   : > { %v3317_v12 = vsel %vm7703_vm13, %v6139_v9, %v3316_v36  ;;  %v3318_v22 = vrot.slane %v3316_v36, 4  ;;  %v6140_v13 = vrot.slane %v3173_v30, 9  ;;  %v7345_v11 = vld [vmem:[#allocation3 + $0x378] ss:$36 sps:$4 sm:$0xff]   ;;  %v6715_v3 = vadd.f32 %v6714_v1, %v6713_v4  ;;  %v2603_v10 = vld [vmem:[#allocation2 + $0xc4] sm:$0xf] }
 0x1f1   : > { %v3006_v48 = vrot.slane %v3005_v5, 4  ;;  %v7347_v18 = vld [vmem:[#allocation3 + $0x37c] ss:$36 sps:$4 sm:$0xff]   ;;  %v3016_v61 = vrot.slane %v3015_v7, 4  ;;  %3398 = vst [vmem:[#allocation3 + $0x380] sm:$0xf] %v3317_v12  ;;  %v8379_v42 = vadd.f32 %v6776_v43, %v8167_v32  ;;  %v6778_v36 = vpop.f32.mrf.mxu0 }
 0x1f2   : > { %v7349_v47 = vld [vmem:[#allocation3 + $0x338] ss:$36 sps:$4 sm:$0xff]   ;;  %v3320_v9 = vsel %vm7703_vm13, %v3318_v22, %v3319_v35  ;;  %v3323_v59 = vrot.slane %v3174_v8, 5  ;;  %v3326_v5 = vrot.slane %v3175_v37, 5  ;;  %5489 = vmatprep.mubr.bf16.mxu1 %v7347_v18  ;;  %v2602_v32 = vld [vmem:[#allocation2 + $0xc0] sm:$0xf]  ;;  %v6779_v4 = vadd.f32 %v6778_v36, %v6777_v40  ;;  %v6716_v40 = vpop.f32.mrf.mxu1 }
 0x1f3   : > { %8738 = vst [vmem:[#allocation7_spill] sm:$0xff] %v8379_v42  ;;  %v3011_v28 = vsel %vm7505_vm6, %v3006_v48, %v3010_v62  ;;  %v3021_v58 = vsel %vm7505_vm6, %v3016_v61, %v3020_v41  ;;  %3399 = vst [vmem:[#allocation3 + $0x3a4] sm:$0xf] %v3320_v9  ;;  %v2680_v7 = vld [vmem:[#allocation2 + $0xc0] sm:$0xf]  ;;  %v8391_v30 = vadd.f32 %v6715_v3, %v8299_v60  ;;  %5490 = vmatmul.mubr.bf16.gmra.mxu1 %v7345_v11  ;;  %v6780_v43 = vpop.f32.mrf.mxu0 }
 0x1f4   : > { %3128 = vst [vmem:[#allocation3 + $0x3c4] sm:$0xf] %v3011_v28  ;;  %7031 = vmatmul.mubr.bf16.gmra.mxu0 %v7349_v47  ;;  %3129 = vst [vmem:[#allocation3 + $0x3e8] sm:$0xf] %v3021_v58  ;;  %v3324_v62 = vsel %vm7703_vm13, %v6140_v13, %v3323_v59  ;;  %v3325_v35 = vrot.slane %v3323_v59, 4  ;;  %v3023_v37 = vshrl.u32 %v2680_v7, 16  ;;  %v8398_v3 = vadd.f32 %v6779_v4, %v8177_v51 }
 0x1f5   : > { %2634 = vst [vmem:[#allocation3 + $0x408] sm:$0xf] %v2602_v32  ;;  %2635 = vst [vmem:[#allocation3 + $0x42c] sm:$0xf] %v2603_v10  ;;  %v2681_v8 = vld [vmem:[#allocation2 + $0xc4] sm:$0xf]  ;;  %v6781_v47 = vpop.f32.mrf.mxu0  ;;  %v6717_v32 = vpop.f32.mrf.mxu1 }
 0x1f6   : > { %v2682_v41 = vld [vmem:[#allocation2 + $0xc8] sm:$0x1]  ;;  %3400 = vst [vmem:[#allocation3 + $0x3c8] sm:$0xf] %v3324_v62  ;;  %v3026_v20 = vshll.u32 %v2680_v7, 16  ;;  %v3032_v48 = vshll.u32 %v2681_v8, 16  ;;  %v3327_v1 = vsel %vm7703_vm13, %v3325_v35, %v3326_v5  ;;  %v6718_v35 = vadd.f32 %v6717_v32, %v6716_v40 }
 0x1f7   : > { %v3036_v12 = vshrl.u32 %v2681_v8, 16  ;;  %v3042_v22 = vshll.u32 %v2682_v41, 16  ;;  %v3176_v60 = vld [vmem:[#allocation2 + $0xc0] sm:$0xe]  ;;  %v3025_v11 = vrot.slane %v3023_v37, 4  ;;  %8739 = vst [vmem:[#allocation8_spill] sm:$0xff] %v8398_v3  ;;  %v6782_v8 = vadd.f32 %v6781_v47, %v6780_v43  ;;  %v6783_v5 = vpop.f32.mrf.mxu0  ;;  %v6719_v3 = vpop.f32.mrf.mxu1 }
 0x1f8   : > { %v3177_v18 = vld [vmem:[#allocation2 + $0xc4] sm:$0xf]  ;;  %v3178_v13 = vld [vmem:[#allocation2 + $0xc8] sm:$0x1]  ;;  %v6141_v61 = vrot.slane %v3176_v60, 9  ;;  %v3028_v28 = vrot.slane %v3026_v20, 5  ;;  %v8406_v43 = vadd.f32 %v6718_v35, %v8324_v26 }
 0x1f9   : > { %3401 = vst [vmem:[#allocation3 + $0x3ec] sm:$0xf] %v3327_v1  ;;  %v3034_v9 = vrot.slane %v3032_v48, 5  ;;  %v3038_v59 = vrot.slane %v3036_v12, 4  ;;  %v3044_v36 = vrot.slane %v3042_v22, 5  ;;  %v3330_v10 = vrot.slane %v3177_v18, 5  ;;  %v6784_v22 = vpop.f32.mrf.mxu0 }
 0x1fa   : > { %v3179_v58 = vld [vmem:[#allocation2 + $0xcc] sm:$0xe]  ;;  %v3333_v7 = vrot.slane %v3178_v13, 5  ;;  %v3180_v62 = vld [vmem:[#allocation2 + $0xd0] sm:$0xf]  ;;  %v3029_v41 = vor.u32 %v3028_v28, %v3025_v11  ;;  %v8403_v12 = vadd.f32 %v6782_v8, %v8192_v25  ;;  %v6785_v47 = vadd.f32 %v6784_v22, %v6783_v5  ;;  %v6720_v28 = vpop.f32.mrf.mxu1 }
 0x1fb   : > { %v3039_v37 = vor.u32 %v3038_v59, %v3034_v9  ;;  %v3181_v60 = vld [vmem:[#allocation2 + $0xd4] sm:$0x1]  ;;  %v6142_v42 = vrot.slane %v3179_v58, 9  ;;  %v3337_v51 = vrot.slane %v3180_v62, 5  ;;  %v2604_v4 = vld [vmem:[#allocation2 + $0xcc] sm:$0xf]  ;;  %v3331_v20 = vsel %vm7703_vm13, %v6141_v61, %v3330_v10 }
 0x1fc   : > { %v7353_v1 = vld [vmem:[#allocation3 + $0x380] ss:$36 sps:$4 sm:$0xff]   ;;  %v3332_v48 = vrot.slane %v3330_v10, 4  ;;  %2636 = vst [vmem:[#allocation3 + $0x450] sm:$0xf] %v2604_v4  ;;  %v3030_v18 = vrot.slane %v3029_v41, 4  ;;  %v6721_v8 = vadd.f32 %v6720_v28, %v6719_v3  ;;  %v6722_v4 = vpop.f32.mrf.mxu1 }
 0x1fd   : > { %v7350_v40 = vld [vmem:[#allocation3 + $0x3c0] ss:$36 sps:$4 sm:$0xff]   ;;  %3402 = vst [vmem:[#allocation3 + $0x410] sm:$0xf] %v3331_v20  ;;  %v3338_v13 = vsel %vm7703_vm13, %v6142_v42, %v3337_v51  ;;  %7034 = vmatprep.mubr.bf16.mxu0 %v7353_v1  ;;  %v3040_v61 = vrot.slane %v3039_v37, 4  ;;  %v3339_v25 = vrot.slane %v3337_v51, 4  ;;  %v8415_v42 = vadd.f32 %v6785_v47, %v8210_v6 }
 0x1fe   : > { %v7352_v11 = vld [vmem:[#allocation3 + $0x3c4] ss:$36 sps:$4 sm:$0xff]   ;;  %v3334_v59 = vsel %vm7703_vm13, %v3332_v48, %v3333_v7  ;;  %v3340_v58 = vrot.slane %v3181_v60, 5  ;;  %3404 = vst [vmem:[#allocation3 + $0x458] sm:$0xf] %v3338_v13  ;;  %v3035_v26 = vsel %vm7505_vm6, %v3030_v18, %v3034_v9  ;;  %v6786_v9 = vpop.f32.mrf.mxu0  ;;  %v8422_v20 = vadd.f32 %v6721_v8, %v8328_v2 }
 0x1ff   : > { %5497 = vmatprep.mubr.bf16.mxu1 %v7352_v11  ;;  %3403 = vst [vmem:[#allocation3 + $0x434] sm:$0xf] %v3334_v59  ;;  %v2605_v32 = vld [vmem:[#allocation2 + $0xd0] sm:$0xf]  ;;  %v2683_v10 = vld [vmem:[#allocation2 + $0xcc] sm:$0xf]  ;;  %v3045_v7 = vsel %vm7505_vm6, %v3040_v61, %v3044_v36 }
 0x200   : > { %v2684_v62 = vld [vmem:[#allocation2 + $0xd0] sm:$0xf]  ;;  %5498 = vmatmul.mubr.bf16.gmra.mxu1 %v7350_v40  ;;  %v7354_v5 = vld [vmem:[#allocation3 + $0x3c8] ss:$36 sps:$4 sm:$0xff]   ;;  %3130 = vst [vmem:[#allocation3 + $0x40c] sm:$0xf] %v3035_v26  ;;  %v3341_v35 = vsel %vm7703_vm13, %v3339_v25, %v3340_v58  ;;  %v6787_v1 = vpop.f32.mrf.mxu0  ;;  %v6723_v40 = vpop.f32.mrf.mxu1 }
 0x201   : > { %2637 = vst [vmem:[#allocation3 + $0x474] sm:$0xf] %v2605_v32  ;;  %v2685_v41 = vld [vmem:[#allocation2 + $0xd4] sm:$0x1]  ;;  %3131 = vst [vmem:[#allocation3 + $0x430] sm:$0xf] %v3045_v7  ;;  %7035 = vmatmul.mubr.bf16.gmra.mxu0 %v7354_v5  ;;  %v6788_v11 = vadd.f32 %v6787_v1, %v6786_v9  ;;  %v6724_v13 = vadd.f32 %v6723_v40, %v6722_v4  ;;  %v6615_v5 = vadd.f32 %v8012_v14, %v8002_v54 }
 0x202   : > { %3405 = vst [vmem:[#allocation3 + $0x47c] sm:$0xf] %v3341_v35  ;;  %v3047_v37 = vshrl.u32 %v2683_v10, 16  ;;  %v3050_v60 = vshll.u32 %v2683_v10, 16  ;;  %v3056_v51 = vshll.u32 %v2684_v62, 16  ;;  %v3060_v6 = vshrl.u32 %v2684_v62, 16  ;;  %v6789_v18 = vpop.f32.mrf.mxu0  ;;  %v6725_v59 = vpop.f32.mrf.mxu1 }
 0x203   : > { %v3066_v3 = vshll.u32 %v2685_v41, 16  ;;  %v8425_v58 = vadd.f32 %v6788_v11, %v8221_v34  ;;  %v8428_v2 = vadd.f32 %v6724_v13, %v7991_v29  ;;  %v7355_v7 = vld [vmem:[#allocation3 + $0x408] ss:$36 sps:$4 sm:$0xff]  }
 0x204   : > { %v3049_v36 = vrot.slane %v3047_v37, 4  ;;  %v3052_v48 = vrot.slane %v3050_v60, 5  ;;  %v3058_v56 = vrot.slane %v3056_v51, 5  ;;  %v3062_v22 = vrot.slane %v3060_v6, 4  ;;  %v6790_v26 = vpop.f32.mrf.mxu0  ;;  %v6726_v8 = vpop.f32.mrf.mxu1 }
 0x205   : > { %v3068_v61 = vrot.slane %v3066_v3, 5  ;;  %v6791_v62 = vadd.f32 %v6790_v26, %v6789_v18  ;;  %v6727_v41 = vadd.f32 %v6726_v8, %v6725_v59  ;;  %v6621_v18 = vadd.f32 %v8057_v46, %v8046_v63 }
 0x206   : > { %v3053_v47 = vor.u32 %v3052_v48, %v3049_v36  ;;  %v3063_v28 = vor.u32 %v3062_v22, %v3058_v56  ;;  %v7358_v25 = vld [vmem:[#allocation3 + $0x410] ss:$36 sps:$4 sm:$0xff]   ;;  %v6792_v54 = vpop.f32.mrf.mxu0  ;;  %v6728_v14 = vpop.f32.mrf.mxu1  ;;  %v6627_v8 = vadd.f32 %v8079_v55, %v8073_v23 }
 0x207   : > { %7038 = vmatprep.mubr.bf16.mxu0 %v7358_v25  ;;  %v8437_v29 = vadd.f32 %v6791_v62, %v8225_v49  ;;  %v8439_v60 = vadd.f32 %v6727_v41, %v6615_v5 }
 0x208   : > { %v3054_v32 = vrot.slane %v3053_v47, 4  ;;  %v3064_v10 = vrot.slane %v3063_v28, 4  ;;  %v7357_v35 = vld [vmem:[#allocation3 + $0x40c] ss:$36 sps:$4 sm:$0xff]   ;;  %v6793_v51 = vpop.f32.mrf.mxu0  ;;  %v6729_v4 = vpop.f32.mrf.mxu1 }
 0x209   : > { %v7359_v9 = vld [vmem:[#allocation3 + $0x458] ss:$36 sps:$4 sm:$0xff]   ;;  %5505 = vmatprep.mubr.bf16.mxu1 %v7357_v35  ;;  %v6794_v6 = vadd.f32 %v6793_v51, %v6792_v54  ;;  %v6730_v1 = vadd.f32 %v6729_v4, %v6728_v14  ;;  %v7360_v49 = vld [vmem:[#allocation3 + $0x450] ss:$36 sps:$4 sm:$0xff]  }
 0x20a   : > { %v3059_v34 = vsel %vm7505_vm6, %v3054_v32, %v3058_v56  ;;  %v3069_v37 = vsel %vm7505_vm6, %v3064_v10, %v3068_v61  ;;  %5506 = vmatmul.mubr.bf16.gmra.mxu1 %v7355_v7  ;;  %7039 = vmatmul.mubr.bf16.gmra.mxu0 %v7359_v9  ;;  %v6795_v3 = vpop.f32.mrf.mxu0  ;;  %v6731_v36 = vpop.f32.mrf.mxu1 }
 0x20b   : > { %3132 = vst [vmem:[#allocation3 + $0x454] sm:$0xf] %v3059_v34  ;;  %3133 = vst [vmem:[#allocation3 + $0x478] sm:$0xf] %v3069_v37  ;;  %v8442_v33 = vadd.f32 %v6794_v6, %v8261_v52  ;;  %v8445_v56 = vadd.f32 %v6730_v1, %v8026_v57 }
 0x20c   : > { %v6796_v48 = vpop.f32.mrf.mxu0  ;;  %v6732_v11 = vpop.f32.mrf.mxu1 }
 0x20d   : > { %v6797_v40 = vadd.f32 %v6796_v48, %v6795_v3  ;;  %v6733_v13 = vadd.f32 %v6732_v11, %v6731_v36  ;;  %v8741_v11 = vld [vmem:[#allocation5_spill] sm:$0xff] }
 0x20e   : > { %v6798_v52 = vpop.f32.mrf.mxu0  ;;  %v6734_v61 = vpop.f32.mrf.mxu1 }
 0x20f   : > { %v8450_v47 = vadd.f32 %v6797_v40, %v8264_v15  ;;  %v8452_v28 = vadd.f32 %v6733_v13, %v6621_v18  ;;  %v8740_v40 = vld [vmem:[#allocation4_spill] sm:$0xff] }
 0x210   : > { %v6799_v59 = vpop.f32.mrf.mxu0  ;;  %v6735_v25 = vpop.f32.mrf.mxu1 }
 0x211   : > { %v6800_v57 = vadd.f32 %v6799_v59, %v6798_v52  ;;  %v6736_v26 = vadd.f32 %v6735_v25, %v6734_v61  ;;  %v8742_v59 = vld [vmem:[#allocation6_spill] sm:$0xff] }
 0x212   : > { %v7362_v22 = vld [vmem:[#allocation3 + $0x454] ss:$36 sps:$4 sm:$0xff]   ;;  %v6801_v32 = vpop.f32.mrf.mxu0  ;;  %v6737_v10 = vpop.f32.mrf.mxu1 }
 0x213   : > { %5513 = vmatprep.mubr.bf16.mxu1 %v7362_v22  ;;  %v8455_v62 = vadd.f32 %v6800_v57, %v8281_v45  ;;  %v8458_v63 = vadd.f32 %v6736_v26, %v8071_v16 }
 0x214   : > { %5514 = vmatmul.mubr.bf16.gmra.mxu1 %v7360_v49  ;;  %v6802_v46 = vpop.f32.mrf.mxu0  ;;  %v6738_v15 = vpop.f32.mrf.mxu1 }
 0x215   : > { %v6803_v5 = vadd.f32 %v6802_v46, %v6801_v32  ;;  %v6739_v7 = vadd.f32 %v6738_v15, %v6737_v10 }
 0x216   : > { %v6804_v9 = vpop.f32.mrf.mxu0 }
 0x217   : > { %v8463_v35 = vadd.f32 %v6803_v5, %v8287_v24  ;;  %v8465_v41 = vadd.f32 %v6739_v7, %v6627_v8  ;;  %v6740_v23 = vpop.f32.mrf.mxu1 }
 0x218   : > { %v6805_v34 = vpop.f32.mrf.mxu0 }
 0x219   : > { %v6806_v37 = vadd.f32 %v6805_v34, %v6804_v9  ;;  %v6741_v6 = vpop.f32.mrf.mxu1 }
 0x21a   : > { %v6807_v45 = vpop.f32.mrf.mxu0  ;;  %v6742_v24 = vadd.f32 %v6741_v6, %v6740_v23 }
 0x21b   : > { %v8468_v54 = vadd.f32 %v6806_v37, %v8312_v21  ;;  %v6743_v1 = vpop.f32.mrf.mxu1 }
 0x21c   : > { %v6808_v16 = vpop.f32.mrf.mxu0  ;;  %v8474_v49 = vadd.f32 %v6742_v24, %v8091_v39 }
 0x21d   : > { %v6809_v14 = vadd.f32 %v6808_v16, %v6807_v45  ;;  %v6744_v21 = vpop.f32.mrf.mxu1 }
 0x21e   : > { %v6810_v55 = vpop.f32.mrf.mxu0  ;;  %v6745_v18 = vadd.f32 %v6744_v21, %v6743_v1 }
 0x21f   : > { %v8471_v51 = vadd.f32 %v6809_v14, %v8314_v27  ;;  %v6633_v27 = vadd.f32 %v8741_v11, %v8740_v40  ;;  %v8481_v52 = vpop.f32.mrf.mxu1 }
 0x220   : > { %v6811_v4 = vpop.f32.mrf.mxu0 }
 0x221   : > { %v6812_v3 = vadd.f32 %v6811_v4, %v6810_v55  ;;  %v8483_v61 = vadd.f32 %v6745_v18, %v6633_v27  ;;  %v8488_v39 = vpop.f32.mrf.mxu1 }
 0x222   : > { %v6813_v36 = vpop.f32.mrf.mxu0 }
 0x223   : > { %v8477_v48 = vadd.f32 %v6812_v3, %v8331_v38  ;;  %v8490_v32 = vpop.f32.mrf.mxu1 }
 0x224   : > { %v6814_v22 = vpop.f32.mrf.mxu0 }
 0x225   : > { %v6815_v13 = vadd.f32 %v6814_v22, %v6813_v36  ;;  %v8495_v15 = vpop.f32.mrf.mxu1 }
 0x226   : > { %v6816_v57 = vpop.f32.mrf.mxu0 }
 0x227   : > { %v8486_v25 = vadd.f32 %v6815_v13, %v8742_v59 }
 0x228   : > { %v6817_v26 = vpop.f32.mrf.mxu0 }
 0x229   : > { %v6818_v38 = vadd.f32 %v6817_v26, %v6816_v57 }
 0x22a   : > { %v6819_v10 = vpop.f32.mrf.mxu0  ;;  %v8497_v7 = vpop.f32.mrf.mxu1 }
 0x22b   : > { %v8493_v46 = vadd.f32 %v6818_v38, %v8357_v31 }
 0x22c   : > { %v6820_v8 = vpop.f32.mrf.mxu0  ;;  %v8502_v34 = vpop.f32.mrf.mxu1 }
 0x22d   : > { %v6821_v5 = vadd.f32 %v6820_v8, %v6819_v10 }
 0x22e   : > { %v8504_v37 = vpop.f32.mrf.mxu1 }
 0x22f   : > { %v8500_v9 = vadd.f32 %v6821_v5, %v8371_v44 }
 0x230   : > { %v6822_v45 = vpop.f32.mrf.mxu0  ;;  %v8506_v23 = vpop.f32.mrf.mxu1 }
 0x232   : > { %v6823_v16 = vpop.f32.mrf.mxu0 }
 0x233   : > { %v6824_v14 = vadd.f32 %v6823_v16, %v6822_v45 }
 0x234   : > { %v6825_v31 = vpop.f32.mrf.mxu0 }
 0x235   : > { %v8509_v55 = vadd.f32 %v6824_v14, %v8382_v19 }
 0x236   : > { %v6826_v6 = vpop.f32.mrf.mxu0 }
 0x237   : > { %v6827_v4 = vadd.f32 %v6826_v6, %v6825_v31 }
 0x238   : > { %v8511_v24 = vpop.f32.mrf.mxu1 }
 0x239   : > { %v8514_v44 = vadd.f32 %v6827_v4, %v8391_v30 }
 0x23a   : > { %v8516_v3 = vpop.f32.mrf.mxu1 }
 0x23b   : > { %8743 = vst [vmem:[#allocation4_spill] sm:$0xff] %v8514_v44 }
 0x23c   : > { %v6828_v1 = vpop.f32.mrf.mxu0  ;;  %v8518_v36 = vpop.f32.mrf.mxu1 }
 0x23e   : > { %v6829_v21 = vpop.f32.mrf.mxu0  ;;  %v8520_v40 = vpop.f32.mrf.mxu1 }
 0x23f   : > { %v6830_v22 = vadd.f32 %v6829_v21, %v6828_v1 }
 0x240   : > { %v6831_v11 = vpop.f32.mrf.mxu0 }
 0x241   : > { %v8523_v19 = vadd.f32 %v6830_v22, %v8406_v43 }
 0x242   : > { %v6832_v27 = vpop.f32.mrf.mxu0 }
 0x243   : > { %v6833_v18 = vadd.f32 %v6832_v27, %v6831_v11  ;;  %v8525_v13 = vpop.f32.mrf.mxu1 }
 0x245   : > { %v8528_v30 = vadd.f32 %v6833_v18, %v8422_v20  ;;  %v8530_v59 = vpop.f32.mrf.mxu1 }
 0x247   : > { %v8532_v26 = vpop.f32.mrf.mxu1 }
 0x248   : > { %v6834_v57 = vpop.f32.mrf.mxu0 }
 0x249   : > { %v8534_v8 = vpop.f32.mrf.mxu1 }
 0x24a   : > { %v6835_v38 = vpop.f32.mrf.mxu0 }
 0x24b   : > { %v6836_v10 = vadd.f32 %v6835_v38, %v6834_v57 }
 0x24c   : > { %v6837_v5 = vpop.f32.mrf.mxu0 }
 0x24d   : > { %v8537_v43 = vadd.f32 %v6836_v10, %v8428_v2 }
 0x24e   : > { %v6838_v45 = vpop.f32.mrf.mxu0 }
 0x24f   : > { %8744 = vst [vmem:[#allocation5_spill] sm:$0xff] %v8537_v43  ;;  %v6839_v16 = vadd.f32 %v6838_v45, %v6837_v5 }
 0x251   : > { %v8539_v14 = vpop.f32.mrf.mxu1  ;;  %v8542_v20 = vadd.f32 %v6839_v16, %v8439_v60 }
 0x253   : > { %8745 = vst [vmem:[#allocation6_spill] sm:$0xff] %v8542_v20  ;;  %v8544_v31 = vpop.f32.mrf.mxu1 }
 0x255   : > { %v6840_v6 = vpop.f32.mrf.mxu0  ;;  %v8546_v4 = vpop.f32.mrf.mxu1 }
 0x257   : > { %v6841_v1 = vpop.f32.mrf.mxu0  ;;  %v8548_v11 = vpop.f32.mrf.mxu1 }
 0x258   : > { %v6842_v21 = vadd.f32 %v6841_v1, %v6840_v6 }
 0x259   : > { %v6843_v22 = vpop.f32.mrf.mxu0 }
 0x25a   : > { %v8551_v2 = vadd.f32 %v6842_v21, %v8445_v56 }
 0x25b   : > { %v6844_v27 = vpop.f32.mrf.mxu0 }
 0x25c   : > { %8746 = vst [vmem:[#allocation9_spill] sm:$0xff] %v8551_v2  ;;  %v6845_v18 = vadd.f32 %v6844_v27, %v6843_v22 }
 0x25e   : > { %v8553_v57 = vpop.f32.mrf.mxu1  ;;  %v8556_v60 = vadd.f32 %v6845_v18, %v8452_v28 }
 0x260   : > { %8747 = vst [vmem:[#allocation10_spill] sm:$0xff] %v8556_v60  ;;  %v8558_v38 = vpop.f32.mrf.mxu1 }
 0x262   : > { %v6846_v10 = vpop.f32.mrf.mxu0  ;;  %v8560_v5 = vpop.f32.mrf.mxu1 }
 0x264   : > { %v6847_v45 = vpop.f32.mrf.mxu0  ;;  %v8562_v1 = vpop.f32.mrf.mxu1 }
 0x265   : > { %v6848_v16 = vadd.f32 %v6847_v45, %v6846_v10 }
 0x266   : > { %v6849_v6 = vpop.f32.mrf.mxu0 }
 0x267   : > { %v8565_v56 = vadd.f32 %v6848_v16, %v8458_v63 }
 0x268   : > { %v6850_v21 = vpop.f32.mrf.mxu0 }
 0x269   : > { %8748 = vst [vmem:[#allocation11_spill] sm:$0xff] %v8565_v56  ;;  %v6851_v22 = vadd.f32 %v6850_v21, %v6849_v6  ;;  %v6882_v21 = vadd.f32 %v8502_v34, %v8497_v7 }
 0x26b   : > { %v8567_v27 = vpop.f32.mrf.mxu1  ;;  %v8570_v28 = vadd.f32 %v6851_v22, %v8465_v41  ;;  %v6876_v41 = vadd.f32 %v8488_v39, %v8481_v52  ;;  %v6885_v22 = vadd.f32 %v8506_v23, %v8504_v37  ;;  %v5404_v39 = vadd.f32 %v6882_v21, %v8366_v53  ;;  %v8752_v21 = vld [vmem:[#allocation7_spill] sm:$0xff] }
 0x26c   : > { %v6888_v23 = vadd.f32 %v8516_v3, %v8511_v24  ;;  %v6894_v53 = vadd.f32 %v8530_v59, %v8525_v13 }
 0x26d   : > { %8749 = vst [vmem:[#allocation12_spill] sm:$0xff] %v8570_v28  ;;  %v8572_v18 = vpop.f32.mrf.mxu1  ;;  %v5396_v7 = vadd.f32 %v6876_v41, %v8349_v50  ;;  %v5407_v34 = vadd.f32 %v6885_v22, %v8374_v17  ;;  %v6897_v50 = vadd.f32 %v8534_v8, %v8532_v26 }
 0x26e   : > { %v5412_v22 = vadd.f32 %v6888_v23, %v8752_v21 }
 0x26f   : > { %v8574_v60 = vpop.f32.mrf.mxu1 }
 0x271   : > { %v8576_v2 = vpop.f32.mrf.mxu1 }
 0x275   : > { %v6852_v20 = vpop.f32.mrf.mxu0 }
 0x277   : > { %v6853_v10 = vpop.f32.mrf.mxu0 }
 0x278   : > { %v6854_v45 = vadd.f32 %v6853_v10, %v6852_v20 }
 0x279   : > { %v6855_v43 = vpop.f32.mrf.mxu0  ;;  %v8581_v16 = vpop.f32.mrf.mxu1 }
 0x27a   : > { %v8579_v63 = vadd.f32 %v6854_v45, %v8474_v49  ;;  %v6879_v49 = vadd.f32 %v8495_v15, %v8490_v32 }
 0x27b   : > { %v6856_v6 = vpop.f32.mrf.mxu0  ;;  %v8589_v56 = vpop.f32.mrf.mxu1 }
 0x27c   : > { %8750 = vst [vmem:[#allocation13_spill] sm:$0xff] %v8579_v63  ;;  %v6857_v28 = vadd.f32 %v6856_v6, %v6855_v43 }
 0x27d   : > { %v7012_v20 = vpop.f32.mrf.mxu0  ;;  %v8596_v45 = vpop.f32.mrf.mxu1 }
 0x27e   : > { %v8594_v10 = vadd.f32 %v6857_v28, %v8483_v61  ;;  %v5565_v32 = vadd.f32 %v7012_v20, %v5404_v39  ;;  %v5399_v28 = vadd.f32 %v6879_v49, %v8354_v0  ;;  %v6891_v20 = vadd.f32 %v8520_v40, %v8518_v36 }
 0x27f   : > { %v5556_v52 = vpop.f32.mrf.mxu0  ;;  %v8601_v37 = vpop.f32.mrf.mxu1  ;;  %v5420_v49 = vadd.f32 %v6894_v53, %v8403_v12  ;;  %v8753_v12 = vld [vmem:[#allocation8_spill] sm:$0xff] }
 0x280   : > { %8751 = vst [vmem:[#allocation14_spill] sm:$0xff] %v8594_v10  ;;  %v5557_v15 = vadd.f32 %v5556_v52, %v5396_v7  ;;  %v5423_v7 = vadd.f32 %v6897_v50, %v8415_v42  ;;  %v5415_v40 = vadd.f32 %v6891_v20, %v8753_v12 }
 0x281   : > { %v7013_v43 = vpop.f32.mrf.mxu0 }
 0x282   : > { %v5568_v61 = vadd.f32 %v7013_v43, %v5407_v34  ;;  %v5881_v13 = vmul.f32 %v5557_v15, %v5557_v15  ;;  %v5883_v34 = vmul.f32 %v5565_v32, %v5565_v32 }
 0x283   : > { %v5559_v17 = vpop.f32.mrf.mxu0 }
 0x284   : > { %v8606_v6 = vpop.f32.mrf.mxu1  ;;  %v6435_v24 = vpack.c.bf16 %v5568_v61, %v5565_v32  ;;  %v5560_v3 = vadd.f32 %v5559_v17, %v5399_v28  ;;  %v5884_v17 = vmul.f32 %v5568_v61, %v5568_v61 }
 0x285   : > { %v7016_v41 = vpop.f32.mrf.mxu0 }
 0x286   : > { %v8619_v0 = vpop.f32.mrf.mxu1  ;;  %6507 = vst [vmem:[%s8617_s8 + $0x8] sm:$0xff] %v6435_v24   ;;  %v6430_v59 = vpack.c.bf16 %v5560_v3, %v5557_v15  ;;  %v5843_v26 = vadd.f32 %v5560_v3, %v5557_v15  ;;  %v5882_v8 = vmul.f32 %v5560_v3, %v5560_v3  ;;  %v5581_v15 = vadd.f32 %v7016_v41, %v5420_v49 }
 0x287   : > { %v5572_v52 = vpop.f32.mrf.mxu0  ;;  %v6903_v49 = vadd.f32 %v8548_v11, %v8546_v4 }
 0x288   : > { %v8626_v39 = vpop.f32.mrf.mxu1  ;;  %6431 = vst [vmem:[%s8617_s8] sm:$0xff] %v6430_v59   ;;  %v5844_v43 = vadd.f32 %v5843_v26, %v5565_v32  ;;  %v5913_v28 = vadd.f32 %v5882_v8, %v5881_v13  ;;  %v5573_v23 = vadd.f32 %v5572_v52, %v5412_v22  ;;  %v6900_v32 = vadd.f32 %v8544_v31, %v8539_v14 }
 0x289   : > { %v7017_v24 = vpop.f32.mrf.mxu0  ;;  %v6906_v13 = vadd.f32 %v8558_v38, %v8553_v57 }
 0x28a   : > { %v5914_v21 = vadd.f32 %v5913_v28, %v5883_v34  ;;  %v5845_v3 = vadd.f32 %v5844_v43, %v5568_v61  ;;  %v5584_v10 = vadd.f32 %v7017_v24, %v5423_v7  ;;  %v8630_v36 = vpop.f32.mrf.mxu1  ;;  %v5885_v44 = vmul.f32 %v5573_v23, %v5573_v23 }
 0x28b   : > { %v5575_v53 = vpop.f32.mrf.mxu0  ;;  %v6909_v61 = vadd.f32 %v8562_v1, %v8560_v5  ;;  %v5887_v7 = vmul.f32 %v5581_v15, %v5581_v15  ;;  %v5428_v57 = vadd.f32 %v6900_v32, %v8425_v58 }
 0x28c   : > { %v5846_v63 = vadd.f32 %v5845_v3, %v5573_v23  ;;  %v5915_v42 = vadd.f32 %v5914_v21, %v5884_v17  ;;  %v6445_v50 = vpack.c.bf16 %v5584_v10, %v5581_v15  ;;  %v5576_v22 = vadd.f32 %v5575_v53, %v5415_v40 }
 0x28d   : > { %v5439_v5 = vadd.f32 %v6909_v61, %v8450_v47  ;;  %v5888_v1 = vmul.f32 %v5584_v10, %v5584_v10  ;;  %v5431_v17 = vadd.f32 %v6903_v49, %v8437_v29  ;;  %v6918_v47 = vadd.f32 %v8589_v56, %v8581_v16 }
 0x28e   : > { %v5916_v41 = vadd.f32 %v5915_v42, %v5885_v44  ;;  %6509 = vst [vmem:[%s8617_s8 + $0x18] sm:$0xff] %v6445_v50   ;;  %v6440_v59 = vpack.c.bf16 %v5576_v22, %v5573_v23  ;;  %v5847_v26 = vadd.f32 %v5846_v63, %v5576_v22  ;;  %v5886_v8 = vmul.f32 %v5576_v22, %v5576_v22 }
 0x28f   : > { %v5436_v44 = vadd.f32 %v6906_v13, %v8442_v33  ;;  %v6912_v33 = vadd.f32 %v8572_v18, %v8567_v27  ;;  %v6915_v27 = vadd.f32 %v8576_v2, %v8574_v60  ;;  %v5452_v56 = vadd.f32 %v6918_v47, %v8468_v54 }
 0x290   : > { %6508 = vst [vmem:[%s8617_s8 + $0x10] sm:$0xff] %v6440_v59   ;;  %v5848_v14 = vadd.f32 %v5847_v26, %v5581_v15  ;;  %v5917_v31 = vadd.f32 %v5916_v41, %v5886_v8 }
 0x291   : > { %v5444_v16 = vadd.f32 %v6912_v33, %v8455_v62  ;;  %v5447_v54 = vadd.f32 %v6915_v27, %v8463_v35 }
 0x292   : > { %v8640_v20 = vpop.f32.mrf.mxu1  ;;  %v5918_v63 = vadd.f32 %v5917_v31, %v5887_v7  ;;  %v5849_v28 = vadd.f32 %v5848_v14, %v5584_v10  ;;  %v6921_v10 = vadd.f32 %v8601_v37, %v8596_v45 }
 0x293   : > { %v7020_v52 = vpop.f32.mrf.mxu0 }
 0x294   : > { %v8645_v34 = vpop.f32.mrf.mxu1  ;;  %v5597_v4 = vadd.f32 %v7020_v52, %v5436_v44  ;;  %v5919_v15 = vadd.f32 %v5918_v63, %v5888_v1  ;;  %v5455_v59 = vadd.f32 %v6921_v10, %v8471_v51  ;;  %v6924_v63 = vadd.f32 %v8619_v0, %v8606_v6 }
 0x295   : > { %v5588_v38 = vpop.f32.mrf.mxu0 }
 0x296   : > { %v5589_v43 = vadd.f32 %v5588_v38, %v5428_v57  ;;  %v6931_v23 = vpop.f32.mrf.mxu1  ;;  %v5891_v37 = vmul.f32 %v5597_v4, %v5597_v4  ;;  %v5460_v6 = vadd.f32 %v6924_v63, %v8477_v48 }
 0x297   : > { %v7021_v11 = vpop.f32.mrf.mxu0 }
 0x298   : > { %v5850_v24 = vadd.f32 %v5849_v28, %v5589_v43  ;;  %v5889_v21 = vmul.f32 %v5589_v43, %v5589_v43  ;;  %v5600_v3 = vadd.f32 %v7021_v11, %v5439_v5  ;;  %v6932_v58 = vpop.f32.mrf.mxu1  ;;  %v6930_v11 = vadd.f32 %v8645_v34, %v8640_v20 }
 0x299   : > { %v5591_v12 = vpop.f32.mrf.mxu0 }
 0x29a   : > { %v5920_v40 = vadd.f32 %v5919_v15, %v5889_v21  ;;  %v6455_v53 = vpack.c.bf16 %v5600_v3, %v5597_v4  ;;  %v5592_v42 = vadd.f32 %v5591_v12, %v5431_v17  ;;  %v5892_v26 = vmul.f32 %v5600_v3, %v5600_v3 }
 0x29b   : > { %v8657_v29 = vpop.f32.mrf.mxu1  ;;  %v7024_v50 = vpop.f32.mrf.mxu0  ;;  %v6933_v17 = vadd.f32 %v6932_v58, %v6931_v23  ;;  %v5468_v20 = vadd.f32 %v6930_v11, %v8493_v46 }
 0x29c   : > { %6511 = vst [vmem:[%s8617_s8 + $0x28] sm:$0xff] %v6455_v53   ;;  %v6450_v32 = vpack.c.bf16 %v5592_v42, %v5589_v43  ;;  %v5851_v22 = vadd.f32 %v5850_v24, %v5592_v42  ;;  %v5890_v13 = vmul.f32 %v5592_v42, %v5592_v42  ;;  %v5613_v14 = vadd.f32 %v7024_v50, %v5452_v56 }
 0x29d   : > { %v6935_v18 = vpop.f32.mrf.mxu1  ;;  %v5604_v45 = vpop.f32.mrf.mxu0  ;;  %v5471_v58 = vadd.f32 %v6933_v17, %v8500_v9 }
 0x29e   : > { %6510 = vst [vmem:[%s8617_s8 + $0x20] sm:$0xff] %v6450_v32   ;;  %v5852_v61 = vadd.f32 %v5851_v22, %v5597_v4  ;;  %v5921_v41 = vadd.f32 %v5920_v40, %v5890_v13  ;;  %v5605_v8 = vadd.f32 %v5604_v45, %v5444_v16  ;;  %v5895_v24 = vmul.f32 %v5613_v14, %v5613_v14 }
 0x29f   : > { %v6937_v49 = vpop.f32.mrf.mxu1  ;;  %v7025_v52 = vpop.f32.mrf.mxu0  ;;  %v6936_v48 = vadd.f32 %v6935_v18, %v8657_v29 }
 0x2a0   : > { %v5922_v7 = vadd.f32 %v5921_v41, %v5891_v37  ;;  %v5853_v2 = vadd.f32 %v5852_v61, %v5600_v3  ;;  %v5616_v60 = vadd.f32 %v7025_v52, %v5455_v59  ;;  %v5893_v57 = vmul.f32 %v5605_v8, %v5605_v8 }
 0x2a1   : > { %v5607_v31 = vpop.f32.mrf.mxu0  ;;  %v6938_v5 = vpop.f32.mrf.mxu1  ;;  %v6927_v3 = vadd.f32 %v8630_v36, %v8626_v39 }
 0x2a2   : > { %v5854_v62 = vadd.f32 %v5853_v2, %v5605_v8  ;;  %v5923_v44 = vadd.f32 %v5922_v7, %v5892_v26  ;;  %v6465_v38 = vpack.c.bf16 %v5616_v60, %v5613_v14  ;;  %v5608_v1 = vadd.f32 %v5607_v31, %v5447_v54 }
 0x2a3   : > { %v5896_v12 = vmul.f32 %v5616_v60, %v5616_v60  ;;  %v5463_v39 = vadd.f32 %v6927_v3, %v8486_v25  ;;  %v6939_v25 = vadd.f32 %v6938_v5, %v6937_v49  ;;  %v5476_v7 = vadd.f32 %v6936_v48, %v8509_v55 }
 0x2a4   : > { %v5924_v51 = vadd.f32 %v5923_v44, %v5893_v57  ;;  %6513 = vst [vmem:[%s8617_s8 + $0x38] sm:$0xff] %v6465_v38   ;;  %v6460_v43 = vpack.c.bf16 %v5608_v1, %v5605_v8  ;;  %v5855_v28 = vadd.f32 %v5854_v62, %v5608_v1  ;;  %v5894_v4 = vmul.f32 %v5608_v1, %v5608_v1 }
 0x2a6   : > { %6512 = vst [vmem:[%s8617_s8 + $0x30] sm:$0xff] %v6460_v43   ;;  %v5856_v21 = vadd.f32 %v5855_v28, %v5613_v14  ;;  %v5925_v15 = vadd.f32 %v5924_v51, %v5894_v4  ;;  %v8754_v51 = vld [vmem:[#allocation4_spill] sm:$0xff] }
 0x2a7   : > { %v5479_v55 = vadd.f32 %v6939_v25, %v8754_v51 }
 0x2a8   : > { %v5926_v10 = vadd.f32 %v5925_v15, %v5895_v24  ;;  %v5857_v0 = vadd.f32 %v5856_v21, %v5616_v60 }
 0x2a9   : > { %v6940_v35 = vpop.f32.mrf.mxu1 }
 0x2aa   : > { %v5927_v23 = vadd.f32 %v5926_v10, %v5896_v12 }
 0x2ab   : > { %v7028_v33 = vpop.f32.mrf.mxu0  ;;  %v6941_v47 = vpop.f32.mrf.mxu1 }
 0x2ac   : > { %v5629_v36 = vadd.f32 %v7028_v33, %v5468_v20  ;;  %v6942_v27 = vadd.f32 %v6941_v47, %v6940_v35 }
 0x2ad   : > { %v5620_v40 = vpop.f32.mrf.mxu0  ;;  %v6943_v53 = vpop.f32.mrf.mxu1 }
 0x2ae   : > { %v5621_v34 = vadd.f32 %v5620_v40, %v5460_v6  ;;  %v5899_v8 = vmul.f32 %v5629_v36, %v5629_v36  ;;  %v5484_v2 = vadd.f32 %v6942_v27, %v8523_v19  ;;  %v8755_v40 = vld [vmem:[#allocation5_spill] sm:$0xff] }
 0x2af   : > { %v7029_v42 = vpop.f32.mrf.mxu0  ;;  %v6944_v50 = vpop.f32.mrf.mxu1 }
 0x2b0   : > { %v5858_v32 = vadd.f32 %v5857_v0, %v5621_v34  ;;  %v5897_v22 = vmul.f32 %v5621_v34, %v5621_v34  ;;  %v5632_v13 = vadd.f32 %v7029_v42, %v5471_v58  ;;  %v6945_v45 = vadd.f32 %v6944_v50, %v6943_v53  ;;  %v8756_v50 = vld [vmem:[#allocation9_spill] sm:$0xff] }
 0x2b1   : > { %v5623_v56 = vpop.f32.mrf.mxu0 }
 0x2b2   : > { %v5928_v16 = vadd.f32 %v5927_v23, %v5897_v22  ;;  %v6475_v46 = vpack.c.bf16 %v5632_v13, %v5629_v36  ;;  %v5624_v37 = vadd.f32 %v5623_v56, %v5463_v39  ;;  %v5487_v60 = vadd.f32 %v6945_v45, %v8528_v30 }
 0x2b3   : > { %v6946_v61 = vpop.f32.mrf.mxu1  ;;  %v5900_v54 = vmul.f32 %v5632_v13, %v5632_v13 }
 0x2b4   : > { %v7032_v9 = vpop.f32.mrf.mxu0  ;;  %6515 = vst [vmem:[%s8617_s8 + $0x48] sm:$0xff] %v6475_v46   ;;  %v6470_v41 = vpack.c.bf16 %v5624_v37, %v5621_v34  ;;  %v5859_v59 = vadd.f32 %v5858_v32, %v5624_v37  ;;  %v5898_v26 = vmul.f32 %v5624_v37, %v5624_v37 }
 0x2b5   : > { %v6947_v52 = vpop.f32.mrf.mxu1  ;;  %v5645_v38 = vadd.f32 %v7032_v9, %v5484_v2  ;;  %v8758_v9 = vld [vmem:[#allocation10_spill] sm:$0xff] }
 0x2b6   : > { %v5636_v14 = vpop.f32.mrf.mxu0  ;;  %6514 = vst [vmem:[%s8617_s8 + $0x40] sm:$0xff] %v6470_v41   ;;  %v5860_v29 = vadd.f32 %v5859_v59, %v5629_v36  ;;  %v5929_v18 = vadd.f32 %v5928_v16, %v5898_v26  ;;  %v6948_v30 = vadd.f32 %v6947_v52, %v6946_v61  ;;  %v8757_v16 = vld [vmem:[#allocation6_spill] sm:$0xff] }
 0x2b7   : > { %v5637_v31 = vadd.f32 %v5636_v14, %v5476_v7  ;;  %v6949_v62 = vpop.f32.mrf.mxu1  ;;  %v5903_v3 = vmul.f32 %v5645_v38, %v5645_v38 }
 0x2b8   : > { %v7033_v57 = vpop.f32.mrf.mxu0  ;;  %v5930_v44 = vadd.f32 %v5929_v18, %v5899_v8  ;;  %v5861_v49 = vadd.f32 %v5860_v29, %v5632_v13  ;;  %v5492_v53 = vadd.f32 %v6948_v30, %v8755_v40 }
 0x2b9   : > { %v5648_v5 = vadd.f32 %v7033_v57, %v5487_v60  ;;  %v6950_v1 = vpop.f32.mrf.mxu1  ;;  %v5901_v28 = vmul.f32 %v5637_v31, %v5637_v31 }
 0x2ba   : > { %v5639_v63 = vpop.f32.mrf.mxu0  ;;  %v5862_v43 = vadd.f32 %v5861_v49, %v5637_v31  ;;  %v5931_v4 = vadd.f32 %v5930_v44, %v5900_v54  ;;  %v6951_v6 = vadd.f32 %v6950_v1, %v6949_v62 }
 0x2bb   : > { %v6485_v19 = vpack.c.bf16 %v5648_v5, %v5645_v38  ;;  %v5640_v11 = vadd.f32 %v5639_v63, %v5479_v55  ;;  %v5904_v20 = vmul.f32 %v5648_v5, %v5648_v5 }
 0x2bc   : > { %v5932_v35 = vadd.f32 %v5931_v4, %v5901_v28  ;;  %v5495_v46 = vadd.f32 %v6951_v6, %v8757_v16 }
 0x2bd   : > { %6517 = vst [vmem:[%s8617_s8 + $0x58] sm:$0xff] %v6485_v19   ;;  %v6480_v17 = vpack.c.bf16 %v5640_v11, %v5637_v31  ;;  %v5863_v24 = vadd.f32 %v5862_v43, %v5640_v11  ;;  %v5902_v21 = vmul.f32 %v5640_v11, %v5640_v11  ;;  %v8760_v11 = vld [vmem:[#allocation12_spill] sm:$0xff] }
 0x2bf   : > { %6516 = vst [vmem:[%s8617_s8 + $0x50] sm:$0xff] %v6480_v17   ;;  %v5864_v33 = vadd.f32 %v5863_v24, %v5645_v38  ;;  %v5933_v47 = vadd.f32 %v5932_v35, %v5902_v21 }
 0x2c0   : > { %v6952_v15 = vpop.f32.mrf.mxu1 }
 0x2c1   : > { %v7036_v12 = vpop.f32.mrf.mxu0  ;;  %v5934_v34 = vadd.f32 %v5933_v47, %v5903_v3  ;;  %v5865_v58 = vadd.f32 %v5864_v33, %v5648_v5  ;;  %v8759_v5 = vld [vmem:[#allocation11_spill] sm:$0xff] }
 0x2c2   : > { %v6953_v10 = vpop.f32.mrf.mxu1 }
 0x2c3   : > { %v6954_v0 = vadd.f32 %v6953_v10, %v6952_v15  ;;  %v5652_v23 = vpop.f32.mrf.mxu0  ;;  %v5935_v32 = vadd.f32 %v5934_v34, %v5904_v20 }
 0x2c4   : > { %v6955_v42 = vpop.f32.mrf.mxu1  ;;  %v5653_v36 = vadd.f32 %v5652_v23, %v5492_v53 }
 0x2c5   : > { %v5500_v39 = vadd.f32 %v6954_v0, %v8756_v50  ;;  %v7037_v22 = vpop.f32.mrf.mxu0  ;;  %v8761_v0 = vld [vmem:[#allocation13_spill] sm:$0xff] }
 0x2c6   : > { %v6956_v13 = vpop.f32.mrf.mxu1  ;;  %v5866_v48 = vadd.f32 %v5865_v58, %v5653_v36  ;;  %v5905_v27 = vmul.f32 %v5653_v36, %v5653_v36 }
 0x2c7   : > { %v6957_v56 = vadd.f32 %v6956_v13, %v6955_v42  ;;  %v5661_v45 = vadd.f32 %v7036_v12, %v5500_v39  ;;  %v5655_v37 = vpop.f32.mrf.mxu0  ;;  %v8762_v42 = vld [vmem:[#allocation14_spill] sm:$0xff] }
 0x2c8   : > { %v5936_v61 = vadd.f32 %v5935_v32, %v5905_v27  ;;  %v5656_v59 = vadd.f32 %v5655_v37, %v5495_v46 }
 0x2c9   : > { %v5503_v41 = vadd.f32 %v6957_v56, %v8758_v9  ;;  %v5907_v29 = vmul.f32 %v5661_v45, %v5661_v45 }
 0x2ca   : > { %v6490_v25 = vpack.c.bf16 %v5656_v59, %v5653_v36  ;;  %v5867_v8 = vadd.f32 %v5866_v48, %v5656_v59  ;;  %v5906_v52 = vmul.f32 %v5656_v59, %v5656_v59  ;;  %v6958_v7 = vpop.f32.mrf.mxu1  ;;  %v7040_v14 = vpop.f32.mrf.mxu0 }
 0x2cb   : > { %v5664_v26 = vadd.f32 %v7037_v22, %v5503_v41 }
 0x2cc   : > { %6518 = vst [vmem:[%s8617_s8 + $0x60] sm:$0xff] %v6490_v25   ;;  %v5868_v60 = vadd.f32 %v5867_v8, %v5661_v45  ;;  %v5937_v54 = vadd.f32 %v5936_v61, %v5906_v52  ;;  %v6959_v31 = vpop.f32.mrf.mxu1  ;;  %v5668_v62 = vpop.f32.mrf.mxu0 }
 0x2cd   : > { %v6495_v18 = vpack.c.bf16 %v5664_v26, %v5661_v45  ;;  %v5908_v2 = vmul.f32 %v5664_v26, %v5664_v26  ;;  %v6960_v57 = vadd.f32 %v6959_v31, %v6958_v7 }
 0x2ce   : > { %v5938_v44 = vadd.f32 %v5937_v54, %v5907_v29  ;;  %v6961_v38 = vpop.f32.mrf.mxu1  ;;  %v5869_v49 = vadd.f32 %v5868_v60, %v5664_v26  ;;  %v7041_v63 = vpop.f32.mrf.mxu0 }
 0x2cf   : > { %6519 = vst [vmem:[%s8617_s8 + $0x68] sm:$0xff] %v6495_v18   ;;  %v5508_v1 = vadd.f32 %v6960_v57, %v8759_v5 }
 0x2d0   : > { %v5939_v51 = vadd.f32 %v5938_v44, %v5908_v2  ;;  %v6962_v55 = vpop.f32.mrf.mxu1  ;;  %v5671_v17 = vpop.f32.mrf.mxu0 }
 0x2d1   : > { %v5669_v43 = vadd.f32 %v5668_v62, %v5508_v1  ;;  %v6963_v28 = vadd.f32 %v6962_v55, %v6961_v38 }
 0x2d3   : > { %v5870_v4 = vadd.f32 %v5869_v49, %v5669_v43  ;;  %v5909_v19 = vmul.f32 %v5669_v43, %v5669_v43  ;;  %v5511_v30 = vadd.f32 %v6963_v28, %v8760_v11 }
 0x2d4   : > { %v6964_v35 = vpop.f32.mrf.mxu1 }
 0x2d5   : > { %v5940_v24 = vadd.f32 %v5939_v51, %v5909_v19  ;;  %v5672_v21 = vadd.f32 %v5671_v17, %v5511_v30 }
 0x2d6   : > { %v6965_v15 = vpop.f32.mrf.mxu1 }
 0x2d7   : > { %v6500_v3 = vpack.c.bf16 %v5672_v21, %v5669_v43  ;;  %v5871_v33 = vadd.f32 %v5870_v4, %v5672_v21  ;;  %v5910_v47 = vmul.f32 %v5672_v21, %v5672_v21  ;;  %v6966_v12 = vadd.f32 %v6965_v15, %v6964_v35 }
 0x2d8   : > { %v6967_v10 = vpop.f32.mrf.mxu1 }
 0x2d9   : > { %6520 = vst [vmem:[%s8617_s8 + $0x70] sm:$0xff] %v6500_v3   ;;  %v5941_v6 = vadd.f32 %v5940_v24, %v5910_v47  ;;  %v5516_v40 = vadd.f32 %v6966_v12, %v8761_v0 }
 0x2da   : > { %v6968_v53 = vpop.f32.mrf.mxu1 }
 0x2db   : > { %v5677_v20 = vadd.f32 %v7040_v14, %v5516_v40  ;;  %v6969_v34 = vadd.f32 %v6968_v53, %v6967_v10 }
 0x2dd   : > { %v5872_v23 = vadd.f32 %v5871_v33, %v5677_v20  ;;  %v5911_v58 = vmul.f32 %v5677_v20, %v5677_v20  ;;  %v5519_v50 = vadd.f32 %v6969_v34, %v8762_v42 }
 0x2df   : > { %v5942_v39 = vadd.f32 %v5941_v6, %v5911_v58  ;;  %v5680_v36 = vadd.f32 %v7041_v63, %v5519_v50 }
 0x2e1   : > { %v6505_v32 = vpack.c.bf16 %v5680_v36, %v5677_v20  ;;  %v5873_v22 = vadd.f32 %v5872_v23, %v5680_v36  ;;  %v5912_v13 = vmul.f32 %v5680_v36, %v5680_v36 }
 0x2e3   : > { %6521 = vst [vmem:[%s8617_s8 + $0x78] sm:$0xff] %v6505_v32   ;;  %v5874_v48 = vrot.slane %v5873_v22, 4  ;;  %v5943_v27 = vadd.f32 %v5942_v39, %v5912_v13 }
 0x2e5   : > { %v5875_v56 = vadd.f32 %v5874_v48, %v5873_v22  ;;  %v5944_v16 = vrot.slane %v5943_v27, 4 }
 0x2e7   : > { %v5876_v46 = vrot.slane %v5875_v56, 2  ;;  %v5945_v45 = vadd.f32 %v5944_v16, %v5943_v27 }
 0x2e9   : > { %v5877_v37 = vadd.f32 %v5876_v46, %v5875_v56  ;;  %v5946_v61 = vrot.slane %v5945_v45, 2 }
 0x2eb   : > { %v5878_v9 = vrot.slane %v5877_v37, 1  ;;  %v5947_v41 = vadd.f32 %v5946_v61, %v5945_v45 }
 0x2ed   : > { %v5879_v59 = vadd.f32 %v5878_v9, %v5877_v37  ;;  %v5948_v26 = vrot.slane %v5947_v41, 1 }
 0x2ef   : > { %5880 = vst [vmem:[%s289_s10] sm:$0x1] %v5879_v59  ;;  %v5949_v25 = vadd.f32 %v5948_v26, %v5947_v41 }
 0x2f1   : > { %5950 = vst [vmem:[%s294_s13] sm:$0x1] %v5949_v25 }
 0x2f2 PF: > { %s17_s1 = sadd.s32 1, %s7386_s1   ;;  %s8763_s21 = smov %s7382_s22 }
 0x2f3   : > { %p14_p5 = scmp.ge.s32.totalorder %s17_s1, 4   ;;  %s8764_s22 = smov %s8766_s2 }
 0x2f5   :  { %16 = sbr.rel (!%p14_p5) target bundleno = 2 (0x2), region = 104 }

// kernel: basic_block_forward.4
= control target key start
LH: loop header
LB: loop body
LE: loop exit
PB: predicated region body
PF: predicated region fallthrough
CT: control target
= control target key end

     0   :  { %s7879_s21 = smov 0   ;;  %s7881_s22 = smov 0   ;;  %s9476_s0 = inlined_call_operand.vmem [shape: bf16[2,16,16,128], index: 0, kind: input, shape index: {}]   ;;  %s9477_s1 = inlined_call_operand.vmem [shape: f32[1,128], index: 1, kind: input, shape index: {}]   ;;  %s9478_s2 = inlined_call_operand.vmem [shape: f32[1,128], index: 2, kind: input, shape index: {}]   ;;  %s9479_s3 = inlined_call_operand.vmem [shape: bf16[1152,128], index: 3, kind: input, shape index: {}]   ;;  %s9480_s4 = inlined_call_operand.vmem [shape: bf16[2,256,128], index: 4, kind: output, shape index: {0}]   ;;  %s9481_s5 = inlined_call_operand.vmem [shape: f32[2,1,128], index: 5, kind: output, shape index: {1}]   ;;  %s9482_s6 = inlined_call_operand.vmem [shape: f32[2,1,128], index: 6, kind: output, shape index: {2}]  }
   0x1   :  { %s7883_s23 = smov 0  }
   0x2 LB: > { %s29_s24 = sadd.s32 1, %s7837_s22  ;;  %p6380_p0 = scmp.ge.s32.totalorder %s7841_s23, 1  ;;  %s7841_s23 = sphi %s7883_s23, %s17_s23   ;;  %s7837_s22 = sphi %s7881_s22, %s9519_s22   ;;  %s7833_s21 = sphi %s7879_s21, %s9518_s21  }
   0x3   : > { %p31_p1 = scmp.ge.s32.totalorder %s29_s24, 2  ;;  %p235_p2 = scmp.lt.s32.totalorder %s7841_s23, 3 }
   0x5   : > { %s9521_s24 = smov (%p31_p1, %s29_s24), 0  ;;  %p236_p3 = pnand %p6380_p0, %p235_p2 }
   0x7   : > { %239 = sbr.rel (%p236_p3) target bundleno = 759 (0x2f7), region = 36 }
   0xc   : > { %v7534_v0 = vld [vmem:[%s9479_s3 + $0x78] sm:$0xff]   ;;  %v7843_v2 = vmov 0   ;;  %v7536_v3 = vld [vmem:[%s9479_s3 + $0x70] sm:$0xff]   ;;  %v7538_v5 = vld [vmem:[%s9479_s3 + $0x68] sm:$0xff]   ;;  %p274_p4 = scmp.lt.s32.totalorder %s7833_s21, 1  ;;  %vm956_vm2 = vcmask 1040384  }
   0xd   : > { %v7535_v1 = vld [vmem:[%s9479_s3 + $0x38] sm:$0xff]   ;;  %298 = vst [vmem:[#allocation2] sm:$0xf] %v7843_v2  ;;  %299 = vst [vmem:[#allocation2 + $0x4] sm:$0xf] %v7843_v2  ;;  %6973 = vmatprep.subr.bf16.mxu0 %v7534_v0  ;;  %7493 = vmatprep.subr.bf16.mxu1 %v7534_v0  ;;  %v7537_v4 = vld [vmem:[%s9479_s3 + $0x30] sm:$0xff]  }
   0xe   : > { %300 = vst [vmem:[#allocation2 + $0x8] sm:$0x1] %v7843_v2  ;;  %301 = vst [vmem:[#allocation2 + $0xc] sm:$0xf] %v7843_v2  ;;  %6974 = vmatpush3.bf16.msra.mxu0 %v7535_v1  ;;  %7501 = vmatpush3.bf16.msra.mxu1 %v7535_v1  ;;  %v7539_v6 = vld [vmem:[%s9479_s3 + $0x28] sm:$0xff]   ;;  %v7540_v7 = vld [vmem:[%s9479_s3 + $0x60] sm:$0xff]  }
   0xf   : > { %302 = vst [vmem:[#allocation2 + $0x10] sm:$0xf] %v7843_v2  ;;  %303 = vst [vmem:[#allocation2 + $0x14] sm:$0x1] %v7843_v2  ;;  %6975 = vmatprep.subr.bf16.mxu0 %v7536_v3  ;;  %7494 = vmatprep.subr.bf16.mxu1 %v7536_v3  ;;  %s9523_s21 = smov (!%p274_p4, %s7833_s21), 1  ;;  %v7541_v8 = vld [vmem:[%s9479_s3 + $0x20] sm:$0xff]  }
  0x10   : > { %304 = vst [vmem:[#allocation2 + $0x18] sm:$0xf] %v7843_v2  ;;  %305 = vst [vmem:[#allocation2 + $0x1c] sm:$0xf] %v7843_v2  ;;  %v7542_v9 = vld [vmem:[%s9479_s3 + $0x58] sm:$0xff]   ;;  %s6729_s19 = sshll.u32 %s9523_s21, 7  ;;  %s289_s20 = scalar_lea.vmem %s9481_s5, %s9523_s21 }
  0x11   : > { %306 = vst [vmem:[#allocation2 + $0x20] sm:$0x1] %v7843_v2  ;;  %307 = vst [vmem:[#allocation2 + $0x24] sm:$0xf] %v7843_v2  ;;  %v7543_v10 = vld [vmem:[%s9479_s3 + $0x18] sm:$0xff]   ;;  %v7544_v11 = vld [vmem:[%s9479_s3 + $0x50] sm:$0xff]   ;;  %s7942_s30 = scalar_lea.vmem %s9476_s0, %s6729_s19  ;;  %s9370_s17 = scalar_lea.vmem %s9480_s4, %s6729_s19 }
  0x12   : > { %308 = vst [vmem:[#allocation2 + $0x28] sm:$0xf] %v7843_v2  ;;  %309 = vst [vmem:[#allocation2 + $0x2c] sm:$0x1] %v7843_v2  ;;  %6976 = vmatpush3.bf16.msra.mxu0 %v7537_v4  ;;  %7502 = vmatpush3.bf16.msra.mxu1 %v7537_v4  ;;  %vm1309_vm0 = vsmask.f32 3328  ;;  %s294_s27 = scalar_lea.vmem %s9482_s6, %s9523_s21 }
  0x13   : > { %310 = vst [vmem:[#allocation2 + $0x30] sm:$0xf] %v7843_v2  ;;  %311 = vst [vmem:[#allocation2 + $0x34] sm:$0xf] %v7843_v2  ;;  %6977 = vmatprep.subr.bf16.mxu0 %v7538_v5  ;;  %7495 = vmatprep.subr.bf16.mxu1 %v7538_v5  ;;  %vm1310_vm1 = vsmask.f32 7440 }
  0x14   : > { %312 = vst [vmem:[#allocation2 + $0x38] sm:$0x1] %v7843_v2  ;;  %313 = vst [vmem:[#allocation2 + $0x3c] sm:$0xf] %v7843_v2  ;;  %v1197_v12 = vld [vmem:[#allocation2] sm:$0xf] }
  0x15   : > { %314 = vst [vmem:[#allocation2 + $0x40] sm:$0xf] %v7843_v2  ;;  %315 = vst [vmem:[#allocation2 + $0x44] sm:$0x1] %v7843_v2  ;;  %v1198_v13 = vld [vmem:[#allocation2 + $0x4] sm:$0xf] }
  0x16   : > { %316 = vst [vmem:[#allocation2 + $0x48] sm:$0xf] %v7843_v2  ;;  %317 = vst [vmem:[#allocation2 + $0x4c] sm:$0xf] %v7843_v2  ;;  %6978 = vmatpush3.bf16.msra.mxu0 %v7539_v6  ;;  %7503 = vmatpush3.bf16.msra.mxu1 %v7539_v6  ;;  %v1261_v14 = vld [vmem:[#allocation2] sm:$0xf] }
  0x17   : > { %318 = vst [vmem:[#allocation2 + $0x50] sm:$0x1] %v7843_v2  ;;  %319 = vst [vmem:[#allocation2 + $0x54] sm:$0xf] %v7843_v2  ;;  %6979 = vmatprep.subr.bf16.mxu0 %v7540_v7  ;;  %7496 = vmatprep.subr.bf16.mxu1 %v7540_v7  ;;  %v1262_v15 = vld [vmem:[#allocation2 + $0x4] sm:$0xf] }
  0x18   : > { %320 = vst [vmem:[#allocation2 + $0x58] sm:$0xf] %v7843_v2  ;;  %321 = vst [vmem:[#allocation2 + $0x5c] sm:$0x1] %v7843_v2  ;;  %v1263_v16 = vld [vmem:[#allocation2 + $0x8] sm:$0x1] }
  0x19   : > { %322 = vst [vmem:[#allocation2 + $0x60] sm:$0xf] %v7843_v2  ;;  %323 = vst [vmem:[#allocation2 + $0x64] sm:$0xf] %v7843_v2  ;;  %v1313_v17 = vshrl.u32 %v1261_v14, 16  ;;  %v1316_v18 = vshll.u32 %v1261_v14, 16 }
  0x1a   : > { %324 = vst [vmem:[#allocation2 + $0x68] sm:$0x1] %v7843_v2  ;;  %325 = vst [vmem:[#allocation2 + $0x6c] sm:$0xf] %v7843_v2  ;;  %6980 = vmatpush3.bf16.msra.mxu0 %v7541_v8  ;;  %7504 = vmatpush3.bf16.msra.mxu1 %v7541_v8  ;;  %v1322_v19 = vshll.u32 %v1262_v15, 16  ;;  %v6800_v20 = vld [vmem:[%s7942_s30] sm:$0xff]  }
  0x1b   : > { %326 = vst [vmem:[#allocation2 + $0x70] sm:$0xf] %v7843_v2  ;;  %327 = vst [vmem:[#allocation2 + $0x74] sm:$0x1] %v7843_v2  ;;  %6981 = vmatprep.subr.bf16.mxu0 %v7542_v9  ;;  %7497 = vmatprep.subr.bf16.mxu1 %v7542_v9  ;;  %v7545_v21 = vld [vmem:[%s9479_s3 + $0x10] sm:$0xff]   ;;  %v7546_v22 = vld [vmem:[%s9479_s3 + $0x48] sm:$0xff]   ;;  %v6801_v25 = vunpack.c.l.bf16 %v6800_v20  ;;  %v6802_v26 = vunpack.c.h.bf16 %v6800_v20 }
  0x1c   : > { %328 = vst [vmem:[#allocation2 + $0x78] sm:$0xf] %v7843_v2  ;;  %329 = vst [vmem:[#allocation2 + $0x7c] sm:$0xf] %v7843_v2  ;;  %v1326_v23 = vshrl.u32 %v1262_v15, 16  ;;  %v1332_v24 = vshll.u32 %v1263_v16, 16 }
  0x1d   : > { %330 = vst [vmem:[#allocation2 + $0x80] sm:$0x1] %v7843_v2  ;;  %331 = vst [vmem:[#allocation2 + $0x84] sm:$0xf] %v7843_v2  ;;  %v7954_v27 = vld [vmem:[%s9477_s1] ss:$0 sm:$0xff] }
  0x1e   : > { %332 = vst [vmem:[#allocation2 + $0x88] sm:$0xf] %v7843_v2  ;;  %333 = vst [vmem:[#allocation2 + $0x8c] sm:$0x1] %v7843_v2  ;;  %6982 = vmatpush3.bf16.msra.mxu0 %v7543_v10  ;;  %7505 = vmatpush3.bf16.msra.mxu1 %v7543_v10  ;;  %v1315_v28 = vrot.slane %v1313_v17, 4  ;;  %v1318_v29 = vrot.slane %v1316_v18, 5  ;;  %v426_v34 = vmul.f32 %v6801_v25, %v7954_v27 }
  0x1f   : > { %334 = vst [vmem:[#allocation2 + $0x90] sm:$0xf] %v7843_v2  ;;  %335 = vst [vmem:[#allocation2 + $0x94] sm:$0xf] %v7843_v2  ;;  %6983 = vmatprep.subr.bf16.mxu0 %v7544_v11  ;;  %7498 = vmatprep.subr.bf16.mxu1 %v7544_v11  ;;  %v1324_v30 = vrot.slane %v1322_v19, 5  ;;  %v6953_v32 = vld [vmem:[%s7942_s30 + $0x58] sm:$0xff]   ;;  %v427_v35 = vmul.f32 %v6802_v26, %v7954_v27 }
  0x20   : > { %336 = vst [vmem:[#allocation2 + $0x98] sm:$0x1] %v7843_v2  ;;  %337 = vst [vmem:[#allocation2 + $0x9c] sm:$0xf] %v7843_v2  ;;  %v7959_v31 = vld [vmem:[%s9478_s2] ss:$0 sm:$0xff]  ;;  %v1319_v36 = vor.u32 %v1318_v29, %v1315_v28  ;;  %v6845_v38 = vunpack.c.l.bf16 %v6953_v32  ;;  %v6846_v44 = vunpack.c.h.bf16 %v6953_v32 }
  0x21   : > { %338 = vst [vmem:[#allocation2 + $0xa0] sm:$0xf] %v7843_v2  ;;  %339 = vst [vmem:[#allocation2 + $0xa4] sm:$0x1] %v7843_v2  ;;  %v1328_v33 = vrot.slane %v1326_v23, 4  ;;  %v1334_v37 = vrot.slane %v1332_v24, 5  ;;  %v465_v42 = vadd.f32 %v7959_v31, %v426_v34  ;;  %v466_v43 = vadd.f32 %v7959_v31, %v427_v35 }
  0x22   : > { %340 = vst [vmem:[#allocation2 + $0xa8] sm:$0xf] %v7843_v2  ;;  %341 = vst [vmem:[#allocation2 + $0xac] sm:$0xf] %v7843_v2  ;;  %vm625_vm3 = vsmask.f32 256  ;;  %6984 = vmatpush3.bf16.msra.mxu0 %v7545_v21  ;;  %7506 = vmatpush3.bf16.msra.mxu1 %v7545_v21  ;;  %v448_v47 = vmul.f32 %v6845_v38, %v7954_v27  ;;  %v449_v52 = vmul.f32 %v6846_v44, %v7954_v27 }
  0x23   : > { %342 = vst [vmem:[#allocation2 + $0xb0] sm:$0x1] %v7843_v2  ;;  %343 = vst [vmem:[#allocation2 + $0xb4] sm:$0xf] %v7843_v2  ;;  %vm626_vm4 = vsmask.f32 4368  ;;  %v1329_v41 = vor.u32 %v1328_v33, %v1324_v30  ;;  %6985 = vmatprep.subr.bf16.mxu0 %v7546_v22  ;;  %7499 = vmatprep.subr.bf16.mxu1 %v7546_v22 }
  0x24   : > { %344 = vst [vmem:[#allocation2 + $0xb8] sm:$0xf] %v7843_v2  ;;  %345 = vst [vmem:[#allocation2 + $0xbc] sm:$0x1] %v7843_v2  ;;  %v7547_v39 = vld [vmem:[%s9479_s3 + $0x8] sm:$0xff]   ;;  %v7548_v45 = vld [vmem:[%s9479_s3 + $0x40] sm:$0xff]   ;;  %v487_v54 = vadd.f32 %v7959_v31, %v448_v47  ;;  %v488_v59 = vadd.f32 %v7959_v31, %v449_v52 }
  0x25   : > { %346 = vst [vmem:[#allocation2 + $0xc0] sm:$0xf] %v7843_v2  ;;  %347 = vst [vmem:[#allocation2 + $0xc4] sm:$0xf] %v7843_v2  ;;  %v1320_v46 = vrot.slane %v1319_v36, 4  ;;  %v7549_v48 = vld [vmem:[%s9479_s3] sm:$0xff]  }
  0x26   : > { %348 = vst [vmem:[#allocation2 + $0xc8] sm:$0x1] %v7843_v2  ;;  %349 = vst [vmem:[#allocation2 + $0xcc] sm:$0xf] %v7843_v2  ;;  %vm950_vm6 = vsmask.f32 7938  ;;  %6986 = vmatpush3.bf16.msra.mxu0 %v7547_v39  ;;  %7507 = vmatpush3.bf16.msra.mxu1 %v7547_v39 }
  0x27   : > { %350 = vst [vmem:[#allocation2 + $0xd0] sm:$0xf] %v7843_v2  ;;  %351 = vst [vmem:[#allocation2 + $0xd4] sm:$0x1] %v7843_v2  ;;  %v1330_v49 = vrot.slane %v1329_v41, 4  ;;  %v497_v50 = vmax.f32 %v465_v42, 0.0  ;;  %6987 = vmatprep.subr.bf16.mxu0 %v7548_v45  ;;  %7500 = vmatprep.subr.bf16.mxu1 %v7548_v45 }
  0x28   : > { %1229 = vst [vmem:[#allocation3] sm:$0xf] %v1197_v12  ;;  %1230 = vst [vmem:[#allocation3 + $0x24] sm:$0xf] %v1198_v13  ;;  %v498_v51 = vmax.f32 %v466_v43, 0.0  ;;  %vm949_vm7 = vcmask 1043456  }
  0x29   : > { %vm7969_vm5 = vmor %vm1309_vm0, %vm1310_vm1  ;;  %v6731_v56 = vpack.c.bf16 %v497_v50, %v497_v50  ;;  %v7558_v58 = vld [vmem:[%s9479_s3 + $0xf8] sm:$0xff]   ;;  %v519_v60 = vmax.f32 %v487_v54, 0.0  ;;  %v520_v3 = vmax.f32 %v488_v59, 0.0  ;;  %v6943_v5 = vld [vmem:[%s7942_s30 + $0x8] sm:$0xff]   ;;  %vm1856_vm11 = vcmask 1042432  }
  0x2a   : > { %v1325_v53 = vsel %vm7969_vm5, %v1320_v46, %v1324_v30  ;;  %v1335_v55 = vsel %vm7969_vm5, %v1330_v49, %v1334_v37  ;;  %v6732_v57 = vpack.c.bf16 %v498_v51, %v498_v51  ;;  %v7559_v61 = vld [vmem:[%s9479_s3 + $0x178] sm:$0xff]   ;;  %vm7997_vm8 = vmand %vm956_vm2, %vm625_vm3  ;;  %6988 = vmatpush3.bf16.msra.mxu0 %v7549_v48  ;;  %7508 = vmatpush3.bf16.msra.mxu1 %v7549_v48  ;;  %v6805_v9 = vunpack.c.l.bf16 %v6943_v5  ;;  %v952_v12 = vld [vmem:[#allocation2 + $0xc] sm:$0xf] }
  0x2b   : > { %1728 = vst [vmem:[#allocation3 + $0x4] sm:$0xf] %v1325_v53  ;;  %1729 = vst [vmem:[#allocation3 + $0x28] sm:$0xf] %v1335_v55  ;;  %v629_v62 = vshrl.u32 %v6731_v56, 16  ;;  %v632_v63 = vshll.u32 %v6731_v56, 16  ;;  %v6753_v4 = vpack.c.bf16 %v519_v60, %v519_v60  ;;  %v6806_v10 = vunpack.c.h.bf16 %v6943_v5  ;;  %7085 = vmatprep.subr.bf16.mxu1 %v7558_v58  ;;  %7197 = vmatprep.subr.bf16.mxu0 %v7559_v61 }
  0x2c   : > { %v637_v0 = vshrl.u32 %v6732_v57, 16  ;;  %v640_v1 = vshll.u32 %v6732_v57, 16  ;;  %vm8004_vm9 = vmor %vm625_vm3, %vm626_vm4  ;;  %v958_v13 = vld [vmem:[#allocation2 + $0x14] sm:$0x1]  ;;  %v6754_v14 = vpack.c.bf16 %v520_v3, %v520_v3  ;;  %v1031_v21 = vld [vmem:[#allocation2 + $0x90] sm:$0xf]  ;;  %v428_v28 = vmul.f32 %v6805_v9, %v7954_v27 }
  0x2d   : > { %v631_v7 = vrot.slane %v629_v62, 7  ;;  %vm8010_vm10 = vmand %vm949_vm7, %vm950_vm6  ;;  %v816_v15 = vshrl.u32 %v6753_v4, 16  ;;  %v819_v16 = vshll.u32 %v6753_v4, 16  ;;  %v7562_v22 = vld [vmem:[%s9479_s3 + $0x138] sm:$0xff]   ;;  %v6954_v23 = vld [vmem:[%s7942_s30 + $0x60] sm:$0xff]   ;;  %v429_v35 = vmul.f32 %v6806_v10, %v7954_v27 }
  0x2e   : > { %v639_v8 = vrot.slane %v637_v0, 7  ;;  %v824_v25 = vshrl.u32 %v6754_v14, 16  ;;  %v827_v26 = vshll.u32 %v6754_v14, 16  ;;  %v467_v39 = vadd.f32 %v7959_v31, %v428_v28  ;;  %v1035_v41 = vld [vmem:[#allocation2 + $0x98] sm:$0x1]  ;;  %v7574_v49 = vld [vmem:[%s9479_s3 + $0x170] sm:$0xff]  }
  0x2f   : > { %v634_v17 = vor.u32 %v632_v63, %v631_v7  ;;  %v635_v18 = vrot.slane %v631_v7, 4  ;;  %v818_v24 = vrot.slane %v816_v15, 7  ;;  %v7550_v29 = vld [vmem:[#allocation3] ss:$36 sps:$4 sm:$0xff]   ;;  %v468_v42 = vadd.f32 %v7959_v31, %v429_v35  ;;  %v7576_v57 = vld [vmem:[%s9479_s3 + $0x130] sm:$0xff]   ;;  %v6955_v63 = vld [vmem:[%s7942_s30 + $0x68] sm:$0xff]  }
  0x30   : > { %v642_v19 = vor.u32 %v640_v1, %v639_v8  ;;  %v644_v20 = vrot.slane %v639_v8, 4  ;;  %v826_v38 = vrot.slane %v824_v25, 7  ;;  %v6849_v43 = vunpack.c.l.bf16 %v6954_v23  ;;  %v6944_v58 = vld [vmem:[%s7942_s30 + $0x10] sm:$0xff]  }
  0x31   : > { %v953_v33 = vsel %vm8010_vm10, %v634_v17, %v952_v12  ;;  %v821_v36 = vor.u32 %v819_v16, %v818_v24  ;;  %v822_v37 = vrot.slane %v818_v24, 4  ;;  %v6850_v44 = vunpack.c.h.bf16 %v6954_v23 }
  0x32   : > { %v7552_v30 = vld [vmem:[#allocation3 + $0x4] ss:$36 sps:$4 sm:$0xff]   ;;  %v643_v32 = vsel %vm8004_vm9, %v635_v18, %v642_v19  ;;  %v959_v34 = vsel %vm7997_vm8, %v644_v20, %v958_v13  ;;  %954 = vst [vmem:[#allocation2 + $0xc] sm:$0xf] %v953_v33  ;;  %v829_v45 = vor.u32 %v827_v26, %v826_v38  ;;  %v831_v46 = vrot.slane %v826_v38, 4 }
  0x33   : > { %955 = vst [vmem:[#allocation2 + $0x10] sm:$0xf] %v643_v32  ;;  %960 = vst [vmem:[#allocation2 + $0x14] sm:$0x1] %v959_v34  ;;  %5204 = vmatprep.mubr.bf16.mxu0 %v7552_v30  ;;  %v1032_v47 = vsel %vm8010_vm10, %v821_v36, %v1031_v21  ;;  %v499_v48 = vmax.f32 %v467_v39, 0.0  ;;  %v500_v50 = vmax.f32 %v468_v42, 0.0  ;;  %v450_v51 = vmul.f32 %v6849_v43, %v7954_v27 }
  0x34   : > { %5205 = vmatmul.mubr.bf16.vlgmr.msra.gmra.mxu0 %v7550_v29  ;;  %1033 = vst [vmem:[#allocation2 + $0x90] sm:$0xf] %v1032_v47  ;;  %v451_v52 = vmul.f32 %v6850_v44, %v7954_v27  ;;  %v830_v53 = vsel %vm8004_vm9, %v822_v37, %v829_v45  ;;  %v1036_v54 = vsel %vm7997_vm8, %v831_v46, %v1035_v41  ;;  %v6809_v61 = vunpack.c.l.bf16 %v6944_v58  ;;  %v961_v37 = vld [vmem:[#allocation2 + $0x18] sm:$0xf] }
  0x35   : > { %7198 = vmatpush3.bf16.msra.mxu0 %v7562_v22  ;;  %v6733_v55 = vpack.c.bf16 %v499_v48, %v499_v48  ;;  %1034 = vst [vmem:[#allocation2 + $0x94] sm:$0xf] %v830_v53  ;;  %1037 = vst [vmem:[#allocation2 + $0x98] sm:$0x1] %v1036_v54  ;;  %v8039_v56 = vpack.c.bf16 %v500_v50, %v500_v50  ;;  %v6810_v62 = vunpack.c.h.bf16 %v6944_v58  ;;  %v6853_v7 = vunpack.c.l.bf16 %v6955_v63  ;;  %v965_v58 = vld [vmem:[#allocation2 + $0x20] sm:$0x1] }
  0x36   : > { %7199 = vmatprep.subr.bf16.mxu0 %v7574_v49  ;;  %v8047_v4 = vadd.f32 %v7959_v31, %v450_v51  ;;  %v8050_v5 = vadd.f32 %v7959_v31, %v451_v52  ;;  %v6854_v8 = vunpack.c.h.bf16 %v6955_v63  ;;  %v430_v14 = vmul.f32 %v6809_v61, %v7954_v27 }
  0x37   : > { %v646_v59 = vshrl.u32 %v6733_v55, 16  ;;  %v649_v60 = vshll.u32 %v6733_v55, 16  ;;  %v431_v15 = vmul.f32 %v6810_v62, %v7954_v27  ;;  %v8057_v38 = vmul.f32 %v6853_v7, %v7954_v27 }
  0x38   : > { %v469_v24 = vadd.f32 %v7959_v31, %v430_v14  ;;  %v8060_v39 = vmul.f32 %v6854_v8, %v7954_v27  ;;  %v654_v52 = vshrl.u32 %v8039_v56, 16  ;;  %vm1857_vm12 = vcmask 1046532  }
  0x39   : > { %v1199_v0 = vld [vmem:[#allocation2 + $0xc] sm:$0xf]  ;;  %7200 = vmatpush3.bf16.msra.mxu0 %v7576_v57  ;;  %v648_v19 = vrot.slane %v646_v59, 7  ;;  %v470_v25 = vadd.f32 %v7959_v31, %v431_v15  ;;  %v657_v57 = vshll.u32 %v8039_v56, 16  ;;  %vm8210_vm13 = vmor %vm1856_vm11, %vm1857_vm12 }
  0x3a   : > { %v1200_v1 = vld [vmem:[#allocation2 + $0x10] sm:$0xf]  ;;  %v1264_v3 = vld [vmem:[#allocation2 + $0xc] sm:$0xf]  ;;  %1231 = vst [vmem:[#allocation3 + $0x48] sm:$0xf] %v1199_v0 }
  0x3b   : > { %1232 = vst [vmem:[#allocation3 + $0x6c] sm:$0xf] %v1200_v1  ;;  %v1265_v9 = vld [vmem:[#allocation2 + $0x10] sm:$0xf]  ;;  %v1266_v10 = vld [vmem:[#allocation2 + $0x14] sm:$0x1]  ;;  %v651_v36 = vor.u32 %v649_v60, %v648_v19 }
  0x3c   : > { %v1337_v12 = vshrl.u32 %v1264_v3, 16  ;;  %v1340_v13 = vshll.u32 %v1264_v3, 16  ;;  %v1346_v16 = vshll.u32 %v1265_v9, 16  ;;  %v1350_v17 = vshrl.u32 %v1265_v9, 16  ;;  %v1221_v22 = vld [vmem:[#allocation2 + $0x90] sm:$0xf] }
  0x3d   : > { %v1356_v18 = vshll.u32 %v1266_v10, 16  ;;  %v1297_v23 = vld [vmem:[#allocation2 + $0x90] sm:$0xf]  ;;  %1253 = vst [vmem:[#allocation3 + $0x360] sm:$0xf] %v1221_v22  ;;  %v652_v48 = vrot.slane %v648_v19, 4  ;;  %v962_v62 = vsel %vm8010_vm10, %v651_v36, %v961_v37 }
  0x3e   : > { %v1339_v20 = vrot.slane %v1337_v12, 4  ;;  %v1342_v21 = vrot.slane %v1340_v13, 5  ;;  %v1348_v26 = vrot.slane %v1346_v16, 5  ;;  %v1352_v28 = vrot.slane %v1350_v17, 4  ;;  %v1222_v33 = vld [vmem:[#allocation2 + $0x94] sm:$0xf] }
  0x3f   : > { %v1358_v29 = vrot.slane %v1356_v18, 5  ;;  %v1601_v30 = vshrl.u32 %v1297_v23, 16  ;;  %v1298_v34 = vld [vmem:[#allocation2 + $0x94] sm:$0xf]  ;;  %v1299_v35 = vld [vmem:[#allocation2 + $0x98] sm:$0x1] }
  0x40   : > { %v1343_v32 = vor.u32 %v1342_v21, %v1339_v20  ;;  %v1353_v41 = vor.u32 %v1352_v28, %v1348_v26  ;;  %1254 = vst [vmem:[#allocation3 + $0x384] sm:$0xf] %v1222_v33  ;;  %v1604_v43 = vshll.u32 %v1297_v23, 16  ;;  %v1610_v44 = vshll.u32 %v1298_v34, 16  ;;  %963 = vst [vmem:[#allocation2 + $0x18] sm:$0xf] %v962_v62 }
  0x41   : > { %v1603_v42 = vrot.slane %v1601_v30, 4  ;;  %v1614_v46 = vshrl.u32 %v1298_v34, 16  ;;  %v1620_v47 = vshll.u32 %v1299_v35, 16  ;;  %v656_v61 = vrot.slane %v654_v52, 7  ;;  %v7592_v22 = vld [vmem:[%s9479_s3 + $0x168] sm:$0xff]   ;;  %v7563_v62 = vld [vmem:[%s9479_s3 + $0xf0] sm:$0xff]  }
  0x42   : > { %v1344_v45 = vrot.slane %v1343_v32, 4  ;;  %v1354_v49 = vrot.slane %v1353_v41, 4  ;;  %v1606_v50 = vrot.slane %v1604_v43, 5  ;;  %v1612_v51 = vrot.slane %v1610_v44, 5  ;;  %v968_v34 = vld [vmem:[#allocation2 + $0x24] sm:$0xf]  ;;  %7201 = vmatprep.subr.bf16.mxu0 %v7592_v22 }
  0x43   : > { %v1616_v54 = vrot.slane %v1614_v46, 4  ;;  %v1622_v55 = vrot.slane %v1620_v47, 5  ;;  %v521_v0 = vmax.f32 %v8047_v4, 0.0  ;;  %v522_v1 = vmax.f32 %v8050_v5, 0.0  ;;  %v6945_v5 = vld [vmem:[%s7942_s30 + $0x18] sm:$0xff]   ;;  %v7564_v22 = vld [vmem:[%s9479_s3 + $0xb0] sm:$0xff]  }
  0x44   : > { %v1349_v53 = vsel %vm7969_vm5, %v1344_v45, %v1348_v26  ;;  %v1359_v59 = vsel %vm7969_vm5, %v1354_v49, %v1358_v29  ;;  %v1607_v60 = vor.u32 %v1606_v50, %v1603_v42  ;;  %v501_v3 = vmax.f32 %v469_v24, 0.0  ;;  %v1038_v24 = vld [vmem:[#allocation2 + $0x9c] sm:$0xf]  ;;  %v7560_v37 = vld [vmem:[#allocation3 + $0x48] ss:$36 sps:$4 sm:$0xff]  }
  0x45   : > { %1730 = vst [vmem:[#allocation3 + $0x4c] sm:$0xf] %v1349_v53  ;;  %1731 = vst [vmem:[#allocation3 + $0x70] sm:$0xf] %v1359_v59  ;;  %v1617_v63 = vor.u32 %v1616_v54, %v1612_v51  ;;  %v659_v7 = vor.u32 %v657_v57, %v656_v61  ;;  %v661_v8 = vrot.slane %v656_v61, 4  ;;  %v502_v9 = vmax.f32 %v470_v25, 0.0 }
  0x46   : > { %v1608_v56 = vrot.slane %v1607_v60, 4  ;;  %v6755_v12 = vpack.c.bf16 %v521_v0, %v521_v0  ;;  %v6756_v13 = vpack.c.bf16 %v522_v1, %v522_v1  ;;  %v6735_v14 = vpack.c.bf16 %v501_v3, %v501_v3  ;;  %v1042_v25 = vld [vmem:[#allocation2 + $0xa4] sm:$0x1]  ;;  %v8097_v54 = vld [vmem:[%s7942_s30 + $0x70] sm:$0xff]   ;;  %v972_v60 = vld [vmem:[#allocation2 + $0x2c] sm:$0x1] }
  0x47   : > { %v1618_v10 = vrot.slane %v1617_v63, 4  ;;  %v660_v16 = vsel %vm8004_vm9, %v652_v48, %v659_v7  ;;  %v966_v4 = vsel %vm7997_vm8, %v661_v8, %v965_v58  ;;  %v8078_v17 = vpack.c.bf16 %v502_v9, %v502_v9  ;;  %v1201_v45 = vld [vmem:[#allocation2 + $0x18] sm:$0xf]  ;;  %v7596_v61 = vld [vmem:[%s9479_s3 + $0x128] sm:$0xff]  }
  0x48   : > { %v1613_v15 = vsel %vm7969_vm5, %v1608_v56, %v1612_v51  ;;  %964 = vst [vmem:[#allocation2 + $0x1c] sm:$0xf] %v660_v16  ;;  %967 = vst [vmem:[#allocation2 + $0x20] sm:$0x1] %v966_v4  ;;  %v833_v19 = vshrl.u32 %v6755_v12, 16  ;;  %v836_v20 = vshll.u32 %v6755_v12, 16  ;;  %v8090_v35 = vadd.f32 %v7959_v31, %v8057_v38  ;;  %7202 = vmatpush3.bf16.msra.mxu0 %v7596_v61 }
  0x49   : > { %v1623_v18 = vsel %vm7969_vm5, %v1618_v10, %v1622_v55  ;;  %1752 = vst [vmem:[#allocation3 + $0x364] sm:$0xf] %v1613_v15  ;;  %v841_v21 = vshrl.u32 %v6756_v13, 16  ;;  %v844_v23 = vshll.u32 %v6756_v13, 16  ;;  %v663_v26 = vshrl.u32 %v6735_v14, 16  ;;  %v7573_v61 = vld [vmem:[%s9479_s3 + $0xe0] sm:$0xff]  }
  0x4a   : > { %1753 = vst [vmem:[#allocation3 + $0x388] sm:$0xf] %v1623_v18  ;;  %v666_v28 = vshll.u32 %v6735_v14, 16  ;;  %v671_v29 = vshrl.u32 %v8078_v17, 16  ;;  %v835_v30 = vrot.slane %v833_v19, 7  ;;  %v674_v33 = vshll.u32 %v8078_v17, 16 }
  0x4b   : > { %v843_v32 = vrot.slane %v841_v21, 7  ;;  %v665_v41 = vrot.slane %v663_v26, 7  ;;  %v8094_v42 = vadd.f32 %v7959_v31, %v8060_v39  ;;  %v6813_v43 = vunpack.c.l.bf16 %v6945_v5  ;;  %v1267_v46 = vld [vmem:[#allocation2 + $0x18] sm:$0xf]  ;;  %1233 = vst [vmem:[#allocation3 + $0x90] sm:$0xf] %v1201_v45 }
  0x4c   : > { %v7553_v36 = vld [vmem:[#allocation3 + $0x4c] ss:$36 sps:$4 sm:$0xff]   ;;  %v6814_v44 = vunpack.c.h.bf16 %v6945_v5  ;;  %v838_v47 = vor.u32 %v836_v20, %v835_v30  ;;  %v839_v48 = vrot.slane %v835_v30, 4  ;;  %v1361_v38 = vshrl.u32 %v1267_v46, 16  ;;  %v7561_v39 = vld [vmem:[%s9479_s3 + $0xb8] sm:$0xff]  }
  0x4d   : > { %v846_v49 = vor.u32 %v844_v23, %v843_v32  ;;  %v848_v50 = vrot.slane %v843_v32, 4  ;;  %5212 = vmatprep.mubr.bf16.mxu0 %v7553_v36  ;;  %v1364_v51 = vshll.u32 %v1267_v46, 16  ;;  %v668_v52 = vor.u32 %v666_v28, %v665_v41  ;;  %v7555_v8 = vld [vmem:[#allocation3 + $0x360] ss:$36 sps:$4 sm:$0xff]   ;;  %v7572_v45 = vld [vmem:[%s9479_s3 + $0xa8] sm:$0xff]  }
  0x4e   : > { %v669_v53 = vrot.slane %v665_v41, 4  ;;  %5213 = vmatmul.mubr.bf16.gmra.mxu0 %v7560_v37  ;;  %v1039_v57 = vsel %vm8010_vm10, %v838_v47, %v1038_v24  ;;  %v673_v59 = vrot.slane %v671_v29, 7  ;;  %v1363_v1 = vrot.slane %v1361_v38, 4  ;;  %v8138_v37 = vld [vmem:[%s7942_s30 + $0x20] sm:$0xff]  }
  0x4f   : > { %v847_v55 = vsel %vm8004_vm9, %v839_v48, %v846_v49  ;;  %v1043_v58 = vsel %vm7997_vm8, %v848_v50, %v1042_v25  ;;  %v1202_v63 = vld [vmem:[#allocation2 + $0x1c] sm:$0xf]  ;;  %1040 = vst [vmem:[#allocation2 + $0x9c] sm:$0xf] %v1039_v57  ;;  %v969_v3 = vsel %vm8010_vm10, %v668_v52, %v968_v34  ;;  %v432_v56 = vmul.f32 %v6813_v43, %v7954_v27  ;;  %v1269_v15 = vld [vmem:[#allocation2 + $0x20] sm:$0x1] }
  0x50   : > { %v1268_v0 = vld [vmem:[#allocation2 + $0x1c] sm:$0xf]  ;;  %1041 = vst [vmem:[#allocation2 + $0xa0] sm:$0xf] %v847_v55  ;;  %1044 = vst [vmem:[#allocation2 + $0xa4] sm:$0x1] %v1043_v58  ;;  %v433_v7 = vmul.f32 %v6814_v44, %v7954_v27  ;;  %v676_v12 = vor.u32 %v674_v33, %v673_v59  ;;  %v6857_v13 = vunpack.c.l.bf16 %v8097_v54  ;;  %v6858_v14 = vunpack.c.h.bf16 %v8097_v54 }
  0x51   : > { %v7557_v9 = vld [vmem:[#allocation3 + $0x364] ss:$36 sps:$4 sm:$0xff]   ;;  %1234 = vst [vmem:[#allocation3 + $0xb4] sm:$0xf] %v1202_v63  ;;  %v1366_v10 = vrot.slane %v1364_v51, 5  ;;  %v1370_v16 = vshll.u32 %v1268_v0, 16  ;;  %v8135_v36 = vadd.f32 %v7959_v31, %v432_v56  ;;  %v6817_v52 = vunpack.c.l.bf16 %v8138_v37 }
  0x52   : > { %970 = vst [vmem:[#allocation2 + $0x24] sm:$0xf] %v969_v3  ;;  %v1374_v4 = vshrl.u32 %v1268_v0, 16  ;;  %v678_v17 = vrot.slane %v673_v59, 4  ;;  %v523_v5 = vmax.f32 %v8090_v35, 0.0  ;;  %5300 = vmatprep.mubr.bf16.mxu1 %v7557_v9  ;;  %v1380_v19 = vshll.u32 %v1269_v15, 16 }
  0x53   : > { %v1367_v18 = vor.u32 %v1366_v10, %v1363_v1  ;;  %v677_v20 = vsel %vm8004_vm9, %v669_v53, %v676_v12  ;;  %v524_v21 = vmax.f32 %v8094_v42, 0.0  ;;  %5301 = vmatmul.mubr.bf16.vlgmr.msra.gmra.mxu1 %v7555_v8  ;;  %v1372_v23 = vrot.slane %v1370_v16, 5  ;;  %v7569_v33 = vld [vmem:[%s9479_s3 + $0xe8] sm:$0xff]  }
  0x54   : > { %v1376_v24 = vrot.slane %v1374_v4, 4  ;;  %971 = vst [vmem:[#allocation2 + $0x28] sm:$0xf] %v677_v20  ;;  %v973_v25 = vsel %vm7997_vm8, %v678_v17, %v972_v60  ;;  %v6757_v26 = vpack.c.bf16 %v523_v5, %v523_v5  ;;  %7086 = vmatpush3.bf16.msra.mxu1 %v7561_v39  ;;  %v1382_v29 = vrot.slane %v1380_v19, 5  ;;  %v7575_v17 = vld [vmem:[%s9479_s3 + $0xa0] sm:$0xff]   ;;  %v7581_v19 = vld [vmem:[%s9479_s3 + $0xd8] sm:$0xff]  }
  0x55   : > { %v1368_v28 = vrot.slane %v1367_v18, 4  ;;  %974 = vst [vmem:[#allocation2 + $0x2c] sm:$0x1] %v973_v25  ;;  %v8129_v30 = vpack.c.bf16 %v524_v21, %v524_v21  ;;  %7087 = vmatprep.subr.bf16.mxu1 %v7563_v62  ;;  %v8146_v46 = vadd.f32 %v7959_v31, %v433_v7  ;;  %v454_v47 = vmul.f32 %v6857_v13, %v7954_v27 }
  0x56   : > { %v1377_v32 = vor.u32 %v1376_v24, %v1372_v23  ;;  %v850_v34 = vshrl.u32 %v6757_v26, 16  ;;  %v853_v35 = vshll.u32 %v6757_v26, 16  ;;  %v1223_v42 = vld [vmem:[#allocation2 + $0x9c] sm:$0xf]  ;;  %v8150_v48 = vmul.f32 %v6858_v14, %v7954_v27  ;;  %v1045_v24 = vld [vmem:[#allocation2 + $0xa8] sm:$0xf] }
  0x57   : > { %v1373_v41 = vsel %vm7969_vm5, %v1368_v28, %v1372_v23  ;;  %v1224_v43 = vld [vmem:[#allocation2 + $0xa0] sm:$0xf]  ;;  %v1300_v44 = vld [vmem:[#allocation2 + $0x9c] sm:$0xf]  ;;  %1255 = vst [vmem:[#allocation3 + $0x3a8] sm:$0xf] %v1223_v42  ;;  %v6818_v53 = vunpack.c.h.bf16 %v8138_v37  ;;  %v8164_v15 = vadd.f32 %v7959_v31, %v454_v47 }
  0x58   : > { %v1378_v49 = vrot.slane %v1377_v32, 4  ;;  %1732 = vst [vmem:[#allocation3 + $0x94] sm:$0xf] %v1373_v41  ;;  %1256 = vst [vmem:[#allocation3 + $0x3cc] sm:$0xf] %v1224_v43  ;;  %v1625_v51 = vshrl.u32 %v1300_v44, 16  ;;  %7088 = vmatpush3.bf16.msra.mxu1 %v7564_v22 }
  0x59   : > { %v1301_v50 = vld [vmem:[#allocation2 + $0xa0] sm:$0xf]  ;;  %v1302_v38 = vld [vmem:[#allocation2 + $0xa4] sm:$0x1]  ;;  %v1628_v54 = vshll.u32 %v1300_v44, 16  ;;  %7089 = vmatprep.subr.bf16.mxu1 %v7569_v33  ;;  %v8159_v63 = vrot.slane %v850_v34, 7 }
  0x5a   : > { %v1634_v39 = vshll.u32 %v1301_v50, 16  ;;  %v1638_v55 = vshrl.u32 %v1301_v50, 16  ;;  %v1644_v57 = vshll.u32 %v1302_v38, 16  ;;  %v1203_v58 = vld [vmem:[#allocation2 + $0x24] sm:$0xf]  ;;  %v1383_v59 = vsel %vm7969_vm5, %v1378_v49, %v1382_v29  ;;  %v7584_v32 = vld [vmem:[%s9479_s3 + $0x98] sm:$0xff]  }
  0x5b   : > { %v1627_v60 = vrot.slane %v1625_v51, 4  ;;  %1235 = vst [vmem:[#allocation3 + $0xd8] sm:$0xf] %v1203_v58  ;;  %v1270_v62 = vld [vmem:[#allocation2 + $0x24] sm:$0xf]  ;;  %v858_v0 = vshrl.u32 %v8129_v30, 16  ;;  %v855_v14 = vor.u32 %v853_v35, %v8159_v63 }
  0x5c   : > { %1733 = vst [vmem:[#allocation3 + $0xb8] sm:$0xf] %v1383_v59  ;;  %v1630_v1 = vrot.slane %v1628_v54, 5  ;;  %v1636_v3 = vrot.slane %v1634_v39, 5  ;;  %v1640_v56 = vrot.slane %v1638_v55, 4  ;;  %v1646_v7 = vrot.slane %v1644_v57, 5  ;;  %7090 = vmatpush3.bf16.msra.mxu1 %v7572_v45 }
  0x5d   : > { %v1204_v8 = vld [vmem:[#allocation2 + $0x28] sm:$0xf]  ;;  %v1272_v10 = vld [vmem:[#allocation2 + $0x2c] sm:$0x1]  ;;  %v1385_v12 = vshrl.u32 %v1270_v62, 16  ;;  %v1388_v13 = vshll.u32 %v1270_v62, 16  ;;  %7091 = vmatprep.subr.bf16.mxu1 %v7573_v61  ;;  %v494_v59 = vadd.f32 %v7959_v31, %v8150_v48 }
  0x5e   : > { %1236 = vst [vmem:[#allocation3 + $0xfc] sm:$0xf] %v1204_v8  ;;  %v1271_v9 = vld [vmem:[#allocation2 + $0x28] sm:$0xf]  ;;  %v1631_v16 = vor.u32 %v1630_v1, %v1627_v60  ;;  %v1641_v4 = vor.u32 %v1640_v56, %v1636_v3  ;;  %v1404_v22 = vshll.u32 %v1272_v10, 16  ;;  %v856_v23 = vrot.slane %v8159_v63, 4 }
  0x5f   : > { %v1394_v5 = vshll.u32 %v1271_v9, 16  ;;  %v1398_v18 = vshrl.u32 %v1271_v9, 16  ;;  %v1387_v20 = vrot.slane %v1385_v12, 4  ;;  %v1390_v21 = vrot.slane %v1388_v13, 5  ;;  %v7607_v33 = vld [vmem:[%s9479_s3 + $0x160] sm:$0xff]   ;;  %v7585_v44 = vld [vmem:[%s9479_s3 + $0xd0] sm:$0xff]  }
  0x60   : > { %v1632_v25 = vrot.slane %v1631_v16, 4  ;;  %v1642_v26 = vrot.slane %v1641_v4, 4  ;;  %v1406_v35 = vrot.slane %v1404_v22, 5  ;;  %v860_v41 = vrot.slane %v858_v0, 7  ;;  %v1049_v43 = vld [vmem:[#allocation2 + $0xb0] sm:$0x1]  ;;  %7092 = vmatpush3.bf16.msra.mxu1 %v7575_v17  ;;  %7203 = vmatprep.subr.bf16.mxu0 %v7607_v33 }
  0x61   : > { %v1396_v28 = vrot.slane %v1394_v5, 5  ;;  %v1400_v29 = vrot.slane %v1398_v18, 4  ;;  %v1391_v34 = vor.u32 %v1390_v21, %v1387_v20  ;;  %v861_v42 = vshll.u32 %v8129_v30, 16  ;;  %v8183_v45 = vld [vmem:[#allocation2] sm:$0xe]  ;;  %7093 = vmatprep.subr.bf16.mxu1 %v7581_v19  ;;  %v7586_v8 = vld [vmem:[%s9479_s3 + $0x90] sm:$0xff]  }
  0x62   : > { %v7608_v47 = vld [vmem:[%s9479_s3 + $0x120] sm:$0xff]   ;;  %v1637_v49 = vsel %vm7969_vm5, %v1632_v25, %v1636_v3  ;;  %v1647_v50 = vsel %vm7969_vm5, %v1642_v26, %v1646_v7  ;;  %v1046_v30 = vsel %vm8010_vm10, %v855_v14, %v1045_v24  ;;  %v2035_v51 = vld [vmem:[#allocation2 + $0xc] sm:$0xf]  ;;  %v2036_v54 = vld [vmem:[#allocation2 + $0x10] sm:$0xf]  ;;  %v434_v60 = vmul.f32 %v6817_v52, %v7954_v27 }
  0x63   : > { %v1401_v38 = vor.u32 %v1400_v29, %v1396_v28  ;;  %v7565_v39 = vld [vmem:[#allocation3 + $0x94] ss:$36 sps:$4 sm:$0xff]   ;;  %1754 = vst [vmem:[#allocation3 + $0x3ac] sm:$0xf] %v1637_v49  ;;  %1755 = vst [vmem:[#allocation3 + $0x3d0] sm:$0xf] %v1647_v50  ;;  %v863_v58 = vor.u32 %v861_v42, %v860_v41  ;;  %7204 = vmatpush3.bf16.msra.mxu0 %v7608_v47  ;;  %v435_v17 = vmul.f32 %v6818_v53, %v7954_v27 }
  0x64   : > { %v7570_v55 = vld [vmem:[#allocation3 + $0x90] ss:$36 sps:$4 sm:$0xff]   ;;  %v1392_v57 = vrot.slane %v1391_v34, 4  ;;  %1047 = vst [vmem:[#allocation2 + $0xa8] sm:$0xf] %v1046_v30  ;;  %v865_v63 = vrot.slane %v860_v41, 4  ;;  %5220 = vmatprep.mubr.bf16.mxu0 %v7565_v39  ;;  %7094 = vmatpush3.bf16.msra.mxu1 %v7584_v32 }
  0x65   : > { %v8199_v61 = vld [vmem:[#allocation2 + $0x4] sm:$0xf]  ;;  %2067 = vst [vmem:[#allocation3 + $0xc] sm:$0xf] %v2035_v51  ;;  %2068 = vst [vmem:[#allocation3 + $0x30] sm:$0xf] %v2036_v54  ;;  %v864_v3 = vsel %vm8004_vm9, %v856_v23, %v863_v58  ;;  %5221 = vmatmul.mubr.bf16.gmra.mxu0 %v7570_v55  ;;  %7095 = vmatprep.subr.bf16.mxu1 %v7585_v44 }
  0x66   : > { %v1402_v62 = vrot.slane %v1401_v38, 4  ;;  %v503_v0 = vmax.f32 %v8135_v36, 0.0  ;;  %v504_v1 = vmax.f32 %v8146_v46, 0.0  ;;  %v1397_v48 = vsel %vm7969_vm5, %v1392_v57, %v1396_v28  ;;  %1048 = vst [vmem:[#allocation2 + $0xac] sm:$0xf] %v864_v3  ;;  %v6947_v18 = vld [vmem:[%s7942_s30 + $0x28] sm:$0xff]  }
  0x67   : > { %v525_v52 = vmax.f32 %v8164_v15, 0.0  ;;  %v526_v56 = vmax.f32 %v494_v59, 0.0  ;;  %1734 = vst [vmem:[#allocation3 + $0xdc] sm:$0xf] %v1397_v48  ;;  %v1050_v46 = vsel %vm7997_vm8, %v865_v63, %v1049_v43  ;;  %v6431_v10 = vrot.slane %v8183_v45, 9  ;;  %v7591_v15 = vld [vmem:[%s9479_s3 + $0xc8] sm:$0xff]  }
  0x68   : > { %v1407_v36 = vsel %vm7969_vm5, %v1402_v62, %v1406_v35  ;;  %v6737_v9 = vpack.c.bf16 %v503_v0, %v503_v0  ;;  %1051 = vst [vmem:[#allocation2 + $0xb0] sm:$0x1] %v1050_v46  ;;  %v8222_v12 = vpack.c.bf16 %v504_v1, %v504_v1  ;;  %v1861_v5 = vrot.slane %v8199_v61, 5  ;;  %v6948_v19 = vld [vmem:[%s7942_s30 + $0x30] sm:$0xff]   ;;  %v7595_v25 = vld [vmem:[%s9479_s3 + $0x88] sm:$0xff]   ;;  %v7597_v27 = vld [vmem:[%s9479_s3 + $0xc0] sm:$0xff]   ;;  %7096 = vmatpush3.bf16.msra.mxu1 %v7586_v8 }
  0x69   : > { %1735 = vst [vmem:[#allocation3 + $0x100] sm:$0xf] %v1407_v36  ;;  %v8224_v13 = vpack.c.bf16 %v525_v52, %v525_v52  ;;  %v8226_v14 = vpack.c.bf16 %v526_v56, %v526_v56  ;;  %v975_v22 = vld [vmem:[#allocation2 + $0x30] sm:$0xf]  ;;  %v8251_v28 = vadd.f32 %v7959_v31, %v434_v60  ;;  %v7571_v32 = vld [vmem:[#allocation3 + $0x3a8] ss:$36 sps:$4 sm:$0xff]   ;;  %7097 = vmatprep.subr.bf16.mxu1 %v7591_v15  ;;  %v6821_v35 = vunpack.c.l.bf16 %v6947_v18 }
  0x6a   : > { %v680_v16 = vshrl.u32 %v6737_v9, 16  ;;  %v683_v4 = vshll.u32 %v6737_v9, 16  ;;  %v688_v20 = vshrl.u32 %v8222_v12, 16  ;;  %v691_v21 = vshll.u32 %v8222_v12, 16  ;;  %v7567_v37 = vld [vmem:[#allocation3 + $0x3ac] ss:$36 sps:$4 sm:$0xff]  }
  0x6b   : > { %v867_v23 = vshrl.u32 %v8224_v13, 16  ;;  %v870_v24 = vshll.u32 %v8224_v13, 16  ;;  %v875_v26 = vshrl.u32 %v8226_v14, 16  ;;  %v1862_v29 = vsel %vm8210_vm13, %v6431_v10, %v1861_v5  ;;  %v1225_v33 = vld [vmem:[#allocation2 + $0xa8] sm:$0xf]  ;;  %5308 = vmatprep.mubr.bf16.mxu1 %v7567_v37  ;;  %v7598_v49 = vld [vmem:[%s9479_s3 + $0x80] sm:$0xff]  }
  0x6c   : > { %v8247_v53 = vrot.slane %v680_v16, 7  ;;  %v1303_v34 = vld [vmem:[#allocation2 + $0xa8] sm:$0xf]  ;;  %2003 = vst [vmem:[#allocation3 + $0x8] sm:$0xf] %v1862_v29  ;;  %v6822_v41 = vunpack.c.h.bf16 %v6947_v18  ;;  %v6825_v42 = vunpack.c.l.bf16 %v6948_v19  ;;  %v6826_v43 = vunpack.c.h.bf16 %v6948_v19  ;;  %v7619_v50 = vld [vmem:[%s9479_s3 + $0x158] sm:$0xff]   ;;  %5309 = vmatmul.mubr.bf16.gmra.mxu1 %v7571_v32 }
  0x6d   : > { %1257 = vst [vmem:[#allocation3 + $0x3f0] sm:$0xf] %v1225_v33  ;;  %v1649_v44 = vshrl.u32 %v1303_v34, 16  ;;  %v1652_v45 = vshll.u32 %v1303_v34, 16  ;;  %v1226_v38 = vld [vmem:[#allocation2 + $0xac] sm:$0xf]  ;;  %7098 = vmatpush3.bf16.msra.mxu1 %v7595_v25  ;;  %7205 = vmatprep.subr.bf16.mxu0 %v7619_v50 }
  0x6e   : > { %v685_v31 = vor.u32 %v683_v4, %v8247_v53  ;;  %v686_v47 = vrot.slane %v8247_v53, 4  ;;  %v1304_v30 = vld [vmem:[#allocation2 + $0xac] sm:$0xf]  ;;  %v690_v51 = vrot.slane %v688_v20, 7  ;;  %v979_v54 = vld [vmem:[#allocation2 + $0x38] sm:$0x1]  ;;  %7099 = vmatprep.subr.bf16.mxu1 %v7597_v27 }
  0x6f   : > { %v8268_v39 = vld [vmem:[%s9478_s2] ss:$0 sm:$0xff]  ;;  %v7604_v57 = vld [vmem:[%s9479_s3 + $0x1f8] sm:$0xff]   ;;  %1258 = vst [vmem:[#allocation3 + $0x414] sm:$0xf] %v1226_v38  ;;  %v1651_v0 = vrot.slane %v1649_v44, 4 }
  0x70   : > { %v8271_v55 = vadd.f32 %v8268_v39, %v435_v17  ;;  %v8279_v58 = vld [vmem:[%s9477_s1] ss:$0 sm:$0xff]  ;;  %v7577_v62 = vld [vmem:[#allocation3 + $0xdc] ss:$36 sps:$4 sm:$0xff]   ;;  %v1305_v63 = vld [vmem:[#allocation2 + $0xb0] sm:$0x1]  ;;  %v976_v1 = vsel %vm8010_vm10, %v685_v31, %v975_v22  ;;  %v693_v9 = vor.u32 %v691_v21, %v690_v51 }
  0x71   : > { %v8282_v59 = vmul.f32 %v8279_v58, %v6821_v35  ;;  %v8285_v60 = vmul.f32 %v8279_v58, %v6822_v41  ;;  %v8290_v48 = vmul.f32 %v8279_v58, %v6825_v42  ;;  %v8293_v3 = vmul.f32 %v8279_v58, %v6826_v43  ;;  %v7582_v8 = vld [vmem:[#allocation3 + $0xd8] ss:$36 sps:$4 sm:$0xff]   ;;  %977 = vst [vmem:[#allocation2 + $0x30] sm:$0xf] %v976_v1  ;;  %v2037_v20 = vld [vmem:[#allocation2 + $0x18] sm:$0xf] }
  0x72   : > { %v1654_v52 = vrot.slane %v1652_v45, 5  ;;  %v1658_v56 = vshll.u32 %v1304_v30, 16  ;;  %v1662_v36 = vshrl.u32 %v1304_v30, 16  ;;  %v1668_v46 = vshll.u32 %v1305_v63, 16  ;;  %5228 = vmatprep.mubr.bf16.mxu0 %v7577_v62  ;;  %v1052_v16 = vld [vmem:[#allocation2 + $0xb4] sm:$0xf]  ;;  %7100 = vmatpush3.bf16.msra.mxu1 %v7598_v49 }
  0x73   : > { %v695_v10 = vrot.slane %v690_v51, 4  ;;  %v869_v12 = vrot.slane %v867_v23, 7  ;;  %v877_v15 = vrot.slane %v875_v26, 7  ;;  %5229 = vmatmul.mubr.bf16.gmra.mxu0 %v7582_v8  ;;  %v7623_v22 = vld [vmem:[%s9479_s3 + $0x118] sm:$0xff]   ;;  %v694_v25 = vsel %vm8004_vm9, %v686_v47, %v693_v9  ;;  %2069 = vst [vmem:[#allocation3 + $0x54] sm:$0xf] %v2037_v20  ;;  %7309 = vmatprep.subr.bf16.mxu1 %v7604_v57 }
  0x74   : > { %v1655_v4 = vor.u32 %v1654_v52, %v1651_v0  ;;  %v1660_v17 = vrot.slane %v1658_v56, 5  ;;  %v1664_v18 = vrot.slane %v1662_v36, 4  ;;  %v1670_v19 = vrot.slane %v1668_v46, 5  ;;  %v1056_v37 = vld [vmem:[#allocation2 + $0xbc] sm:$0x1]  ;;  %7206 = vmatpush3.bf16.msra.mxu0 %v7623_v22  ;;  %v7631_v31 = vld [vmem:[%s9479_s3 + $0x150] sm:$0xff]  }
  0x75   : > { %v980_v21 = vsel %vm7997_vm8, %v695_v10, %v979_v54  ;;  %v872_v23 = vor.u32 %v870_v24, %v869_v12  ;;  %v873_v27 = vrot.slane %v869_v12, 4  ;;  %v2038_v53 = vld [vmem:[#allocation2 + $0x1c] sm:$0xf]  ;;  %978 = vst [vmem:[#allocation2 + $0x34] sm:$0xf] %v694_v25  ;;  %v878_v32 = vshll.u32 %v8226_v14, 16  ;;  %7207 = vmatprep.subr.bf16.mxu0 %v7631_v31 }
  0x76   : > { %v1656_v26 = vrot.slane %v1655_v4, 4  ;;  %v1665_v29 = vor.u32 %v1664_v18, %v1660_v17  ;;  %981 = vst [vmem:[#allocation2 + $0x38] sm:$0x1] %v980_v21  ;;  %v882_v33 = vrot.slane %v877_v15, 4  ;;  %v1762_v34 = vld [vmem:[#allocation2 + $0x8] sm:$0x1]  ;;  %v8321_v50 = vadd.f32 %v8268_v39, %v8282_v59 }
  0x77   : > { %2070 = vst [vmem:[#allocation3 + $0x78] sm:$0xf] %v2038_v53  ;;  %v1053_v13 = vsel %vm8010_vm10, %v872_v23, %v1052_v16  ;;  %v505_v24 = vmax.f32 %v8251_v28, 0.0  ;;  %v506_v35 = vmax.f32 %v8271_v55, 0.0  ;;  %v1863_v41 = vrot.slane %v1861_v5, 4  ;;  %v6949_v45 = vld [vmem:[%s7942_s30 + $0x38] sm:$0xff]  }
  0x78   : > { %v1661_v42 = vsel %vm7969_vm5, %v1656_v26, %v1660_v17  ;;  %v1666_v43 = vrot.slane %v1665_v29, 4  ;;  %v880_v14 = vor.u32 %v878_v32, %v877_v15  ;;  %1054 = vst [vmem:[#allocation2 + $0xb4] sm:$0xf] %v1053_v13  ;;  %v1057_v44 = vsel %vm7997_vm8, %v882_v33, %v1056_v37  ;;  %v1205_v28 = vld [vmem:[#allocation2 + $0x30] sm:$0xf] }
  0x79   : > { %1756 = vst [vmem:[#allocation3 + $0x3f4] sm:$0xf] %v1661_v42  ;;  %v1273_v47 = vld [vmem:[#allocation2 + $0x30] sm:$0xf]  ;;  %1058 = vst [vmem:[#allocation2 + $0xbc] sm:$0x1] %v1057_v44  ;;  %v6739_v61 = vpack.c.bf16 %v505_v24, %v505_v24  ;;  %v6740_v5 = vpack.c.bf16 %v506_v35, %v506_v35  ;;  %v8334_v46 = vadd.f32 %v8268_v39, %v8285_v60  ;;  %v6829_v16 = vunpack.c.l.bf16 %v6949_v45 }
  0x7a   : > { %v1864_v49 = vrot.slane %v1762_v34, 5  ;;  %v7632_v38 = vld [vmem:[%s9479_s3 + $0x110] sm:$0xff]   ;;  %v1671_v30 = vsel %vm7969_vm5, %v1666_v43, %v1670_v19  ;;  %1237 = vst [vmem:[#allocation3 + $0x120] sm:$0xf] %v1205_v28  ;;  %v1409_v51 = vshrl.u32 %v1273_v47, 16  ;;  %v1412_v54 = vshll.u32 %v1273_v47, 16 }
  0x7b   : > { %v881_v55 = vsel %vm8004_vm9, %v873_v27, %v880_v14  ;;  %v2039_v57 = vld [vmem:[#allocation2 + $0x24] sm:$0xf]  ;;  %v2040_v62 = vld [vmem:[#allocation2 + $0x28] sm:$0xf]  ;;  %1757 = vst [vmem:[#allocation3 + $0x418] sm:$0xf] %v1671_v30  ;;  %7208 = vmatpush3.bf16.msra.mxu0 %v7632_v38  ;;  %v8338_v12 = vadd.f32 %v8268_v39, %v8290_v48  ;;  %v8342_v15 = vadd.f32 %v8268_v39, %v8293_v3  ;;  %v6830_v4 = vunpack.c.h.bf16 %v6949_v45 }
  0x7c   : > { %1055 = vst [vmem:[#allocation2 + $0xb8] sm:$0xf] %v881_v55  ;;  %v697_v59 = vshrl.u32 %v6739_v61, 16  ;;  %v700_v63 = vshll.u32 %v6739_v61, 16  ;;  %v705_v0 = vshrl.u32 %v6740_v5, 16  ;;  %v708_v1 = vshll.u32 %v6740_v5, 16 }
  0x7d   : > { %2071 = vst [vmem:[#allocation3 + $0x9c] sm:$0xf] %v2039_v57  ;;  %2072 = vst [vmem:[#allocation3 + $0xc0] sm:$0xf] %v2040_v62  ;;  %v1411_v52 = vrot.slane %v1409_v51, 4  ;;  %v1414_v56 = vrot.slane %v1412_v54, 5  ;;  %v1865_v36 = vsel %vm8210_vm13, %v1863_v41, %v1864_v49  ;;  %v440_v27 = vmul.f32 %v8279_v58, %v6829_v16 }
  0x7e   : > { %v1206_v8 = vld [vmem:[#allocation2 + $0x34] sm:$0xf]  ;;  %v1275_v10 = vld [vmem:[#allocation2 + $0x38] sm:$0x1]  ;;  %2004 = vst [vmem:[#allocation3 + $0x2c] sm:$0xf] %v1865_v36  ;;  %v8346_v48 = vmul.f32 %v8279_v58, %v6830_v4 }
  0x7f   : > { %v1274_v9 = vld [vmem:[#allocation2 + $0x34] sm:$0xf]  ;;  %1238 = vst [vmem:[#allocation3 + $0x144] sm:$0xf] %v1206_v8  ;;  %v1415_v17 = vor.u32 %v1414_v56, %v1411_v52  ;;  %v1428_v60 = vshll.u32 %v1275_v10, 16  ;;  %v699_v21 = vrot.slane %v697_v59, 7  ;;  %v8353_v49 = vadd.f32 %v8268_v39, %v440_v27 }
  0x80   : > { %v1418_v18 = vshll.u32 %v1274_v9, 16  ;;  %v1422_v19 = vshrl.u32 %v1274_v9, 16  ;;  %v982_v20 = vld [vmem:[#allocation2 + $0x3c] sm:$0xf]  ;;  %v1227_v22 = vld [vmem:[#allocation2 + $0xb4] sm:$0xf] }
  0x81   : > { %v1306_v25 = vld [vmem:[#allocation2 + $0xb4] sm:$0xf]  ;;  %v707_v23 = vrot.slane %v705_v0, 7  ;;  %v1416_v37 = vrot.slane %v1415_v17, 4  ;;  %v1430_v26 = vrot.slane %v1428_v60, 5  ;;  %v702_v34 = vor.u32 %v700_v63, %v699_v21  ;;  %v7645_v8 = vld [vmem:[%s9479_s3 + $0x148] sm:$0xff]  }
  0x82   : > { %v1420_v3 = vrot.slane %v1418_v18, 5  ;;  %v1424_v53 = vrot.slane %v1422_v19, 4  ;;  %1259 = vst [vmem:[#allocation3 + $0x438] sm:$0xf] %v1227_v22  ;;  %v1308_v29 = vld [vmem:[#allocation2 + $0xbc] sm:$0x1]  ;;  %7209 = vmatprep.subr.bf16.mxu0 %v7645_v8 }
  0x83   : > { %v1673_v32 = vshrl.u32 %v1306_v25, 16  ;;  %v1676_v33 = vshll.u32 %v1306_v25, 16  ;;  %v703_v13 = vrot.slane %v699_v21, 4  ;;  %v7579_v24 = vld [vmem:[#allocation3 + $0x3f4] ss:$36 sps:$4 sm:$0xff]   ;;  %v1692_v43 = vshll.u32 %v1308_v29, 16 }
  0x84   : > { %v7583_v35 = vld [vmem:[#allocation3 + $0x3f0] ss:$36 sps:$4 sm:$0xff]   ;;  %v1421_v41 = vsel %vm7969_vm5, %v1416_v37, %v1420_v3  ;;  %v1425_v42 = vor.u32 %v1424_v53, %v1420_v3  ;;  %v710_v14 = vor.u32 %v708_v1, %v707_v23  ;;  %v986_v44 = vld [vmem:[#allocation2 + $0x44] sm:$0x1]  ;;  %v1228_v31 = vld [vmem:[#allocation2 + $0xb8] sm:$0xf]  ;;  %v983_v5 = vsel %vm8010_vm10, %v702_v34, %v982_v20  ;;  %5316 = vmatprep.mubr.bf16.mxu1 %v7579_v24 }
  0x85   : > { %v1763_v45 = vld [vmem:[#allocation2 + $0xc] sm:$0xe]  ;;  %1736 = vst [vmem:[#allocation3 + $0x124] sm:$0xf] %v1421_v41  ;;  %v1307_v28 = vld [vmem:[#allocation2 + $0xb8] sm:$0xf]  ;;  %5317 = vmatmul.mubr.bf16.gmra.mxu1 %v7583_v35  ;;  %v8381_v34 = vadd.f32 %v8268_v39, %v8346_v48 }
  0x86   : > { %v1675_v47 = vrot.slane %v1673_v32, 4  ;;  %v1678_v61 = vrot.slane %v1676_v33, 5  ;;  %v1426_v38 = vrot.slane %v1425_v42, 4  ;;  %1260 = vst [vmem:[#allocation3 + $0x45c] sm:$0xf] %v1228_v31  ;;  %v1682_v30 = vshll.u32 %v1307_v28, 16 }
  0x87   : > { %v1686_v51 = vshrl.u32 %v1307_v28, 16  ;;  %v1694_v54 = vrot.slane %v1692_v43, 5  ;;  %984 = vst [vmem:[#allocation2 + $0x3c] sm:$0xf] %v983_v5  ;;  %v711_v57 = vsel %vm8004_vm9, %v703_v13, %v710_v14  ;;  %v712_v62 = vrot.slane %v707_v23, 4  ;;  %v7648_v25 = vld [vmem:[%s9479_s3 + $0x108] sm:$0xff]  }
  0x88   : > { %v1679_v55 = vor.u32 %v1678_v61, %v1675_v47  ;;  %v507_v59 = vmax.f32 %v8321_v50, 0.0  ;;  %v1764_v63 = vld [vmem:[#allocation2 + $0x10] sm:$0xf]  ;;  %v1765_v0 = vld [vmem:[#allocation2 + $0x14] sm:$0x1]  ;;  %v1431_v1 = vsel %vm7969_vm5, %v1426_v38, %v1430_v26  ;;  %v1684_v52 = vrot.slane %v1682_v30, 5  ;;  %7210 = vmatpush3.bf16.msra.mxu0 %v7648_v25 }
  0x89   : > { %v1688_v56 = vrot.slane %v1686_v51, 4  ;;  %985 = vst [vmem:[#allocation2 + $0x40] sm:$0xf] %v711_v57  ;;  %v508_v36 = vmax.f32 %v8334_v46, 0.0  ;;  %1737 = vst [vmem:[#allocation3 + $0x148] sm:$0xf] %v1431_v1  ;;  %v987_v10 = vsel %vm7997_vm8, %v712_v62, %v986_v44 }
  0x8a   : > { %v1680_v9 = vrot.slane %v1679_v55, 4  ;;  %v6741_v50 = vpack.c.bf16 %v507_v59, %v507_v59  ;;  %v6432_v16 = vrot.slane %v1763_v45, 9  ;;  %988 = vst [vmem:[#allocation2 + $0x44] sm:$0x1] %v987_v10  ;;  %v1868_v18 = vrot.slane %v1764_v63, 5  ;;  %v8375_v3 = vld [vmem:[%s7942_s30 + $0x40] sm:$0xff]  }
  0x8b   : > { %v1689_v4 = vor.u32 %v1688_v56, %v1684_v52  ;;  %v6742_v17 = vpack.c.bf16 %v508_v36, %v508_v36  ;;  %v1871_v19 = vrot.slane %v1765_v0, 5  ;;  %v509_v22 = vmax.f32 %v8338_v12, 0.0  ;;  %v989_v32 = vld [vmem:[#allocation2 + $0x48] sm:$0xf]  ;;  %v993_v42 = vld [vmem:[#allocation2 + $0x50] sm:$0x1] }
  0x8c   : > { %v1685_v46 = vsel %vm7969_vm5, %v1680_v9, %v1684_v52  ;;  %v714_v60 = vshrl.u32 %v6741_v50, 16  ;;  %v717_v20 = vshll.u32 %v6741_v50, 16  ;;  %v1869_v37 = vsel %vm8210_vm13, %v6432_v16, %v1868_v18  ;;  %v7593_v47 = vld [vmem:[#allocation3 + $0x120] ss:$36 sps:$4 sm:$0xff]   ;;  %v2041_v52 = vld [vmem:[#allocation2 + $0x30] sm:$0xf] }
  0x8d   : > { %v1690_v21 = vrot.slane %v1689_v4, 4  ;;  %1758 = vst [vmem:[#allocation3 + $0x43c] sm:$0xf] %v1685_v46  ;;  %v722_v23 = vshrl.u32 %v6742_v17, 16  ;;  %v725_v27 = vshll.u32 %v6742_v17, 16  ;;  %v1870_v33 = vrot.slane %v1868_v18, 4 }
  0x8e   : > { %v1207_v53 = vld [vmem:[#allocation2 + $0x3c] sm:$0xf]  ;;  %v716_v29 = vrot.slane %v714_v60, 7  ;;  %2005 = vst [vmem:[#allocation3 + $0x50] sm:$0xf] %v1869_v37  ;;  %v8377_v12 = vpack.c.bf16 %v509_v22, %v509_v22  ;;  %v510_v48 = vmax.f32 %v8342_v15, 0.0  ;;  %v6833_v38 = vunpack.c.l.bf16 %v8375_v3 }
  0x8f   : > { %v1276_v26 = vld [vmem:[#allocation2 + $0x3c] sm:$0xf]  ;;  %v1695_v13 = vsel %vm7969_vm5, %v1690_v21, %v1694_v54  ;;  %1239 = vst [vmem:[#allocation3 + $0x168] sm:$0xf] %v1207_v53  ;;  %v724_v41 = vrot.slane %v722_v23, 7  ;;  %v1872_v31 = vsel %vm8210_vm13, %v1870_v33, %v1871_v19  ;;  %v6834_v30 = vunpack.c.h.bf16 %v8375_v3  ;;  %v8399_v16 = vld [vmem:[%s7942_s30 + $0x48] sm:$0xff]  }
  0x90   : > { %v1433_v24 = vshrl.u32 %v1276_v26, 16  ;;  %v1436_v35 = vshll.u32 %v1276_v26, 16  ;;  %1759 = vst [vmem:[#allocation3 + $0x460] sm:$0xf] %v1695_v13  ;;  %v1208_v43 = vld [vmem:[#allocation2 + $0x40] sm:$0xf]  ;;  %v719_v44 = vor.u32 %v717_v20, %v716_v29  ;;  %v6744_v0 = vpack.c.bf16 %v510_v48, %v510_v48 }
  0x91   : > { %v1277_v14 = vld [vmem:[#allocation2 + $0x40] sm:$0xf]  ;;  %v720_v45 = vrot.slane %v716_v29, 4  ;;  %1240 = vst [vmem:[#allocation3 + $0x18c] sm:$0xf] %v1208_v43  ;;  %v727_v5 = vor.u32 %v725_v27, %v724_v41  ;;  %v729_v62 = vrot.slane %v724_v41, 4  ;;  %v8412_v26 = vmul.f32 %v8279_v58, %v6833_v38 }
  0x92   : > { %v7587_v28 = vld [vmem:[#allocation3 + $0x124] ss:$36 sps:$4 sm:$0xff]   ;;  %v1435_v61 = vrot.slane %v1433_v24, 4  ;;  %2006 = vst [vmem:[#allocation3 + $0x74] sm:$0xf] %v1872_v31  ;;  %v1438_v54 = vrot.slane %v1436_v35, 5  ;;  %v990_v63 = vsel %vm8010_vm10, %v719_v44, %v989_v32  ;;  %v8415_v29 = vmul.f32 %v8279_v58, %v6834_v30 }
  0x93   : > { %v1278_v51 = vld [vmem:[#allocation2 + $0x44] sm:$0x1]  ;;  %v1442_v55 = vshll.u32 %v1277_v14, 16  ;;  %v1446_v57 = vshrl.u32 %v1277_v14, 16  ;;  %5236 = vmatprep.mubr.bf16.mxu0 %v7587_v28  ;;  %v728_v15 = vsel %vm8004_vm9, %v720_v45, %v727_v5  ;;  %v1766_v1 = vld [vmem:[#allocation2 + $0x18] sm:$0xe]  ;;  %v994_v9 = vsel %vm7997_vm8, %v729_v62, %v993_v42 }
  0x94   : > { %v1452_v59 = vshll.u32 %v1278_v51, 16  ;;  %5237 = vmatmul.mubr.bf16.gmra.mxu0 %v7593_v47  ;;  %v1439_v56 = vor.u32 %v1438_v54, %v1435_v61  ;;  %991 = vst [vmem:[#allocation2 + $0x48] sm:$0xf] %v990_v63  ;;  %992 = vst [vmem:[#allocation2 + $0x4c] sm:$0xf] %v728_v15  ;;  %v731_v18 = vshrl.u32 %v8377_v12, 16  ;;  %v6837_v13 = vunpack.c.l.bf16 %v8399_v16 }
  0x95   : > { %v1444_v36 = vrot.slane %v1442_v55, 5  ;;  %v1448_v8 = vrot.slane %v1446_v57, 4  ;;  %v8396_v10 = vld [vmem:[#allocation2 + $0x1c] sm:$0xf]  ;;  %v2042_v50 = vld [vmem:[#allocation2 + $0x34] sm:$0xf]  ;;  %v6838_v24 = vunpack.c.h.bf16 %v8399_v16 }
  0x96   : > { %2073 = vst [vmem:[#allocation3 + $0xe4] sm:$0xf] %v2041_v52  ;;  %v1454_v4 = vrot.slane %v1452_v59, 5  ;;  %v7603_v17 = vld [vmem:[#allocation3 + $0xc] ss:$36 sps:$4 sm:$0xff]   ;;  %v734_v19 = vshll.u32 %v8377_v12, 16 }
  0x97   : > { %995 = vst [vmem:[#allocation2 + $0x50] sm:$0x1] %v994_v9  ;;  %v739_v46 = vshrl.u32 %v6744_v0, 16  ;;  %v8403_v60 = vld [vmem:[#allocation2 + $0x20] sm:$0x1]  ;;  %v1440_v22 = vrot.slane %v1439_v56, 4  ;;  %v1449_v25 = vor.u32 %v1448_v8, %v1444_v36 }
  0x98   : > { %2074 = vst [vmem:[#allocation3 + $0x108] sm:$0xf] %v2042_v50  ;;  %v7657_v20 = vld [vmem:[%s9479_s3 + $0x140] sm:$0xff]   ;;  %v742_v21 = vshll.u32 %v6744_v0, 16  ;;  %v6433_v23 = vrot.slane %v1766_v1, 9  ;;  %v733_v53 = vrot.slane %v731_v18, 7 }
  0x99   : > { %v7658_v27 = vld [vmem:[%s9479_s3 + $0x100] sm:$0xff]   ;;  %v7589_v37 = vld [vmem:[#allocation3 + $0x43c] ss:$36 sps:$4 sm:$0xff]   ;;  %7211 = vmatprep.subr.bf16.mxu0 %v7657_v20  ;;  %v1445_v32 = vsel %vm7969_vm5, %v1440_v22, %v1444_v36  ;;  %v1450_v33 = vrot.slane %v1449_v25, 4  ;;  %v741_v43 = vrot.slane %v739_v46, 7  ;;  %v1875_v14 = vrot.slane %v8396_v10, 5 }
  0x9a   : > { %v7594_v3 = vld [vmem:[#allocation3 + $0x438] ss:$36 sps:$4 sm:$0xff]   ;;  %7212 = vmatpush3.bf16.msra.mxu0 %v7658_v27  ;;  %5324 = vmatprep.mubr.bf16.mxu1 %v7589_v37  ;;  %1738 = vst [vmem:[#allocation3 + $0x16c] sm:$0xf] %v1445_v32  ;;  %v736_v41 = vor.u32 %v734_v19, %v733_v53  ;;  %v737_v42 = vrot.slane %v733_v53, 4  ;;  %v1878_v45 = vrot.slane %v8403_v60, 5 }
  0x9b   : > { %v996_v12 = vld [vmem:[#allocation2 + $0x54] sm:$0xf]  ;;  %5325 = vmatmul.mubr.bf16.gmra.mxu1 %v7594_v3  ;;  %v1455_v44 = vsel %vm7969_vm5, %v1450_v33, %v1454_v4  ;;  %v511_v31 = vmax.f32 %v8353_v49, 0.0  ;;  %v512_v48 = vmax.f32 %v8381_v34, 0.0  ;;  %v7670_v28 = vld [vmem:[%s9479_s3 + $0x238] sm:$0xff]   ;;  %v744_v38 = vor.u32 %v742_v21, %v741_v43  ;;  %v7637_v16 = vld [vmem:[%s9479_s3 + $0x1e8] sm:$0xff]  }
  0x9c   : > { %v8422_v35 = vld [vmem:[%s7942_s30 + $0x50] sm:$0xff]   ;;  %1739 = vst [vmem:[#allocation3 + $0x190] sm:$0xf] %v1455_v44  ;;  %5365 = vmatprep.mubr.bf16.mxu1 %v7603_v17  ;;  %v1209_v47 = vld [vmem:[#allocation2 + $0x48] sm:$0xf]  ;;  %v997_v30 = vsel %vm8010_vm10, %v736_v41, %v996_v12  ;;  %v1876_v54 = vsel %vm8210_vm13, %v6433_v23, %v1875_v14  ;;  %7445 = vmatprep.subr.bf16.mxu0 %v7670_v28  ;;  %v7606_v63 = vld [vmem:[%s9479_s3 + $0x1b8] sm:$0xff]  }
  0x9d   : > { %v1210_v61 = vld [vmem:[#allocation2 + $0x4c] sm:$0xf]  ;;  %v1279_v5 = vld [vmem:[#allocation2 + $0x48] sm:$0xf]  ;;  %v1000_v51 = vld [vmem:[#allocation2 + $0x5c] sm:$0x1]  ;;  %v6841_v49 = vunpack.c.l.bf16 %v8422_v35  ;;  %v6745_v59 = vpack.c.bf16 %v511_v31, %v511_v31  ;;  %v8438_v15 = vpack.c.bf16 %v512_v48, %v512_v48  ;;  %v745_v56 = vsel %vm8004_vm9, %v737_v42, %v744_v38 }
  0x9e   : > { %1241 = vst [vmem:[#allocation3 + $0x1b0] sm:$0xf] %v1209_v47  ;;  %1242 = vst [vmem:[#allocation3 + $0x1d4] sm:$0xf] %v1210_v61  ;;  %v1280_v34 = vld [vmem:[#allocation2 + $0x4c] sm:$0xf]  ;;  %v8467_v44 = vadd.f32 %v8268_v39, %v8412_v26  ;;  %v8476_v31 = vmul.f32 %v8279_v58, %v6837_v13  ;;  %v8482_v26 = vmul.f32 %v8279_v58, %v6838_v24 }
  0x9f   : > { %v1281_v55 = vld [vmem:[#allocation2 + $0x50] sm:$0x1]  ;;  %v1457_v57 = vshrl.u32 %v1279_v5, 16  ;;  %v1460_v62 = vshll.u32 %v1279_v5, 16  ;;  %998 = vst [vmem:[#allocation2 + $0x54] sm:$0xf] %v997_v30 }
  0xa0   : > { %2007 = vst [vmem:[#allocation3 + $0x98] sm:$0xf] %v1876_v54  ;;  %v1466_v0 = vshll.u32 %v1280_v34, 16  ;;  %v1470_v1 = vshrl.u32 %v1280_v34, 16  ;;  %v1476_v52 = vshll.u32 %v1281_v55, 16  ;;  %v746_v10 = vrot.slane %v741_v43, 4 }
  0xa1   : > { %v7601_v36 = vld [vmem:[#allocation3 + $0x8] ss:$36 sps:$4 sm:$0xff]   ;;  %v1459_v8 = vrot.slane %v1457_v57, 4  ;;  %v1462_v9 = vrot.slane %v1460_v62, 5  ;;  %999 = vst [vmem:[#allocation2 + $0x58] sm:$0xf] %v745_v56 }
  0xa2   : > { %v1877_v50 = vrot.slane %v1875_v14, 4  ;;  %v1468_v4 = vrot.slane %v1466_v0, 5  ;;  %v1472_v17 = vrot.slane %v1470_v1, 4  ;;  %v1478_v18 = vrot.slane %v1476_v52, 5  ;;  %v7611_v19 = vld [vmem:[#allocation3 + $0x54] ss:$36 sps:$4 sm:$0xff]  }
  0xa3   : > { %v748_v46 = vshrl.u32 %v6745_v59, 16  ;;  %v1463_v60 = vor.u32 %v1462_v9, %v1459_v8  ;;  %v1001_v20 = vsel %vm7997_vm8, %v746_v10, %v1000_v51  ;;  %v7620_v25 = vld [vmem:[%s9479_s3 + $0x1f0] sm:$0xff]   ;;  %v751_v21 = vshll.u32 %v6745_v59, 16  ;;  %v1003_v23 = vld [vmem:[#allocation2 + $0x60] sm:$0xf]  ;;  %5366 = vmatmul.mubr.bf16.vlgmr.msra.gmra.mxu1 %v7601_v36 }
  0xa4   : > { %v1879_v22 = vsel %vm8210_vm13, %v1877_v50, %v1878_v45  ;;  %v1473_v27 = vor.u32 %v1472_v17, %v1468_v4  ;;  %1002 = vst [vmem:[#allocation2 + $0x5c] sm:$0x1] %v1001_v20  ;;  %v7624_v37 = vld [vmem:[%s9479_s3 + $0x1b0] sm:$0xff]   ;;  %v756_v53 = vshrl.u32 %v8438_v15, 16  ;;  %v759_v32 = vshll.u32 %v8438_v15, 16  ;;  %7310 = vmatpush3.bf16.msra.mxu1 %v7606_v63  ;;  %5373 = vmatprep.mubr.bf16.mxu1 %v7611_v19  ;;  %v7640_v63 = vld [vmem:[%s9479_s3 + $0x1a8] sm:$0xff]  }
  0xa5   : > { %2008 = vst [vmem:[#allocation3 + $0xbc] sm:$0xf] %v1879_v22  ;;  %v8455_v3 = vrot.slane %v748_v46, 7  ;;  %v8459_v33 = vld [vmem:[#allocation2 + $0x24] sm:$0xe]  ;;  %v1464_v42 = vrot.slane %v1463_v60, 4  ;;  %v8471_v45 = vadd.f32 %v8268_v39, %v8415_v29  ;;  %v6842_v29 = vunpack.c.h.bf16 %v8422_v35  ;;  %7311 = vmatprep.subr.bf16.mxu1 %v7620_v25 }
  0xa6   : > { %v7599_v12 = vld [vmem:[#allocation3 + $0x16c] ss:$36 sps:$4 sm:$0xff]   ;;  %v8463_v14 = vld [vmem:[#allocation2 + $0x2c] sm:$0x1]  ;;  %v1474_v48 = vrot.slane %v1473_v27, 4  ;;  %v758_v62 = vrot.slane %v756_v53, 7 }
  0xa7   : > { %v7605_v41 = vld [vmem:[#allocation3 + $0x168] ss:$36 sps:$4 sm:$0xff]   ;;  %v8461_v43 = vld [vmem:[#allocation2 + $0x28] sm:$0xf]  ;;  %v1211_v28 = vld [vmem:[#allocation2 + $0x54] sm:$0xf]  ;;  %v753_v61 = vor.u32 %v751_v21, %v8455_v3  ;;  %5244 = vmatprep.mubr.bf16.mxu0 %v7599_v12  ;;  %v1469_v5 = vsel %vm7969_vm5, %v1464_v42, %v1468_v4 }
  0xa8   : > { %v1282_v47 = vld [vmem:[#allocation2 + $0x54] sm:$0xf]  ;;  %v7614_v13 = vld [vmem:[#allocation3 + $0x50] ss:$36 sps:$4 sm:$0xff]   ;;  %1243 = vst [vmem:[#allocation3 + $0x1f8] sm:$0xf] %v1211_v28  ;;  %5245 = vmatmul.mubr.bf16.gmra.mxu0 %v7605_v41  ;;  %v1479_v24 = vsel %vm7969_vm5, %v1474_v48, %v1478_v18  ;;  %7312 = vmatpush3.bf16.msra.mxu1 %v7624_v37  ;;  %v761_v10 = vor.u32 %v759_v32, %v758_v62 }
  0xa9   : > { %v1481_v38 = vshrl.u32 %v1282_v47, 16  ;;  %v1484_v30 = vshll.u32 %v1282_v47, 16  ;;  %v754_v51 = vrot.slane %v8455_v3, 4  ;;  %v1007_v54 = vld [vmem:[#allocation2 + $0x68] sm:$0x1]  ;;  %v1004_v59 = vsel %vm8010_vm10, %v753_v61, %v1003_v23  ;;  %v7653_v18 = vld [vmem:[%s9479_s3 + $0x1e0] sm:$0xff]   ;;  %7313 = vmatprep.subr.bf16.mxu1 %v7637_v16 }
  0xaa   : > { %v2043_v34 = vld [vmem:[#allocation2 + $0x3c] sm:$0xf]  ;;  %1740 = vst [vmem:[#allocation3 + $0x1b4] sm:$0xf] %v1469_v5  ;;  %v1212_v55 = vld [vmem:[#allocation2 + $0x58] sm:$0xf] }
  0xab   : > { %v1283_v57 = vld [vmem:[#allocation2 + $0x58] sm:$0xf]  ;;  %v6434_v15 = vrot.slane %v8459_v33, 9  ;;  %2075 = vst [vmem:[#allocation3 + $0x12c] sm:$0xf] %v2043_v34  ;;  %v1483_v0 = vrot.slane %v1481_v38, 4  ;;  %v762_v23 = vsel %vm8004_vm9, %v754_v51, %v761_v10  ;;  %5374 = vmatmul.mubr.bf16.gmra.mxu1 %v7614_v13  ;;  %v446_v34 = vmul.f32 %v8279_v58, %v6841_v49 }
  0xac   : > { %1741 = vst [vmem:[#allocation3 + $0x1d8] sm:$0xf] %v1479_v24  ;;  %1244 = vst [vmem:[#allocation3 + $0x21c] sm:$0xf] %v1212_v55  ;;  %v1486_v1 = vrot.slane %v1484_v30, 5  ;;  %v1490_v52 = vshll.u32 %v1283_v57, 16  ;;  %7314 = vmatpush3.bf16.msra.mxu1 %v7640_v63 }
  0xad   : > { %v1494_v56 = vshrl.u32 %v1283_v57, 16  ;;  %1005 = vst [vmem:[#allocation2 + $0x60] sm:$0xf] %v1004_v59  ;;  %v1772_v36 = vld [vmem:[#allocation2 + $0x30] sm:$0xe]  ;;  %v763_v50 = vrot.slane %v758_v62, 4  ;;  %7315 = vmatprep.subr.bf16.mxu1 %v7653_v18  ;;  %v484_v18 = vadd.f32 %v8268_v39, %v8482_v26 }
  0xae   : > { %v8499_v8 = vld [vmem:[#allocation2 + $0x34] sm:$0xf]  ;;  %v2044_v9 = vld [vmem:[#allocation2 + $0x40] sm:$0xf]  ;;  %v1882_v4 = vrot.slane %v8461_v43, 5  ;;  %v1885_v17 = vrot.slane %v8463_v14, 5  ;;  %v1487_v46 = vor.u32 %v1486_v1, %v1483_v0 }
  0xaf   : > { %2076 = vst [vmem:[#allocation3 + $0x150] sm:$0xf] %v2044_v9  ;;  %v1284_v19 = vld [vmem:[#allocation2 + $0x5c] sm:$0x1]  ;;  %v1492_v60 = vrot.slane %v1490_v52, 5  ;;  %v1496_v20 = vrot.slane %v1494_v56, 4  ;;  %v1008_v27 = vsel %vm7997_vm8, %v763_v50, %v1007_v54  ;;  %v8531_v54 = vadd.f32 %v8268_v39, %v8476_v31 }
  0xb0   : > { %v513_v22 = vmax.f32 %v8467_v44, 0.0  ;;  %v1500_v25 = vshll.u32 %v1284_v19, 16  ;;  %v7617_v21 = vld [vmem:[#allocation3 + $0x9c] ss:$36 sps:$4 sm:$0xff]   ;;  %v1883_v37 = vsel %vm8210_vm13, %v6434_v15, %v1882_v4  ;;  %v1488_v3 = vrot.slane %v1487_v46, 4  ;;  %v7656_v12 = vld [vmem:[%s9479_s3 + $0x1a0] sm:$0xff]  }
  0xb1   : > { %v1497_v53 = vor.u32 %v1496_v20, %v1492_v60  ;;  %1006 = vst [vmem:[#allocation2 + $0x64] sm:$0xf] %v762_v23  ;;  %1009 = vst [vmem:[#allocation2 + $0x68] sm:$0x1] %v1008_v27  ;;  %v1884_v32 = vrot.slane %v1882_v4, 4  ;;  %v514_v33 = vmax.f32 %v8471_v45, 0.0  ;;  %5381 = vmatprep.mubr.bf16.mxu1 %v7617_v21  ;;  %7316 = vmatpush3.bf16.msra.mxu1 %v7656_v12 }
  0xb2   : > { %2009 = vst [vmem:[#allocation3 + $0xe0] sm:$0xf] %v1883_v37  ;;  %v1502_v41 = vrot.slane %v1500_v25, 5  ;;  %v6747_v42 = vpack.c.bf16 %v513_v22, %v513_v22  ;;  %v8517_v43 = vld [vmem:[#allocation2 + $0x38] sm:$0x1]  ;;  %v6435_v14 = vrot.slane %v1772_v36, 9  ;;  %v1493_v45 = vsel %vm7969_vm5, %v1488_v3, %v1492_v60 }
  0xb3   : > { %v1889_v44 = vrot.slane %v8499_v8, 5  ;;  %v7669_v48 = vld [vmem:[%s9479_s3 + $0x1d8] sm:$0xff]   ;;  %v1498_v28 = vrot.slane %v1497_v53, 4  ;;  %v7622_v47 = vld [vmem:[#allocation3 + $0x98] ss:$36 sps:$4 sm:$0xff]   ;;  %v1886_v61 = vsel %vm8210_vm13, %v1884_v32, %v1885_v17  ;;  %v6748_v5 = vpack.c.bf16 %v514_v33, %v514_v33 }
  0xb4   : > { %v7609_v13 = vld [vmem:[#allocation3 + $0x1b4] ss:$36 sps:$4 sm:$0xff]   ;;  %1742 = vst [vmem:[#allocation3 + $0x1fc] sm:$0xf] %v1493_v45  ;;  %2010 = vst [vmem:[#allocation3 + $0x104] sm:$0xf] %v1886_v61  ;;  %7317 = vmatprep.subr.bf16.mxu1 %v7669_v48  ;;  %v447_v19 = vmul.f32 %v8279_v58, %v6842_v29  ;;  %v8552_v46 = vadd.f32 %v8268_v39, %v446_v34  ;;  %5382 = vmatmul.mubr.bf16.gmra.mxu1 %v7622_v47 }
  0xb5   : > { %v7613_v38 = vld [vmem:[#allocation3 + $0x1b0] ss:$36 sps:$4 sm:$0xff]   ;;  %v765_v30 = vshrl.u32 %v6747_v42, 16  ;;  %v1890_v51 = vsel %vm8210_vm13, %v6435_v14, %v1889_v44  ;;  %v7673_v16 = vld [vmem:[%s9479_s3 + $0x198] sm:$0xff]   ;;  %v1503_v24 = vsel %vm7969_vm5, %v1498_v28, %v1502_v41  ;;  %v1213_v55 = vld [vmem:[#allocation2 + $0x60] sm:$0xf]  ;;  %5252 = vmatprep.mubr.bf16.mxu0 %v7609_v13 }
  0xb6   : > { %v1285_v57 = vld [vmem:[#allocation2 + $0x60] sm:$0xf]  ;;  %v768_v62 = vshll.u32 %v6747_v42, 16  ;;  %v773_v59 = vshrl.u32 %v6748_v5, 16  ;;  %2011 = vst [vmem:[#allocation3 + $0x128] sm:$0xf] %v1890_v51  ;;  %5253 = vmatmul.mubr.bf16.gmra.mxu0 %v7613_v38  ;;  %7318 = vmatpush3.bf16.msra.mxu1 %v7673_v16 }
  0xb7   : > { %1743 = vst [vmem:[#allocation3 + $0x220] sm:$0xf] %v1503_v24  ;;  %1245 = vst [vmem:[#allocation3 + $0x240] sm:$0xf] %v1213_v55  ;;  %v1505_v31 = vshrl.u32 %v1285_v57, 16  ;;  %v1508_v15 = vshll.u32 %v1285_v57, 16 }
  0xb8   : > { %v767_v63 = vrot.slane %v765_v30, 7  ;;  %v776_v0 = vshll.u32 %v6748_v5, 16  ;;  %v1010_v49 = vld [vmem:[#allocation2 + $0x6c] sm:$0xf]  ;;  %v775_v1 = vrot.slane %v773_v59, 7  ;;  %v1891_v56 = vrot.slane %v1889_v44, 4 }
  0xb9   : > { %v1014_v52 = vld [vmem:[#allocation2 + $0x74] sm:$0x1]  ;;  %v1892_v36 = vrot.slane %v8517_v43, 5  ;;  %v515_v8 = vmax.f32 %v8531_v54, 0.0  ;;  %v1214_v10 = vld [vmem:[#allocation2 + $0x64] sm:$0xf] }
  0xba   : > { %v7684_v9 = vld [vmem:[%s9479_s3 + $0x1d0] sm:$0xff]   ;;  %v1286_v50 = vld [vmem:[#allocation2 + $0x64] sm:$0xf]  ;;  %v1287_v4 = vld [vmem:[#allocation2 + $0x68] sm:$0x1]  ;;  %v770_v17 = vor.u32 %v768_v62, %v767_v63  ;;  %v1507_v60 = vrot.slane %v1505_v31, 4  ;;  %v778_v37 = vor.u32 %v776_v0, %v775_v1 }
  0xbb   : > { %1246 = vst [vmem:[#allocation3 + $0x264] sm:$0xf] %v1214_v10  ;;  %v1510_v20 = vrot.slane %v1508_v15, 5  ;;  %v1514_v22 = vshll.u32 %v1286_v50, 16  ;;  %v1518_v25 = vshrl.u32 %v1286_v50, 16  ;;  %v7688_v23 = vld [vmem:[%s9479_s3 + $0x190] sm:$0xff]   ;;  %7319 = vmatprep.subr.bf16.mxu1 %v7684_v9  ;;  %v1893_v14 = vsel %vm8210_vm13, %v1891_v56, %v1892_v36 }
  0xbc   : > { %v1775_v21 = vld [vmem:[#allocation2 + $0x3c] sm:$0xe]  ;;  %v1524_v27 = vshll.u32 %v1287_v4, 16  ;;  %v771_v26 = vrot.slane %v767_v63, 4  ;;  %v780_v35 = vrot.slane %v775_v1, 4  ;;  %v7699_v39 = vld [vmem:[%s9479_s3 + $0x1c8] sm:$0xff]   ;;  %v1011_v33 = vsel %vm8010_vm10, %v770_v17, %v1010_v49  ;;  %7320 = vmatpush3.bf16.msra.mxu1 %v7688_v23 }
  0xbd   : > { %v1776_v3 = vld [vmem:[#allocation2 + $0x40] sm:$0xf]  ;;  %v1511_v58 = vor.u32 %v1510_v20, %v1507_v60  ;;  %v1516_v29 = vrot.slane %v1514_v22, 5  ;;  %v1520_v53 = vrot.slane %v1518_v25, 4  ;;  %v7630_v41 = vld [vmem:[#allocation3 + $0xe0] ss:$36 sps:$4 sm:$0xff]   ;;  %v6749_v5 = vpack.c.bf16 %v515_v8, %v515_v8  ;;  %7321 = vmatprep.subr.bf16.mxu1 %v7699_v39 }
  0xbe   : > { %v7627_v32 = vld [vmem:[#allocation3 + $0xe4] ss:$36 sps:$4 sm:$0xff]   ;;  %v1526_v12 = vrot.slane %v1524_v27, 5  ;;  %v779_v42 = vsel %vm8004_vm9, %v771_v26, %v778_v37  ;;  %1012 = vst [vmem:[#allocation2 + $0x6c] sm:$0xf] %v1011_v33  ;;  %v1015_v43 = vsel %vm7997_vm8, %v780_v35, %v1014_v52  ;;  %v7703_v48 = vld [vmem:[%s9479_s3 + $0x188] sm:$0xff]  }
  0xbf   : > { %v1777_v44 = vld [vmem:[#allocation2 + $0x44] sm:$0x1]  ;;  %v7615_v45 = vld [vmem:[#allocation3 + $0x1fc] ss:$36 sps:$4 sm:$0xff]   ;;  %v1512_v47 = vrot.slane %v1511_v58, 4  ;;  %v1521_v61 = vor.u32 %v1520_v53, %v1516_v29  ;;  %5389 = vmatprep.mubr.bf16.mxu1 %v7627_v32  ;;  %v516_v51 = vmax.f32 %v484_v18, 0.0 }
  0xc0   : > { %v7621_v28 = vld [vmem:[#allocation3 + $0x1f8] ss:$36 sps:$4 sm:$0xff]   ;;  %1013 = vst [vmem:[#allocation2 + $0x70] sm:$0xf] %v779_v42  ;;  %1016 = vst [vmem:[#allocation2 + $0x74] sm:$0x1] %v1015_v43  ;;  %5260 = vmatprep.mubr.bf16.mxu0 %v7615_v45  ;;  %5390 = vmatmul.mubr.bf16.gmra.mxu1 %v7630_v41 }
  0xc1   : > { %2012 = vst [vmem:[#allocation3 + $0x14c] sm:$0xf] %v1893_v14  ;;  %v8574_v13 = vld [vmem:[%s9478_s2] ss:$0 sm:$0xff]  ;;  %v8578_v30 = vld [vmem:[%s7942_s30 + $0x78] sm:$0xff]   ;;  %v6436_v54 = vrot.slane %v1775_v21, 9  ;;  %v1517_v55 = vsel %vm7969_vm5, %v1512_v47, %v1516_v29  ;;  %5261 = vmatmul.mubr.bf16.gmra.mxu0 %v7621_v28  ;;  %v6750_v63 = vpack.c.bf16 %v516_v51, %v516_v51  ;;  %7322 = vmatpush3.bf16.msra.mxu1 %v7703_v48 }
  0xc2   : > { %v486_v38 = vadd.f32 %v8574_v13, %v447_v19  ;;  %v1896_v34 = vrot.slane %v1776_v3, 5  ;;  %v1899_v16 = vrot.slane %v1777_v44, 5  ;;  %v2045_v24 = vld [vmem:[#allocation2 + $0x48] sm:$0xf]  ;;  %v1522_v57 = vrot.slane %v1521_v61, 4  ;;  %v7714_v15 = vld [vmem:[%s9479_s3 + $0x1c0] sm:$0xff]  }
  0xc3   : > { %v782_v62 = vshrl.u32 %v6749_v5, 16  ;;  %v785_v59 = vshll.u32 %v6749_v5, 16  ;;  %v2046_v31 = vld [vmem:[#allocation2 + $0x4c] sm:$0xf]  ;;  %2077 = vst [vmem:[#allocation3 + $0x174] sm:$0xf] %v2045_v24  ;;  %v6861_v4 = vunpack.c.l.bf16 %v8578_v30  ;;  %7323 = vmatprep.subr.bf16.mxu1 %v7714_v15 }
  0xc4   : > { %1744 = vst [vmem:[#allocation3 + $0x244] sm:$0xf] %v1517_v55  ;;  %v1897_v0 = vsel %vm8210_vm13, %v6436_v54, %v1896_v34  ;;  %v1898_v49 = vrot.slane %v1896_v34, 4  ;;  %2078 = vst [vmem:[#allocation3 + $0x198] sm:$0xf] %v2046_v31  ;;  %v517_v1 = vmax.f32 %v8552_v46, 0.0  ;;  %v1527_v52 = vsel %vm7969_vm5, %v1522_v57, %v1526_v12 }
  0xc5   : > { %v784_v56 = vrot.slane %v782_v62, 7  ;;  %2013 = vst [vmem:[#allocation3 + $0x170] sm:$0xf] %v1897_v0  ;;  %v518_v36 = vmax.f32 %v486_v38, 0.0  ;;  %1745 = vst [vmem:[#allocation3 + $0x268] sm:$0xf] %v1527_v52 }
  0xc6   : > { %v790_v8 = vshrl.u32 %v6750_v63, 16  ;;  %v793_v9 = vshll.u32 %v6750_v63, 16  ;;  %v1017_v10 = vld [vmem:[#allocation2 + $0x78] sm:$0xf]  ;;  %v1900_v50 = vsel %vm8210_vm13, %v1898_v49, %v1899_v16  ;;  %v1215_v17 = vld [vmem:[#allocation2 + $0x6c] sm:$0xf]  ;;  %v6751_v21 = vpack.c.bf16 %v517_v1, %v517_v1 }
  0xc7   : > { %v1288_v18 = vld [vmem:[#allocation2 + $0x6c] sm:$0xf]  ;;  %v787_v19 = vor.u32 %v785_v59, %v784_v56  ;;  %v788_v46 = vrot.slane %v784_v56, 4  ;;  %2014 = vst [vmem:[#allocation3 + $0x194] sm:$0xf] %v1900_v50  ;;  %v7718_v60 = vld [vmem:[%s9479_s3 + $0x180] sm:$0xff]   ;;  %v8596_v23 = vpack.c.bf16 %v518_v36, %v518_v36 }
  0xc8   : > { %v1216_v20 = vld [vmem:[#allocation2 + $0x70] sm:$0xf]  ;;  %1247 = vst [vmem:[#allocation3 + $0x288] sm:$0xf] %v1215_v17  ;;  %v1290_v25 = vld [vmem:[#allocation2 + $0x74] sm:$0x1]  ;;  %7324 = vmatpush3.bf16.msra.mxu1 %v7718_v60 }
  0xc9   : > { %v1289_v22 = vld [vmem:[#allocation2 + $0x70] sm:$0xf]  ;;  %1248 = vst [vmem:[#allocation3 + $0x2ac] sm:$0xf] %v1216_v20  ;;  %v1529_v27 = vshrl.u32 %v1288_v18, 16  ;;  %v1532_v26 = vshll.u32 %v1288_v18, 16  ;;  %v1018_v32 = vsel %vm8010_vm10, %v787_v19, %v1017_v10 }
  0xca   : > { %v1538_v37 = vshll.u32 %v1289_v22, 16  ;;  %v1542_v35 = vshrl.u32 %v1289_v22, 16  ;;  %v1021_v3 = vld [vmem:[#allocation2 + $0x80] sm:$0x1]  ;;  %v1548_v39 = vshll.u32 %v1290_v25, 16  ;;  %v792_v53 = vrot.slane %v790_v8, 7 }
  0xcb   : > { %v7635_v58 = vld [vmem:[#allocation3 + $0x12c] ss:$36 sps:$4 sm:$0xff]   ;;  %v8603_v33 = vld [vmem:[%s9477_s1] ss:$0 sm:$0xff]  ;;  %v1531_v41 = vrot.slane %v1529_v27, 4  ;;  %v1534_v42 = vrot.slane %v1532_v26, 5 }
  0xcc   : > { %v7639_v29 = vld [vmem:[#allocation3 + $0x128] ss:$36 sps:$4 sm:$0xff]   ;;  %v456_v12 = vmul.f32 %v8603_v33, %v6861_v4  ;;  %v1540_v43 = vrot.slane %v1538_v37, 5  ;;  %v1544_v14 = vrot.slane %v1542_v35, 4  ;;  %1019 = vst [vmem:[#allocation2 + $0x78] sm:$0xf] %v1018_v32  ;;  %5397 = vmatprep.mubr.bf16.mxu1 %v7635_v58  ;;  %v795_v48 = vor.u32 %v793_v9, %v792_v53 }
  0xcd   : > { %v1550_v44 = vrot.slane %v1548_v39, 5  ;;  %v797_v45 = vrot.slane %v792_v53, 4  ;;  %v799_v28 = vshrl.u32 %v6751_v21, 16  ;;  %v1778_v47 = vld [vmem:[#allocation2 + $0x48] sm:$0xe]  ;;  %v1535_v38 = vor.u32 %v1534_v42, %v1531_v41  ;;  %5398 = vmatmul.mubr.bf16.gmra.mxu1 %v7639_v29 }
  0xce   : > { %v7625_v61 = vld [vmem:[#allocation3 + $0x244] ss:$36 sps:$4 sm:$0xff]   ;;  %v1545_v51 = vor.u32 %v1544_v14, %v1540_v43  ;;  %v802_v54 = vshll.u32 %v6751_v21, 16  ;;  %v796_v34 = vsel %vm8004_vm9, %v788_v46, %v795_v48  ;;  %v7643_v24 = vld [vmem:[#allocation3 + $0x174] ss:$36 sps:$4 sm:$0xff]   ;;  %v8611_v62 = vadd.f32 %v8574_v13, %v456_v12 }
  0xcf   : > { %v7629_v5 = vld [vmem:[#allocation3 + $0x240] ss:$36 sps:$4 sm:$0xff]   ;;  %v1022_v16 = vsel %vm7997_vm8, %v797_v45, %v1021_v3  ;;  %v801_v55 = vrot.slane %v799_v28, 7  ;;  %v1024_v57 = vld [vmem:[#allocation2 + $0x84] sm:$0xf]  ;;  %5268 = vmatprep.mubr.bf16.mxu0 %v7625_v61  ;;  %v1536_v59 = vrot.slane %v1535_v38, 4  ;;  %5405 = vmatprep.mubr.bf16.mxu1 %v7643_v24 }
  0xd0   : > { %v1546_v31 = vrot.slane %v1545_v51, 4  ;;  %1020 = vst [vmem:[#allocation2 + $0x7c] sm:$0xf] %v796_v34  ;;  %1023 = vst [vmem:[#allocation2 + $0x80] sm:$0x1] %v1022_v16  ;;  %v807_v63 = vshrl.u32 %v8596_v23, 16  ;;  %5269 = vmatmul.mubr.bf16.gmra.mxu0 %v7629_v5 }
  0xd1   : > { %v7647_v15 = vld [vmem:[#allocation3 + $0x170] ss:$36 sps:$4 sm:$0xff]   ;;  %v810_v0 = vshll.u32 %v8596_v23, 16  ;;  %v804_v1 = vor.u32 %v802_v54, %v801_v55  ;;  %v805_v52 = vrot.slane %v801_v55, 4  ;;  %v1780_v36 = vld [vmem:[#allocation2 + $0x50] sm:$0x1]  ;;  %v1541_v10 = vsel %vm7969_vm5, %v1536_v59, %v1540_v43 }
  0xd2   : > { %v1779_v49 = vld [vmem:[#allocation2 + $0x4c] sm:$0xf]  ;;  %v6437_v8 = vrot.slane %v1778_v47, 9  ;;  %v1551_v50 = vsel %vm7969_vm5, %v1546_v31, %v1550_v44  ;;  %v809_v4 = vrot.slane %v807_v63, 7  ;;  %v1906_v17 = vrot.slane %v1780_v36, 5 }
  0xd3   : > { %v1028_v56 = vld [vmem:[#allocation2 + $0x8c] sm:$0x1]  ;;  %v1903_v9 = vrot.slane %v1779_v49, 5  ;;  %v2047_v18 = vld [vmem:[#allocation2 + $0x54] sm:$0xf]  ;;  %v1025_v20 = vsel %vm8010_vm10, %v804_v1, %v1024_v57  ;;  %v527_v21 = vmax.f32 %v8611_v62, 0.0 }
  0xd4   : > { %v2048_v19 = vld [vmem:[#allocation2 + $0x58] sm:$0xf]  ;;  %1746 = vst [vmem:[#allocation3 + $0x28c] sm:$0xf] %v1541_v10  ;;  %1747 = vst [vmem:[#allocation3 + $0x2b0] sm:$0xf] %v1551_v50  ;;  %v812_v26 = vor.u32 %v810_v0, %v809_v4 }
  0xd5   : > { %v1217_v46 = vld [vmem:[#allocation2 + $0x78] sm:$0xf]  ;;  %v1904_v22 = vsel %vm8210_vm13, %v6437_v8, %v1903_v9  ;;  %v1905_v25 = vrot.slane %v1903_v9, 4  ;;  %2079 = vst [vmem:[#allocation3 + $0x1bc] sm:$0xf] %v2047_v18  ;;  %v814_v37 = vrot.slane %v809_v4, 4  ;;  %5406 = vmatmul.mubr.bf16.gmra.mxu1 %v7647_v15 }
  0xd6   : > { %v1291_v60 = vld [vmem:[#allocation2 + $0x78] sm:$0xf]  ;;  %2080 = vst [vmem:[#allocation3 + $0x1e0] sm:$0xf] %v2048_v19  ;;  %1249 = vst [vmem:[#allocation3 + $0x2d0] sm:$0xf] %v1217_v46  ;;  %v813_v58 = vsel %vm8004_vm9, %v805_v52, %v812_v26 }
  0xd7   : > { %v1553_v23 = vshrl.u32 %v1291_v60, 16  ;;  %v1556_v27 = vshll.u32 %v1291_v60, 16  ;;  %1026 = vst [vmem:[#allocation2 + $0x84] sm:$0xf] %v1025_v20  ;;  %2015 = vst [vmem:[#allocation3 + $0x1b8] sm:$0xf] %v1904_v22  ;;  %v1907_v35 = vsel %vm8210_vm13, %v1905_v25, %v1906_v17  ;;  %v1029_v29 = vsel %vm7997_vm8, %v814_v37, %v1028_v56 }
  0xd8   : > { %2016 = vst [vmem:[#allocation3 + $0x1dc] sm:$0xf] %v1907_v35  ;;  %v1218_v53 = vld [vmem:[#allocation2 + $0x7c] sm:$0xf]  ;;  %v1293_v12 = vld [vmem:[#allocation2 + $0x80] sm:$0x1] }
  0xd9   : > { %v1555_v3 = vrot.slane %v1553_v23, 4  ;;  %v1558_v39 = vrot.slane %v1556_v27, 5  ;;  %v1292_v32 = vld [vmem:[#allocation2 + $0x7c] sm:$0xf]  ;;  %1027 = vst [vmem:[#allocation2 + $0x88] sm:$0xf] %v813_v58 }
  0xda   : > { %1030 = vst [vmem:[#allocation2 + $0x8c] sm:$0x1] %v1029_v29  ;;  %1250 = vst [vmem:[#allocation3 + $0x2f4] sm:$0xf] %v1218_v53  ;;  %v1562_v42 = vshll.u32 %v1292_v32, 16  ;;  %v1566_v43 = vshrl.u32 %v1292_v32, 16 }
  0xdb   : > { %v1559_v41 = vor.u32 %v1558_v39, %v1555_v3  ;;  %v1572_v14 = vshll.u32 %v1293_v12, 16  ;;  %v1781_v44 = vld [vmem:[#allocation2 + $0x54] sm:$0xe]  ;;  %v1782_v48 = vld [vmem:[#allocation2 + $0x58] sm:$0xf] }
  0xdc   : > { %v7633_v45 = vld [vmem:[#allocation3 + $0x28c] ss:$36 sps:$4 sm:$0xff]   ;;  %v1564_v47 = vrot.slane %v1562_v42, 5  ;;  %v1568_v5 = vrot.slane %v1566_v43, 4  ;;  %v1783_v16 = vld [vmem:[#allocation2 + $0x5c] sm:$0x1] }
  0xdd   : > { %v1560_v28 = vrot.slane %v1559_v41, 4  ;;  %v7638_v61 = vld [vmem:[#allocation3 + $0x288] ss:$36 sps:$4 sm:$0xff]   ;;  %v1574_v38 = vrot.slane %v1572_v14, 5  ;;  %5276 = vmatprep.mubr.bf16.mxu0 %v7633_v45  ;;  %v6438_v24 = vrot.slane %v1781_v44, 9  ;;  %v1910_v15 = vrot.slane %v1782_v48, 5 }
  0xde   : > { %v1219_v51 = vld [vmem:[#allocation2 + $0x84] sm:$0xf]  ;;  %5277 = vmatmul.mubr.bf16.gmra.mxu0 %v7638_v61  ;;  %v1569_v55 = vor.u32 %v1568_v5, %v1564_v47  ;;  %v7651_v31 = vld [vmem:[#allocation3 + $0x1bc] ss:$36 sps:$4 sm:$0xff]   ;;  %v2049_v17 = vld [vmem:[#allocation2 + $0x60] sm:$0xf] }
  0xdf   : > { %v1565_v54 = vsel %vm7969_vm5, %v1560_v28, %v1564_v47  ;;  %1251 = vst [vmem:[#allocation3 + $0x318] sm:$0xf] %v1219_v51  ;;  %v1294_v34 = vld [vmem:[#allocation2 + $0x84] sm:$0xf]  ;;  %5413 = vmatprep.mubr.bf16.mxu1 %v7651_v31  ;;  %v7655_v8 = vld [vmem:[#allocation3 + $0x1b8] ss:$36 sps:$4 sm:$0xff]   ;;  %v1911_v50 = vsel %vm8210_vm13, %v6438_v24, %v1910_v15  ;;  %v6862_v24 = vunpack.c.h.bf16 %v8578_v30 }
  0xe0   : > { %1748 = vst [vmem:[#allocation3 + $0x2d4] sm:$0xf] %v1565_v54  ;;  %v1577_v57 = vshrl.u32 %v1294_v34, 16  ;;  %v1580_v59 = vshll.u32 %v1294_v34, 16  ;;  %v1220_v63 = vld [vmem:[#allocation2 + $0x88] sm:$0xf]  ;;  %5414 = vmatmul.mubr.bf16.gmra.mxu1 %v7655_v8 }
  0xe1   : > { %v1295_v0 = vld [vmem:[#allocation2 + $0x88] sm:$0xf]  ;;  %v1296_v49 = vld [vmem:[#allocation2 + $0x8c] sm:$0x1]  ;;  %v1570_v1 = vrot.slane %v1569_v55, 4  ;;  %v1912_v4 = vrot.slane %v1910_v15, 4 }
  0xe2   : > { %1252 = vst [vmem:[#allocation3 + $0x33c] sm:$0xf] %v1220_v63  ;;  %v1579_v52 = vrot.slane %v1577_v57, 4  ;;  %v1582_v56 = vrot.slane %v1580_v59, 5  ;;  %v1586_v36 = vshll.u32 %v1295_v0, 16  ;;  %v1590_v9 = vshrl.u32 %v1295_v0, 16 }
  0xe3   : > { %v1596_v10 = vshll.u32 %v1296_v49, 16  ;;  %v1575_v18 = vsel %vm7969_vm5, %v1570_v1, %v1574_v38  ;;  %v1913_v60 = vrot.slane %v1783_v16, 5  ;;  %2017 = vst [vmem:[#allocation3 + $0x200] sm:$0xf] %v1911_v50  ;;  %v2050_v20 = vld [vmem:[#allocation2 + $0x64] sm:$0xf] }
  0xe4   : > { %v1583_v19 = vor.u32 %v1582_v56, %v1579_v52  ;;  %v1588_v46 = vrot.slane %v1586_v36, 5  ;;  %2081 = vst [vmem:[#allocation3 + $0x204] sm:$0xf] %v2049_v17  ;;  %v2099_v22 = vld [vmem:[#allocation2 + $0xc] sm:$0xf]  ;;  %v1592_v25 = vrot.slane %v1590_v9, 4 }
  0xe5   : > { %1749 = vst [vmem:[#allocation3 + $0x2f8] sm:$0xf] %v1575_v18  ;;  %v1598_v23 = vrot.slane %v1596_v10, 5  ;;  %2082 = vst [vmem:[#allocation3 + $0x228] sm:$0xf] %v2050_v20  ;;  %v1914_v35 = vsel %vm8210_vm13, %v1912_v4, %v1913_v60  ;;  %v2148_v3 = vshrl.u32 %v2099_v22, 16  ;;  %v457_v20 = vmul.f32 %v8603_v33, %v6862_v24 }
  0xe6   : > { %v2100_v27 = vld [vmem:[#allocation2 + $0x10] sm:$0xf]  ;;  %v2101_v26 = vld [vmem:[#allocation2 + $0x14] sm:$0x1]  ;;  %v1584_v37 = vrot.slane %v1583_v19, 4  ;;  %v2151_v39 = vshll.u32 %v2099_v22, 16  ;;  %v1593_v29 = vor.u32 %v1592_v25, %v1588_v46 }
  0xe7   : > { %v2595_v58 = vld [vmem:[#allocation2 + $0xc] sm:$0xe]  ;;  %2018 = vst [vmem:[#allocation3 + $0x224] sm:$0xf] %v1914_v35  ;;  %v2157_v53 = vshll.u32 %v2100_v27, 16  ;;  %v2161_v32 = vshrl.u32 %v2100_v27, 16 }
  0xe8   : > { %v2167_v12 = vshll.u32 %v2101_v26, 16  ;;  %v2596_v41 = vld [vmem:[#allocation2 + $0x10] sm:$0xf]  ;;  %v1589_v42 = vsel %vm7969_vm5, %v1584_v37, %v1588_v46  ;;  %v2150_v43 = vrot.slane %v2148_v3, 4  ;;  %v2153_v14 = vrot.slane %v2151_v39, 5 }
  0xe9   : > { %v2597_v44 = vld [vmem:[#allocation2 + $0x14] sm:$0x1]  ;;  %v6447_v48 = vrot.slane %v2595_v58, 9  ;;  %v1594_v45 = vrot.slane %v1593_v29, 4  ;;  %1750 = vst [vmem:[#allocation3 + $0x31c] sm:$0xf] %v1589_v42  ;;  %v8659_v42 = vpack.c.bf16 %v527_v21, %v527_v21 }
  0xea   : > { %v2159_v28 = vrot.slane %v2157_v53, 5  ;;  %v2163_v47 = vrot.slane %v2161_v32, 4  ;;  %v2169_v61 = vrot.slane %v2167_v12, 5  ;;  %v1784_v5 = vld [vmem:[#allocation2 + $0x60] sm:$0xe]  ;;  %v2154_v38 = vor.u32 %v2153_v14, %v2150_v43 }
  0xeb   : > { %v2693_v51 = vrot.slane %v2596_v41, 5  ;;  %v2696_v54 = vrot.slane %v2597_v44, 5  ;;  %v1785_v34 = vld [vmem:[#allocation2 + $0x64] sm:$0xf]  ;;  %v1786_v16 = vld [vmem:[#allocation2 + $0x68] sm:$0x1]  ;;  %v1599_v55 = vsel %vm7969_vm5, %v1594_v45, %v1598_v23 }
  0xec   : > { %v2164_v57 = vor.u32 %v2163_v47, %v2159_v28  ;;  %v6439_v59 = vrot.slane %v1784_v5, 9  ;;  %v1917_v31 = vrot.slane %v1785_v34, 5  ;;  %v2051_v15 = vld [vmem:[#allocation2 + $0x6c] sm:$0xf]  ;;  %1751 = vst [vmem:[#allocation3 + $0x340] sm:$0xf] %v1599_v55 }
  0xed   : > { %v7641_v63 = vld [vmem:[#allocation3 + $0x2d4] ss:$36 sps:$4 sm:$0xff]   ;;  %v2155_v49 = vrot.slane %v2154_v38, 4  ;;  %v2694_v1 = vsel %vm8210_vm13, %v6447_v48, %v2693_v51  ;;  %2083 = vst [vmem:[#allocation3 + $0x24c] sm:$0xf] %v2051_v15  ;;  %v2695_v56 = vrot.slane %v2693_v51, 4  ;;  %v8662_v48 = vadd.f32 %v8574_v13, %v457_v20 }
  0xee   : > { %v7646_v0 = vld [vmem:[#allocation3 + $0x2d0] ss:$36 sps:$4 sm:$0xff]   ;;  %v2165_v52 = vrot.slane %v2164_v57, 4  ;;  %2835 = vst [vmem:[#allocation3 + $0x14] sm:$0xf] %v2694_v1  ;;  %v1918_v30 = vsel %vm8210_vm13, %v6439_v59, %v1917_v31  ;;  %v1919_v36 = vrot.slane %v1917_v31, 4  ;;  %5284 = vmatprep.mubr.bf16.mxu0 %v7641_v63 }
  0xef   : > { %v2052_v8 = vld [vmem:[#allocation2 + $0x70] sm:$0xf]  ;;  %v7659_v9 = vld [vmem:[#allocation3 + $0x204] ss:$36 sps:$4 sm:$0xff]   ;;  %v2160_v10 = vsel %vm7969_vm5, %v2155_v49, %v2159_v28  ;;  %v1920_v4 = vrot.slane %v1786_v16, 5  ;;  %5285 = vmatmul.mubr.bf16.gmra.mxu0 %v7646_v0  ;;  %v2697_v18 = vsel %vm8210_vm13, %v2695_v56, %v2696_v54  ;;  %v884_v21 = vshrl.u32 %v8659_v42, 16 }
  0xf0   : > { %v7664_v50 = vld [vmem:[#allocation3 + $0x200] ss:$36 sps:$4 sm:$0xff]   ;;  %2019 = vst [vmem:[#allocation3 + $0x248] sm:$0xf] %v1918_v30  ;;  %2084 = vst [vmem:[#allocation3 + $0x270] sm:$0xf] %v2052_v8  ;;  %v2170_v17 = vsel %vm7969_vm5, %v2165_v52, %v2169_v61  ;;  %5421 = vmatprep.mubr.bf16.mxu1 %v7659_v9 }
  0xf1   : > { %2563 = vst [vmem:[#allocation3 + $0x10] sm:$0xf] %v2160_v10  ;;  %v2102_v19 = vld [vmem:[#allocation2 + $0x18] sm:$0xf]  ;;  %v2103_v46 = vld [vmem:[#allocation2 + $0x1c] sm:$0xf]  ;;  %v1921_v22 = vsel %vm8210_vm13, %v1919_v36, %v1920_v4  ;;  %5422 = vmatmul.mubr.bf16.gmra.mxu1 %v7664_v50 }
  0xf2   : > { %v2104_v60 = vld [vmem:[#allocation2 + $0x20] sm:$0x1]  ;;  %2564 = vst [vmem:[#allocation3 + $0x34] sm:$0xf] %v2170_v17  ;;  %2836 = vst [vmem:[#allocation3 + $0x38] sm:$0xf] %v2697_v18 }
  0xf3   : > { %v2172_v25 = vshrl.u32 %v2102_v19, 16  ;;  %v2175_v23 = vshll.u32 %v2102_v19, 16  ;;  %v2181_v27 = vshll.u32 %v2103_v46, 16  ;;  %v2598_v26 = vld [vmem:[#allocation2 + $0x18] sm:$0xe]  ;;  %v2185_v37 = vshrl.u32 %v2103_v46, 16 }
  0xf4   : > { %2020 = vst [vmem:[#allocation3 + $0x26c] sm:$0xf] %v1921_v22  ;;  %v2191_v35 = vshll.u32 %v2104_v60, 16  ;;  %v2599_v3 = vld [vmem:[#allocation2 + $0x1c] sm:$0xf]  ;;  %v6448_v33 = vrot.slane %v2598_v26, 9 }
  0xf5   : > { %v2600_v39 = vld [vmem:[#allocation2 + $0x20] sm:$0x1]  ;;  %v2174_v58 = vrot.slane %v2172_v25, 4  ;;  %v2177_v29 = vrot.slane %v2175_v23, 5  ;;  %v2183_v53 = vrot.slane %v2181_v27, 5  ;;  %v2187_v41 = vrot.slane %v2185_v37, 4 }
  0xf6   : > { %v7649_v32 = vld [vmem:[#allocation3 + $0x31c] ss:$36 sps:$4 sm:$0xff]   ;;  %v2700_v14 = vrot.slane %v2599_v3, 5  ;;  %v2703_v44 = vrot.slane %v2600_v39, 5  ;;  %v2193_v28 = vrot.slane %v2191_v35, 5  ;;  %v528_v16 = vmax.f32 %v8662_v48, 0.0 }
  0xf7   : > { %v7654_v12 = vld [vmem:[#allocation3 + $0x318] ss:$36 sps:$4 sm:$0xff]   ;;  %v2178_v43 = vor.u32 %v2177_v29, %v2174_v58  ;;  %5292 = vmatprep.mubr.bf16.mxu0 %v7649_v32  ;;  %v2188_v45 = vor.u32 %v2187_v41, %v2183_v53  ;;  %v7665_v51 = vld [vmem:[#allocation3 + $0x24c] ss:$36 sps:$4 sm:$0xff]   ;;  %v1787_v57 = vld [vmem:[#allocation2 + $0x6c] sm:$0xe] }
  0xf8   : > { %v2701_v61 = vsel %vm8210_vm13, %v6448_v33, %v2700_v14  ;;  %v2702_v5 = vrot.slane %v2700_v14, 4  ;;  %5293 = vmatmul.mubr.bf16.gmra.mxu0 %v7654_v12  ;;  %v1788_v59 = vld [vmem:[#allocation2 + $0x70] sm:$0xf]  ;;  %5429 = vmatprep.mubr.bf16.mxu1 %v7665_v51  ;;  %v1789_v31 = vld [vmem:[#allocation2 + $0x74] sm:$0x1]  ;;  %v6440_v15 = vrot.slane %v1787_v57, 9 }
  0xf9   : > { %v2179_v47 = vrot.slane %v2178_v43, 4  ;;  %v7663_v38 = vld [vmem:[#allocation3 + $0x14] ss:$36 sps:$4 sm:$0xff]   ;;  %v2189_v62 = vrot.slane %v2188_v45, 4  ;;  %2837 = vst [vmem:[#allocation3 + $0x5c] sm:$0xf] %v2701_v61 }
  0xfa   : > { %v2704_v13 = vsel %vm8210_vm13, %v2702_v5, %v2703_v44  ;;  %v7661_v24 = vld [vmem:[#allocation3 + $0x10] ss:$36 sps:$4 sm:$0xff]   ;;  %5526 = vmatprep.mubr.bf16.mxu0 %v7663_v38  ;;  %v1924_v63 = vrot.slane %v1788_v59, 5  ;;  %v2053_v0 = vld [vmem:[#allocation2 + $0x78] sm:$0xf]  ;;  %v1927_v49 = vrot.slane %v1789_v31, 5  ;;  %v8702_v59 = vpack.c.bf16 %v528_v16, %v528_v16 }
  0xfb   : > { %v2184_v54 = vsel %vm7969_vm5, %v2179_v47, %v2183_v53  ;;  %v7671_v34 = vld [vmem:[#allocation3 + $0x248] ss:$36 sps:$4 sm:$0xff]   ;;  %v2194_v55 = vsel %vm7969_vm5, %v2189_v62, %v2193_v28  ;;  %2838 = vst [vmem:[#allocation3 + $0x80] sm:$0xf] %v2704_v13  ;;  %v2054_v1 = vld [vmem:[#allocation2 + $0x7c] sm:$0xf] }
  0xfc   : > { %2565 = vst [vmem:[#allocation3 + $0x58] sm:$0xf] %v2184_v54  ;;  %2566 = vst [vmem:[#allocation3 + $0x7c] sm:$0xf] %v2194_v55  ;;  %5430 = vmatmul.mubr.bf16.gmra.mxu1 %v7671_v34  ;;  %v2105_v52 = vld [vmem:[#allocation2 + $0x24] sm:$0xf]  ;;  %v1925_v36 = vsel %vm8210_vm13, %v6440_v15, %v1924_v63 }
  0xfd   : > { %2085 = vst [vmem:[#allocation3 + $0x294] sm:$0xf] %v2053_v0  ;;  %v7685_v56 = vld [vmem:[%s9479_s3 + $0x230] sm:$0xff]   ;;  %v8677_v30 = vrot.slane %v884_v21, 7  ;;  %v1926_v8 = vrot.slane %v1924_v63, 4  ;;  %v2196_v50 = vshrl.u32 %v2105_v52, 16 }
  0xfe   : > { %2086 = vst [vmem:[#allocation3 + $0x2b8] sm:$0xf] %v2054_v1  ;;  %v2106_v9 = vld [vmem:[#allocation2 + $0x28] sm:$0xf]  ;;  %v2107_v10 = vld [vmem:[#allocation2 + $0x2c] sm:$0x1] }
  0xff   : > { %2021 = vst [vmem:[#allocation3 + $0x290] sm:$0xf] %v1925_v36  ;;  %v2199_v4 = vshll.u32 %v2105_v52, 16  ;;  %v2205_v17 = vshll.u32 %v2106_v9, 16  ;;  %v2209_v18 = vshrl.u32 %v2106_v9, 16  ;;  %v2215_v19 = vshll.u32 %v2107_v10, 16 }
 0x100   : > { %v2601_v46 = vld [vmem:[#allocation2 + $0x24] sm:$0xe]  ;;  %v1928_v60 = vsel %vm8210_vm13, %v1926_v8, %v1927_v49  ;;  %v2198_v20 = vrot.slane %v2196_v50, 4  ;;  %v2602_v22 = vld [vmem:[#allocation2 + $0x28] sm:$0xf]  ;;  %5527 = vmatmul.mubr.bf16.vlgmr.msra.gmra.mxu0 %v7661_v24  ;;  %v7818_v58 = vld [vmem:[%s9479_s3 + $0x238] sm:$0xff]  }
 0x101   : > { %v2603_v25 = vld [vmem:[#allocation2 + $0x2c] sm:$0x1]  ;;  %v6449_v23 = vrot.slane %v2601_v46, 9  ;;  %2022 = vst [vmem:[#allocation3 + $0x2b4] sm:$0xf] %v1928_v60  ;;  %v2201_v27 = vrot.slane %v2199_v4, 5  ;;  %7446 = vmatpush3.bf16.msra.mxu0 %v7818_v58 }
 0x102   : > { %v2207_v26 = vrot.slane %v2205_v17, 5  ;;  %v2211_v37 = vrot.slane %v2209_v18, 4  ;;  %v2217_v35 = vrot.slane %v2215_v19, 5  ;;  %v1790_v3 = vld [vmem:[#allocation2 + $0x78] sm:$0xe]  ;;  %v7700_v39 = vld [vmem:[%s9479_s3 + $0x228] sm:$0xff]   ;;  %7447 = vmatprep.subr.bf16.mxu0 %v7685_v56 }
 0x103   : > { %v2707_v29 = vrot.slane %v2602_v22, 5  ;;  %v2710_v53 = vrot.slane %v2603_v25, 5  ;;  %v1791_v33 = vld [vmem:[#allocation2 + $0x7c] sm:$0xf]  ;;  %v6441_v32 = vrot.slane %v1790_v3, 9  ;;  %v2202_v43 = vor.u32 %v2201_v27, %v2198_v20  ;;  %v7715_v13 = vld [vmem:[%s9479_s3 + $0x220] sm:$0xff]  }
 0x104   : > { %v7667_v12 = vld [vmem:[#allocation3 + $0x5c] ss:$36 sps:$4 sm:$0xff]   ;;  %v2212_v14 = vor.u32 %v2211_v37, %v2207_v26  ;;  %v1931_v44 = vrot.slane %v1791_v33, 5  ;;  %v1792_v47 = vld [vmem:[#allocation2 + $0x80] sm:$0x1]  ;;  %v890_v5 = vrot.slane %v8677_v30, 4 }
 0x105   : > { %v7672_v41 = vld [vmem:[#allocation3 + $0x58] ss:$36 sps:$4 sm:$0xff]   ;;  %v2708_v45 = vsel %vm8210_vm13, %v6449_v23, %v2707_v29  ;;  %v2709_v28 = vrot.slane %v2707_v29, 4  ;;  %v2055_v61 = vld [vmem:[#allocation2 + $0x84] sm:$0xf]  ;;  %5534 = vmatprep.mubr.bf16.mxu0 %v7667_v12  ;;  %v2203_v38 = vrot.slane %v2202_v43, 4  ;;  %7448 = vmatpush3.bf16.msra.mxu0 %v7685_v56 }
 0x106   : > { %v2213_v62 = vrot.slane %v2212_v14, 4  ;;  %2839 = vst [vmem:[#allocation3 + $0xa4] sm:$0xf] %v2708_v45  ;;  %v1932_v21 = vsel %vm8210_vm13, %v6441_v32, %v1931_v44  ;;  %v1933_v51 = vrot.slane %v1931_v44, 4  ;;  %v2056_v54 = vld [vmem:[#allocation2 + $0x88] sm:$0xf]  ;;  %7449 = vmatprep.subr.bf16.mxu0 %v7700_v39 }
 0x107   : > { %2087 = vst [vmem:[#allocation3 + $0x2dc] sm:$0xf] %v2055_v61  ;;  %v2711_v34 = vsel %vm8210_vm13, %v2709_v28, %v2710_v53  ;;  %v1934_v24 = vrot.slane %v1792_v47, 5  ;;  %2023 = vst [vmem:[#allocation3 + $0x2d8] sm:$0xf] %v1932_v21  ;;  %v2208_v31 = vsel %vm7969_vm5, %v2203_v38, %v2207_v26  ;;  %v892_v46 = vshrl.u32 %v8702_v59, 16 }
 0x108   : > { %2088 = vst [vmem:[#allocation3 + $0x300] sm:$0xf] %v2056_v54  ;;  %v2108_v55 = vld [vmem:[#allocation2 + $0x30] sm:$0xf]  ;;  %v2109_v57 = vld [vmem:[#allocation2 + $0x34] sm:$0xf]  ;;  %v2218_v15 = vsel %vm7969_vm5, %v2213_v62, %v2217_v35  ;;  %5535 = vmatmul.mubr.bf16.gmra.mxu0 %v7672_v41 }
 0x109   : > { %2840 = vst [vmem:[#allocation3 + $0xc8] sm:$0xf] %v2711_v34  ;;  %v2110_v63 = vld [vmem:[#allocation2 + $0x38] sm:$0x1]  ;;  %v2220_v0 = vshrl.u32 %v2108_v55, 16  ;;  %v2223_v49 = vshll.u32 %v2108_v55, 16  ;;  %v1935_v48 = vsel %vm8210_vm13, %v1933_v51, %v1934_v24  ;;  %7450 = vmatpush3.bf16.msra.mxu0 %v7700_v39  ;;  %v6989_v39 = vpop.f32.mrf.mxu0 }
 0x10a   : > { %v2604_v1 = vld [vmem:[#allocation2 + $0x30] sm:$0xe]  ;;  %2567 = vst [vmem:[#allocation3 + $0xa0] sm:$0xf] %v2208_v31  ;;  %2568 = vst [vmem:[#allocation3 + $0xc4] sm:$0xf] %v2218_v15  ;;  %7451 = vmatprep.subr.bf16.mxu0 %v7715_v13 }
 0x10b   : > { %v7674_v52 = vld [vmem:[#allocation3 + $0x294] ss:$36 sps:$4 sm:$0xff]   ;;  %v2229_v16 = vshll.u32 %v2109_v57, 16  ;;  %2024 = vst [vmem:[#allocation3 + $0x2fc] sm:$0xf] %v1935_v48  ;;  %v2222_v36 = vrot.slane %v2220_v0, 4  ;;  %v6990_v14 = vpop.f32.mrf.mxu0 }
 0x10c   : > { %v7678_v56 = vld [vmem:[#allocation3 + $0x290] ss:$36 sps:$4 sm:$0xff]   ;;  %v2225_v8 = vrot.slane %v2223_v49, 5  ;;  %v2233_v9 = vshrl.u32 %v2109_v57, 16  ;;  %v2239_v10 = vshll.u32 %v2110_v63, 16  ;;  %5437 = vmatprep.mubr.bf16.mxu1 %v7674_v52  ;;  %v6450_v18 = vrot.slane %v2604_v1, 9 }
 0x10d   : > { %v2605_v50 = vld [vmem:[#allocation2 + $0x34] sm:$0xf]  ;;  %v2231_v4 = vrot.slane %v2229_v16, 5  ;;  %v2606_v17 = vld [vmem:[#allocation2 + $0x38] sm:$0x1]  ;;  %5438 = vmatmul.mubr.bf16.gmra.mxu1 %v7678_v56  ;;  %v8716_v37 = vrot.slane %v892_v46, 7  ;;  %7452 = vmatpush3.bf16.msra.mxu0 %v7715_v13  ;;  %v8725_v47 = vadd.f32 %v6990_v14, %v6989_v39 }
 0x10e   : > { %v2714_v19 = vrot.slane %v2605_v50, 5  ;;  %v2226_v60 = vor.u32 %v2225_v8, %v2222_v36  ;;  %v2235_v20 = vrot.slane %v2233_v9, 4  ;;  %v2241_v22 = vrot.slane %v2239_v10, 5  ;;  %v7730_v23 = vld [vmem:[%s9479_s3 + $0x218] sm:$0xff]   ;;  %v1793_v29 = vld [vmem:[#allocation2 + $0x84] sm:$0xe] }
 0x10f   : > { %v2717_v25 = vrot.slane %v2606_v17, 5  ;;  %v1794_v53 = vld [vmem:[#allocation2 + $0x88] sm:$0xf]  ;;  %v7742_v33 = vld [vmem:[%s9479_s3 + $0x210] sm:$0xff]   ;;  %v6442_v43 = vrot.slane %v1793_v29, 9  ;;  %7453 = vmatprep.subr.bf16.mxu0 %v7730_v23 }
 0x110   : > { %v2715_v27 = vsel %vm8210_vm13, %v6450_v18, %v2714_v19  ;;  %v2716_v26 = vrot.slane %v2714_v19, 4  ;;  %v2227_v35 = vrot.slane %v2226_v60, 4  ;;  %v2236_v3 = vor.u32 %v2235_v20, %v2231_v4  ;;  %v7676_v32 = vld [vmem:[#allocation3 + $0xa4] ss:$36 sps:$4 sm:$0xff]   ;;  %v7680_v45 = vld [vmem:[#allocation3 + $0x2dc] ss:$36 sps:$4 sm:$0xff]  }
 0x111   : > { %2841 = vst [vmem:[#allocation3 + $0xec] sm:$0xf] %v2715_v27  ;;  %v7679_v44 = vld [vmem:[#allocation3 + $0xa0] ss:$36 sps:$4 sm:$0xff]   ;;  %v1938_v28 = vrot.slane %v1794_v53, 5  ;;  %5542 = vmatprep.mubr.bf16.mxu0 %v7676_v32  ;;  %5445 = vmatprep.mubr.bf16.mxu1 %v7680_v45  ;;  %v7755_v56 = vld [vmem:[%s9479_s3 + $0x208] sm:$0xff]  }
 0x112   : > { %v2718_v58 = vsel %vm8210_vm13, %v2716_v26, %v2717_v25  ;;  %v2232_v12 = vsel %vm7969_vm5, %v2227_v35, %v2231_v4  ;;  %v2237_v41 = vrot.slane %v2236_v3, 4  ;;  %v7686_v38 = vld [vmem:[#allocation3 + $0x2d8] ss:$36 sps:$4 sm:$0xff]   ;;  %v1795_v62 = vld [vmem:[#allocation2 + $0x8c] sm:$0x1]  ;;  %5543 = vmatmul.mubr.bf16.gmra.mxu0 %v7679_v44  ;;  %v895_v26 = vshll.u32 %v8702_v59, 16 }
 0x113   : > { %2842 = vst [vmem:[#allocation3 + $0x110] sm:$0xf] %v2718_v58  ;;  %2569 = vst [vmem:[#allocation3 + $0xe8] sm:$0xf] %v2232_v12  ;;  %v2057_v21 = vld [vmem:[#allocation2 + $0x90] sm:$0xf]  ;;  %v1939_v51 = vsel %vm8210_vm13, %v6442_v43, %v1938_v28  ;;  %7454 = vmatpush3.bf16.msra.mxu0 %v7730_v23 }
 0x114   : > { %v2242_v61 = vsel %vm7969_vm5, %v2237_v41, %v2241_v22  ;;  %v1940_v54 = vrot.slane %v1938_v28, 4  ;;  %v1941_v13 = vrot.slane %v1795_v62, 5  ;;  %v2058_v34 = vld [vmem:[#allocation2 + $0x94] sm:$0xf]  ;;  %2089 = vst [vmem:[#allocation3 + $0x324] sm:$0xf] %v2057_v21  ;;  %7455 = vmatprep.subr.bf16.mxu0 %v7742_v33  ;;  %v897_v44 = vor.u32 %v895_v26, %v8716_v37 }
 0x115   : > { %2570 = vst [vmem:[#allocation3 + $0x10c] sm:$0xf] %v2242_v61  ;;  %v2111_v24 = vld [vmem:[#allocation2 + $0x3c] sm:$0xf]  ;;  %5446 = vmatmul.mubr.bf16.gmra.mxu1 %v7686_v38  ;;  %2025 = vst [vmem:[#allocation3 + $0x320] sm:$0xf] %v1939_v51 }
 0x116   : > { %2090 = vst [vmem:[#allocation3 + $0x348] sm:$0xf] %v2058_v34  ;;  %v2112_v55 = vld [vmem:[#allocation2 + $0x40] sm:$0xf]  ;;  %v2113_v57 = vld [vmem:[#allocation2 + $0x44] sm:$0x1]  ;;  %v1942_v63 = vsel %vm8210_vm13, %v1940_v54, %v1941_v13 }
 0x117   : > { %v2244_v31 = vshrl.u32 %v2111_v24, 16  ;;  %v2247_v15 = vshll.u32 %v2111_v24, 16  ;;  %v2253_v0 = vshll.u32 %v2112_v55, 16  ;;  %v2257_v49 = vshrl.u32 %v2112_v55, 16  ;;  %v2607_v52 = vld [vmem:[#allocation2 + $0x3c] sm:$0xe]  ;;  %7456 = vmatpush3.bf16.msra.mxu0 %v7742_v33 }
 0x118   : > { %v2263_v1 = vshll.u32 %v2113_v57, 16  ;;  %2026 = vst [vmem:[#allocation3 + $0x344] sm:$0xf] %v1942_v63  ;;  %v2608_v36 = vld [vmem:[#allocation2 + $0x40] sm:$0xf]  ;;  %v6451_v4 = vrot.slane %v2607_v52, 9  ;;  %7457 = vmatprep.subr.bf16.mxu0 %v7755_v56 }
 0x119   : > { %v2246_v48 = vrot.slane %v2244_v31, 4  ;;  %v2249_v16 = vrot.slane %v2247_v15, 5  ;;  %v2609_v8 = vld [vmem:[#allocation2 + $0x44] sm:$0x1]  ;;  %v2255_v9 = vrot.slane %v2253_v0, 5  ;;  %v2259_v10 = vrot.slane %v2257_v49, 4 }
 0x11a   : > { %v2265_v50 = vrot.slane %v2263_v1, 5  ;;  %v1796_v17 = vld [vmem:[#allocation2 + $0x90] sm:$0xe]  ;;  %v2721_v19 = vrot.slane %v2608_v36, 5  ;;  %v2724_v46 = vrot.slane %v2609_v8, 5  ;;  %v898_v15 = vsel %vm8004_vm9, %v890_v5, %v897_v44 }
 0x11b   : > { %v2250_v18 = vor.u32 %v2249_v16, %v2246_v48  ;;  %v1797_v60 = vld [vmem:[#allocation2 + $0x94] sm:$0xf]  ;;  %v6443_v20 = vrot.slane %v1796_v17, 9  ;;  %v2260_v22 = vor.u32 %v2259_v10, %v2255_v9  ;;  %v1798_v25 = vld [vmem:[#allocation2 + $0x98] sm:$0x1]  ;;  %7458 = vmatpush3.bf16.msra.mxu0 %v7755_v56  ;;  %v8754_v56 = vpop.f32.mrf.mxu0 }
 0x11c   : > { %v1945_v23 = vrot.slane %v1797_v60, 5  ;;  %v2059_v27 = vld [vmem:[#allocation2 + $0x9c] sm:$0xf]  ;;  %v7682_v35 = vld [vmem:[#allocation3 + $0xec] ss:$36 sps:$4 sm:$0xff]   ;;  %v2722_v58 = vsel %vm8210_vm13, %v6451_v4, %v2721_v19  ;;  %v2723_v53 = vrot.slane %v2721_v19, 4 }
 0x11d   : > { %v7687_v3 = vld [vmem:[#allocation3 + $0xe8] ss:$36 sps:$4 sm:$0xff]   ;;  %v2251_v39 = vrot.slane %v2250_v18, 4  ;;  %2091 = vst [vmem:[#allocation3 + $0x36c] sm:$0xf] %v2059_v27  ;;  %v2261_v29 = vrot.slane %v2260_v22, 4  ;;  %5550 = vmatprep.mubr.bf16.mxu0 %v7682_v35  ;;  %v8758_v17 = vpop.f32.mrf.mxu0 }
 0x11e   : > { %2843 = vst [vmem:[#allocation3 + $0x134] sm:$0xf] %v2722_v58  ;;  %v1946_v33 = vsel %vm8210_vm13, %v6443_v20, %v1945_v23  ;;  %v1947_v32 = vrot.slane %v1945_v23, 4  ;;  %v2060_v12 = vld [vmem:[#allocation2 + $0xa0] sm:$0xf]  ;;  %v1948_v41 = vrot.slane %v1798_v25, 5  ;;  %5551 = vmatmul.mubr.bf16.gmra.mxu0 %v7687_v3  ;;  %v2725_v61 = vsel %vm8210_vm13, %v2723_v53, %v2724_v46 }
 0x11f   : > { %v2256_v59 = vsel %vm7969_vm5, %v2251_v39, %v2255_v9  ;;  %2027 = vst [vmem:[#allocation3 + $0x368] sm:$0xf] %v1946_v33  ;;  %2092 = vst [vmem:[#allocation3 + $0x390] sm:$0xf] %v2060_v12  ;;  %v2114_v43 = vld [vmem:[#allocation2 + $0x48] sm:$0xf]  ;;  %v2266_v28 = vsel %vm7969_vm5, %v2261_v29, %v2265_v50  ;;  %v6995_v33 = vpop.f32.mrf.mxu0 }
 0x120   : > { %v2115_v14 = vld [vmem:[#allocation2 + $0x4c] sm:$0xf]  ;;  %v7689_v45 = vld [vmem:[#allocation3 + $0x324] ss:$36 sps:$4 sm:$0xff]   ;;  %2571 = vst [vmem:[#allocation3 + $0x130] sm:$0xf] %v2256_v59  ;;  %v1949_v21 = vsel %vm8210_vm13, %v1947_v32, %v1948_v41 }
 0x121   : > { %v7693_v38 = vld [vmem:[#allocation3 + $0x320] ss:$36 sps:$4 sm:$0xff]   ;;  %v2268_v62 = vshrl.u32 %v2114_v43, 16  ;;  %2572 = vst [vmem:[#allocation3 + $0x154] sm:$0xf] %v2266_v28  ;;  %v2271_v54 = vshll.u32 %v2114_v43, 16  ;;  %5453 = vmatprep.mubr.bf16.mxu1 %v7689_v45 }
 0x122   : > { %2844 = vst [vmem:[#allocation3 + $0x158] sm:$0xf] %v2725_v61  ;;  %v2116_v51 = vld [vmem:[#allocation2 + $0x50] sm:$0x1]  ;;  %v2277_v13 = vshll.u32 %v2115_v14, 16  ;;  %v2281_v34 = vshrl.u32 %v2115_v14, 16  ;;  %5454 = vmatmul.mubr.bf16.gmra.mxu1 %v7693_v38 }
 0x123   : > { %2028 = vst [vmem:[#allocation3 + $0x38c] sm:$0xf] %v1949_v21  ;;  %v2270_v24 = vrot.slane %v2268_v62, 4  ;;  %v2287_v55 = vshll.u32 %v2116_v51, 16  ;;  %v2610_v57 = vld [vmem:[#allocation2 + $0x48] sm:$0xe] }
 0x124   : > { %v2611_v31 = vld [vmem:[#allocation2 + $0x4c] sm:$0xf]  ;;  %v2273_v63 = vrot.slane %v2271_v54, 5  ;;  %v2279_v0 = vrot.slane %v2277_v13, 5  ;;  %v2283_v49 = vrot.slane %v2281_v34, 4  ;;  %v6452_v52 = vrot.slane %v2610_v57, 9  ;;  %v6996_v57 = vpop.f32.mrf.mxu0 }
 0x125   : > { %v2612_v1 = vld [vmem:[#allocation2 + $0x50] sm:$0x1]  ;;  %1062 = vst [vmem:[#allocation2 + $0xc4] sm:$0xf] %v898_v15  ;;  %v2289_v48 = vrot.slane %v2287_v55, 5  ;;  %v2728_v16 = vrot.slane %v2611_v31, 5 }
 0x126   : > { %v2731_v36 = vrot.slane %v2612_v1, 5  ;;  %v2274_v8 = vor.u32 %v2273_v63, %v2270_v24  ;;  %v2284_v9 = vor.u32 %v2283_v49, %v2279_v0  ;;  %v1799_v4 = vld [vmem:[#allocation2 + $0x9c] sm:$0xe]  ;;  %v7768_v18 = vld [vmem:[%s9479_s3 + $0x200] sm:$0xff]   ;;  %v2061_v3 = vld [vmem:[#allocation2 + $0xa8] sm:$0xf]  ;;  %v7061_v1 = vpop.f32.mrf.mxu1 }
 0x127   : > { %v2729_v10 = vsel %vm8210_vm13, %v6452_v52, %v2728_v16  ;;  %v2730_v50 = vrot.slane %v2728_v16, 4  ;;  %v7695_v20 = vld [vmem:[#allocation3 + $0x36c] ss:$36 sps:$4 sm:$0xff]   ;;  %v6444_v27 = vrot.slane %v1799_v4, 9  ;;  %7459 = vmatprep.subr.bf16.mxu0 %v7768_v18  ;;  %v1800_v26 = vld [vmem:[#allocation2 + $0xa0] sm:$0xf]  ;;  %v8773_v52 = vadd.f32 %v6996_v57, %v6995_v33 }
 0x128   : > { %v2275_v6 = vrot.slane %v2274_v8, 4  ;;  %v2285_v5 = vrot.slane %v2284_v9, 4  ;;  %2845 = vst [vmem:[#allocation3 + $0x17c] sm:$0xf] %v2729_v10  ;;  %v7694_v46 = vld [vmem:[#allocation3 + $0x130] ss:$36 sps:$4 sm:$0xff]   ;;  %7460 = vmatpush3.bf16.msra.mxu0 %v7768_v18  ;;  %5461 = vmatprep.mubr.bf16.mxu1 %v7695_v20  ;;  %v7062_v4 = vpop.f32.mrf.mxu1 }
 0x129   : > { %v7691_v19 = vld [vmem:[#allocation3 + $0x134] ss:$36 sps:$4 sm:$0xff]   ;;  %v2732_v60 = vsel %vm8210_vm13, %v2730_v50, %v2731_v36  ;;  %v1801_v35 = vld [vmem:[#allocation2 + $0xa4] sm:$0x1]  ;;  %v1952_v39 = vrot.slane %v1800_v26, 5 }
 0x12a   : > { %v2280_v22 = vsel %vm7969_vm5, %v2275_v6, %v2279_v0  ;;  %v2290_v25 = vsel %vm7969_vm5, %v2285_v5, %v2289_v48  ;;  %2846 = vst [vmem:[#allocation3 + $0x1a0] sm:$0xf] %v2732_v60  ;;  %v7701_v23 = vld [vmem:[#allocation3 + $0x368] ss:$36 sps:$4 sm:$0xff]   ;;  %5558 = vmatprep.mubr.bf16.mxu0 %v7691_v19  ;;  %v1955_v58 = vrot.slane %v1801_v35, 5 }
 0x12b   : > { %2573 = vst [vmem:[#allocation3 + $0x178] sm:$0xf] %v2280_v22  ;;  %2574 = vst [vmem:[#allocation3 + $0x19c] sm:$0xf] %v2290_v25  ;;  %5559 = vmatmul.mubr.bf16.gmra.mxu0 %v7694_v46  ;;  %v2062_v29 = vld [vmem:[#allocation2 + $0xac] sm:$0xf]  ;;  %5462 = vmatmul.mubr.bf16.gmra.mxu1 %v7701_v23  ;;  %v1953_v43 = vsel %vm8210_vm13, %v6444_v27, %v1952_v39  ;;  %v8779_v22 = vadd.f32 %v7062_v4, %v7061_v1 }
 0x12c   : > { %2093 = vst [vmem:[#allocation3 + $0x3b4] sm:$0xf] %v2061_v3  ;;  %v2117_v53 = vld [vmem:[#allocation2 + $0x54] sm:$0xf]  ;;  %2094 = vst [vmem:[#allocation3 + $0x3d8] sm:$0xf] %v2062_v29 }
 0x12d   : > { %v2118_v32 = vld [vmem:[#allocation2 + $0x58] sm:$0xf]  ;;  %v2119_v12 = vld [vmem:[#allocation2 + $0x5c] sm:$0x1]  ;;  %v2292_v59 = vshrl.u32 %v2117_v53, 16  ;;  %v2295_v41 = vshll.u32 %v2117_v53, 16 }
 0x12e   : > { %v1954_v14 = vrot.slane %v1952_v39, 4  ;;  %v2301_v44 = vshll.u32 %v2118_v32, 16  ;;  %v2305_v45 = vshrl.u32 %v2118_v32, 16  ;;  %v2613_v28 = vld [vmem:[#allocation2 + $0x54] sm:$0xe]  ;;  %v2311_v62 = vshll.u32 %v2119_v12, 16 }
 0x12f   : > { %2029 = vst [vmem:[#allocation3 + $0x3b0] sm:$0xf] %v1953_v43  ;;  %v2294_v61 = vrot.slane %v2292_v59, 4  ;;  %v2297_v38 = vrot.slane %v2295_v41, 5  ;;  %v2614_v21 = vld [vmem:[#allocation2 + $0x58] sm:$0xf] }
 0x130   : > { %v6453_v51 = vrot.slane %v2613_v28, 9  ;;  %v1956_v54 = vsel %vm8210_vm13, %v1954_v14, %v1955_v58  ;;  %v2303_v13 = vrot.slane %v2301_v44, 5  ;;  %v2307_v34 = vrot.slane %v2305_v45, 4  ;;  %v2615_v24 = vld [vmem:[#allocation2 + $0x5c] sm:$0x1] }
 0x131   : > { %v2735_v55 = vrot.slane %v2614_v21, 5  ;;  %2030 = vst [vmem:[#allocation3 + $0x3d4] sm:$0xf] %v1956_v54  ;;  %v2298_v31 = vor.u32 %v2297_v38, %v2294_v61  ;;  %v2313_v15 = vrot.slane %v2311_v62, 5  ;;  %v2738_v63 = vrot.slane %v2615_v24, 5 }
 0x132   : > { %v1802_v0 = vld [vmem:[#allocation2 + $0xa8] sm:$0xe]  ;;  %v1803_v49 = vld [vmem:[#allocation2 + $0xac] sm:$0xf]  ;;  %v7697_v48 = vld [vmem:[#allocation3 + $0x17c] ss:$36 sps:$4 sm:$0xff]   ;;  %v2308_v16 = vor.u32 %v2307_v34, %v2303_v13  ;;  %v8791_v34 = vpop.f32.mrf.mxu0 }
 0x133   : > { %v2736_v36 = vsel %vm8210_vm13, %v6453_v51, %v2735_v55  ;;  %v2737_v8 = vrot.slane %v2735_v55, 4  ;;  %v6445_v9 = vrot.slane %v1802_v0, 9  ;;  %v7702_v10 = vld [vmem:[#allocation3 + $0x178] ss:$36 sps:$4 sm:$0xff]   ;;  %v2299_v50 = vrot.slane %v2298_v31, 4  ;;  %5566 = vmatprep.mubr.bf16.mxu0 %v7697_v48 }
 0x134   : > { %2847 = vst [vmem:[#allocation3 + $0x1c4] sm:$0xf] %v2736_v36  ;;  %v1804_v6 = vld [vmem:[#allocation2 + $0xb0] sm:$0x1]  ;;  %v1959_v5 = vrot.slane %v1803_v49, 5  ;;  %v2309_v18 = vrot.slane %v2308_v16, 4  ;;  %5567 = vmatmul.mubr.bf16.gmra.mxu0 %v7702_v10  ;;  %v8799_v16 = vpop.f32.mrf.mxu0 }
 0x135   : > { %v2739_v19 = vsel %vm8210_vm13, %v2737_v8, %v2738_v63  ;;  %v1962_v46 = vrot.slane %v1804_v6, 5  ;;  %v2063_v60 = vld [vmem:[#allocation2 + $0xb4] sm:$0xf]  ;;  %v2064_v20 = vld [vmem:[#allocation2 + $0xb8] sm:$0xf]  ;;  %v2304_v25 = vsel %vm7969_vm5, %v2299_v50, %v2303_v13  ;;  %v887_v3 = vshll.u32 %v8659_v42, 16 }
 0x136   : > { %2848 = vst [vmem:[#allocation3 + $0x1e8] sm:$0xf] %v2739_v19  ;;  %v1960_v23 = vsel %vm8210_vm13, %v6445_v9, %v1959_v5  ;;  %v1961_v27 = vrot.slane %v1959_v5, 4  ;;  %2095 = vst [vmem:[#allocation3 + $0x3fc] sm:$0xf] %v2063_v60  ;;  %v2314_v39 = vsel %vm7969_vm5, %v2309_v18, %v2313_v15 }
 0x137   : > { %2096 = vst [vmem:[#allocation3 + $0x420] sm:$0xf] %v2064_v20  ;;  %v2120_v26 = vld [vmem:[#allocation2 + $0x60] sm:$0xf]  ;;  %v2121_v35 = vld [vmem:[#allocation2 + $0x64] sm:$0xf]  ;;  %v889_v62 = vor.u32 %v887_v3, %v8677_v30 }
 0x138   : > { %2575 = vst [vmem:[#allocation3 + $0x1c0] sm:$0xf] %v2304_v25  ;;  %2031 = vst [vmem:[#allocation3 + $0x3f8] sm:$0xf] %v1960_v23  ;;  %v2122_v58 = vld [vmem:[#allocation2 + $0x68] sm:$0x1]  ;;  %v1963_v32 = vsel %vm8210_vm13, %v1961_v27, %v1962_v46  ;;  %v8805_v46 = vpop.f32.mrf.mxu1  ;;  %v7001_v23 = vpop.f32.mrf.mxu0 }
 0x139   : > { %v2316_v29 = vshrl.u32 %v2120_v26, 16  ;;  %v2319_v53 = vshll.u32 %v2120_v26, 16  ;;  %v2325_v33 = vshll.u32 %v2121_v35, 16  ;;  %2576 = vst [vmem:[#allocation3 + $0x1e4] sm:$0xf] %v2314_v39  ;;  %v2329_v12 = vshrl.u32 %v2121_v35, 16 }
 0x13a   : > { %v2335_v59 = vshll.u32 %v2122_v58, 16  ;;  %v2616_v41 = vld [vmem:[#allocation2 + $0x60] sm:$0xe]  ;;  %v2617_v43 = vld [vmem:[#allocation2 + $0x64] sm:$0xf] }
 0x13b   : > { %v7704_v14 = vld [vmem:[#allocation3 + $0x3b4] ss:$36 sps:$4 sm:$0xff]   ;;  %2032 = vst [vmem:[#allocation3 + $0x41c] sm:$0xf] %v1963_v32  ;;  %v2318_v42 = vrot.slane %v2316_v29, 4  ;;  %v2321_v45 = vrot.slane %v2319_v53, 5 }
 0x13c   : > { %v7708_v44 = vld [vmem:[#allocation3 + $0x3b0] ss:$36 sps:$4 sm:$0xff]   ;;  %v2327_v28 = vrot.slane %v2325_v33, 5  ;;  %v2331_v61 = vrot.slane %v2329_v12, 4  ;;  %5469 = vmatprep.mubr.bf16.mxu1 %v7704_v14  ;;  %v2337_v21 = vrot.slane %v2335_v59, 5  ;;  %v6454_v51 = vrot.slane %v2616_v41, 9  ;;  %v7002_v12 = vpop.f32.mrf.mxu0 }
 0x13d   : > { %v2618_v38 = vld [vmem:[#allocation2 + $0x68] sm:$0x1]  ;;  %v2742_v54 = vrot.slane %v2617_v43, 5  ;;  %5470 = vmatmul.mubr.bf16.gmra.mxu1 %v7708_v44  ;;  %v2322_v24 = vor.u32 %v2321_v45, %v2318_v42  ;;  %v1059_v0 = vld [vmem:[#allocation2 + $0xc0] sm:$0xf]  ;;  %v8811_v42 = vpop.f32.mrf.mxu1 }
 0x13e   : > { %v2745_v13 = vrot.slane %v2618_v38, 5  ;;  %v2332_v55 = vor.u32 %v2331_v61, %v2327_v28  ;;  %v7706_v49 = vld [vmem:[#allocation3 + $0x1c4] ss:$36 sps:$4 sm:$0xff]   ;;  %v1060_v48 = vsel %vm8010_vm10, %v889_v62, %v1059_v0  ;;  %v7710_v36 = vld [vmem:[#allocation3 + $0x3fc] ss:$36 sps:$4 sm:$0xff]  }
 0x13f   : > { %v2743_v57 = vsel %vm8210_vm13, %v6454_v51, %v2742_v54  ;;  %v2744_v31 = vrot.slane %v2742_v54, 4  ;;  %v2323_v15 = vrot.slane %v2322_v24, 4  ;;  %1061 = vst [vmem:[#allocation2 + $0xc0] sm:$0xf] %v1060_v48  ;;  %5574 = vmatprep.mubr.bf16.mxu0 %v7706_v49  ;;  %v1805_v50 = vld [vmem:[#allocation2 + $0xb4] sm:$0xe]  ;;  %5477 = vmatprep.mubr.bf16.mxu1 %v7710_v36  ;;  %v8815_v24 = vadd.f32 %v7002_v12, %v7001_v23  ;;  %v7067_v36 = vpop.f32.mrf.mxu1 }
 0x140   : > { %v2333_v63 = vrot.slane %v2332_v55, 4  ;;  %2849 = vst [vmem:[#allocation3 + $0x20c] sm:$0xf] %v2743_v57  ;;  %v7709_v30 = vld [vmem:[#allocation3 + $0x1c0] ss:$36 sps:$4 sm:$0xff]   ;;  %v6446_v11 = vrot.slane %v1805_v50, 9  ;;  %v8817_v55 = vpop.f32.mrf.mxu0 }
 0x141   : > { %v2746_v1 = vsel %vm8210_vm13, %v2744_v31, %v2745_v13  ;;  %v2328_v8 = vsel %vm7969_vm5, %v2323_v15, %v2327_v28  ;;  %v1806_v6 = vld [vmem:[#allocation2 + $0xb8] sm:$0xf]  ;;  %v1807_v5 = vld [vmem:[#allocation2 + $0xbc] sm:$0x1]  ;;  %5575 = vmatmul.mubr.bf16.gmra.mxu0 %v7709_v30  ;;  %v2066_v19 = vld [vmem:[#allocation2 + $0xc4] sm:$0xf] }
 0x142   : > { %v2338_v9 = vsel %vm7969_vm5, %v2333_v63, %v2337_v21  ;;  %2850 = vst [vmem:[#allocation3 + $0x230] sm:$0xf] %v2746_v1  ;;  %v7716_v10 = vld [vmem:[#allocation3 + $0x3f8] ss:$36 sps:$4 sm:$0xff]   ;;  %2577 = vst [vmem:[#allocation3 + $0x208] sm:$0xf] %v2328_v8 }
 0x143   : > { %2578 = vst [vmem:[#allocation3 + $0x22c] sm:$0xf] %v2338_v9  ;;  %v1966_v4 = vrot.slane %v1806_v6, 5  ;;  %v1969_v18 = vrot.slane %v1807_v5, 5  ;;  %2098 = vst [vmem:[#allocation3 + $0x468] sm:$0xf] %v2066_v19 }
 0x144   : > { %v2123_v60 = vld [vmem:[#allocation2 + $0x6c] sm:$0xf]  ;;  %v2124_v20 = vld [vmem:[#allocation2 + $0x70] sm:$0xf]  ;;  %v2125_v25 = vld [vmem:[#allocation2 + $0x74] sm:$0x1] }
 0x145   : > { %5478 = vmatmul.mubr.bf16.gmra.mxu1 %v7716_v10  ;;  %v1967_v27 = vsel %vm8210_vm13, %v6446_v11, %v1966_v4  ;;  %v1968_v26 = vrot.slane %v1966_v4, 4  ;;  %v2340_v35 = vshrl.u32 %v2123_v60, 16  ;;  %v2343_v3 = vshll.u32 %v2123_v60, 16  ;;  %v2619_v39 = vld [vmem:[#allocation2 + $0x6c] sm:$0xe]  ;;  %v7068_v60 = vpop.f32.mrf.mxu1 }
 0x146   : > { %2033 = vst [vmem:[#allocation3 + $0x440] sm:$0xf] %v1967_v27  ;;  %v2349_v58 = vshll.u32 %v2124_v20, 16  ;;  %v2353_v29 = vshrl.u32 %v2124_v20, 16  ;;  %v2359_v53 = vshll.u32 %v2125_v25, 16  ;;  %v6455_v32 = vrot.slane %v2619_v39, 9  ;;  %v8823_v20 = vpop.f32.mrf.mxu0 }
 0x147   : > { %v2620_v33 = vld [vmem:[#allocation2 + $0x70] sm:$0xf]  ;;  %v1970_v59 = vsel %vm8210_vm13, %v1968_v26, %v1969_v18  ;;  %v2342_v41 = vrot.slane %v2340_v35, 4  ;;  %v2345_v43 = vrot.slane %v2343_v3, 5  ;;  %v2621_v14 = vld [vmem:[#allocation2 + $0x74] sm:$0x1] }
 0x148   : > { %v2749_v44 = vrot.slane %v2620_v33, 5  ;;  %2034 = vst [vmem:[#allocation3 + $0x464] sm:$0xf] %v1970_v59  ;;  %v2065_v45 = vld [vmem:[#allocation2 + $0xc0] sm:$0xf]  ;;  %v2351_v28 = vrot.slane %v2349_v58, 5  ;;  %v8827_v59 = vadd.f32 %v7068_v60, %v7067_v36 }
 0x149   : > { %v2355_v61 = vrot.slane %v2353_v29, 4  ;;  %v2361_v38 = vrot.slane %v2359_v53, 5  ;;  %v2752_v62 = vrot.slane %v2621_v14, 5  ;;  %v7712_v21 = vld [vmem:[#allocation3 + $0x20c] ss:$36 sps:$4 sm:$0xff]   ;;  %v2346_v51 = vor.u32 %v2345_v43, %v2342_v41 }
 0x14a   : > { %2097 = vst [vmem:[#allocation3 + $0x444] sm:$0xf] %v2065_v45  ;;  %v2750_v54 = vsel %vm8210_vm13, %v6455_v32, %v2749_v44  ;;  %v2751_v13 = vrot.slane %v2749_v44, 4  ;;  %v7717_v57 = vld [vmem:[#allocation3 + $0x208] ss:$36 sps:$4 sm:$0xff]   ;;  %5582 = vmatprep.mubr.bf16.mxu0 %v7712_v21 }
 0x14b   : > { %v2356_v31 = vor.u32 %v2355_v61, %v2351_v28  ;;  %2851 = vst [vmem:[#allocation3 + $0x254] sm:$0xf] %v2750_v54  ;;  %v2126_v15 = vld [vmem:[#allocation2 + $0x78] sm:$0xf]  ;;  %v2127_v63 = vld [vmem:[#allocation2 + $0x7c] sm:$0xf]  ;;  %5583 = vmatmul.mubr.bf16.gmra.mxu0 %v7717_v57 }
 0x14c   : > { %v2347_v0 = vrot.slane %v2346_v51, 4  ;;  %v2753_v49 = vsel %vm8210_vm13, %v2751_v13, %v2752_v62  ;;  %v2128_v30 = vld [vmem:[#allocation2 + $0x80] sm:$0x1]  ;;  %v2364_v1 = vshrl.u32 %v2126_v15, 16  ;;  %v2367_v48 = vshll.u32 %v2126_v15, 16 }
 0x14d   : > { %v2357_v8 = vrot.slane %v2356_v31, 4  ;;  %2852 = vst [vmem:[#allocation3 + $0x278] sm:$0xf] %v2753_v49  ;;  %v2373_v9 = vshll.u32 %v2127_v63, 16  ;;  %v2377_v10 = vshrl.u32 %v2127_v63, 16  ;;  %v2383_v50 = vshll.u32 %v2128_v30, 16 }
 0x14e   : > { %v2622_v6 = vld [vmem:[#allocation2 + $0x78] sm:$0xe]  ;;  %v2352_v5 = vsel %vm7969_vm5, %v2347_v0, %v2351_v28  ;;  %v2366_v11 = vrot.slane %v2364_v1, 4  ;;  %v2369_v4 = vrot.slane %v2367_v48, 5  ;;  %v2623_v18 = vld [vmem:[#allocation2 + $0x7c] sm:$0xf]  ;;  %v7007_v28 = vpop.f32.mrf.mxu0 }
 0x14f   : > { %v2624_v19 = vld [vmem:[#allocation2 + $0x80] sm:$0x1]  ;;  %v2362_v25 = vsel %vm7969_vm5, %v2357_v8, %v2361_v38  ;;  %2579 = vst [vmem:[#allocation3 + $0x250] sm:$0xf] %v2352_v5  ;;  %v2375_v23 = vrot.slane %v2373_v9, 5  ;;  %v2379_v27 = vrot.slane %v2377_v10, 4 }
 0x150   : > { %v2868_v26 = vld [vmem:[#allocation2 + $0x18] sm:$0xf]  ;;  %2580 = vst [vmem:[#allocation3 + $0x274] sm:$0xf] %v2362_v25  ;;  %v2370_v35 = vor.u32 %v2369_v4, %v2366_v11  ;;  %v6456_v3 = vrot.slane %v2622_v6, 9  ;;  %v2756_v39 = vrot.slane %v2623_v18, 5  ;;  %v7008_v9 = vpop.f32.mrf.mxu0 }
 0x151   : > { %v2759_v58 = vrot.slane %v2624_v19, 5  ;;  %v2869_v29 = vld [vmem:[#allocation2 + $0x1c] sm:$0xf]  ;;  %2900 = vst [vmem:[#allocation3 + $0x18] sm:$0xf] %v2868_v26  ;;  %v2380_v32 = vor.u32 %v2379_v27, %v2375_v23  ;;  %v2385_v12 = vrot.slane %v2383_v50, 5  ;;  %v8837_v11 = vadd.f32 %v7008_v9, %v7007_v28 }
 0x152   : > { %v7719_v53 = vld [vmem:[#allocation3 + $0x444] ss:$36 sps:$4 sm:$0xff]   ;;  %2901 = vst [vmem:[#allocation3 + $0x3c] sm:$0xf] %v2869_v29  ;;  %v2371_v41 = vrot.slane %v2370_v35, 4  ;;  %v2757_v43 = vsel %vm8210_vm13, %v6456_v3, %v2756_v39  ;;  %v2758_v14 = vrot.slane %v2756_v39, 4  ;;  %v8840_v39 = vpop.f32.mrf.mxu1 }
 0x153   : > { %v7723_v33 = vld [vmem:[#allocation3 + $0x440] ss:$36 sps:$4 sm:$0xff]   ;;  %5485 = vmatprep.mubr.bf16.mxu1 %v7719_v53  ;;  %v2381_v61 = vrot.slane %v2380_v32, 4  ;;  %2853 = vst [vmem:[#allocation3 + $0x29c] sm:$0xf] %v2757_v43 }
 0x154   : > { %v2932_v44 = vld [vmem:[#allocation2 + $0x18] sm:$0xf]  ;;  %v2933_v45 = vld [vmem:[#allocation2 + $0x1c] sm:$0xf]  ;;  %v2934_v38 = vld [vmem:[#allocation2 + $0x20] sm:$0x1]  ;;  %5486 = vmatmul.mubr.bf16.gmra.mxu1 %v7723_v33  ;;  %v2376_v54 = vsel %vm7969_vm5, %v2371_v41, %v2375_v23  ;;  %v2760_v13 = vsel %vm8210_vm13, %v2758_v14, %v2759_v58 }
 0x155   : > { %v2981_v62 = vshrl.u32 %v2932_v44, 16  ;;  %v2984_v21 = vshll.u32 %v2932_v44, 16  ;;  %v2990_v51 = vshll.u32 %v2933_v45, 16  ;;  %v2994_v57 = vshrl.u32 %v2933_v45, 16  ;;  %2581 = vst [vmem:[#allocation3 + $0x298] sm:$0xf] %v2376_v54 }
 0x156   : > { %v3000_v31 = vshll.u32 %v2934_v38, 16  ;;  %v2386_v15 = vsel %vm7969_vm5, %v2381_v61, %v2385_v12  ;;  %2854 = vst [vmem:[#allocation3 + $0x2c0] sm:$0xf] %v2760_v13  ;;  %v2129_v30 = vld [vmem:[#allocation2 + $0x84] sm:$0xf] }
 0x157   : > { %v2983_v63 = vrot.slane %v2981_v62, 4  ;;  %v2986_v0 = vrot.slane %v2984_v21, 5  ;;  %v2992_v49 = vrot.slane %v2990_v51, 5  ;;  %2582 = vst [vmem:[#allocation3 + $0x2bc] sm:$0xf] %v2386_v15  ;;  %v2996_v1 = vrot.slane %v2994_v57, 4 }
 0x158   : > { %v3002_v48 = vrot.slane %v3000_v31, 5  ;;  %v2130_v36 = vld [vmem:[#allocation2 + $0x88] sm:$0xf]  ;;  %v2388_v8 = vshrl.u32 %v2129_v30, 16  ;;  %v7721_v10 = vld [vmem:[#allocation3 + $0x254] ss:$36 sps:$4 sm:$0xff]   ;;  %v8848_v31 = vpop.f32.mrf.mxu1 }
 0x159   : > { %v7724_v50 = vld [vmem:[#allocation3 + $0x250] ss:$36 sps:$4 sm:$0xff]   ;;  %v2987_v6 = vor.u32 %v2986_v0, %v2983_v63  ;;  %v2391_v5 = vshll.u32 %v2129_v30, 16  ;;  %v2997_v4 = vor.u32 %v2996_v1, %v2992_v49  ;;  %v2397_v60 = vshll.u32 %v2130_v36, 16  ;;  %5590 = vmatprep.mubr.bf16.mxu0 %v7721_v10  ;;  %v2625_v3 = vld [vmem:[#allocation2 + $0x84] sm:$0xe] }
 0x15a   : > { %v2131_v18 = vld [vmem:[#allocation2 + $0x8c] sm:$0x1]  ;;  %v2390_v19 = vrot.slane %v2388_v8, 4  ;;  %v2401_v25 = vshrl.u32 %v2130_v36, 16  ;;  %5591 = vmatmul.mubr.bf16.gmra.mxu0 %v7724_v50  ;;  %v2626_v33 = vld [vmem:[#allocation2 + $0x88] sm:$0xf] }
 0x15b   : > { %v2988_v27 = vrot.slane %v2987_v6, 4  ;;  %v2393_v26 = vrot.slane %v2391_v5, 5  ;;  %v2407_v35 = vshll.u32 %v2131_v18, 16  ;;  %v2998_v58 = vrot.slane %v2997_v4, 4  ;;  %v2627_v14 = vld [vmem:[#allocation2 + $0x8c] sm:$0x1] }
 0x15c   : > { %v2399_v29 = vrot.slane %v2397_v60, 5  ;;  %v2403_v53 = vrot.slane %v2401_v25, 4  ;;  %v6457_v32 = vrot.slane %v2625_v3, 9  ;;  %v2763_v44 = vrot.slane %v2626_v33, 5  ;;  %v2870_v45 = vld [vmem:[#allocation2 + $0x24] sm:$0xf] }
 0x15d   : > { %v2993_v12 = vsel %vm7969_vm5, %v2988_v27, %v2992_v49  ;;  %v2394_v41 = vor.u32 %v2393_v26, %v2390_v19  ;;  %v2409_v43 = vrot.slane %v2407_v35, 5  ;;  %v3003_v28 = vsel %vm7969_vm5, %v2998_v58, %v3002_v48  ;;  %v2871_v62 = vld [vmem:[#allocation2 + $0x28] sm:$0xf]  ;;  %2902 = vst [vmem:[#allocation3 + $0x60] sm:$0xf] %v2870_v45  ;;  %v7073_v26 = vpop.f32.mrf.mxu1 }
 0x15e   : > { %3396 = vst [vmem:[#allocation3 + $0x1c] sm:$0xf] %v2993_v12  ;;  %v2404_v61 = vor.u32 %v2403_v53, %v2399_v29  ;;  %v2766_v38 = vrot.slane %v2627_v14, 5  ;;  %v2935_v21 = vld [vmem:[#allocation2 + $0x24] sm:$0xf]  ;;  %v2764_v57 = vsel %vm8210_vm13, %v6457_v32, %v2763_v44  ;;  %v2765_v63 = vrot.slane %v2763_v44, 4 }
 0x15f   : > { %v7725_v51 = vld [vmem:[#allocation3 + $0x29c] ss:$36 sps:$4 sm:$0xff]   ;;  %3397 = vst [vmem:[#allocation3 + $0x40] sm:$0xf] %v3003_v28  ;;  %v2395_v13 = vrot.slane %v2394_v41, 4  ;;  %v3005_v1 = vshrl.u32 %v2935_v21, 16  ;;  %v7074_v14 = vpop.f32.mrf.mxu1 }
 0x160   : > { %v7731_v54 = vld [vmem:[#allocation3 + $0x298] ss:$36 sps:$4 sm:$0xff]   ;;  %2903 = vst [vmem:[#allocation3 + $0x84] sm:$0xf] %v2871_v62  ;;  %v2405_v15 = vrot.slane %v2404_v61, 4  ;;  %5598 = vmatprep.mubr.bf16.mxu0 %v7725_v51  ;;  %v3008_v48 = vshll.u32 %v2935_v21, 16  ;;  %v2767_v10 = vsel %vm8210_vm13, %v2765_v63, %v2766_v38  ;;  %v8856_v38 = vadd.f32 %v7074_v14, %v7073_v26 }
 0x161   : > { %2855 = vst [vmem:[#allocation3 + $0x2e4] sm:$0xf] %v2764_v57  ;;  %v2936_v0 = vld [vmem:[#allocation2 + $0x28] sm:$0xf]  ;;  %v2937_v49 = vld [vmem:[#allocation2 + $0x2c] sm:$0x1]  ;;  %v2400_v30 = vsel %vm7969_vm5, %v2395_v13, %v2399_v29  ;;  %v8858_v57 = vpop.f32.mrf.mxu0 }
 0x162   : > { %v3014_v36 = vshll.u32 %v2936_v0, 16  ;;  %v2132_v8 = vld [vmem:[#allocation2 + $0x90] sm:$0xf]  ;;  %v2410_v9 = vsel %vm7969_vm5, %v2405_v15, %v2409_v43  ;;  %2583 = vst [vmem:[#allocation3 + $0x2e0] sm:$0xf] %v2400_v30  ;;  %v3018_v50 = vshrl.u32 %v2936_v0, 16  ;;  %5599 = vmatmul.mubr.bf16.gmra.mxu0 %v7731_v54 }
 0x163   : > { %v3024_v6 = vshll.u32 %v2937_v49, 16  ;;  %v2133_v5 = vld [vmem:[#allocation2 + $0x94] sm:$0xf]  ;;  %v2134_v4 = vld [vmem:[#allocation2 + $0x98] sm:$0x1]  ;;  %v3007_v18 = vrot.slane %v3005_v1, 4  ;;  %v8866_v26 = vpop.f32.mrf.mxu0 }
 0x164   : > { %2584 = vst [vmem:[#allocation3 + $0x304] sm:$0xf] %v2410_v9  ;;  %2856 = vst [vmem:[#allocation3 + $0x308] sm:$0xf] %v2767_v10  ;;  %v3010_v19 = vrot.slane %v3008_v48, 5  ;;  %v3016_v60 = vrot.slane %v3014_v36, 5 }
 0x165   : > { %v2412_v25 = vshrl.u32 %v2132_v8, 16  ;;  %v2628_v27 = vld [vmem:[#allocation2 + $0x90] sm:$0xe]  ;;  %v3020_v35 = vrot.slane %v3018_v50, 4  ;;  %v3026_v3 = vrot.slane %v3024_v6, 5  ;;  %v2415_v58 = vshll.u32 %v2132_v8, 16 }
 0x166   : > { %v2421_v29 = vshll.u32 %v2133_v5, 16  ;;  %v2629_v53 = vld [vmem:[#allocation2 + $0x94] sm:$0xf]  ;;  %v3011_v33 = vor.u32 %v3010_v19, %v3007_v18  ;;  %v2425_v12 = vshrl.u32 %v2133_v5, 16  ;;  %v2431_v41 = vshll.u32 %v2134_v4, 16 }
 0x167   : > { %v2414_v32 = vrot.slane %v2412_v25, 4  ;;  %v2630_v43 = vld [vmem:[#allocation2 + $0x98] sm:$0x1]  ;;  %v7727_v44 = vld [vmem:[#allocation3 + $0x18] ss:$36 sps:$4 sm:$0xff]   ;;  %v3021_v28 = vor.u32 %v3020_v35, %v3016_v60  ;;  %v2417_v61 = vrot.slane %v2415_v58, 5 }
 0x168   : > { %v7729_v45 = vld [vmem:[#allocation3 + $0x1c] ss:$36 sps:$4 sm:$0xff]   ;;  %v3012_v62 = vrot.slane %v3011_v33, 4  ;;  %v2423_v21 = vrot.slane %v2421_v29, 5  ;;  %v2427_v51 = vrot.slane %v2425_v12, 4  ;;  %v2433_v54 = vrot.slane %v2431_v41, 5 }
 0x169   : > { %v2872_v13 = vld [vmem:[#allocation2 + $0x30] sm:$0xf]  ;;  %5687 = vmatprep.mubr.bf16.mxu1 %v7729_v45  ;;  %v3022_v15 = vrot.slane %v3021_v28, 4  ;;  %v2418_v63 = vor.u32 %v2417_v61, %v2414_v32  ;;  %v6458_v0 = vrot.slane %v2628_v27, 9  ;;  %v2770_v49 = vrot.slane %v2629_v53, 5 }
 0x16a   : > { %v2873_v30 = vld [vmem:[#allocation2 + $0x34] sm:$0xf]  ;;  %2904 = vst [vmem:[#allocation3 + $0xa8] sm:$0xf] %v2872_v13  ;;  %5688 = vmatmul.mubr.bf16.vlgmr.msra.gmra.mxu1 %v7727_v44  ;;  %v3017_v1 = vsel %vm7969_vm5, %v3012_v62, %v3016_v60  ;;  %v2428_v48 = vor.u32 %v2427_v51, %v2423_v21  ;;  %v2773_v36 = vrot.slane %v2630_v43, 5  ;;  %v8874_v43 = vpop.f32.mrf.mxu1 }
 0x16b   : > { %2905 = vst [vmem:[#allocation3 + $0xcc] sm:$0xf] %v2873_v30  ;;  %v2938_v8 = vld [vmem:[#allocation2 + $0x30] sm:$0xf]  ;;  %v2939_v9 = vld [vmem:[#allocation2 + $0x34] sm:$0xf]  ;;  %v3027_v50 = vsel %vm7969_vm5, %v3022_v15, %v3026_v3  ;;  %v2771_v4 = vsel %vm8210_vm13, %v6458_v0, %v2770_v49  ;;  %v7013_v15 = vpop.f32.mrf.mxu0 }
 0x16c   : > { %v7732_v10 = vld [vmem:[#allocation3 + $0x2e4] ss:$36 sps:$4 sm:$0xff]   ;;  %3398 = vst [vmem:[#allocation3 + $0x64] sm:$0xf] %v3017_v1  ;;  %v2419_v5 = vrot.slane %v2418_v63, 4  ;;  %v2429_v18 = vrot.slane %v2428_v48, 4 }
 0x16d   : > { %v7736_v6 = vld [vmem:[#allocation3 + $0x2e0] ss:$36 sps:$4 sm:$0xff]   ;;  %3399 = vst [vmem:[#allocation3 + $0x88] sm:$0xf] %v3027_v50  ;;  %v2772_v19 = vrot.slane %v2770_v49, 4  ;;  %v3029_v25 = vshrl.u32 %v2938_v8, 16  ;;  %5606 = vmatprep.mubr.bf16.mxu0 %v7732_v10  ;;  %v8876_v10 = vpop.f32.mrf.mxu1  ;;  %v7014_v50 = vpop.f32.mrf.mxu0 }
 0x16e   : > { %2857 = vst [vmem:[#allocation3 + $0x32c] sm:$0xf] %v2771_v4  ;;  %v2940_v60 = vld [vmem:[#allocation2 + $0x38] sm:$0x1]  ;;  %v3032_v27 = vshll.u32 %v2938_v8, 16  ;;  %v2424_v35 = vsel %vm7969_vm5, %v2419_v5, %v2423_v21  ;;  %v3038_v3 = vshll.u32 %v2939_v9, 16  ;;  %5607 = vmatmul.mubr.bf16.gmra.mxu0 %v7736_v6  ;;  %v2434_v53 = vsel %vm7969_vm5, %v2429_v18, %v2433_v54 }
 0x16f   : > { %v3042_v58 = vshrl.u32 %v2939_v9, 16  ;;  %v3048_v29 = vshll.u32 %v2940_v60, 16  ;;  %2585 = vst [vmem:[#allocation3 + $0x328] sm:$0xf] %v2424_v35  ;;  %v2774_v33 = vsel %vm8210_vm13, %v2772_v19, %v2773_v36  ;;  %v3031_v32 = vrot.slane %v3029_v25, 4 }
 0x170   : > { %v3034_v12 = vrot.slane %v3032_v27, 5  ;;  %v2135_v41 = vld [vmem:[#allocation2 + $0x9c] sm:$0xf]  ;;  %2586 = vst [vmem:[#allocation3 + $0x34c] sm:$0xf] %v2434_v53  ;;  %v3040_v14 = vrot.slane %v3038_v3, 5  ;;  %v8878_v18 = vadd.f32 %v7014_v50, %v7013_v15  ;;  %v8892_v50 = vpop.f32.mrf.mxu0 }
 0x171   : > { %2858 = vst [vmem:[#allocation3 + $0x350] sm:$0xf] %v2774_v33  ;;  %v3044_v44 = vrot.slane %v3042_v58, 4  ;;  %v3050_v45 = vrot.slane %v3048_v29, 5  ;;  %v2136_v28 = vld [vmem:[#allocation2 + $0xa0] sm:$0xf] }
 0x172   : > { %v2436_v61 = vshrl.u32 %v2135_v41, 16  ;;  %v3035_v62 = vor.u32 %v3034_v12, %v3031_v32  ;;  %v2137_v21 = vld [vmem:[#allocation2 + $0xa4] sm:$0x1]  ;;  %v2439_v51 = vshll.u32 %v2135_v41, 16  ;;  %v2445_v54 = vshll.u32 %v2136_v28, 16 }
 0x173   : > { %v2449_v13 = vshrl.u32 %v2136_v28, 16  ;;  %v3045_v63 = vor.u32 %v3044_v44, %v3040_v14  ;;  %v2455_v49 = vshll.u32 %v2137_v21, 16  ;;  %v2631_v30 = vld [vmem:[#allocation2 + $0x9c] sm:$0xe]  ;;  %v2632_v1 = vld [vmem:[#allocation2 + $0xa0] sm:$0xf]  ;;  %v7079_v44 = vpop.f32.mrf.mxu1 }
 0x174   : > { %v2438_v0 = vrot.slane %v2436_v61, 4  ;;  %v3036_v48 = vrot.slane %v3035_v62, 4  ;;  %v2441_v36 = vrot.slane %v2439_v51, 5  ;;  %v2447_v8 = vrot.slane %v2445_v54, 5  ;;  %v7734_v6 = vld [vmem:[#allocation3 + $0x64] ss:$36 sps:$4 sm:$0xff]  }
 0x175   : > { %v2451_v9 = vrot.slane %v2449_v13, 4  ;;  %v7737_v5 = vld [vmem:[#allocation3 + $0x60] ss:$36 sps:$4 sm:$0xff]   ;;  %v3046_v4 = vrot.slane %v3045_v63, 4  ;;  %v2457_v27 = vrot.slane %v2455_v49, 5  ;;  %5695 = vmatprep.mubr.bf16.mxu1 %v7734_v6  ;;  %v6459_v29 = vrot.slane %v2631_v30, 9 }
 0x176   : > { %v3041_v19 = vsel %vm7969_vm5, %v3036_v48, %v3040_v14  ;;  %v2442_v60 = vor.u32 %v2441_v36, %v2438_v0  ;;  %v2633_v35 = vld [vmem:[#allocation2 + $0xa4] sm:$0x1]  ;;  %v2874_v3 = vld [vmem:[#allocation2 + $0x3c] sm:$0xf]  ;;  %v2777_v53 = vrot.slane %v2632_v1, 5  ;;  %5696 = vmatmul.mubr.bf16.gmra.mxu1 %v7737_v5  ;;  %v7080_v0 = vpop.f32.mrf.mxu1 }
 0x177   : > { %v2452_v25 = vor.u32 %v2451_v9, %v2447_v8  ;;  %v3051_v58 = vsel %vm7969_vm5, %v3046_v4, %v3050_v45  ;;  %3400 = vst [vmem:[#allocation3 + $0xac] sm:$0xf] %v3041_v19  ;;  %v2780_v33 = vrot.slane %v2633_v35, 5  ;;  %v2875_v32 = vld [vmem:[#allocation2 + $0x40] sm:$0xf] }
 0x178   : > { %2906 = vst [vmem:[#allocation3 + $0xf0] sm:$0xf] %v2874_v3  ;;  %v7738_v12 = vld [vmem:[#allocation3 + $0x32c] ss:$36 sps:$4 sm:$0xff]   ;;  %3401 = vst [vmem:[#allocation3 + $0xd0] sm:$0xf] %v3051_v58  ;;  %v2778_v61 = vsel %vm8210_vm13, %v6459_v29, %v2777_v53 }
 0x179   : > { %v7743_v41 = vld [vmem:[#allocation3 + $0x328] ss:$36 sps:$4 sm:$0xff]   ;;  %v2443_v14 = vrot.slane %v2442_v60, 4  ;;  %2907 = vst [vmem:[#allocation3 + $0x114] sm:$0xf] %v2875_v32  ;;  %v2453_v28 = vrot.slane %v2452_v25, 4  ;;  %5614 = vmatprep.mubr.bf16.mxu0 %v7738_v12  ;;  %v8894_v60 = vpop.f32.mrf.mxu1 }
 0x17a   : > { %v2779_v62 = vrot.slane %v2777_v53, 4  ;;  %v2941_v21 = vld [vmem:[#allocation2 + $0x3c] sm:$0xf]  ;;  %v2942_v45 = vld [vmem:[#allocation2 + $0x40] sm:$0xf]  ;;  %5615 = vmatmul.mubr.bf16.gmra.mxu0 %v7743_v41  ;;  %9493 = vst [vmem:[#allocation4_spill] sm:$0xff] %v8894_v60 }
 0x17b   : > { %v2448_v51 = vsel %vm7969_vm5, %v2443_v14, %v2447_v8  ;;  %2859 = vst [vmem:[#allocation3 + $0x374] sm:$0xf] %v2778_v61  ;;  %v2943_v54 = vld [vmem:[#allocation2 + $0x44] sm:$0x1]  ;;  %v3053_v13 = vshrl.u32 %v2941_v21, 16  ;;  %v3056_v15 = vshll.u32 %v2941_v21, 16  ;;  %v2458_v49 = vsel %vm7969_vm5, %v2453_v28, %v2457_v27  ;;  %v8896_v41 = vpop.f32.mrf.mxu1 }
 0x17c   : > { %v3062_v63 = vshll.u32 %v2942_v45, 16  ;;  %2587 = vst [vmem:[#allocation3 + $0x370] sm:$0xf] %v2448_v51  ;;  %v2781_v30 = vsel %vm8210_vm13, %v2779_v62, %v2780_v33  ;;  %v3066_v1 = vshrl.u32 %v2942_v45, 16  ;;  %v3072_v48 = vshll.u32 %v2943_v54, 16  ;;  %9494 = vst [vmem:[#allocation5_spill] sm:$0xff] %v8896_v41  ;;  %v8900_v45 = vpop.f32.mrf.mxu0 }
 0x17d   : > { %v2138_v36 = vld [vmem:[#allocation2 + $0xa8] sm:$0xf]  ;;  %v2139_v9 = vld [vmem:[#allocation2 + $0xac] sm:$0xf]  ;;  %2588 = vst [vmem:[#allocation3 + $0x394] sm:$0xf] %v2458_v49  ;;  %v8898_v21 = vadd.f32 %v7080_v0, %v7079_v44  ;;  %v7101_v49 = vpop.f32.mrf.mxu1 }
 0x17e   : > { %2860 = vst [vmem:[#allocation3 + $0x398] sm:$0xf] %v2781_v30  ;;  %v3055_v8 = vrot.slane %v3053_v13, 4  ;;  %v3058_v6 = vrot.slane %v3056_v15, 5  ;;  %v3064_v5 = vrot.slane %v3062_v63, 5  ;;  %v2460_v19 = vshrl.u32 %v2138_v36, 16 }
 0x17f   : > { %v2140_v4 = vld [vmem:[#allocation2 + $0xb0] sm:$0x1]  ;;  %v3068_v25 = vrot.slane %v3066_v1, 4  ;;  %v3074_v27 = vrot.slane %v3072_v48, 5  ;;  %v2463_v35 = vshll.u32 %v2138_v36, 16  ;;  %v2469_v3 = vshll.u32 %v2139_v9, 16 }
 0x180   : > { %v2634_v58 = vld [vmem:[#allocation2 + $0xa8] sm:$0xe]  ;;  %v3059_v29 = vor.u32 %v3058_v6, %v3055_v8  ;;  %v2462_v53 = vrot.slane %v2460_v19, 4  ;;  %v2473_v33 = vshrl.u32 %v2139_v9, 16  ;;  %v2479_v32 = vshll.u32 %v2140_v4, 16  ;;  %9495 = vst [vmem:[#allocation6_spill] sm:$0xff] %v8898_v21  ;;  %v7102_v19 = vpop.f32.mrf.mxu1 }
 0x181   : > { %v2635_v12 = vld [vmem:[#allocation2 + $0xac] sm:$0xf]  ;;  %v7740_v14 = vld [vmem:[#allocation3 + $0xac] ss:$36 sps:$4 sm:$0xff]   ;;  %v3069_v61 = vor.u32 %v3068_v25, %v3064_v5  ;;  %v2465_v62 = vrot.slane %v2463_v35, 5  ;;  %v2471_v54 = vrot.slane %v2469_v3, 5 }
 0x182   : > { %v7744_v28 = vld [vmem:[#allocation3 + $0xa8] ss:$36 sps:$4 sm:$0xff]   ;;  %v3060_v51 = vrot.slane %v3059_v29, 4  ;;  %v2475_v13 = vrot.slane %v2473_v33, 4  ;;  %v2481_v15 = vrot.slane %v2479_v32, 5  ;;  %5703 = vmatprep.mubr.bf16.mxu1 %v7740_v14  ;;  %v6460_v48 = vrot.slane %v2634_v58, 9 }
 0x183   : > { %v2636_v63 = vld [vmem:[#allocation2 + $0xb0] sm:$0x1]  ;;  %v3070_v30 = vrot.slane %v3069_v61, 4  ;;  %v2466_v1 = vor.u32 %v2465_v62, %v2462_v53  ;;  %v2784_v36 = vrot.slane %v2635_v12, 5  ;;  %v2876_v9 = vld [vmem:[#allocation2 + $0x48] sm:$0xf]  ;;  %5704 = vmatmul.mubr.bf16.gmra.mxu1 %v7744_v28  ;;  %v7019_v53 = vpop.f32.mrf.mxu0  ;;  %v7103_v33 = vadd.f32 %v7102_v19, %v7101_v49  ;;  %v7104_v61 = vpop.f32.mrf.mxu1 }
 0x184   : > { %v3065_v8 = vsel %vm7969_vm5, %v3060_v51, %v3064_v5  ;;  %v2476_v44 = vor.u32 %v2475_v13, %v2471_v54  ;;  %v2787_v0 = vrot.slane %v2636_v63, 5  ;;  %v2877_v6 = vld [vmem:[#allocation2 + $0x4c] sm:$0xf]  ;;  %2908 = vst [vmem:[#allocation3 + $0x138] sm:$0xf] %v2876_v9  ;;  %v8910_v5 = vadd.f32 %v8758_v17, %v8754_v56 }
 0x185   : > { %v2944_v4 = vld [vmem:[#allocation2 + $0x48] sm:$0xf]  ;;  %v7745_v25 = vld [vmem:[#allocation3 + $0x374] ss:$36 sps:$4 sm:$0xff]   ;;  %v3075_v35 = vsel %vm7969_vm5, %v3070_v30, %v3074_v27  ;;  %3402 = vst [vmem:[#allocation3 + $0xf4] sm:$0xf] %v3065_v8  ;;  %v2785_v58 = vsel %vm8210_vm13, %v6460_v48, %v2784_v36  ;;  %v8914_v27 = vadd.f32 %v8799_v16, %v8791_v34  ;;  %v7020_v49 = vpop.f32.mrf.mxu0 }
 0x186   : > { %v7749_v3 = vld [vmem:[#allocation3 + $0x370] ss:$36 sps:$4 sm:$0xff]   ;;  %v2467_v29 = vrot.slane %v2466_v1, 4  ;;  %2909 = vst [vmem:[#allocation3 + $0x15c] sm:$0xf] %v2877_v6  ;;  %v2477_v32 = vrot.slane %v2476_v44, 4  ;;  %5622 = vmatprep.mubr.bf16.mxu0 %v7745_v25  ;;  %v7105_v1 = vpop.f32.mrf.mxu1 }
 0x187   : > { %3403 = vst [vmem:[#allocation3 + $0x118] sm:$0xf] %v3075_v35  ;;  %v2786_v12 = vrot.slane %v2784_v36, 4  ;;  %2861 = vst [vmem:[#allocation3 + $0x3bc] sm:$0xf] %v2785_v58  ;;  %v3077_v51 = vshrl.u32 %v2944_v4, 16  ;;  %5623 = vmatmul.mubr.bf16.gmra.mxu0 %v7749_v3  ;;  %v8922_v44 = vpop.f32.mrf.mxu0 }
 0x188   : > { %v2945_v14 = vld [vmem:[#allocation2 + $0x4c] sm:$0xf]  ;;  %v2946_v28 = vld [vmem:[#allocation2 + $0x50] sm:$0x1]  ;;  %v2472_v62 = vsel %vm7969_vm5, %v2467_v29, %v2471_v54  ;;  %v3080_v13 = vshll.u32 %v2944_v4, 16  ;;  %v2482_v56 = vsel %vm7969_vm5, %v2477_v32, %v2481_v15  ;;  %v7107_v35 = vpop.f32.mrf.mxu1 }
 0x189   : > { %v3086_v63 = vshll.u32 %v2945_v14, 16  ;;  %2589 = vst [vmem:[#allocation3 + $0x3b8] sm:$0xf] %v2472_v62  ;;  %v2788_v17 = vsel %vm8210_vm13, %v2786_v12, %v2787_v0  ;;  %v3090_v30 = vshrl.u32 %v2945_v14, 16  ;;  %v3096_v34 = vshll.u32 %v2946_v28, 16 }
 0x18a   : > { %v2141_v16 = vld [vmem:[#allocation2 + $0xb4] sm:$0xf]  ;;  %2590 = vst [vmem:[#allocation3 + $0x3dc] sm:$0xf] %v2482_v56  ;;  %2862 = vst [vmem:[#allocation3 + $0x3e0] sm:$0xf] %v2788_v17 }
 0x18b   : > { %v3079_v48 = vrot.slane %v3077_v51, 4  ;;  %v3082_v54 = vrot.slane %v3080_v13, 5  ;;  %v3088_v36 = vrot.slane %v3086_v63, 5  ;;  %v2142_v9 = vld [vmem:[#allocation2 + $0xb8] sm:$0xf]  ;;  %v2484_v8 = vshrl.u32 %v2141_v16, 16  ;;  %v8924_v13 = vpop.f32.mrf.mxu0  ;;  %v7108_v63 = vpop.f32.mrf.mxu1 }
 0x18c   : > { %v3092_v6 = vrot.slane %v3090_v30, 4  ;;  %v3098_v4 = vrot.slane %v3096_v34, 5  ;;  %v2143_v15 = vld [vmem:[#allocation2 + $0xbc] sm:$0x1]  ;;  %v2487_v19 = vshll.u32 %v2141_v16, 16  ;;  %v2493_v25 = vshll.u32 %v2142_v9, 16 }
 0x18d   : > { %v3083_v0 = vor.u32 %v3082_v54, %v3079_v48  ;;  %v2486_v3 = vrot.slane %v2484_v8, 4  ;;  %v2497_v29 = vshrl.u32 %v2142_v9, 16  ;;  %v2503_v58 = vshll.u32 %v2143_v15, 16  ;;  %v2637_v32 = vld [vmem:[#allocation2 + $0xb4] sm:$0xe] }
 0x18e   : > { %v3093_v12 = vor.u32 %v3092_v6, %v3088_v36  ;;  %v2489_v14 = vrot.slane %v2487_v19, 5  ;;  %v2495_v28 = vrot.slane %v2493_v25, 5  ;;  %v2638_v62 = vld [vmem:[#allocation2 + $0xb8] sm:$0xf]  ;;  %v6461_v51 = vrot.slane %v2637_v32, 9  ;;  %v7110_v19 = vpop.f32.mrf.mxu1 }
 0x18f   : > { %v7747_v56 = vld [vmem:[#allocation3 + $0xf4] ss:$36 sps:$4 sm:$0xff]   ;;  %v3084_v30 = vrot.slane %v3083_v0, 4  ;;  %v8928_v34 = vadd.f32 %v8823_v20, %v8817_v55  ;;  %v8930_v16 = vadd.f32 %v7020_v49, %v7019_v53  ;;  %v8933_v48 = vadd.f32 %v7103_v33, %v8725_v47  ;;  %v2639_v15 = vld [vmem:[#allocation2 + $0xbc] sm:$0x1] }
 0x190   : > { %v7750_v17 = vld [vmem:[#allocation3 + $0xf0] ss:$36 sps:$4 sm:$0xff]   ;;  %v3094_v54 = vrot.slane %v3093_v12, 4  ;;  %v2490_v9 = vor.u32 %v2489_v14, %v2486_v3  ;;  %v2499_v8 = vrot.slane %v2497_v29, 4  ;;  %v2505_v6 = vrot.slane %v2503_v58, 5  ;;  %5711 = vmatprep.mubr.bf16.mxu1 %v7747_v56  ;;  %v7025_v3 = vpop.f32.mrf.mxu0  ;;  %v7111_v58 = vpop.f32.mrf.mxu1 }
 0x191   : > { %v3089_v25 = vsel %vm7969_vm5, %v3084_v30, %v3088_v36  ;;  %v2791_v0 = vrot.slane %v2638_v62, 5  ;;  %v2794_v32 = vrot.slane %v2639_v15, 5  ;;  %v2878_v23 = vld [vmem:[#allocation2 + $0x54] sm:$0xf]  ;;  %v7106_v55 = vadd.f32 %v7105_v1, %v7104_v61  ;;  %5712 = vmatmul.mubr.bf16.gmra.mxu1 %v7750_v17  ;;  %v2879_v14 = vld [vmem:[#allocation2 + $0x58] sm:$0xf] }
 0x192   : > { %v7751_v20 = vld [vmem:[#allocation3 + $0x3bc] ss:$36 sps:$4 sm:$0xff]   ;;  %v3099_v47 = vsel %vm7969_vm5, %v3094_v54, %v3098_v4  ;;  %3404 = vst [vmem:[#allocation3 + $0x13c] sm:$0xf] %v3089_v25  ;;  %v2491_v33 = vrot.slane %v2490_v9, 4  ;;  %v2500_v49 = vor.u32 %v2499_v8, %v2495_v28  ;;  %v7109_v29 = vadd.f32 %v7108_v63, %v7107_v35  ;;  %v7026_v17 = vpop.f32.mrf.mxu0  ;;  %v7113_v30 = vpop.f32.mrf.mxu1 }
 0x193   : > { %v7756_v53 = vld [vmem:[#allocation3 + $0x3b8] ss:$36 sps:$4 sm:$0xff]   ;;  %2910 = vst [vmem:[#allocation3 + $0x180] sm:$0xf] %v2878_v23  ;;  %3405 = vst [vmem:[#allocation3 + $0x160] sm:$0xf] %v3099_v47  ;;  %v2792_v36 = vsel %vm8210_vm13, %v6461_v51, %v2791_v0  ;;  %v8942_v1 = vadd.f32 %v7106_v55, %v8910_v5  ;;  %v7112_v62 = vadd.f32 %v7111_v58, %v7110_v19  ;;  %5630 = vmatprep.mubr.bf16.mxu0 %v7751_v20 }
 0x194   : > { %v2793_v12 = vrot.slane %v2791_v0, 4  ;;  %v2947_v61 = vld [vmem:[#allocation2 + $0x54] sm:$0xf]  ;;  %v2496_v4 = vsel %vm7969_vm5, %v2491_v33, %v2495_v28  ;;  %v2501_v56 = vrot.slane %v2500_v49, 4  ;;  %2863 = vst [vmem:[#allocation3 + $0x404] sm:$0xf] %v2792_v36  ;;  %v8947_v51 = vadd.f32 %v7109_v29, %v8773_v52  ;;  %5631 = vmatmul.mubr.bf16.gmra.mxu0 %v7756_v53  ;;  %v8957_v47 = vpop.f32.mrf.mxu0 }
 0x195   : > { %2911 = vst [vmem:[#allocation3 + $0x1a4] sm:$0xf] %v2879_v14  ;;  %v2948_v23 = vld [vmem:[#allocation2 + $0x58] sm:$0xf]  ;;  %v2949_v35 = vld [vmem:[#allocation2 + $0x5c] sm:$0x1] }
 0x196   : > { %v3101_v63 = vshrl.u32 %v2947_v61, 16  ;;  %2591 = vst [vmem:[#allocation3 + $0x400] sm:$0xf] %v2496_v4  ;;  %v2795_v5 = vsel %vm8210_vm13, %v2793_v12, %v2794_v32  ;;  %v3104_v54 = vshll.u32 %v2947_v61, 16  ;;  %v3110_v9 = vshll.u32 %v2948_v23, 16  ;;  %v7114_v32 = vpop.f32.mrf.mxu1  ;;  %v8959_v61 = vpop.f32.mrf.mxu0 }
 0x197   : > { %v3114_v8 = vshrl.u32 %v2948_v23, 16  ;;  %v1063_v28 = vld [vmem:[#allocation2 + $0xc8] sm:$0x1]  ;;  %v2506_v15 = vsel %vm7969_vm5, %v2501_v56, %v2505_v6  ;;  %2864 = vst [vmem:[#allocation3 + $0x428] sm:$0xf] %v2795_v5  ;;  %v3120_v25 = vshll.u32 %v2949_v35, 16 }
 0x198   : > { %v3103_v19 = vrot.slane %v3101_v63, 4  ;;  %v9496_v0 = vrot.slane %v8716_v37, 4  ;;  %v2144_v55 = vld [vmem:[#allocation2 + $0xc0] sm:$0xf]  ;;  %v2145_v20 = vld [vmem:[#allocation2 + $0xc4] sm:$0xf]  ;;  %v7116_v2 = vpop.f32.mrf.mxu1 }
 0x199   : > { %2592 = vst [vmem:[#allocation3 + $0x424] sm:$0xf] %v2506_v15  ;;  %v3106_v53 = vrot.slane %v3104_v54, 5  ;;  %v3112_v33 = vrot.slane %v3110_v9, 5  ;;  %v3116_v49 = vrot.slane %v3114_v8, 4  ;;  %v2508_v29 = vshrl.u32 %v2144_v55, 16 }
 0x19a   : > { %v1064_v52 = vsel %vm7997_vm8, %v9496_v0, %v1063_v28  ;;  %v2640_v6 = vld [vmem:[#allocation2 + $0xc0] sm:$0xe]  ;;  %v3122_v58 = vrot.slane %v3120_v25, 5  ;;  %v2511_v36 = vshll.u32 %v2144_v55, 16  ;;  %v2517_v12 = vshll.u32 %v2145_v20, 16  ;;  %v7117_v25 = vpop.f32.mrf.mxu1 }
 0x19b   : > { %1065 = vst [vmem:[#allocation2 + $0xc8] sm:$0x1] %v1064_v52  ;;  %v2521_v14 = vshrl.u32 %v2145_v20, 16  ;;  %v2641_v37 = vld [vmem:[#allocation2 + $0xc4] sm:$0xf]  ;;  %v3107_v4 = vor.u32 %v3106_v53, %v3103_v19  ;;  %v3117_v56 = vor.u32 %v3116_v49, %v3112_v33  ;;  %v2510_v23 = vrot.slane %v2508_v29, 4  ;;  %v7031_v53 = vpop.f32.mrf.mxu0 }
 0x19c   : > { %v6462_v35 = vrot.slane %v2640_v6, 9  ;;  %v2880_v63 = vld [vmem:[#allocation2 + $0x60] sm:$0xf]  ;;  %v7753_v5 = vld [vmem:[#allocation3 + $0x13c] ss:$36 sps:$4 sm:$0xff]   ;;  %v2513_v9 = vrot.slane %v2511_v36, 5  ;;  %v8963_v8 = vadd.f32 %v8866_v26, %v8858_v57  ;;  %v8965_v28 = vadd.f32 %v7026_v17, %v7025_v3  ;;  %v7119_v3 = vpop.f32.mrf.mxu1 }
 0x19d   : > { %v7757_v54 = vld [vmem:[#allocation3 + $0x138] ss:$36 sps:$4 sm:$0xff]   ;;  %2912 = vst [vmem:[#allocation3 + $0x1c8] sm:$0xf] %v2880_v63  ;;  %v8968_v15 = vadd.f32 %v7112_v62, %v8914_v27  ;;  %v3108_v0 = vrot.slane %v3107_v4, 4  ;;  %v3118_v19 = vrot.slane %v3117_v56, 4  ;;  %5719 = vmatprep.mubr.bf16.mxu1 %v7753_v5  ;;  %v7115_v57 = vadd.f32 %v7114_v32, %v7113_v30  ;;  %v7032_v4 = vpop.f32.mrf.mxu0 }
 0x19e   : > { %v2519_v52 = vrot.slane %v2517_v12, 5  ;;  %v2523_v55 = vrot.slane %v2521_v14, 4  ;;  %v2881_v20 = vld [vmem:[#allocation2 + $0x64] sm:$0xf]  ;;  %v2514_v49 = vor.u32 %v2513_v9, %v2510_v23  ;;  %v2798_v29 = vrot.slane %v2641_v37, 5  ;;  %5720 = vmatmul.mubr.bf16.gmra.mxu1 %v7757_v54 }
 0x19f   : > { %2913 = vst [vmem:[#allocation3 + $0x1ec] sm:$0xf] %v2881_v20  ;;  %v2950_v6 = vld [vmem:[#allocation2 + $0x60] sm:$0xf]  ;;  %v2951_v36 = vld [vmem:[#allocation2 + $0x64] sm:$0xf]  ;;  %v7118_v26 = vadd.f32 %v7117_v25, %v7116_v2  ;;  %v3113_v27 = vsel %vm7969_vm5, %v3108_v0, %v3112_v33  ;;  %v3123_v62 = vsel %vm7969_vm5, %v3118_v19, %v3122_v58  ;;  %v8976_v32 = vadd.f32 %v7032_v4, %v7031_v53  ;;  %v7120_v33 = vpop.f32.mrf.mxu1  ;;  %v8981_v9 = vpop.f32.mrf.mxu0 }
 0x1a0   : > { %v2524_v17 = vor.u32 %v2523_v55, %v2519_v52  ;;  %v2952_v12 = vld [vmem:[#allocation2 + $0x68] sm:$0x1]  ;;  %v3125_v14 = vshrl.u32 %v2950_v6, 16  ;;  %v7758_v56 = vld [vmem:[#allocation3 + $0x404] ss:$36 sps:$4 sm:$0xff]   ;;  %v2515_v23 = vrot.slane %v2514_v49, 4  ;;  %v2799_v30 = vsel %vm8210_vm13, %v6462_v35, %v2798_v29 }
 0x1a1   : > { %3406 = vst [vmem:[#allocation3 + $0x184] sm:$0xf] %v3113_v27  ;;  %3407 = vst [vmem:[#allocation3 + $0x1a8] sm:$0xf] %v3123_v62  ;;  %v7762_v37 = vld [vmem:[#allocation3 + $0x400] ss:$36 sps:$4 sm:$0xff]   ;;  %v8979_v2 = vadd.f32 %v7115_v57, %v8815_v24  ;;  %v8984_v25 = vadd.f32 %v7118_v26, %v8928_v34  ;;  %v7121_v0 = vadd.f32 %v7120_v33, %v7119_v3  ;;  %5638 = vmatprep.mubr.bf16.mxu0 %v7758_v56  ;;  %v7122_v20 = vpop.f32.mrf.mxu1 }
 0x1a2   : > { %v2146_v63 = vld [vmem:[#allocation2 + $0xc8] sm:$0x1]  ;;  %v2525_v58 = vrot.slane %v2524_v17, 4  ;;  %v2800_v54 = vrot.slane %v2798_v29, 4  ;;  %2865 = vst [vmem:[#allocation3 + $0x44c] sm:$0xf] %v2799_v30  ;;  %v2520_v35 = vsel %vm7969_vm5, %v2515_v23, %v2519_v52  ;;  %5639 = vmatmul.mubr.bf16.gmra.mxu0 %v7762_v37  ;;  %v8992_v52 = vadd.f32 %v8900_v45, %v8892_v50  ;;  %v8997_v37 = vpop.f32.mrf.mxu0 }
 0x1a3   : > { %v2642_v5 = vld [vmem:[#allocation2 + $0xc8] sm:$0x1]  ;;  %v2527_v19 = vshll.u32 %v2146_v63, 16  ;;  %v3127_v24 = vrot.slane %v3125_v14, 4  ;;  %2593 = vst [vmem:[#allocation3 + $0x448] sm:$0xf] %v2520_v35  ;;  %v8995_v17 = vadd.f32 %v7121_v0, %v8837_v11  ;;  %v7123_v14 = vpop.f32.mrf.mxu1 }
 0x1a4   : > { %v2801_v55 = vrot.slane %v2642_v5, 5  ;;  %v3128_v53 = vshll.u32 %v2950_v6, 16  ;;  %v3134_v49 = vshll.u32 %v2951_v36, 16  ;;  %v3138_v29 = vshrl.u32 %v2951_v36, 16  ;;  %v2882_v27 = vld [vmem:[#allocation2 + $0x6c] sm:$0xf] }
 0x1a5   : > { %v3144_v57 = vshll.u32 %v2952_v12, 16  ;;  %v2529_v62 = vrot.slane %v2527_v19, 5  ;;  %v2883_v26 = vld [vmem:[#allocation2 + $0x70] sm:$0xf]  ;;  %2914 = vst [vmem:[#allocation3 + $0x210] sm:$0xf] %v2882_v27  ;;  %v7125_v63 = vpop.f32.mrf.mxu1 }
 0x1a6   : > { %v2802_v34 = vsel %vm8210_vm13, %v2800_v54, %v2801_v55  ;;  %v2953_v3 = vld [vmem:[#allocation2 + $0x6c] sm:$0xf]  ;;  %v3130_v6 = vrot.slane %v3128_v53, 5  ;;  %v3136_v36 = vrot.slane %v3134_v49, 5  ;;  %v3140_v12 = vrot.slane %v3138_v29, 4 }
 0x1a7   : > { %2866 = vst [vmem:[#allocation3 + $0x470] sm:$0xf] %v2802_v34  ;;  %v3146_v4 = vrot.slane %v3144_v57, 5  ;;  %2915 = vst [vmem:[#allocation3 + $0x234] sm:$0xf] %v2883_v26  ;;  %v2530_v23 = vsel %vm7969_vm5, %v2525_v58, %v2529_v62  ;;  %v3149_v33 = vshrl.u32 %v2953_v3, 16  ;;  %v7124_v29 = vadd.f32 %v7123_v14, %v7122_v20  ;;  %v7126_v57 = vpop.f32.mrf.mxu1 }
 0x1a8   : > { %v2954_v56 = vld [vmem:[#allocation2 + $0x70] sm:$0xf]  ;;  %v2955_v30 = vld [vmem:[#allocation2 + $0x74] sm:$0x1]  ;;  %v3152_v50 = vshll.u32 %v2953_v3, 16  ;;  %v3131_v5 = vor.u32 %v3130_v6, %v3127_v24  ;;  %v3141_v54 = vor.u32 %v3140_v12, %v3136_v36  ;;  %v7037_v3 = vpop.f32.mrf.mxu0 }
 0x1a9   : > { %v3158_v45 = vshll.u32 %v2954_v56, 16  ;;  %v7760_v11 = vld [vmem:[#allocation3 + $0x184] ss:$36 sps:$4 sm:$0xff]   ;;  %2594 = vst [vmem:[#allocation3 + $0x46c] sm:$0xf] %v2530_v23  ;;  %v3162_v0 = vshrl.u32 %v2954_v56, 16  ;;  %v9002_v12 = vadd.f32 %v7124_v29, %v8963_v8  ;;  %v7127_v56 = vadd.f32 %v7126_v57, %v7125_v63 }
 0x1aa   : > { %v3168_v35 = vshll.u32 %v2955_v30, 16  ;;  %v7763_v19 = vld [vmem:[#allocation3 + $0x180] ss:$36 sps:$4 sm:$0xff]   ;;  %v3151_v55 = vrot.slane %v3149_v33, 4  ;;  %v3154_v53 = vrot.slane %v3152_v50, 5  ;;  %5727 = vmatprep.mubr.bf16.mxu1 %v7760_v11  ;;  %v3132_v27 = vrot.slane %v3131_v5, 4  ;;  %v7128_v30 = vpop.f32.mrf.mxu1  ;;  %v7038_v5 = vpop.f32.mrf.mxu0 }
 0x1ab   : > { %v3160_v49 = vrot.slane %v3158_v45, 5  ;;  %v3142_v58 = vrot.slane %v3141_v54, 4  ;;  %v3164_v62 = vrot.slane %v3162_v0, 4  ;;  %v3428_v26 = vld [vmem:[#allocation2 + $0x18] sm:$0xe]  ;;  %5728 = vmatmul.mubr.bf16.gmra.mxu1 %v7763_v19 }
 0x1ac   : > { %v3170_v34 = vrot.slane %v3168_v35, 5  ;;  %v3155_v41 = vor.u32 %v3154_v53, %v3151_v55  ;;  %v3429_v23 = vld [vmem:[#allocation2 + $0x1c] sm:$0xf]  ;;  %v3430_v24 = vld [vmem:[#allocation2 + $0x20] sm:$0x1]  ;;  %v6463_v6 = vrot.slane %v3428_v26, 9  ;;  %v3137_v20 = vsel %vm7969_vm5, %v3132_v27, %v3136_v36  ;;  %v7129_v63 = vpop.f32.mrf.mxu1  ;;  %v7040_v57 = vpop.f32.mrf.mxu0 }
 0x1ad   : > { %v3147_v14 = vsel %vm7969_vm5, %v3142_v58, %v3146_v4  ;;  %v3165_v33 = vor.u32 %v3164_v62, %v3160_v49  ;;  %v3526_v50 = vrot.slane %v3429_v23, 5  ;;  %v3431_v45 = vld [vmem:[#allocation2 + $0x24] sm:$0xe]  ;;  %v3432_v11 = vld [vmem:[#allocation2 + $0x28] sm:$0xf]  ;;  %v3529_v0 = vrot.slane %v3430_v24, 5 }
 0x1ae   : > { %3408 = vst [vmem:[#allocation3 + $0x1cc] sm:$0xf] %v3137_v20  ;;  %3409 = vst [vmem:[#allocation3 + $0x1f0] sm:$0xf] %v3147_v14  ;;  %v3156_v54 = vrot.slane %v3155_v41, 4  ;;  %v6464_v8 = vrot.slane %v3431_v45, 9  ;;  %v9014_v23 = vadd.f32 %v7038_v5, %v7037_v3  ;;  %v7131_v24 = vpop.f32.mrf.mxu1  ;;  %v7130_v45 = vadd.f32 %v7129_v63, %v7128_v30 }
 0x1af   : > { %v3433_v35 = vld [vmem:[#allocation2 + $0x2c] sm:$0x1]  ;;  %v3533_v19 = vrot.slane %v3432_v11, 5  ;;  %v3166_v55 = vrot.slane %v3165_v33, 4  ;;  %v3527_v36 = vsel %vm8210_vm13, %v6463_v6, %v3526_v50  ;;  %v3528_v53 = vrot.slane %v3526_v50, 4 }
 0x1b0   : > { %v3536_v29 = vrot.slane %v3433_v35, 5  ;;  %v2884_v4 = vld [vmem:[#allocation2 + $0x78] sm:$0xf]  ;;  %v7764_v27 = vld [vmem:[#allocation3 + $0x44c] ss:$36 sps:$4 sm:$0xff]   ;;  %v3161_v62 = vsel %vm7969_vm5, %v3156_v54, %v3160_v49  ;;  %v9021_v50 = vadd.f32 %v7127_v56, %v8878_v18  ;;  %v7132_v35 = vpop.f32.mrf.mxu1  ;;  %v9028_v63 = vadd.f32 %v7130_v45, %v8992_v52 }
 0x1b1   : > { %v7769_v58 = vld [vmem:[#allocation3 + $0x448] ss:$36 sps:$4 sm:$0xff]   ;;  %3668 = vst [vmem:[#allocation3 + $0x20] sm:$0xf] %v3527_v36  ;;  %v3534_v41 = vsel %vm8210_vm13, %v6464_v8, %v3533_v19  ;;  %v3535_v26 = vrot.slane %v3533_v19, 4  ;;  %v3171_v6 = vsel %vm7969_vm5, %v3166_v55, %v3170_v34  ;;  %v3530_v20 = vsel %vm8210_vm13, %v3528_v53, %v3529_v0  ;;  %5646 = vmatprep.mubr.bf16.mxu0 %v7764_v27  ;;  %v7041_v0 = vpop.f32.mrf.mxu0 }
 0x1b2   : > { %2916 = vst [vmem:[#allocation3 + $0x258] sm:$0xf] %v2884_v4  ;;  %3410 = vst [vmem:[#allocation3 + $0x214] sm:$0xf] %v3161_v62  ;;  %v2885_v14 = vld [vmem:[#allocation2 + $0x7c] sm:$0xf]  ;;  %5647 = vmatmul.mubr.bf16.gmra.mxu0 %v7769_v58  ;;  %v9025_v30 = vadd.f32 %v7041_v0, %v7040_v57  ;;  %v7134_v27 = vpop.f32.mrf.mxu1  ;;  %v7133_v58 = vadd.f32 %v7132_v35, %v7131_v24 }
 0x1b3   : > { %3670 = vst [vmem:[#allocation3 + $0x68] sm:$0xf] %v3534_v41  ;;  %v2956_v33 = vld [vmem:[#allocation2 + $0x78] sm:$0xf]  ;;  %v2957_v49 = vld [vmem:[#allocation2 + $0x7c] sm:$0xf]  ;;  %v3537_v3 = vsel %vm8210_vm13, %v3535_v26, %v3536_v29 }
 0x1b4   : > { %3411 = vst [vmem:[#allocation3 + $0x238] sm:$0xf] %v3171_v6  ;;  %3669 = vst [vmem:[#allocation3 + $0x44] sm:$0xf] %v3530_v20  ;;  %v2958_v34 = vld [vmem:[#allocation2 + $0x80] sm:$0x1]  ;;  %v7135_v57 = vpop.f32.mrf.mxu1 }
 0x1b5   : > { %2917 = vst [vmem:[#allocation3 + $0x27c] sm:$0xf] %v2885_v14  ;;  %v3173_v11 = vshrl.u32 %v2956_v33, 16  ;;  %v3176_v5 = vshll.u32 %v2956_v33, 16  ;;  %v3182_v54 = vshll.u32 %v2957_v49, 16  ;;  %v3186_v8 = vshrl.u32 %v2957_v49, 16 }
 0x1b6   : > { %3671 = vst [vmem:[#allocation3 + $0x8c] sm:$0xf] %v3537_v3  ;;  %v3192_v19 = vshll.u32 %v2958_v34, 16  ;;  %v3434_v18 = vld [vmem:[#allocation2 + $0x30] sm:$0xe]  ;;  %v7024_v34 = vadd.f32 %v8924_v13, %v8922_v44 }
 0x1b7   : > { %v3435_v56 = vld [vmem:[#allocation2 + $0x34] sm:$0xf]  ;;  %v3175_v55 = vrot.slane %v3173_v11, 4  ;;  %v3178_v36 = vrot.slane %v3176_v5, 5  ;;  %v3184_v53 = vrot.slane %v3182_v54, 5  ;;  %v6465_v4 = vrot.slane %v3434_v18, 9  ;;  %v7043_v11 = vpop.f32.mrf.mxu0 }
 0x1b8   : > { %v3436_v29 = vld [vmem:[#allocation2 + $0x38] sm:$0x1]  ;;  %v7766_v62 = vld [vmem:[#allocation3 + $0x1cc] ss:$36 sps:$4 sm:$0xff]   ;;  %v3188_v41 = vrot.slane %v3186_v8, 4  ;;  %v3194_v26 = vrot.slane %v3192_v19, 5  ;;  %v9033_v5 = vadd.f32 %v7133_v58, %v8930_v16  ;;  %v7136_v54 = vadd.f32 %v7135_v57, %v7134_v27 }
 0x1b9   : > { %v7770_v6 = vld [vmem:[#allocation3 + $0x1c8] ss:$36 sps:$4 sm:$0xff]   ;;  %v3179_v20 = vor.u32 %v3178_v36, %v3175_v55  ;;  %v3540_v14 = vrot.slane %v3435_v56, 5  ;;  %v3543_v33 = vrot.slane %v3436_v29, 5  ;;  %v3437_v49 = vld [vmem:[#allocation2 + $0x3c] sm:$0xe]  ;;  %5735 = vmatprep.mubr.bf16.mxu1 %v7766_v62  ;;  %v7044_v56 = vpop.f32.mrf.mxu0 }
 0x1ba   : > { %v3189_v3 = vor.u32 %v3188_v41, %v3184_v53  ;;  %v3438_v52 = vld [vmem:[#allocation2 + $0x40] sm:$0xf]  ;;  %v3439_v45 = vld [vmem:[#allocation2 + $0x44] sm:$0x1]  ;;  %5736 = vmatmul.mubr.bf16.gmra.mxu1 %v7770_v6  ;;  %v6466_v8 = vrot.slane %v3437_v49, 9  ;;  %v9037_v55 = vadd.f32 %v7136_v54, %v7024_v34  ;;  %v9043_v29 = vadd.f32 %v7044_v56, %v7043_v11 }
 0x1bb   : > { %v3180_v24 = vrot.slane %v3179_v20, 4  ;;  %v3541_v0 = vsel %vm8210_vm13, %v6465_v4, %v3540_v14  ;;  %v3542_v35 = vrot.slane %v3540_v14, 4  ;;  %v7771_v19 = vld [vmem:[#allocation3 + $0x214] ss:$36 sps:$4 sm:$0xff]   ;;  %v7773_v36 = vld [vmem:[#allocation3 + $0x20] ss:$36 sps:$4 sm:$0xff]   ;;  %v7046_v6 = vpop.f32.mrf.mxu0  ;;  %v7137_v20 = vpop.f32.mrf.mxu1 }
 0x1bc   : > { %v3190_v18 = vrot.slane %v3189_v3, 4  ;;  %3672 = vst [vmem:[#allocation3 + $0xb0] sm:$0xf] %v3541_v0  ;;  %v7774_v44 = vld [vmem:[#allocation3 + $0x210] ss:$36 sps:$4 sm:$0xff]   ;;  %5743 = vmatprep.mubr.bf16.mxu1 %v7771_v19  ;;  %v3547_v62 = vrot.slane %v3438_v52, 5  ;;  %7461 = vmatprep.mubr.bf16.mxu0 %v7773_v36 }
 0x1bd   : > { %v3185_v13 = vsel %vm7969_vm5, %v3180_v24, %v3184_v53  ;;  %v3544_v16 = vsel %vm8210_vm13, %v3542_v35, %v3543_v33  ;;  %v7775_v4 = vld [vmem:[#allocation3 + $0x68] ss:$36 sps:$4 sm:$0xff]   ;;  %v3550_v41 = vrot.slane %v3439_v45, 5  ;;  %v2887_v53 = vld [vmem:[#allocation2 + $0x88] sm:$0xf]  ;;  %v7047_v52 = vpop.f32.mrf.mxu0  ;;  %v7138_v45 = vpop.f32.mrf.mxu1 }
 0x1be   : > { %v3195_v27 = vsel %vm7969_vm5, %v3190_v18, %v3194_v26  ;;  %3412 = vst [vmem:[#allocation3 + $0x25c] sm:$0xf] %v3185_v13  ;;  %3673 = vst [vmem:[#allocation3 + $0xd4] sm:$0xf] %v3544_v16  ;;  %v2886_v58 = vld [vmem:[#allocation2 + $0x84] sm:$0xf]  ;;  %7462 = vmatmul.mubr.bf16.vlgmr.msra.gmra.mxu0 %v7775_v4  ;;  %v3548_v49 = vsel %vm8210_vm13, %v6466_v8, %v3547_v62  ;;  %v9049_v35 = vadd.f32 %v7047_v52, %v7046_v6 }
 0x1bf   : > { %3413 = vst [vmem:[#allocation3 + $0x280] sm:$0xf] %v3195_v27  ;;  %2918 = vst [vmem:[#allocation3 + $0x2a0] sm:$0xf] %v2886_v58  ;;  %v2959_v14 = vld [vmem:[#allocation2 + $0x84] sm:$0xf]  ;;  %v7139_v13 = vadd.f32 %v7138_v45, %v7137_v20  ;;  %v7140_v16 = vpop.f32.mrf.mxu1 }
 0x1c0   : > { %v2960_v33 = vld [vmem:[#allocation2 + $0x88] sm:$0xf]  ;;  %v3549_v57 = vrot.slane %v3547_v62, 4  ;;  %2919 = vst [vmem:[#allocation3 + $0x2c4] sm:$0xf] %v2887_v53  ;;  %v3197_v3 = vshrl.u32 %v2959_v14, 16 }
 0x1c1   : > { %v2961_v26 = vld [vmem:[#allocation2 + $0x8c] sm:$0x1]  ;;  %v3200_v34 = vshll.u32 %v2959_v14, 16  ;;  %3674 = vst [vmem:[#allocation3 + $0xf8] sm:$0xf] %v3548_v49  ;;  %v3206_v11 = vshll.u32 %v2960_v33, 16 }
 0x1c2   : > { %v3210_v54 = vshrl.u32 %v2960_v33, 16  ;;  %v3216_v24 = vshll.u32 %v2961_v26, 16  ;;  %v3440_v0 = vld [vmem:[#allocation2 + $0x48] sm:$0xe]  ;;  %v3551_v19 = vsel %vm8210_vm13, %v3549_v57, %v3550_v41  ;;  %v3199_v18 = vrot.slane %v3197_v3, 4  ;;  %5744 = vmatmul.mubr.bf16.gmra.mxu1 %v7774_v44  ;;  %v7141_v41 = vpop.f32.mrf.mxu1 }
 0x1c3   : > { %v3202_v56 = vrot.slane %v3200_v34, 5  ;;  %v3441_v8 = vld [vmem:[#allocation2 + $0x4c] sm:$0xf]  ;;  %v3442_v36 = vld [vmem:[#allocation2 + $0x50] sm:$0x1]  ;;  %v3208_v4 = vrot.slane %v3206_v11, 5  ;;  %v9054_v26 = vadd.f32 %v7139_v13, %v8965_v28  ;;  %v7030_v44 = vadd.f32 %v8959_v61, %v8957_v47 }
 0x1c4   : > { %3675 = vst [vmem:[#allocation3 + $0x11c] sm:$0xf] %v3551_v19  ;;  %v3212_v27 = vrot.slane %v3210_v54, 4  ;;  %v3218_v62 = vrot.slane %v3216_v24, 5  ;;  %v6467_v58 = vrot.slane %v3440_v0, 9  ;;  %v3554_v14 = vrot.slane %v3441_v8, 5 }
 0x1c5   : > { %v3203_v53 = vor.u32 %v3202_v56, %v3199_v18  ;;  %v3557_v33 = vrot.slane %v3442_v36, 5  ;;  %v3443_v6 = vld [vmem:[#allocation2 + $0x54] sm:$0xe]  ;;  %v3444_v49 = vld [vmem:[#allocation2 + $0x58] sm:$0xf]  ;;  %v7142_v20 = vadd.f32 %v7141_v41, %v7140_v16 }
 0x1c6   : > { %v7779_v57 = vld [vmem:[#allocation3 + $0xb0] ss:$36 sps:$4 sm:$0xff]   ;;  %v3213_v3 = vor.u32 %v3212_v27, %v3208_v4  ;;  %v6468_v34 = vrot.slane %v3443_v6, 9  ;;  %v7776_v52 = vld [vmem:[#allocation3 + $0x258] ss:$36 sps:$4 sm:$0xff]   ;;  %v3555_v54 = vsel %vm8210_vm13, %v6467_v58, %v3554_v14  ;;  %v3556_v0 = vrot.slane %v3554_v14, 4 }
 0x1c7   : > { %v7778_v45 = vld [vmem:[#allocation3 + $0x25c] ss:$36 sps:$4 sm:$0xff]   ;;  %v3204_v11 = vrot.slane %v3203_v53, 4  ;;  %7465 = vmatprep.mubr.bf16.mxu0 %v7779_v57  ;;  %3676 = vst [vmem:[#allocation3 + $0x140] sm:$0xf] %v3555_v54  ;;  %v3561_v19 = vrot.slane %v3444_v49, 5  ;;  %v9060_v18 = vadd.f32 %v7142_v20, %v7030_v44  ;;  %v7049_v53 = vpop.f32.mrf.mxu0 }
 0x1c8   : > { %v3214_v24 = vrot.slane %v3213_v3, 4  ;;  %v3445_v28 = vld [vmem:[#allocation2 + $0x5c] sm:$0x1]  ;;  %5751 = vmatprep.mubr.bf16.mxu1 %v7778_v45  ;;  %v2888_v61 = vld [vmem:[#allocation2 + $0x90] sm:$0xf]  ;;  %v3558_v36 = vsel %vm8210_vm13, %v3556_v0, %v3557_v33  ;;  %v7143_v3 = vpop.f32.mrf.mxu1 }
 0x1c9   : > { %v3209_v56 = vsel %vm7969_vm5, %v3204_v11, %v3208_v4  ;;  %v3564_v47 = vrot.slane %v3445_v28, 5  ;;  %v3562_v13 = vsel %vm8210_vm13, %v6468_v34, %v3561_v19  ;;  %v3563_v16 = vrot.slane %v3561_v19, 4  ;;  %v2889_v27 = vld [vmem:[#allocation2 + $0x94] sm:$0xf]  ;;  %2920 = vst [vmem:[#allocation3 + $0x2e8] sm:$0xf] %v2888_v61  ;;  %v7050_v57 = vpop.f32.mrf.mxu0 }
 0x1ca   : > { %v3219_v8 = vsel %vm7969_vm5, %v3214_v24, %v3218_v62  ;;  %3414 = vst [vmem:[#allocation3 + $0x2a4] sm:$0xf] %v3209_v56  ;;  %v2962_v58 = vld [vmem:[#allocation2 + $0x90] sm:$0xf]  ;;  %3677 = vst [vmem:[#allocation3 + $0x164] sm:$0xf] %v3558_v36  ;;  %5752 = vmatmul.mubr.bf16.gmra.mxu1 %v7776_v52  ;;  %v9072_v11 = vadd.f32 %v7050_v57, %v7049_v53  ;;  %v7144_v56 = vpop.f32.mrf.mxu1 }
 0x1cb   : > { %v7780_v14 = vld [vmem:[#allocation3 + $0xf8] ss:$36 sps:$4 sm:$0xff]   ;;  %3415 = vst [vmem:[#allocation3 + $0x2c8] sm:$0xf] %v3219_v8  ;;  %3678 = vst [vmem:[#allocation3 + $0x188] sm:$0xf] %v3562_v13  ;;  %v3565_v62 = vsel %vm8210_vm13, %v3563_v16, %v3564_v47  ;;  %v7052_v19 = vpop.f32.mrf.mxu0 }
 0x1cc   : > { %2921 = vst [vmem:[#allocation3 + $0x30c] sm:$0xf] %v2889_v27  ;;  %v2963_v4 = vld [vmem:[#allocation2 + $0x94] sm:$0xf]  ;;  %v2964_v6 = vld [vmem:[#allocation2 + $0x98] sm:$0x1]  ;;  %7466 = vmatmul.mubr.bf16.gmra.mxu0 %v7780_v14 }
 0x1cd   : > { %v3221_v33 = vshrl.u32 %v2962_v58, 16  ;;  %v3224_v49 = vshll.u32 %v2962_v58, 16  ;;  %v3230_v41 = vshll.u32 %v2963_v4, 16  ;;  %3679 = vst [vmem:[#allocation3 + $0x1ac] sm:$0xf] %v3565_v62  ;;  %v3234_v34 = vshrl.u32 %v2963_v4, 16  ;;  %v7053_v14 = vpop.f32.mrf.mxu0  ;;  %v7146_v62 = vpop.f32.mrf.mxu1 }
 0x1ce   : > { %v3240_v44 = vshll.u32 %v2964_v6, 16  ;;  %v3446_v20 = vld [vmem:[#allocation2 + $0x60] sm:$0xe]  ;;  %v3447_v45 = vld [vmem:[#allocation2 + $0x64] sm:$0xf]  ;;  %v7145_v4 = vadd.f32 %v7144_v56, %v7143_v3 }
 0x1cf   : > { %v3223_v54 = vrot.slane %v3221_v33, 4  ;;  %v3226_v24 = vrot.slane %v3224_v49, 5  ;;  %v3232_v52 = vrot.slane %v3230_v41, 5  ;;  %v3448_v0 = vld [vmem:[#allocation2 + $0x68] sm:$0x1]  ;;  %v6469_v28 = vrot.slane %v3446_v20, 9  ;;  %v7147_v3 = vpop.f32.mrf.mxu1 }
 0x1d0   : > { %v3236_v47 = vrot.slane %v3234_v34, 4  ;;  %v3242_v61 = vrot.slane %v3240_v44, 5  ;;  %v3568_v8 = vrot.slane %v3447_v45, 5  ;;  %v3571_v36 = vrot.slane %v3448_v0, 5  ;;  %v3449_v16 = vld [vmem:[#allocation2 + $0x6c] sm:$0xe]  ;;  %v7055_v45 = vpop.f32.mrf.mxu0 }
 0x1d1   : > { %v3227_v13 = vor.u32 %v3226_v24, %v3223_v54  ;;  %v3450_v27 = vld [vmem:[#allocation2 + $0x70] sm:$0xf]  ;;  %v3451_v58 = vld [vmem:[#allocation2 + $0x74] sm:$0x1]  ;;  %v6470_v49 = vrot.slane %v3449_v16, 9  ;;  %v9076_v44 = vadd.f32 %v7053_v14, %v7052_v19  ;;  %v9079_v54 = vadd.f32 %v7145_v4, %v8976_v32 }
 0x1d2   : > { %v3237_v53 = vor.u32 %v3236_v47, %v3232_v52  ;;  %v3569_v6 = vsel %vm8210_vm13, %v6469_v28, %v3568_v8  ;;  %v3570_v33 = vrot.slane %v3568_v8, 4  ;;  %v2890_v41 = vld [vmem:[#allocation2 + $0x9c] sm:$0xf]  ;;  %v7036_v28 = vadd.f32 %v8997_v37, %v8981_v9  ;;  %v7056_v16 = vpop.f32.mrf.mxu0  ;;  %v2891_v14 = vld [vmem:[#allocation2 + $0xa0] sm:$0xf] }
 0x1d3   : > { %v7781_v57 = vld [vmem:[#allocation3 + $0x2a0] ss:$36 sps:$4 sm:$0xff]   ;;  %v3228_v34 = vrot.slane %v3227_v13, 4  ;;  %3680 = vst [vmem:[#allocation3 + $0x1d0] sm:$0xf] %v3569_v6  ;;  %v7148_v56 = vadd.f32 %v7147_v3, %v7146_v62  ;;  %v3575_v13 = vrot.slane %v3450_v27, 5 }
 0x1d4   : > { %v7783_v20 = vld [vmem:[#allocation3 + $0x2a4] ss:$36 sps:$4 sm:$0xff]   ;;  %2922 = vst [vmem:[#allocation3 + $0x330] sm:$0xf] %v2890_v41  ;;  %v3572_v0 = vsel %vm8210_vm13, %v3570_v33, %v3571_v36  ;;  %v3238_v19 = vrot.slane %v3237_v53, 4  ;;  %v3578_v32 = vrot.slane %v3451_v58, 5  ;;  %v9087_v36 = vadd.f32 %v7056_v16, %v7055_v45  ;;  %v7058_v33 = vpop.f32.mrf.mxu0  ;;  %v7149_v58 = vpop.f32.mrf.mxu1 }
 0x1d5   : > { %v7784_v24 = vld [vmem:[#allocation3 + $0x140] ss:$36 sps:$4 sm:$0xff]   ;;  %5759 = vmatprep.mubr.bf16.mxu1 %v7783_v20  ;;  %v7785_v47 = vld [vmem:[#allocation3 + $0x188] ss:$36 sps:$4 sm:$0xff]   ;;  %v3233_v8 = vsel %vm7969_vm5, %v3228_v34, %v3232_v52  ;;  %3681 = vst [vmem:[#allocation3 + $0x1f4] sm:$0xf] %v3572_v0  ;;  %v9089_v6 = vadd.f32 %v7148_v56, %v7036_v28  ;;  %v3576_v37 = vsel %vm8210_vm13, %v6470_v49, %v3575_v13 }
 0x1d6   : > { %7469 = vmatprep.mubr.bf16.mxu0 %v7784_v24  ;;  %5760 = vmatmul.mubr.bf16.gmra.mxu1 %v7781_v57  ;;  %3416 = vst [vmem:[#allocation3 + $0x2ec] sm:$0xf] %v3233_v8  ;;  %v2965_v4 = vld [vmem:[#allocation2 + $0x9c] sm:$0xf]  ;;  %v3243_v9 = vsel %vm7969_vm5, %v3238_v19, %v3242_v61  ;;  %v3577_v52 = vrot.slane %v3575_v13, 4  ;;  %v7059_v28 = vpop.f32.mrf.mxu0  ;;  %v7150_v56 = vpop.f32.mrf.mxu1 }
 0x1d7   : > { %7470 = vmatmul.mubr.bf16.gmra.mxu0 %v7785_v47  ;;  %2923 = vst [vmem:[#allocation3 + $0x354] sm:$0xf] %v2891_v14  ;;  %v2966_v27 = vld [vmem:[#allocation2 + $0xa0] sm:$0xf]  ;;  %v2967_v62 = vld [vmem:[#allocation2 + $0xa4] sm:$0x1] }
 0x1d8   : > { %v3245_v53 = vshrl.u32 %v2965_v4, 16  ;;  %3417 = vst [vmem:[#allocation3 + $0x310] sm:$0xf] %v3243_v9  ;;  %3682 = vst [vmem:[#allocation3 + $0x218] sm:$0xf] %v3576_v37  ;;  %v3248_v41 = vshll.u32 %v2965_v4, 16  ;;  %v3579_v61 = vsel %vm8210_vm13, %v3577_v52, %v3578_v32  ;;  %v9097_v37 = vadd.f32 %v7059_v28, %v7058_v33  ;;  %v7152_v32 = vpop.f32.mrf.mxu1 }
 0x1d9   : > { %v3254_v57 = vshll.u32 %v2966_v27, 16  ;;  %v3258_v20 = vshrl.u32 %v2966_v27, 16  ;;  %v3264_v34 = vshll.u32 %v2967_v62, 16  ;;  %v3452_v45 = vld [vmem:[#allocation2 + $0x78] sm:$0xe]  ;;  %v7213_v27 = vpop.f32.mrf.mxu0  ;;  %v7151_v62 = vadd.f32 %v7150_v56, %v7149_v58 }
 0x1da   : > { %v3247_v3 = vrot.slane %v3245_v53, 4  ;;  %v3453_v24 = vld [vmem:[#allocation2 + $0x7c] sm:$0xf]  ;;  %v3454_v49 = vld [vmem:[#allocation2 + $0x80] sm:$0x1]  ;;  %v6471_v0 = vrot.slane %v3452_v45, 9 }
 0x1db   : > { %3683 = vst [vmem:[#allocation3 + $0x23c] sm:$0xf] %v3579_v61  ;;  %v3250_v47 = vrot.slane %v3248_v41, 5  ;;  %v3256_v8 = vrot.slane %v3254_v57, 5  ;;  %v3260_v19 = vrot.slane %v3258_v20, 4  ;;  %v3266_v13 = vrot.slane %v3264_v34, 5 }
 0x1dc   : > { %v3582_v16 = vrot.slane %v3453_v24, 5  ;;  %v3585_v14 = vrot.slane %v3454_v49, 5  ;;  %v3455_v4 = vld [vmem:[#allocation2 + $0x84] sm:$0xe]  ;;  %v3456_v9 = vld [vmem:[#allocation2 + $0x88] sm:$0xf]  ;;  %v7214_v24 = vpop.f32.mrf.mxu0  ;;  %v7153_v49 = vpop.f32.mrf.mxu1 }
 0x1dd   : > { %v7789_v52 = vld [vmem:[#allocation3 + $0x1d0] ss:$36 sps:$4 sm:$0xff]   ;;  %v3251_v53 = vor.u32 %v3250_v47, %v3247_v3  ;;  %v3261_v60 = vor.u32 %v3260_v19, %v3256_v8  ;;  %v6472_v57 = vrot.slane %v3455_v4, 9  ;;  %v3589_v20 = vrot.slane %v3456_v9, 5  ;;  %v7786_v3 = vld [vmem:[#allocation3 + $0x2e8] ss:$36 sps:$4 sm:$0xff]  }
 0x1de   : > { %v3457_v45 = vld [vmem:[#allocation2 + $0x8c] sm:$0x1]  ;;  %v3583_v61 = vsel %vm8210_vm13, %v6471_v0, %v3582_v16  ;;  %v3584_v41 = vrot.slane %v3582_v16, 4  ;;  %v2892_v34 = vld [vmem:[#allocation2 + $0xa8] sm:$0xf]  ;;  %7473 = vmatprep.mubr.bf16.mxu0 %v7789_v52  ;;  %v7215_v56 = vadd.f32 %v7214_v24, %v7213_v27  ;;  %v7216_v4 = vpop.f32.mrf.mxu0  ;;  %v9106_v9 = vadd.f32 %v7151_v62, %v9014_v23 }
 0x1df   : > { %v3252_v21 = vrot.slane %v3251_v53, 4  ;;  %v3262_v33 = vrot.slane %v3261_v60, 4  ;;  %3684 = vst [vmem:[#allocation3 + $0x260] sm:$0xf] %v3583_v61  ;;  %v3592_v28 = vrot.slane %v3457_v45, 5  ;;  %v3590_v0 = vsel %vm8210_vm13, %v6472_v57, %v3589_v20 }
 0x1e0   : > { %v2893_v58 = vld [vmem:[#allocation2 + $0xac] sm:$0xf]  ;;  %2924 = vst [vmem:[#allocation3 + $0x378] sm:$0xf] %v2892_v34  ;;  %v7788_v47 = vld [vmem:[#allocation3 + $0x2ec] ss:$36 sps:$4 sm:$0xff]   ;;  %v3586_v19 = vsel %vm8210_vm13, %v3584_v41, %v3585_v14  ;;  %v9113_v14 = vadd.f32 %v7215_v56, %v8933_v48  ;;  %v7154_v45 = vadd.f32 %v7153_v49, %v7152_v32 }
 0x1e1   : > { %v3591_v16 = vrot.slane %v3589_v20, 4  ;;  %2925 = vst [vmem:[#allocation3 + $0x39c] sm:$0xf] %v2893_v58  ;;  %v3257_v60 = vsel %vm7969_vm5, %v3252_v21, %v3256_v8  ;;  %v3267_v27 = vsel %vm7969_vm5, %v3262_v33, %v3266_v13  ;;  %3685 = vst [vmem:[#allocation3 + $0x284] sm:$0xf] %v3586_v19  ;;  %5767 = vmatprep.mubr.bf16.mxu1 %v7788_v47  ;;  %v7217_v21 = vpop.f32.mrf.mxu0 }
 0x1e2   : > { %3686 = vst [vmem:[#allocation3 + $0x2a8] sm:$0xf] %v3590_v0  ;;  %v2968_v52 = vld [vmem:[#allocation2 + $0xa8] sm:$0xf]  ;;  %v2969_v53 = vld [vmem:[#allocation2 + $0xac] sm:$0xf]  ;;  %5768 = vmatmul.mubr.bf16.gmra.mxu1 %v7786_v3  ;;  %v7218_v49 = vadd.f32 %v7217_v21, %v7216_v4  ;;  %v9118_v58 = vadd.f32 %v7154_v45, %v9025_v30 }
 0x1e3   : > { %9497 = vst [vmem:[#allocation7_spill] sm:$0xff] %v9113_v14  ;;  %v7790_v61 = vld [vmem:[#allocation3 + $0x218] ss:$36 sps:$4 sm:$0xff]   ;;  %3418 = vst [vmem:[#allocation3 + $0x334] sm:$0xf] %v3257_v60  ;;  %v3593_v23 = vsel %vm8210_vm13, %v3591_v16, %v3592_v28  ;;  %v3269_v8 = vshrl.u32 %v2968_v52, 16  ;;  %v7219_v33 = vpop.f32.mrf.mxu0 }
 0x1e4   : > { %3419 = vst [vmem:[#allocation3 + $0x358] sm:$0xf] %v3267_v27  ;;  %v2970_v62 = vld [vmem:[#allocation2 + $0xb0] sm:$0x1]  ;;  %3687 = vst [vmem:[#allocation3 + $0x2cc] sm:$0xf] %v3593_v23  ;;  %7474 = vmatmul.mubr.bf16.gmra.mxu0 %v7790_v61  ;;  %v9121_v21 = vadd.f32 %v7218_v49, %v8942_v1 }
 0x1e5   : > { %v3272_v13 = vshll.u32 %v2968_v52, 16  ;;  %v3278_v41 = vshll.u32 %v2969_v53, 16  ;;  %v3282_v57 = vshrl.u32 %v2969_v53, 16  ;;  %v3458_v20 = vld [vmem:[#allocation2 + $0x90] sm:$0xe]  ;;  %v3288_v48 = vshll.u32 %v2970_v62, 16  ;;  %v7220_v52 = vpop.f32.mrf.mxu0  ;;  %v7155_v53 = vpop.f32.mrf.mxu1 }
 0x1e6   : > { %v3459_v34 = vld [vmem:[#allocation2 + $0x94] sm:$0xf]  ;;  %v3460_v32 = vld [vmem:[#allocation2 + $0x98] sm:$0x1]  ;;  %v6473_v24 = vrot.slane %v3458_v20, 9  ;;  %v3271_v28 = vrot.slane %v3269_v8, 4  ;;  %v7221_v30 = vadd.f32 %v7220_v52, %v7219_v33 }
 0x1e7   : > { %v3274_v56 = vrot.slane %v3272_v13, 5  ;;  %v3280_v47 = vrot.slane %v3278_v41, 5  ;;  %v3284_v3 = vrot.slane %v3282_v57, 4  ;;  %v3461_v19 = vld [vmem:[#allocation2 + $0x9c] sm:$0xe]  ;;  %v3290_v0 = vrot.slane %v3288_v48, 5  ;;  %v7222_v13 = vpop.f32.mrf.mxu0  ;;  %v7156_v41 = vpop.f32.mrf.mxu1 }
 0x1e8   : > { %v3596_v16 = vrot.slane %v3459_v34, 5  ;;  %v3599_v60 = vrot.slane %v3460_v32, 5  ;;  %v6474_v27 = vrot.slane %v3461_v19, 9  ;;  %v3462_v62 = vld [vmem:[#allocation2 + $0xa0] sm:$0xf]  ;;  %9498 = vst [vmem:[#allocation8_spill] sm:$0xff] %v9121_v21  ;;  %v9126_v32 = vadd.f32 %v7221_v30, %v8947_v51 }
 0x1e9   : > { %v3275_v61 = vor.u32 %v3274_v56, %v3271_v28  ;;  %v3285_v23 = vor.u32 %v3284_v3, %v3280_v47  ;;  %v3463_v20 = vld [vmem:[#allocation2 + $0xa4] sm:$0x1]  ;;  %v2894_v4 = vld [vmem:[#allocation2 + $0xb4] sm:$0xf]  ;;  %v7794_v45 = vld [vmem:[#allocation3 + $0x260] ss:$36 sps:$4 sm:$0xff]   ;;  %v7157_v28 = vadd.f32 %v7156_v41, %v7155_v53  ;;  %v7223_v49 = vpop.f32.mrf.mxu0  ;;  %v9128_v33 = vpop.f32.mrf.mxu1 }
 0x1ea   : > { %v3597_v8 = vsel %vm8210_vm13, %v6473_v24, %v3596_v16  ;;  %2926 = vst [vmem:[#allocation3 + $0x3c0] sm:$0xf] %v2894_v4  ;;  %v7791_v57 = vld [vmem:[#allocation3 + $0x330] ss:$36 sps:$4 sm:$0xff]   ;;  %9499 = vst [vmem:[#allocation9_spill] sm:$0xff] %v9126_v32  ;;  %7477 = vmatprep.mubr.bf16.mxu0 %v7794_v45  ;;  %v3598_v19 = vrot.slane %v3596_v16, 4  ;;  %v7224_v45 = vadd.f32 %v7223_v49, %v7222_v13 }
 0x1eb   : > { %v3276_v48 = vrot.slane %v3275_v61, 4  ;;  %v3286_v34 = vrot.slane %v3285_v23, 4  ;;  %3688 = vst [vmem:[#allocation3 + $0x2f0] sm:$0xf] %v3597_v8  ;;  %v7793_v56 = vld [vmem:[#allocation3 + $0x334] ss:$36 sps:$4 sm:$0xff]   ;;  %v9135_v8 = vadd.f32 %v7157_v28, %v9043_v29 }
 0x1ec   : > { %v7795_v1 = vld [vmem:[#allocation3 + $0x2a8] ss:$36 sps:$4 sm:$0xff]   ;;  %v3603_v52 = vrot.slane %v3462_v62, 5  ;;  %v2895_v61 = vld [vmem:[#allocation2 + $0xb8] sm:$0xf]  ;;  %5775 = vmatprep.mubr.bf16.mxu1 %v7793_v56  ;;  %v3606_v51 = vrot.slane %v3463_v20, 5 }
 0x1ed   : > { %v3281_v24 = vsel %vm7969_vm5, %v3276_v48, %v3280_v47  ;;  %v3291_v3 = vsel %vm7969_vm5, %v3286_v34, %v3290_v0  ;;  %v2971_v23 = vld [vmem:[#allocation2 + $0xb4] sm:$0xf]  ;;  %7478 = vmatmul.mubr.bf16.gmra.mxu0 %v7795_v1  ;;  %2927 = vst [vmem:[#allocation3 + $0x3e4] sm:$0xf] %v2895_v61  ;;  %v2972_v53 = vld [vmem:[#allocation2 + $0xb8] sm:$0xf]  ;;  %v7159_v47 = vpop.f32.mrf.mxu1  ;;  %5776 = vmatmul.mubr.bf16.gmra.mxu1 %v7791_v57  ;;  %v7225_v34 = vpop.f32.mrf.mxu0 }
 0x1ee   : > { %3420 = vst [vmem:[#allocation3 + $0x37c] sm:$0xf] %v3281_v24  ;;  %3421 = vst [vmem:[#allocation3 + $0x3a0] sm:$0xf] %v3291_v3  ;;  %v2973_v4 = vld [vmem:[#allocation2 + $0xbc] sm:$0x1]  ;;  %v3600_v0 = vsel %vm8210_vm13, %v3598_v19, %v3599_v60  ;;  %v3604_v16 = vsel %vm8210_vm13, %v6474_v27, %v3603_v52 }
 0x1ef   : > { %v3293_v30 = vshrl.u32 %v2971_v23, 16  ;;  %v3605_v62 = vrot.slane %v3603_v52, 4  ;;  %v3296_v41 = vshll.u32 %v2971_v23, 16  ;;  %v3464_v48 = vld [vmem:[#allocation2 + $0xa8] sm:$0xe]  ;;  %v3302_v13 = vshll.u32 %v2972_v53, 16  ;;  %v7161_v49 = vpop.f32.mrf.mxu1  ;;  %v7226_v19 = vpop.f32.mrf.mxu0 }
 0x1f0   : > { %v3465_v20 = vld [vmem:[#allocation2 + $0xac] sm:$0xf]  ;;  %3689 = vst [vmem:[#allocation3 + $0x314] sm:$0xf] %v3600_v0  ;;  %3690 = vst [vmem:[#allocation3 + $0x338] sm:$0xf] %v3604_v16 }
 0x1f1   : > { %v3295_v56 = vrot.slane %v3293_v30, 4  ;;  %v3306_v1 = vshrl.u32 %v2972_v53, 16  ;;  %v3312_v29 = vshll.u32 %v2973_v4, 16  ;;  %v3466_v28 = vld [vmem:[#allocation2 + $0xb0] sm:$0x1]  ;;  %v3607_v57 = vsel %vm8210_vm13, %v3605_v62, %v3606_v51  ;;  %v7162_v16 = vpop.f32.mrf.mxu1  ;;  %v7228_v51 = vpop.f32.mrf.mxu0 }
 0x1f2   : > { %v3298_v60 = vrot.slane %v3296_v41, 5  ;;  %v6475_v24 = vrot.slane %v3464_v48, 9  ;;  %v3610_v3 = vrot.slane %v3465_v20, 5  ;;  %v3467_v27 = vld [vmem:[#allocation2 + $0xb4] sm:$0xe]  ;;  %v3304_v52 = vrot.slane %v3302_v13, 5 }
 0x1f3   : > { %3691 = vst [vmem:[#allocation3 + $0x35c] sm:$0xf] %v3607_v57  ;;  %v3308_v61 = vrot.slane %v3306_v1, 4  ;;  %v3314_v23 = vrot.slane %v3312_v29, 5  ;;  %v3613_v0 = vrot.slane %v3466_v28, 5  ;;  %v6476_v32 = vrot.slane %v3467_v27, 9  ;;  %v7164_v1 = vpop.f32.mrf.mxu1 }
 0x1f4   : > { %v3299_v30 = vor.u32 %v3298_v60, %v3295_v56  ;;  %v3611_v53 = vsel %vm8210_vm13, %v6475_v24, %v3610_v3  ;;  %v3612_v4 = vrot.slane %v3610_v3, 4  ;;  %v3468_v21 = vld [vmem:[#allocation2 + $0xb8] sm:$0xf]  ;;  %v3469_v14 = vld [vmem:[#allocation2 + $0xbc] sm:$0x1]  ;;  %v9146_v13 = vadd.f32 %v7224_v45, %v8968_v15  ;;  %v7229_v3 = vpop.f32.mrf.mxu0 }
 0x1f5   : > { %v3309_v62 = vor.u32 %v3308_v61, %v3304_v52  ;;  %3692 = vst [vmem:[#allocation3 + $0x380] sm:$0xf] %v3611_v53  ;;  %v3617_v41 = vrot.slane %v3468_v21, 5  ;;  %v3620_v48 = vrot.slane %v3469_v14, 5  ;;  %v2896_v20 = vld [vmem:[#allocation2 + $0xc0] sm:$0xf]  ;;  %v7227_v60 = vadd.f32 %v7226_v19, %v7225_v34  ;;  %v7165_v34 = vpop.f32.mrf.mxu1 }
 0x1f6   : > { %v2897_v57 = vld [vmem:[#allocation2 + $0xc4] sm:$0xf]  ;;  %v7796_v29 = vld [vmem:[#allocation3 + $0x378] ss:$36 sps:$4 sm:$0xff]   ;;  %v3300_v56 = vrot.slane %v3299_v30, 4  ;;  %v3614_v28 = vsel %vm8210_vm13, %v3612_v4, %v3613_v0  ;;  %v7160_v24 = vadd.f32 %v7159_v47, %v9128_v33  ;;  %v7230_v61 = vadd.f32 %v7229_v3, %v7228_v51 }
 0x1f7   : > { %2928 = vst [vmem:[#allocation3 + $0x408] sm:$0xf] %v2896_v20  ;;  %2929 = vst [vmem:[#allocation3 + $0x42c] sm:$0xf] %v2897_v57  ;;  %v7798_v27 = vld [vmem:[#allocation3 + $0x37c] ss:$36 sps:$4 sm:$0xff]   ;;  %v3618_v14 = vsel %vm8210_vm13, %v6476_v32, %v3617_v41  ;;  %v9156_v0 = vadd.f32 %v7227_v60, %v8979_v2  ;;  %v7163_v47 = vadd.f32 %v7162_v16, %v7161_v49 }
 0x1f8   : > { %v3310_v21 = vrot.slane %v3309_v62, 4  ;;  %3693 = vst [vmem:[#allocation3 + $0x3a4] sm:$0xf] %v3614_v28  ;;  %v3619_v15 = vrot.slane %v3617_v41, 4  ;;  %v2974_v45 = vld [vmem:[#allocation2 + $0xc0] sm:$0xf]  ;;  %v3305_v30 = vsel %vm7969_vm5, %v3300_v56, %v3304_v52  ;;  %v9159_v33 = vadd.f32 %v7160_v24, %v9049_v35  ;;  %5783 = vmatprep.mubr.bf16.mxu1 %v7798_v27  ;;  %v7231_v41 = vpop.f32.mrf.mxu0 }
 0x1f9   : > { %v7799_v53 = vld [vmem:[#allocation3 + $0x2f0] ss:$36 sps:$4 sm:$0xff]   ;;  %3694 = vst [vmem:[#allocation3 + $0x3c8] sm:$0xf] %v3618_v14  ;;  %3422 = vst [vmem:[#allocation3 + $0x3c4] sm:$0xf] %v3305_v30  ;;  %5784 = vmatmul.mubr.bf16.gmra.mxu1 %v7796_v29  ;;  %v9166_v16 = vadd.f32 %v7230_v61, %v8984_v25  ;;  %v7166_v28 = vadd.f32 %v7165_v34, %v7164_v1 }
 0x1fa   : > { %v3315_v32 = vsel %vm7969_vm5, %v3310_v21, %v3314_v23  ;;  %v3621_v19 = vsel %vm8210_vm13, %v3619_v15, %v3620_v48  ;;  %v2975_v4 = vld [vmem:[#allocation2 + $0xc4] sm:$0xf]  ;;  %v2976_v51 = vld [vmem:[#allocation2 + $0xc8] sm:$0x1]  ;;  %v3317_v52 = vshrl.u32 %v2974_v45, 16  ;;  %v3320_v62 = vshll.u32 %v2974_v45, 16  ;;  %7481 = vmatprep.mubr.bf16.mxu0 %v7799_v53  ;;  %v7232_v3 = vpop.f32.mrf.mxu0  ;;  %v7167_v45 = vpop.f32.mrf.mxu1 }
 0x1fb   : > { %v7800_v2 = vld [vmem:[#allocation3 + $0x338] ss:$36 sps:$4 sm:$0xff]   ;;  %3423 = vst [vmem:[#allocation3 + $0x3e8] sm:$0xf] %v3315_v32  ;;  %3695 = vst [vmem:[#allocation3 + $0x3ec] sm:$0xf] %v3621_v19  ;;  %v9169_v23 = vadd.f32 %v7163_v47, %v9072_v11  ;;  %v7233_v30 = vadd.f32 %v7232_v3, %v7231_v41  ;;  %v9172_v32 = vadd.f32 %v7166_v28, %v9076_v44 }
 0x1fc   : > { %v3326_v35 = vshll.u32 %v2975_v4, 16  ;;  %v3330_v49 = vshrl.u32 %v2975_v4, 16  ;;  %v3319_v20 = vrot.slane %v3317_v52, 4  ;;  %v3322_v48 = vrot.slane %v3320_v62, 5  ;;  %v3470_v56 = vld [vmem:[#allocation2 + $0xc0] sm:$0xe]  ;;  %7482 = vmatmul.mubr.bf16.gmra.mxu0 %v7800_v2  ;;  %v7234_v47 = vpop.f32.mrf.mxu0 }
 0x1fd   : > { %v3336_v57 = vshll.u32 %v2976_v51, 16  ;;  %v3471_v24 = vld [vmem:[#allocation2 + $0xc4] sm:$0xf]  ;;  %v3472_v14 = vld [vmem:[#allocation2 + $0xc8] sm:$0x1]  ;;  %v6477_v15 = vrot.slane %v3470_v56, 9  ;;  %v7168_v51 = vpop.f32.mrf.mxu1 }
 0x1fe   : > { %v3328_v60 = vrot.slane %v3326_v35, 5  ;;  %v3332_v29 = vrot.slane %v3330_v49, 4  ;;  %v3323_v27 = vor.u32 %v3322_v48, %v3319_v20  ;;  %v3624_v25 = vrot.slane %v3471_v24, 5  ;;  %v3473_v4 = vld [vmem:[#allocation2 + $0xcc] sm:$0xe]  ;;  %v7235_v49 = vpop.f32.mrf.mxu0 }
 0x1ff   : > { %v3338_v21 = vrot.slane %v3336_v57, 5  ;;  %v7804_v61 = vld [vmem:[#allocation3 + $0x380] ss:$36 sps:$4 sm:$0xff]   ;;  %v3627_v11 = vrot.slane %v3472_v14, 5  ;;  %v3474_v62 = vld [vmem:[#allocation2 + $0xd0] sm:$0xf]  ;;  %v9177_v35 = vadd.f32 %v7233_v30, %v8995_v17  ;;  %v7169_v41 = vadd.f32 %v7168_v51, %v7167_v45 }
 0x200   : > { %v3333_v53 = vor.u32 %v3332_v29, %v3328_v60  ;;  %v3324_v1 = vrot.slane %v3323_v27, 4  ;;  %v3625_v34 = vsel %vm8210_vm13, %v6477_v15, %v3624_v25  ;;  %v3626_v19 = vrot.slane %v3624_v25, 4  ;;  %7485 = vmatprep.mubr.bf16.mxu0 %v7804_v61  ;;  %v3475_v2 = vld [vmem:[#allocation2 + $0xd4] sm:$0x1]  ;;  %v7801_v20 = vld [vmem:[#allocation3 + $0x3c0] ss:$36 sps:$4 sm:$0xff]   ;;  %v7170_v29 = vpop.f32.mrf.mxu1 }
 0x201   : > { %3696 = vst [vmem:[#allocation3 + $0x410] sm:$0xf] %v3625_v34  ;;  %v6478_v56 = vrot.slane %v3473_v4, 9  ;;  %v7236_v28 = vadd.f32 %v7235_v49, %v7234_v47  ;;  %v3631_v17 = vrot.slane %v3474_v62, 5  ;;  %v3634_v27 = vrot.slane %v3475_v2, 5 }
 0x202   : > { %v3334_v52 = vrot.slane %v3333_v53, 4  ;;  %v7803_v44 = vld [vmem:[#allocation3 + $0x3c4] ss:$36 sps:$4 sm:$0xff]   ;;  %v3329_v48 = vsel %vm7969_vm5, %v3324_v1, %v3328_v60  ;;  %v3628_v57 = vsel %vm8210_vm13, %v3626_v19, %v3627_v11  ;;  %v9186_v14 = vadd.f32 %v7169_v41, %v9087_v36  ;;  %v2898_v60 = vld [vmem:[#allocation2 + $0xcc] sm:$0xf]  ;;  %v7171_v61 = vpop.f32.mrf.mxu1 }
 0x203   : > { %v7805_v24 = vld [vmem:[#allocation3 + $0x3c8] ss:$36 sps:$4 sm:$0xff]   ;;  %3424 = vst [vmem:[#allocation3 + $0x40c] sm:$0xf] %v3329_v48  ;;  %3697 = vst [vmem:[#allocation3 + $0x434] sm:$0xf] %v3628_v57  ;;  %5791 = vmatprep.mubr.bf16.mxu1 %v7803_v44  ;;  %v9189_v45 = vadd.f32 %v7236_v28, %v9002_v12  ;;  %v7172_v47 = vadd.f32 %v7171_v61, %v7170_v29  ;;  %v7237_v12 = vpop.f32.mrf.mxu0 }
 0x204   : > { %v3339_v3 = vsel %vm7969_vm5, %v3334_v52, %v3338_v21  ;;  %v2899_v15 = vld [vmem:[#allocation2 + $0xd0] sm:$0xf]  ;;  %v2977_v25 = vld [vmem:[#allocation2 + $0xcc] sm:$0xf]  ;;  %5792 = vmatmul.mubr.bf16.gmra.mxu1 %v7801_v20  ;;  %7486 = vmatmul.mubr.bf16.gmra.mxu0 %v7805_v24  ;;  %v3632_v21 = vsel %vm8210_vm13, %v6478_v56, %v3631_v17  ;;  %v3633_v53 = vrot.slane %v3631_v17, 4  ;;  %v7173_v2 = vpop.f32.mrf.mxu1 }
 0x205   : > { %3425 = vst [vmem:[#allocation3 + $0x430] sm:$0xf] %v3339_v3  ;;  %2930 = vst [vmem:[#allocation3 + $0x450] sm:$0xf] %v2898_v60  ;;  %v2978_v11 = vld [vmem:[#allocation2 + $0xd0] sm:$0xf]  ;;  %v9196_v62 = vadd.f32 %v7172_v47, %v9097_v37  ;;  %v7238_v44 = vpop.f32.mrf.mxu0 }
 0x206   : > { %2931 = vst [vmem:[#allocation3 + $0x474] sm:$0xf] %v2899_v15  ;;  %v2979_v36 = vld [vmem:[#allocation2 + $0xd4] sm:$0x1]  ;;  %v3341_v30 = vshrl.u32 %v2977_v25, 16  ;;  %v3344_v1 = vshll.u32 %v2977_v25, 16  ;;  %v3635_v51 = vsel %vm8210_vm13, %v3633_v53, %v3634_v27  ;;  %v7239_v48 = vadd.f32 %v7238_v44, %v7237_v12  ;;  %v7174_v57 = vpop.f32.mrf.mxu1 }
 0x207   : > { %3698 = vst [vmem:[#allocation3 + $0x458] sm:$0xf] %v3632_v21  ;;  %v3350_v34 = vshll.u32 %v2978_v11, 16  ;;  %v3354_v19 = vshrl.u32 %v2978_v11, 16  ;;  %v3360_v4 = vshll.u32 %v2979_v36, 16  ;;  %v7240_v3 = vpop.f32.mrf.mxu0  ;;  %v7175_v17 = vadd.f32 %v7174_v57, %v7173_v2 }
 0x208   : > { %v3343_v52 = vrot.slane %v3341_v30, 4  ;;  %3699 = vst [vmem:[#allocation3 + $0x47c] sm:$0xf] %v3635_v51  ;;  %v3346_v49 = vrot.slane %v3344_v1, 5  ;;  %v7806_v7 = vld [vmem:[#allocation3 + $0x408] ss:$36 sps:$4 sm:$0xff]   ;;  %v9199_v60 = vadd.f32 %v7239_v48, %v9021_v50  ;;  %v7176_v37 = vpop.f32.mrf.mxu1  ;;  %v7066_v36 = vadd.f32 %v8811_v42, %v8805_v46 }
 0x209   : > { %v3352_v41 = vrot.slane %v3350_v34, 5  ;;  %v3356_v20 = vrot.slane %v3354_v19, 4  ;;  %v3362_v24 = vrot.slane %v3360_v4, 5  ;;  %v7241_v61 = vpop.f32.mrf.mxu0  ;;  %v9202_v21 = vadd.f32 %v7175_v17, %v8779_v22 }
 0x20a   : > { %v7809_v56 = vld [vmem:[#allocation3 + $0x410] ss:$36 sps:$4 sm:$0xff]   ;;  %v3347_v28 = vor.u32 %v3346_v49, %v3343_v52  ;;  %v7242_v53 = vadd.f32 %v7241_v61, %v7240_v3  ;;  %v7177_v11 = vpop.f32.mrf.mxu1 }
 0x20b   : > { %v3357_v29 = vor.u32 %v3356_v20, %v3352_v41  ;;  %7489 = vmatprep.mubr.bf16.mxu0 %v7809_v56  ;;  %v7178_v47 = vadd.f32 %v7177_v11, %v7176_v37  ;;  %v7243_v34 = vpop.f32.mrf.mxu0 }
 0x20c   : > { %v7808_v27 = vld [vmem:[#allocation3 + $0x40c] ss:$36 sps:$4 sm:$0xff]   ;;  %v3348_v15 = vrot.slane %v3347_v28, 4  ;;  %v9211_v22 = vadd.f32 %v7242_v53, %v9028_v63  ;;  %v7179_v40 = vpop.f32.mrf.mxu1 }
 0x20d   : > { %v3358_v25 = vrot.slane %v3357_v29, 4  ;;  %5799 = vmatprep.mubr.bf16.mxu1 %v7808_v27  ;;  %v9213_v19 = vadd.f32 %v7178_v47, %v7066_v36  ;;  %v7244_v4 = vpop.f32.mrf.mxu0  ;;  %v7811_v52 = vld [vmem:[#allocation3 + $0x450] ss:$36 sps:$4 sm:$0xff]  }
 0x20e   : > { %5800 = vmatmul.mubr.bf16.gmra.mxu1 %v7806_v7  ;;  %v3353_v30 = vsel %vm7969_vm5, %v3348_v15, %v3352_v41  ;;  %v7245_v46 = vadd.f32 %v7244_v4, %v7243_v34  ;;  %v7180_v41 = vpop.f32.mrf.mxu1 }
 0x20f   : > { %v3363_v50 = vsel %vm7969_vm5, %v3358_v25, %v3362_v24  ;;  %v7810_v1 = vld [vmem:[#allocation3 + $0x458] ss:$36 sps:$4 sm:$0xff]   ;;  %3426 = vst [vmem:[#allocation3 + $0x454] sm:$0xf] %v3353_v30  ;;  %v7246_v42 = vpop.f32.mrf.mxu0  ;;  %v7181_v63 = vadd.f32 %v7180_v41, %v7179_v40 }
 0x210   : > { %3427 = vst [vmem:[#allocation3 + $0x478] sm:$0xf] %v3363_v50  ;;  %7490 = vmatmul.mubr.bf16.gmra.mxu0 %v7810_v1  ;;  %v9216_v12 = vadd.f32 %v7245_v46, %v9033_v5  ;;  %v7182_v44 = vpop.f32.mrf.mxu1  ;;  %v7072_v5 = vadd.f32 %v8848_v31, %v8840_v39  ;;  %v7078_v39 = vadd.f32 %v8876_v10, %v8874_v43 }
 0x211   : > { %v7247_v51 = vpop.f32.mrf.mxu0  ;;  %v9222_v48 = vadd.f32 %v7181_v63, %v8827_v59 }
 0x212   : > { %v7248_v2 = vadd.f32 %v7247_v51, %v7246_v42  ;;  %v7183_v56 = vpop.f32.mrf.mxu1  ;;  %v9500_v42 = vld [vmem:[#allocation6_spill] sm:$0xff] }
 0x213   : > { %v7249_v57 = vpop.f32.mrf.mxu0  ;;  %v7184_v28 = vadd.f32 %v7183_v56, %v7182_v44 }
 0x214   : > { %v9219_v20 = vadd.f32 %v7248_v2, %v9037_v55  ;;  %v7185_v24 = vpop.f32.mrf.mxu1  ;;  %v9501_v2 = vld [vmem:[#allocation4_spill] sm:$0xff] }
 0x215   : > { %v7250_v29 = vpop.f32.mrf.mxu0  ;;  %v9226_v17 = vadd.f32 %v7184_v28, %v7072_v5 }
 0x216   : > { %v7251_v3 = vadd.f32 %v7250_v29, %v7249_v57  ;;  %v7186_v7 = vpop.f32.mrf.mxu1 }
 0x217   : > { %v7813_v49 = vld [vmem:[#allocation3 + $0x454] ss:$36 sps:$4 sm:$0xff]   ;;  %v7252_v55 = vpop.f32.mrf.mxu0  ;;  %v7187_v37 = vadd.f32 %v7186_v7, %v7185_v24 }
 0x218   : > { %5807 = vmatprep.mubr.bf16.mxu1 %v7813_v49  ;;  %v9229_v27 = vadd.f32 %v7251_v3, %v9054_v26  ;;  %v7188_v59 = vpop.f32.mrf.mxu1  ;;  %v9502_v49 = vld [vmem:[#allocation5_spill] sm:$0xff] }
 0x219   : > { %5808 = vmatmul.mubr.bf16.gmra.mxu1 %v7811_v52  ;;  %v7253_v15 = vpop.f32.mrf.mxu0  ;;  %v9232_v61 = vadd.f32 %v7187_v37, %v8856_v38  ;;  %v7084_v41 = vadd.f32 %v9502_v49, %v9501_v2 }
 0x21a   : > { %v7254_v25 = vadd.f32 %v7253_v15, %v7252_v55  ;;  %v7189_v53 = vpop.f32.mrf.mxu1 }
 0x21b   : > { %v7255_v11 = vpop.f32.mrf.mxu0  ;;  %v7190_v36 = vadd.f32 %v7189_v53, %v7188_v59 }
 0x21c   : > { %v9237_v31 = vadd.f32 %v7254_v25, %v9060_v18  ;;  %v7191_v4 = vpop.f32.mrf.mxu1 }
 0x21d   : > { %v7256_v30 = vpop.f32.mrf.mxu0  ;;  %v9239_v50 = vadd.f32 %v7190_v36, %v7078_v39 }
 0x21e   : > { %v7257_v26 = vadd.f32 %v7256_v30, %v7255_v11  ;;  %v7192_v43 = vpop.f32.mrf.mxu1 }
 0x21f   : > { %v7258_v47 = vpop.f32.mrf.mxu0  ;;  %v7193_v10 = vadd.f32 %v7192_v43, %v7191_v4 }
 0x220   : > { %v9242_v1 = vadd.f32 %v7257_v26, %v9079_v54  ;;  %v7194_v18 = vpop.f32.mrf.mxu1 }
 0x221   : > { %v7259_v34 = vpop.f32.mrf.mxu0  ;;  %v9248_v51 = vadd.f32 %v7193_v10, %v9500_v42 }
 0x222   : > { %v7260_v38 = vadd.f32 %v7259_v34, %v7258_v47  ;;  %v7195_v52 = vpop.f32.mrf.mxu1 }
 0x223   : > { %v7261_v40 = vpop.f32.mrf.mxu0  ;;  %v7196_v63 = vadd.f32 %v7195_v52, %v7194_v18 }
 0x224   : > { %v9245_v46 = vadd.f32 %v7260_v38, %v9089_v6 }
 0x225   : > { %v7262_v54 = vpop.f32.mrf.mxu0  ;;  %v9252_v57 = vadd.f32 %v7196_v63, %v7084_v41 }
 0x226   : > { %v7263_v44 = vadd.f32 %v7262_v54, %v7261_v40 }
 0x227   : > { %v7264_v56 = vpop.f32.mrf.mxu0 }
 0x228   : > { %v9255_v6 = vadd.f32 %v7263_v44, %v9106_v9 }
 0x229   : > { %v7265_v5 = vpop.f32.mrf.mxu0 }
 0x22a   : > { %v7266_v28 = vadd.f32 %v7265_v5, %v7264_v56  ;;  %v9260_v37 = vpop.f32.mrf.mxu1 }
 0x22b   : > { %v7267_v29 = vpop.f32.mrf.mxu0 }
 0x22c   : > { %v9258_v24 = vadd.f32 %v7266_v28, %v9118_v58  ;;  %v9265_v25 = vpop.f32.mrf.mxu1 }
 0x22d   : > { %v7268_v3 = vpop.f32.mrf.mxu0 }
 0x22e   : > { %v7269_v55 = vadd.f32 %v7268_v3, %v7267_v29  ;;  %v9267_v9 = vpop.f32.mrf.mxu1 }
 0x22f   : > { %v7270_v7 = vpop.f32.mrf.mxu0 }
 0x230   : > { %v9263_v15 = vadd.f32 %v7269_v55, %v9135_v8  ;;  %v9272_v30 = vpop.f32.mrf.mxu1 }
 0x231   : > { %v7271_v59 = vpop.f32.mrf.mxu0 }
 0x232   : > { %v7272_v53 = vadd.f32 %v7271_v59, %v7270_v7 }
 0x233   : > { %v7273_v11 = vpop.f32.mrf.mxu0 }
 0x234   : > { %v9270_v39 = vadd.f32 %v7272_v53, %v9159_v33 }
 0x235   : > { %v7274_v58 = vpop.f32.mrf.mxu0 }
 0x236   : > { %v7275_v36 = vadd.f32 %v7274_v58, %v7273_v11  ;;  %v9277_v38 = vpop.f32.mrf.mxu1 }
 0x237   : > { %v7276_v26 = vpop.f32.mrf.mxu0 }
 0x238   : > { %v9275_v47 = vadd.f32 %v7275_v36, %v9169_v23  ;;  %v7332_v43 = vpop.f32.mrf.mxu1 }
 0x239   : > { %v7277_v8 = vpop.f32.mrf.mxu0 }
 0x23a   : > { %v7278_v34 = vadd.f32 %v7277_v8, %v7276_v26  ;;  %v7334_v33 = vpop.f32.mrf.mxu1 }
 0x23b   : > { %v7279_v10 = vpop.f32.mrf.mxu0 }
 0x23c   : > { %v9280_v4 = vadd.f32 %v7278_v34, %v9172_v32  ;;  %v7335_v42 = vpop.f32.mrf.mxu1 }
 0x23d   : > { %v7280_v18 = vpop.f32.mrf.mxu0 }
 0x23e   : > { %v7281_v40 = vadd.f32 %v7280_v18, %v7279_v10 }
 0x23f   : > { %v7282_v52 = vpop.f32.mrf.mxu0 }
 0x240   : > { %v9283_v2 = vadd.f32 %v7281_v40, %v9186_v14 }
 0x241   : > { %v7283_v49 = vpop.f32.mrf.mxu0 }
 0x242   : > { %v7284_v41 = vadd.f32 %v7283_v49, %v7282_v52 }
 0x243   : > { %v9285_v23 = vpop.f32.mrf.mxu1 }
 0x244   : > { %v9290_v54 = vadd.f32 %v7284_v41, %v9196_v62 }
 0x245   : > { %v9287_v63 = vpop.f32.mrf.mxu1 }
 0x247   : > { %v9292_v32 = vpop.f32.mrf.mxu1  ;;  %v7285_v44 = vpop.f32.mrf.mxu0 }
 0x249   : > { %v7286_v56 = vpop.f32.mrf.mxu0  ;;  %v9294_v28 = vpop.f32.mrf.mxu1 }
 0x24a   : > { %v7287_v5 = vadd.f32 %v7286_v56, %v7285_v44 }
 0x24b   : > { %v7288_v29 = vpop.f32.mrf.mxu0 }
 0x24c   : > { %v9297_v14 = vadd.f32 %v7287_v5, %v9202_v21 }
 0x24d   : > { %v7289_v3 = vpop.f32.mrf.mxu0 }
 0x24e   : > { %v7290_v55 = vadd.f32 %v7289_v3, %v7288_v29 }
 0x250   : > { %v9302_v59 = vadd.f32 %v7290_v55, %v9213_v19 }
 0x251   : > { %v9299_v7 = vpop.f32.mrf.mxu1 }
 0x252   : > { %9503 = vst [vmem:[#allocation6_spill] sm:$0xff] %v9302_v59 }
 0x253   : > { %v9304_v62 = vpop.f32.mrf.mxu1 }
 0x254   : > { %v7291_v53 = vpop.f32.mrf.mxu0 }
 0x255   : > { %v9306_v11 = vpop.f32.mrf.mxu1 }
 0x256   : > { %v7292_v58 = vpop.f32.mrf.mxu0 }
 0x257   : > { %v7293_v36 = vadd.f32 %v7292_v58, %v7291_v53  ;;  %v9308_v26 = vpop.f32.mrf.mxu1 }
 0x258   : > { %v7294_v8 = vpop.f32.mrf.mxu0 }
 0x259   : > { %v9311_v21 = vadd.f32 %v7293_v36, %v9222_v48 }
 0x25a   : > { %v7295_v34 = vpop.f32.mrf.mxu0 }
 0x25b   : > { %v7296_v10 = vadd.f32 %v7295_v34, %v7294_v8 }
 0x25d   : > { %v9316_v19 = vadd.f32 %v7296_v10, %v9226_v17 }
 0x25e   : > { %v9313_v18 = vpop.f32.mrf.mxu1 }
 0x25f   : > { %9504 = vst [vmem:[#allocation4_spill] sm:$0xff] %v9316_v19 }
 0x260   : > { %v9318_v40 = vpop.f32.mrf.mxu1 }
 0x262   : > { %v9320_v52 = vpop.f32.mrf.mxu1  ;;  %v7297_v49 = vpop.f32.mrf.mxu0 }
 0x264   : > { %v7298_v41 = vpop.f32.mrf.mxu0  ;;  %v9322_v44 = vpop.f32.mrf.mxu1 }
 0x265   : > { %v7299_v56 = vadd.f32 %v7298_v41, %v7297_v49 }
 0x266   : > { %v7300_v5 = vpop.f32.mrf.mxu0 }
 0x267   : > { %v9325_v48 = vadd.f32 %v7299_v56, %v9232_v61 }
 0x268   : > { %v7301_v29 = vpop.f32.mrf.mxu0 }
 0x269   : > { %9505 = vst [vmem:[#allocation5_spill] sm:$0xff] %v9325_v48  ;;  %v7302_v55 = vadd.f32 %v7301_v29, %v7300_v5 }
 0x26b   : > { %v9327_v3 = vpop.f32.mrf.mxu1  ;;  %v9332_v17 = vadd.f32 %v7302_v55, %v9239_v50  ;;  %v7327_v50 = vadd.f32 %v9265_v25, %v9260_v37  ;;  %v7333_v55 = vadd.f32 %v7332_v43, %v9277_v38  ;;  %v9510_v25 = vld [vmem:[#allocation7_spill] sm:$0xff] }
 0x26d   : > { %v9329_v53 = vpop.f32.mrf.mxu1  ;;  %9506 = vst [vmem:[#allocation10_spill] sm:$0xff] %v9332_v17  ;;  %v7336_v17 = vadd.f32 %v7335_v42, %v7334_v33  ;;  %v5690_v38 = vadd.f32 %v7327_v50, %v9510_v25  ;;  %v7339_v50 = vadd.f32 %v9287_v63, %v9285_v23  ;;  %v7342_v23 = vadd.f32 %v9294_v28, %v9292_v32 }
 0x26f   : > { %v9334_v58 = vpop.f32.mrf.mxu1  ;;  %v5701_v43 = vadd.f32 %v7336_v17, %v9146_v13  ;;  %v5709_v32 = vadd.f32 %v7342_v23, %v9166_v16 }
 0x271   : > { %v9336_v8 = vpop.f32.mrf.mxu1 }
 0x272   : > { %v7303_v36 = vpop.f32.mrf.mxu0  ;;  %v7360_v16 = vadd.f32 %v9336_v8, %v9334_v58 }
 0x274   : > { %v7304_v34 = vpop.f32.mrf.mxu0 }
 0x275   : > { %v7305_v10 = vadd.f32 %v7304_v34, %v7303_v36 }
 0x276   : > { %v7306_v49 = vpop.f32.mrf.mxu0 }
 0x277   : > { %v9341_v61 = vadd.f32 %v7305_v10, %v9248_v51  ;;  %v7330_v51 = vadd.f32 %v9272_v30, %v9267_v9 }
 0x278   : > { %v7307_v56 = vpop.f32.mrf.mxu0 }
 0x279   : > { %9507 = vst [vmem:[#allocation11_spill] sm:$0xff] %v9341_v61  ;;  %v7308_v29 = vadd.f32 %v7307_v56, %v7306_v49  ;;  %v9509_v56 = vld [vmem:[#allocation9_spill] sm:$0xff] }
 0x27a   : > { %v9338_v41 = vpop.f32.mrf.mxu1  ;;  %v5698_v37 = vadd.f32 %v7333_v55, %v9509_v56  ;;  %v7345_v56 = vadd.f32 %v9304_v62, %v9299_v7 }
 0x27b   : > { %v9351_v36 = vadd.f32 %v7308_v29, %v9252_v57 }
 0x27c   : > { %v9343_v5 = vpop.f32.mrf.mxu1 }
 0x27d   : > { %9508 = vst [vmem:[#allocation12_spill] sm:$0xff] %v9351_v36  ;;  %v9511_v36 = vld [vmem:[#allocation8_spill] sm:$0xff] }
 0x27e   : > { %v9348_v48 = vpop.f32.mrf.mxu1  ;;  %v7463_v34 = vpop.f32.mrf.mxu0  ;;  %v5693_v59 = vadd.f32 %v7330_v51, %v9511_v36 }
 0x27f   : > { %v5859_v42 = vadd.f32 %v7463_v34, %v5698_v37  ;;  %v7348_v37 = vadd.f32 %v9308_v26, %v9306_v11  ;;  %v5714_v11 = vadd.f32 %v7345_v56, %v9177_v35 }
 0x280   : > { %v9355_v10 = vpop.f32.mrf.mxu1  ;;  %v5850_v61 = vpop.f32.mrf.mxu0 }
 0x281   : > { %v5851_v57 = vadd.f32 %v5850_v61, %v5690_v38  ;;  %v6177_v25 = vmul.f32 %v5859_v42, %v5859_v42 }
 0x282   : > { %v9357_v49 = vpop.f32.mrf.mxu1  ;;  %v7464_v33 = vpop.f32.mrf.mxu0 }
 0x283   : > { %v5862_v29 = vadd.f32 %v7464_v33, %v5701_v43  ;;  %v6175_v61 = vmul.f32 %v5851_v57, %v5851_v57 }
 0x284   : > { %v9362_v19 = vpop.f32.mrf.mxu1  ;;  %v5853_v9 = vpop.f32.mrf.mxu0 }
 0x285   : > { %v6871_v13 = vpack.c.bf16 %v5862_v29, %v5859_v42  ;;  %v5854_v17 = vadd.f32 %v5853_v9, %v5693_v59  ;;  %v6178_v33 = vmul.f32 %v5862_v29, %v5862_v29 }
 0x286   : > { %v9372_v30 = vpop.f32.mrf.mxu1 }
 0x287   : > { %6958 = vst [vmem:[%s9370_s17 + $0x8] sm:$0xff] %v6871_v13   ;;  %v6866_v36 = vpack.c.bf16 %v5854_v17, %v5851_v57  ;;  %v6137_v34 = vadd.f32 %v5854_v17, %v5851_v57  ;;  %v6176_v51 = vmul.f32 %v5854_v17, %v5854_v17  ;;  %v5706_v13 = vadd.f32 %v7339_v50, %v9156_v0 }
 0x288   : > { %v9377_v55 = vpop.f32.mrf.mxu1  ;;  %v7351_v0 = vadd.f32 %v9318_v40, %v9313_v18  ;;  %v7354_v18 = vadd.f32 %v9322_v44, %v9320_v52 }
 0x289   : > { %6867 = vst [vmem:[%s9370_s17] sm:$0xff] %v6866_v36   ;;  %v6138_v38 = vadd.f32 %v6137_v34, %v5859_v42  ;;  %v6207_v59 = vadd.f32 %v6176_v51, %v6175_v61  ;;  %v5717_v61 = vadd.f32 %v7348_v37, %v9189_v45  ;;  %v7357_v45 = vadd.f32 %v9329_v53, %v9327_v3 }
 0x28a   : > { %v9384_v43 = vpop.f32.mrf.mxu1 }
 0x28b   : > { %v6208_v9 = vadd.f32 %v6207_v59, %v6177_v25  ;;  %v6139_v7 = vadd.f32 %v6138_v38, %v5862_v29  ;;  %v5730_v58 = vadd.f32 %v7357_v45, %v9216_v12  ;;  %v7369_v45 = vadd.f32 %v9362_v19, %v9357_v49 }
 0x28c   : > { %v7467_v63 = vpop.f32.mrf.mxu0  ;;  %v9388_v57 = vpop.f32.mrf.mxu1 }
 0x28d   : > { %v6209_v17 = vadd.f32 %v6208_v9, %v6178_v33  ;;  %v5875_v28 = vadd.f32 %v7467_v63, %v5714_v11  ;;  %v5722_v9 = vadd.f32 %v7351_v0, %v9199_v60  ;;  %v5733_v11 = vadd.f32 %v7360_v16, %v9219_v20 }
 0x28e   : > { %v5866_v62 = vpop.f32.mrf.mxu0  ;;  %v9392_v42 = vpop.f32.mrf.mxu1  ;;  %v5725_v60 = vadd.f32 %v7354_v18, %v9211_v22  ;;  %v7363_v20 = vadd.f32 %v9343_v5, %v9338_v41  ;;  %v7372_v22 = vadd.f32 %v9377_v55, %v9372_v30  ;;  %v5746_v19 = vadd.f32 %v7369_v45, %v9242_v1 }
 0x28f   : > { %v5867_v26 = vadd.f32 %v5866_v62, %v5706_v13  ;;  %v6181_v13 = vmul.f32 %v5875_v28, %v5875_v28 }
 0x290   : > { %v7468_v36 = vpop.f32.mrf.mxu0  ;;  %v9396_v59 = vpop.f32.mrf.mxu1 }
 0x291   : > { %v6140_v34 = vadd.f32 %v6139_v7, %v5867_v26  ;;  %v6179_v51 = vmul.f32 %v5867_v26, %v5867_v26  ;;  %v5878_v25 = vadd.f32 %v7468_v36, %v5717_v61 }
 0x292   : > { %v5869_v35 = vpop.f32.mrf.mxu0 }
 0x293   : > { %v6210_v29 = vadd.f32 %v6209_v17, %v6179_v51  ;;  %v6881_v50 = vpack.c.bf16 %v5878_v25, %v5875_v28  ;;  %v5870_v56 = vadd.f32 %v5869_v35, %v5709_v32 }
 0x295   : > { %6960 = vst [vmem:[%s9370_s17 + $0x18] sm:$0xff] %v6881_v50   ;;  %v6876_v38 = vpack.c.bf16 %v5870_v56, %v5867_v26  ;;  %v6141_v23 = vadd.f32 %v6140_v34, %v5870_v56  ;;  %v6180_v63 = vmul.f32 %v5870_v56, %v5870_v56  ;;  %v6182_v26 = vmul.f32 %v5878_v25, %v5878_v25 }
 0x296   : > { %v9404_v37 = vpop.f32.mrf.mxu1 }
 0x297   : > { %v7471_v33 = vpop.f32.mrf.mxu0  ;;  %6959 = vst [vmem:[%s9370_s17 + $0x10] sm:$0xff] %v6876_v38   ;;  %v6142_v7 = vadd.f32 %v6141_v23, %v5875_v28  ;;  %v6211_v3 = vadd.f32 %v6210_v29, %v6180_v63 }
 0x298   : > { %v7380_v40 = vpop.f32.mrf.mxu1  ;;  %v5891_v52 = vadd.f32 %v7471_v33, %v5730_v58  ;;  %v7366_v33 = vadd.f32 %v9355_v10, %v9348_v48  ;;  %v7375_v58 = vadd.f32 %v9388_v57, %v9384_v43 }
 0x299   : > { %v5882_v53 = vpop.f32.mrf.mxu0  ;;  %v6212_v17 = vadd.f32 %v6211_v3, %v6181_v13  ;;  %v6143_v61 = vadd.f32 %v6142_v7, %v5878_v25  ;;  %v5738_v13 = vadd.f32 %v7363_v20, %v9229_v27 }
 0x29a   : > { %v5883_v8 = vadd.f32 %v5882_v53, %v5722_v9  ;;  %v7382_v62 = vpop.f32.mrf.mxu1  ;;  %v6185_v16 = vmul.f32 %v5891_v52, %v5891_v52  ;;  %v5749_v53 = vadd.f32 %v7372_v22, %v9245_v46  ;;  %v5741_v10 = vadd.f32 %v7366_v33, %v9237_v31 }
 0x29b   : > { %v7472_v36 = vpop.f32.mrf.mxu0  ;;  %v6213_v34 = vadd.f32 %v6212_v17, %v6182_v26  ;;  %v5754_v31 = vadd.f32 %v7375_v58, %v9255_v6 }
 0x29c   : > { %v5894_v44 = vadd.f32 %v7472_v36, %v5733_v11  ;;  %v6144_v32 = vadd.f32 %v6143_v61, %v5883_v8  ;;  %v6183_v28 = vmul.f32 %v5883_v8, %v5883_v8  ;;  %v7383_v12 = vpop.f32.mrf.mxu1  ;;  %v7381_v61 = vadd.f32 %v7380_v40, %v9404_v37 }
 0x29d   : > { %v5885_v51 = vpop.f32.mrf.mxu0  ;;  %v7384_v1 = vadd.f32 %v7383_v12, %v7382_v62 }
 0x29e   : > { %v6891_v0 = vpack.c.bf16 %v5894_v44, %v5891_v52  ;;  %v5886_v35 = vadd.f32 %v5885_v51, %v5725_v60  ;;  %v6214_v29 = vadd.f32 %v6213_v34, %v6183_v28  ;;  %v6186_v41 = vmul.f32 %v5894_v44, %v5894_v44 }
 0x29f   : > { %v7378_v34 = vadd.f32 %v9396_v59, %v9392_v42  ;;  %v5762_v51 = vadd.f32 %v7381_v61, %v9263_v15  ;;  %v5765_v40 = vadd.f32 %v7384_v1, %v9270_v39 }
 0x2a0   : > { %6962 = vst [vmem:[%s9370_s17 + $0x28] sm:$0xff] %v6891_v0   ;;  %v6886_v50 = vpack.c.bf16 %v5886_v35, %v5883_v8  ;;  %v6145_v25 = vadd.f32 %v6144_v32, %v5886_v35  ;;  %v6184_v56 = vmul.f32 %v5886_v35, %v5886_v35 }
 0x2a1   : > { %v5757_v42 = vadd.f32 %v7378_v34, %v9258_v24 }
 0x2a2   : > { %6961 = vst [vmem:[%s9370_s17 + $0x20] sm:$0xff] %v6886_v50   ;;  %v6146_v38 = vadd.f32 %v6145_v25, %v5891_v52  ;;  %v6215_v23 = vadd.f32 %v6214_v29, %v6184_v56  ;;  %v7385_v63 = vpop.f32.mrf.mxu1 }
 0x2a4   : > { %v7475_v18 = vpop.f32.mrf.mxu0  ;;  %v6216_v5 = vadd.f32 %v6215_v23, %v6185_v16  ;;  %v7386_v9 = vpop.f32.mrf.mxu1  ;;  %v6147_v7 = vadd.f32 %v6146_v38, %v5894_v44 }
 0x2a5   : > { %v5907_v8 = vadd.f32 %v7475_v18, %v5746_v19 }
 0x2a6   : > { %v5898_v3 = vpop.f32.mrf.mxu0  ;;  %v6217_v30 = vadd.f32 %v6216_v5, %v6186_v41  ;;  %v7388_v55 = vpop.f32.mrf.mxu1  ;;  %v7387_v41 = vadd.f32 %v7386_v9, %v7385_v63 }
 0x2a7   : > { %v5899_v49 = vadd.f32 %v5898_v3, %v5738_v13  ;;  %v6189_v62 = vmul.f32 %v5907_v8, %v5907_v8 }
 0x2a8   : > { %v7476_v48 = vpop.f32.mrf.mxu0  ;;  %v7389_v17 = vpop.f32.mrf.mxu1 }
 0x2a9   : > { %v6148_v11 = vadd.f32 %v6147_v7, %v5899_v49  ;;  %v6187_v26 = vmul.f32 %v5899_v49, %v5899_v49  ;;  %v5910_v27 = vadd.f32 %v7476_v48, %v5749_v53  ;;  %v7390_v58 = vadd.f32 %v7389_v17, %v7388_v55 }
 0x2aa   : > { %v5901_v36 = vpop.f32.mrf.mxu0 }
 0x2ab   : > { %v6218_v52 = vadd.f32 %v6217_v30, %v6187_v26  ;;  %v6901_v44 = vpack.c.bf16 %v5910_v27, %v5907_v8  ;;  %v5902_v46 = vadd.f32 %v5901_v36, %v5741_v10  ;;  %v6190_v20 = vmul.f32 %v5910_v27, %v5910_v27 }
 0x2ac   : > { %v5770_v26 = vadd.f32 %v7387_v41, %v9275_v47  ;;  %v5773_v55 = vadd.f32 %v7390_v58, %v9280_v4 }
 0x2ad   : > { %v7479_v60 = vpop.f32.mrf.mxu0  ;;  %6964 = vst [vmem:[%s9370_s17 + $0x38] sm:$0xff] %v6901_v44   ;;  %v6896_v32 = vpack.c.bf16 %v5902_v46, %v5899_v49  ;;  %v6149_v43 = vadd.f32 %v6148_v11, %v5902_v46  ;;  %v6188_v57 = vmul.f32 %v5902_v46, %v5902_v46  ;;  %v7391_v28 = vpop.f32.mrf.mxu1 }
 0x2ae   : > { %v5923_v56 = vadd.f32 %v7479_v60, %v5762_v51 }
 0x2af   : > { %v5914_v37 = vpop.f32.mrf.mxu0  ;;  %6963 = vst [vmem:[%s9370_s17 + $0x30] sm:$0xff] %v6896_v32   ;;  %v6150_v0 = vadd.f32 %v6149_v43, %v5907_v8  ;;  %v6219_v12 = vadd.f32 %v6218_v52, %v6188_v57  ;;  %v7392_v35 = vpop.f32.mrf.mxu1 }
 0x2b0   : > { %v5915_v29 = vadd.f32 %v5914_v37, %v5754_v31  ;;  %v7393_v3 = vadd.f32 %v7392_v35, %v7391_v28  ;;  %v6193_v49 = vmul.f32 %v5923_v56, %v5923_v56 }
 0x2b1   : > { %v7480_v50 = vpop.f32.mrf.mxu0  ;;  %v6220_v25 = vadd.f32 %v6219_v12, %v6189_v62  ;;  %v6151_v6 = vadd.f32 %v6150_v0, %v5910_v27  ;;  %v7394_v45 = vpop.f32.mrf.mxu1 }
 0x2b2   : > { %v5926_v22 = vadd.f32 %v7480_v50, %v5765_v40  ;;  %v6191_v39 = vmul.f32 %v5915_v29, %v5915_v29  ;;  %v5778_v63 = vadd.f32 %v7393_v3, %v9283_v2 }
 0x2b3   : > { %v5917_v15 = vpop.f32.mrf.mxu0  ;;  %v6152_v59 = vadd.f32 %v6151_v6, %v5915_v29  ;;  %v6221_v16 = vadd.f32 %v6220_v25, %v6190_v20  ;;  %v7395_v23 = vpop.f32.mrf.mxu1 }
 0x2b4   : > { %v6911_v38 = vpack.c.bf16 %v5926_v22, %v5923_v56  ;;  %v5918_v33 = vadd.f32 %v5917_v15, %v5757_v42  ;;  %v7396_v30 = vadd.f32 %v7395_v23, %v7394_v45  ;;  %v6194_v8 = vmul.f32 %v5926_v22, %v5926_v22 }
 0x2b5   : > { %v6222_v18 = vadd.f32 %v6221_v16, %v6191_v39  ;;  %v9512_v39 = vld [vmem:[#allocation6_spill] sm:$0xff] }
 0x2b6   : > { %6966 = vst [vmem:[%s9370_s17 + $0x48] sm:$0xff] %v6911_v38   ;;  %v6906_v5 = vpack.c.bf16 %v5918_v33, %v5915_v29  ;;  %v6153_v13 = vadd.f32 %v6152_v59, %v5918_v33  ;;  %v6192_v7 = vmul.f32 %v5918_v33, %v5918_v33  ;;  %v5781_v52 = vadd.f32 %v7396_v30, %v9290_v54 }
 0x2b8   : > { %6965 = vst [vmem:[%s9370_s17 + $0x40] sm:$0xff] %v6906_v5   ;;  %v6154_v24 = vadd.f32 %v6153_v13, %v5923_v56  ;;  %v6223_v53 = vadd.f32 %v6222_v18, %v6192_v7  ;;  %v9513_v7 = vld [vmem:[#allocation4_spill] sm:$0xff] }
 0x2b9   : > { %v7397_v19 = vpop.f32.mrf.mxu1 }
 0x2ba   : > { %v6224_v11 = vadd.f32 %v6223_v53, %v6193_v49  ;;  %v6155_v27 = vadd.f32 %v6154_v24, %v5926_v22 }
 0x2bb   : > { %v7398_v10 = vpop.f32.mrf.mxu1 }
 0x2bc   : > { %v7483_v48 = vpop.f32.mrf.mxu0  ;;  %v6225_v36 = vadd.f32 %v6224_v11, %v6194_v8  ;;  %v7399_v17 = vadd.f32 %v7398_v10, %v7397_v19 }
 0x2bd   : > { %v7400_v61 = vpop.f32.mrf.mxu1  ;;  %v5939_v44 = vadd.f32 %v7483_v48, %v5778_v63 }
 0x2be   : > { %v5930_v9 = vpop.f32.mrf.mxu0  ;;  %v5786_v62 = vadd.f32 %v7399_v17, %v9297_v14 }
 0x2bf   : > { %v5931_v1 = vadd.f32 %v5930_v9, %v5770_v26  ;;  %v7401_v60 = vpop.f32.mrf.mxu1  ;;  %v6197_v0 = vmul.f32 %v5939_v44, %v5939_v44 }
 0x2c0   : > { %v7484_v46 = vpop.f32.mrf.mxu0  ;;  %v7402_v12 = vadd.f32 %v7401_v60, %v7400_v61  ;;  %v9514_v61 = vld [vmem:[#allocation5_spill] sm:$0xff] }
 0x2c1   : > { %v6156_v32 = vadd.f32 %v6155_v27, %v5931_v1  ;;  %v6195_v43 = vmul.f32 %v5931_v1, %v5931_v1  ;;  %v5942_v57 = vadd.f32 %v7484_v46, %v5781_v52 }
 0x2c2   : > { %v5933_v47 = vpop.f32.mrf.mxu0  ;;  %v5789_v16 = vadd.f32 %v7402_v12, %v9512_v39 }
 0x2c3   : > { %v6226_v28 = vadd.f32 %v6225_v36, %v6195_v43  ;;  %v6921_v2 = vpack.c.bf16 %v5942_v57, %v5939_v44  ;;  %v5934_v31 = vadd.f32 %v5933_v47, %v5773_v55  ;;  %v6198_v45 = vmul.f32 %v5942_v57, %v5942_v57 }
 0x2c4   : > { %v7403_v34 = vpop.f32.mrf.mxu1  ;;  %v7487_v51 = vpop.f32.mrf.mxu0 }
 0x2c5   : > { %6968 = vst [vmem:[%s9370_s17 + $0x58] sm:$0xff] %v6921_v2   ;;  %v6916_v37 = vpack.c.bf16 %v5934_v31, %v5931_v1  ;;  %v6157_v40 = vadd.f32 %v6156_v32, %v5934_v31  ;;  %v6196_v54 = vmul.f32 %v5934_v31, %v5934_v31 }
 0x2c6   : > { %v7404_v4 = vpop.f32.mrf.mxu1  ;;  %v5946_v35 = vpop.f32.mrf.mxu0 }
 0x2c7   : > { %6967 = vst [vmem:[%s9370_s17 + $0x50] sm:$0xff] %v6916_v37   ;;  %v6158_v29 = vadd.f32 %v6157_v40, %v5939_v44  ;;  %v6227_v20 = vadd.f32 %v6226_v28, %v6196_v54  ;;  %v7405_v50 = vadd.f32 %v7404_v4, %v7403_v34  ;;  %v5947_v25 = vadd.f32 %v5946_v35, %v5786_v62  ;;  %v9516_v4 = vld [vmem:[#allocation11_spill] sm:$0xff] }
 0x2c8   : > { %v7406_v56 = vpop.f32.mrf.mxu1  ;;  %v7488_v6 = vpop.f32.mrf.mxu0 }
 0x2c9   : > { %v6228_v22 = vadd.f32 %v6227_v20, %v6197_v0  ;;  %v5794_v42 = vadd.f32 %v7405_v50, %v9311_v21  ;;  %v6159_v15 = vadd.f32 %v6158_v29, %v5942_v57  ;;  %v6199_v23 = vmul.f32 %v5947_v25, %v5947_v25  ;;  %v9515_v57 = vld [vmem:[#allocation10_spill] sm:$0xff] }
 0x2ca   : > { %v7407_v59 = vpop.f32.mrf.mxu1  ;;  %v5949_v14 = vpop.f32.mrf.mxu0 }
 0x2cb   : > { %v6160_v38 = vadd.f32 %v6159_v15, %v5947_v25  ;;  %v6229_v33 = vadd.f32 %v6228_v22, %v6198_v45  ;;  %v7408_v18 = vadd.f32 %v7407_v59, %v7406_v56  ;;  %v5955_v41 = vadd.f32 %v7487_v51, %v5794_v42 }
 0x2cc   : > { %v5950_v5 = vadd.f32 %v5949_v14, %v5789_v16 }
 0x2cd   : > { %v6230_v13 = vadd.f32 %v6229_v33, %v6199_v23  ;;  %v5797_v3 = vadd.f32 %v7408_v18, %v9513_v7  ;;  %v6201_v58 = vmul.f32 %v5955_v41, %v5955_v41 }
 0x2ce   : > { %v7409_v19 = vpop.f32.mrf.mxu1  ;;  %v6926_v49 = vpack.c.bf16 %v5950_v5, %v5947_v25  ;;  %v6161_v30 = vadd.f32 %v6160_v38, %v5950_v5  ;;  %v6200_v24 = vmul.f32 %v5950_v5, %v5950_v5 }
 0x2cf   : > { %v5958_v21 = vadd.f32 %v7488_v6, %v5797_v3  ;;  %v9517_v6 = vld [vmem:[#allocation12_spill] sm:$0xff] }
 0x2d0   : > { %v7410_v53 = vpop.f32.mrf.mxu1  ;;  %6969 = vst [vmem:[%s9370_s17 + $0x60] sm:$0xff] %v6926_v49   ;;  %v6162_v48 = vadd.f32 %v6161_v30, %v5955_v41  ;;  %v6231_v10 = vadd.f32 %v6230_v13, %v6200_v24  ;;  %v7491_v11 = vpop.f32.mrf.mxu0 }
 0x2d1   : > { %v7411_v8 = vadd.f32 %v7410_v53, %v7409_v19  ;;  %v6931_v26 = vpack.c.bf16 %v5958_v21, %v5955_v41  ;;  %v6202_v27 = vmul.f32 %v5958_v21, %v5958_v21 }
 0x2d2   : > { %v7412_v63 = vpop.f32.mrf.mxu1  ;;  %v6232_v9 = vadd.f32 %v6231_v10, %v6201_v58  ;;  %v5962_v36 = vpop.f32.mrf.mxu0  ;;  %v6163_v52 = vadd.f32 %v6162_v48, %v5958_v21 }
 0x2d3   : > { %v5802_v1 = vadd.f32 %v7411_v8, %v9514_v61  ;;  %6970 = vst [vmem:[%s9370_s17 + $0x68] sm:$0xff] %v6931_v26  }
 0x2d4   : > { %v7413_v44 = vpop.f32.mrf.mxu1  ;;  %v6233_v60 = vadd.f32 %v6232_v9, %v6202_v27  ;;  %v7492_v17 = vpop.f32.mrf.mxu0 }
 0x2d5   : > { %v5963_v46 = vadd.f32 %v5962_v36, %v5802_v1  ;;  %v7414_v55 = vadd.f32 %v7413_v44, %v7412_v63 }
 0x2d6   : > { %v5965_v28 = vpop.f32.mrf.mxu0 }
 0x2d7   : > { %v6164_v32 = vadd.f32 %v6163_v52, %v5963_v46  ;;  %v6203_v43 = vmul.f32 %v5963_v46, %v5963_v46  ;;  %v5805_v47 = vadd.f32 %v7414_v55, %v9515_v57 }
 0x2d9   : > { %v6234_v2 = vadd.f32 %v6233_v60, %v6203_v43  ;;  %v5966_v31 = vadd.f32 %v5965_v28, %v5805_v47  ;;  %v7415_v34 = vpop.f32.mrf.mxu1 }
 0x2db   : > { %v6936_v51 = vpack.c.bf16 %v5966_v31, %v5963_v46  ;;  %v6165_v37 = vadd.f32 %v6164_v32, %v5966_v31  ;;  %v6204_v40 = vmul.f32 %v5966_v31, %v5966_v31  ;;  %v7416_v54 = vpop.f32.mrf.mxu1 }
 0x2dc   : > { %v7417_v0 = vadd.f32 %v7416_v54, %v7415_v34 }
 0x2dd   : > { %6971 = vst [vmem:[%s9370_s17 + $0x70] sm:$0xff] %v6936_v51   ;;  %v6235_v62 = vadd.f32 %v6234_v2, %v6204_v40  ;;  %v7418_v12 = vpop.f32.mrf.mxu1 }
 0x2de   : > { %v5810_v35 = vadd.f32 %v7417_v0, %v9516_v4 }
 0x2df   : > { %v7419_v29 = vpop.f32.mrf.mxu1 }
 0x2e0   : > { %v5971_v20 = vadd.f32 %v7491_v11, %v5810_v35  ;;  %v7420_v50 = vadd.f32 %v7419_v29, %v7418_v12 }
 0x2e2   : > { %v6166_v25 = vadd.f32 %v6165_v37, %v5971_v20  ;;  %v6205_v56 = vmul.f32 %v5971_v20, %v5971_v20  ;;  %v5813_v45 = vadd.f32 %v7420_v50, %v9517_v6 }
 0x2e4   : > { %v6236_v22 = vadd.f32 %v6235_v62, %v6205_v56  ;;  %v5974_v42 = vadd.f32 %v7492_v17, %v5813_v45 }
 0x2e6   : > { %v6941_v15 = vpack.c.bf16 %v5974_v42, %v5971_v20  ;;  %v6167_v59 = vadd.f32 %v6166_v25, %v5974_v42  ;;  %v6206_v39 = vmul.f32 %v5974_v42, %v5974_v42 }
 0x2e8   : > { %6972 = vst [vmem:[%s9370_s17 + $0x78] sm:$0xff] %v6941_v15   ;;  %v6168_v16 = vrot.slane %v6167_v59, 4  ;;  %v6237_v14 = vadd.f32 %v6236_v22, %v6206_v39 }
 0x2ea   : > { %v6169_v38 = vadd.f32 %v6168_v16, %v6167_v59  ;;  %v6238_v23 = vrot.slane %v6237_v14, 4 }
 0x2ec   : > { %v6170_v33 = vrot.slane %v6169_v38, 2  ;;  %v6239_v18 = vadd.f32 %v6238_v23, %v6237_v14 }
 0x2ee   : > { %v6171_v41 = vadd.f32 %v6170_v33, %v6169_v38  ;;  %v6240_v5 = vrot.slane %v6239_v18, 2 }
 0x2f0   : > { %v6172_v13 = vrot.slane %v6171_v41, 1  ;;  %v6241_v7 = vadd.f32 %v6240_v5, %v6239_v18 }
 0x2f2   : > { %v6173_v3 = vadd.f32 %v6172_v13, %v6171_v41  ;;  %v6242_v19 = vrot.slane %v6241_v7, 1 }
 0x2f4   : > { %6174 = vst [vmem:[%s289_s20] sm:$0x1] %v6173_v3  ;;  %v6243_v49 = vadd.f32 %v6242_v19, %v6241_v7 }
 0x2f6   : > { %6244 = vst [vmem:[%s294_s27] sm:$0x1] %v6243_v49 }
 0x2f7 PF: > { %s17_s23 = sadd.s32 1, %s7841_s23   ;;  %s9518_s21 = smov %s7837_s22 }
 0x2f8   : > { %p14_p5 = scmp.ge.s32.totalorder %s17_s23, 4   ;;  %s9519_s22 = smov %s9521_s24 }
 0x2fa   :  { %16 = sbr.rel (!%p14_p5) target bundleno = 2 (0x2), region = 104 }

</bundles_post_ra>
